<compile_context>
chip_gen: v7x
topology: tpu7x:2x2x1
jax: 0.10.0
libtpu: 0.0.40
codegen_flags: <defaults>
</compile_context>

<pallas_src>
import functools

import jax
import jax.numpy as jnp
from jax.experimental import pallas as pl
from jax.experimental.pallas import tpu as pltpu


# ------------------------------ fused kernel --------------------------------

def _fused_kernel(tail_ref, p0_ref, w0_ref, b0_ref, p1_ref, w1_ref, b1_ref,
                  mblk_ref, g_ref, bt_ref, o_ref, *, C, P, eps=1e-5):
    Bblk = p0_ref.shape[0]
    C0 = w0_ref.shape[1]          # 2C
    C1 = w1_ref.shape[1]          # 5C
    m0, m1 = C0 // C, C1 // C     # 2, 5 token-blocks per branch
    n_tail = tail_ref.shape[1]    # 392

    # Shared operands: loaded once per grid step, reused by every batch in the block.
    w0, b0 = w0_ref[...], b0_ref[...]
    w1, b1 = w1_ref[...], b1_ref[...]
    mblk = mblk_ref[...]          # (5C, 5C) block-diag of 1/C -> per-32-lane-group mean
    gamma, beta = g_ref[...], bt_ref[...]     # (1, 5C) gamma/beta tiled 5x

    def layer_norm(d, width):
        # torch.nn.LayerNorm semantics (biased variance, eps=1e-5, f32 math) applied
        # independently to every 32-lane channel group of `d`, computed lane-dense:
        # the group means/vars come from a block-diagonal matmul (MXU is idle here),
        # so no XLU cross-lane reduction and full-width VPU normalise.
        mb = mblk[:width, :width]
        mean = jnp.dot(d, mb, preferred_element_type=jnp.float32)
        cen = d - mean
        var = jnp.dot(cen * cen, mb, preferred_element_type=jnp.float32)
        inv = jax.lax.rsqrt(var + eps)                    # EUP rsqrt
        return cen * inv * gamma[:, :width] + beta[:, :width]

    for b in range(Bblk):                                 # static unroll, Bblk <= 8
        # Both conv-GEMMs back to back on the MXU (f32 operands, f32 accumulate).
        d0 = jnp.dot(p0_ref[b], w0, preferred_element_type=jnp.float32) + b0  # (P, 2C)
        d1 = jnp.dot(p1_ref[b], w1, preferred_element_type=jnp.float32) + b1  # (P, 5C)
        y0 = layer_norm(d0, C0)
        y1 = layer_norm(d1, C1)
        yt = layer_norm(tail_ref[b], C)                                       # (392, C)

        # Weight columns were pre-permuted so column j of the GEMM result corresponds
        # to (m, c) = (j // C, j % C); token block m of each branch lands at contiguous
        # output rows.  This realises torch's reshape(B, C, -1).permute(0, 2, 1) +
        # concat as plain static row-offset stores (no concatenate / relayout).
        for m in range(m0):
            o_ref[b, m * P:(m + 1) * P, :] = y0[:, m * C:(m + 1) * C]
        for m in range(m1):
            o_ref[b, (m0 + m) * P:(m0 + m + 1) * P, :] = y1[:, m * C:(m + 1) * C]
        o_ref[b, (m0 + m1) * P:(m0 + m1) * P + n_tail, :] = yt


# -------------------------- parameter preparation ---------------------------

def prepare_params(params, C):
    """One-time conversion of PyTorch conv/LN parameters to the kernel's GEMM layout."""
    def conv_to_gemm(w_pt, bias):
        cout, cin, k, _ = w_pt.shape
        mult = cout // C
        # OIHW -> (kh, kw, cin, cout) -> (k*k*cin, cout): matches the (kh, kw, cin)
        # flattening of the im2col patches.
        w_mat = jnp.transpose(w_pt, (2, 3, 1, 0)).reshape(k * k * cin, cout)
        # Fold the conv-output -> token permute into a column permutation:
        # new column m*C + c  <-  old conv output channel c*mult + m.
        w_mat = w_mat.reshape(-1, C, mult).transpose(0, 2, 1).reshape(-1, cout)
        b_vec = bias.reshape(C, mult).transpose(1, 0).reshape(1, cout)
        return w_mat.astype(jnp.float32), b_vec.astype(jnp.float32)

    w0, b0 = conv_to_gemm(params["w0"], params["b0"])
    w1, b1 = conv_to_gemm(params["w1"], params["b1"])
    C1 = w1.shape[1]                                   # 5C (widest branch)
    grp = jnp.arange(C1) // C
    # Block-diagonal "mean" matrix: its [:2C,:2C] corner serves branch 0 and its
    # [:C,:C] corner (a full 1/C block) serves the tem2 tail.
    mblk = jnp.where(grp[:, None] == grp[None, :], 1.0 / C, 0.0).astype(jnp.float32)
    tiles = C1 // C
    gamma_t = jnp.tile(params["gamma"].reshape(1, C), (1, tiles)).astype(jnp.float32)
    beta_t = jnp.tile(params["beta"].reshape(1, C), (1, tiles)).astype(jnp.float32)
    return dict(w0=w0, b0=b0, w1=w1, b1=b1, mblk=mblk, gamma_t=gamma_t, beta_t=beta_t)


def _pick_bblk(B, max_bblk=8):
    # Largest batch block <= max_bblk dividing B, preferring a grid of >= 2 steps so
    # the pipeline can overlap DMA/compute and v7x's 2 TCs both get work.
    divs = [d for d in range(1, min(B, max_bblk) + 1) if B % d == 0]
    pipelined = [d for d in divs if B // d >= 2]
    return max(pipelined) if pipelined else max(divs)


# ------------------------------- forward pass --------------------------------

def scale_reduce_forward(x, gp, reduction_ratio):
    B, N, C = x.shape
    assert len(reduction_ratio) == 3 and N == 2940
    k0, k1 = reduction_ratio[2], reduction_ratio[1]
    H0, C0 = 28, 2 * C            # branch 0 spatial / channels
    H1, C1 = 14, 5 * C            # branch 1 spatial / channels
    assert H0 % k0 == 0 and H1 % k1 == 0
    P = (H0 // k0) * (H0 // k0)   # 49 output pixels per branch
    assert (H1 // k1) * (H1 // k1) == P
    K0, K1 = k0 * k0 * C0, k1 * k1 * C1
    n1 = H0 * H0 * C0 // C                      # 1568
    n2 = n1 + H1 * H1 * C1 // C                 # 2548
    n_tail = N - n2                             # 392
    Nt = (C0 // C) * P + (C1 // C) * P + n_tail  # 98 + 245 + 392 = 735

    def im2col(slab, H, k, Cin):
        # token-major slab -> NHWC -> non-overlapping k x k patches (pure
        # slice/reshape/transpose glue, eligible for input fusion below).
        ph = H // k
        p = slab.reshape(B, ph, k, ph, k, Cin)
        return p.transpose(0, 1, 3, 2, 4, 5).reshape(B, ph * ph, k * k * Cin)

    p0 = im2col(x[:, :n1, :].reshape(B, H0, H0, C0), H0, k0, C0)   # (B, 49, K0)
    p1 = im2col(x[:, n1:n2, :].reshape(B, H1, H1, C1), H1, k1, C1)  # (B, 49, K1)
    tail = x[:, n2:, :]                                             # (B, 392, C)

    Bblk = _pick_bblk(B)
    grid = (B // Bblk,)

    kernel = functools.partial(_fused_kernel, C=C, P=P)

    # Producers of tail/p0/p1 (slices + im2col glue) may be fused into the call;
    # weights/LN constants have no in-jit producer.
    allow_fusion = [True, True, False, False, True, False, False, False, False, False]

    return pl.pallas_call(
        kernel,
        out_shape=jax.ShapeDtypeStruct((B, Nt, C), jnp.float32),
        grid=grid,
        in_specs=[
            pl.BlockSpec((Bblk, n_tail, C), lambda i: (i, 0, 0)),   # tem2 tail
            pl.BlockSpec((Bblk, P, K0), lambda i: (i, 0, 0)),       # patches branch 0
            pl.BlockSpec((K0, C0), lambda i: (0, 0)),               # w0 (col-permuted)
            pl.BlockSpec((1, C0), lambda i: (0, 0)),                # b0
            pl.BlockSpec((Bblk, P, K1), lambda i: (i, 0, 0)),       # patches branch 1
            pl.BlockSpec((K1, C1), lambda i: (0, 0)),               # w1 (col-permuted)
            pl.BlockSpec((1, C1), lambda i: (0, 0)),                # b1
            pl.BlockSpec((C1, C1), lambda i: (0, 0)),               # block-diag 1/C
            pl.BlockSpec((1, C1), lambda i: (0, 0)),                # gamma (tiled)
            pl.BlockSpec((1, C1), lambda i: (0, 0)),                # beta (tiled)
        ],
        out_specs=pl.BlockSpec((Bblk, Nt, C), lambda i: (i, 0, 0)),
        compiler_params=pltpu.CompilerParams(
            dimension_semantics=("parallel",),
            allow_input_fusion=allow_fusion),
    )(tail, p0, gp["w0"], gp["b0"], p1, gp["w1"], gp["b1"],
      gp["mblk"], gp["gamma_t"], gp["beta_t"])


# --------------------------- pure-JAX reference ------------------------------

def reference(x, params, rr):
    B, N, C = x.shape
    tem0 = x[:, :1568, :].reshape(B, 28, 28, 2 * C).transpose(0, 3, 1, 2)
    tem1 = x[:, 1568:2548, :].reshape(B, 14, 14, 5 * C).transpose(0, 3, 1, 2)
    tem2 = x[:, 2548:2940, :]

    def conv(inp, w, b, k):
        out = jax.lax.conv_general_dilated(
            inp, w, (k, k), "VALID",
            dimension_numbers=("NCHW", "OIHW", "NCHW"),
            precision=jax.lax.Precision.HIGHEST)
        return out + b.reshape(1, -1, 1, 1)

    c0 = conv(tem0, params["w0"], params["b0"], rr[2])
    c1 = conv(tem1, params["w1"], params["b1"], rr[1])
    sr0 = c0.reshape(B, C, -1).transpose(0, 2, 1)
    sr1 = c1.reshape(B, C, -1).transpose(0, 2, 1)
    out = jnp.concatenate([sr0, sr1, tem2], axis=1)
    mean = out.mean(-1, keepdims=True)
    var = ((out - mean) ** 2).mean(-1, keepdims=True)
    return (out - mean) / jnp.sqrt(var + 1e-5) * params["gamma"] + params["beta"]


# ----------------------------------- main ------------------------------------

if __name__ == "__main__":
    dim = 32
    B = 4
    reduction_ratio = (1, 2, 4)   # len==3 branch: sr0 uses rr[2]=4, sr1 uses rr[1]=2
    N = 2940                      # hard-coded by Scale_reduce.forward for this branch

    key = jax.random.PRNGKey(0)
    k_x, k_w0, k_b0, k_w1, k_b1, k_g, k_be = jax.random.split(key, 7)
    x = jax.random.normal(k_x, (B, N, dim), dtype=jnp.float32)

    c0, k0 = 2 * dim, reduction_ratio[2]   # Conv2d(2C, 2C, 4, 4)
    c1, k1 = 5 * dim, reduction_ratio[1]   # Conv2d(5C, 5C, 2, 2)
    fan0 = c0 * k0 * k0
    fan1 = c1 * k1 * k1
    params = dict(
        w0=jax.random.normal(k_w0, (c0, c0, k0, k0), jnp.float32) / jnp.sqrt(1.0 * fan0),
        b0=0.01 * jax.random.normal(k_b0, (c0,), jnp.float32),
        w1=jax.random.normal(k_w1, (c1, c1, k1, k1), jnp.float32) / jnp.sqrt(1.0 * fan1),
        b1=0.01 * jax.random.normal(k_b1, (c1,), jnp.float32),
        gamma=1.0 + 0.1 * jax.random.normal(k_g, (dim,), jnp.float32),
        beta=0.05 * jax.random.normal(k_be, (dim,), jnp.float32),
    )

    gemm_params = prepare_params(params, dim)   # one-time weight re-layout (outside jit)

    fwd = jax.jit(lambda xx: scale_reduce_forward(xx, gemm_params, reduction_ratio))
    out = jax.block_until_ready(fwd(x))
    assert out.shape == (B, 98 + 245 + 392, dim), out.shape

    ref = reference(x, params, reduction_ratio)
    err = float(jnp.abs(out - ref).max())
    assert jnp.allclose(out, ref, atol=2e-2, rtol=2e-2), err

    print("KERNEL_OK")
</pallas_src>

<mosaic_0001>
module attributes {stable_mosaic.version = 11 : i64} {
  func.func @_fused_kernel(%arg0: i32, %arg1: memref<2x392x32xf32, #tpu.memory_space<vmem>>, %arg2: memref<2x49x1024xf32, #tpu.memory_space<vmem>>, %arg3: memref<1024x64xf32, #tpu.memory_space<vmem>>, %arg4: memref<1x64xf32, #tpu.memory_space<vmem>>, %arg5: memref<2x49x640xf32, #tpu.memory_space<vmem>>, %arg6: memref<640x160xf32, #tpu.memory_space<vmem>>, %arg7: memref<1x160xf32, #tpu.memory_space<vmem>>, %arg8: memref<160x160xf32, #tpu.memory_space<vmem>>, %arg9: memref<1x160xf32, #tpu.memory_space<vmem>>, %arg10: memref<1x160xf32, #tpu.memory_space<vmem>>, %arg11: memref<2x735x32xf32, #tpu.memory_space<vmem>>) attributes {dimension_semantics = [#tpu.dimension_semantics<parallel>], iteration_bounds = array<i64: 2>, scalar_prefetch = 0 : i64, scratch_operands = 0 : i64, tpu.core_type = #tpu.core_type<tc>, window_params = [{transform_indices = @transform_0, window_bounds = array<i64: 2, 392, 32>}, {transform_indices = @transform_1, window_bounds = array<i64: 2, 49, 1024>}, {pipeline_mode = #tpu.pipeline_mode<synchronous>, transform_indices = @transform_2, window_bounds = array<i64: 1024, 64>}, {pipeline_mode = #tpu.pipeline_mode<synchronous>, transform_indices = @transform_3, window_bounds = array<i64: 1, 64>}, {transform_indices = @transform_4, window_bounds = array<i64: 2, 49, 640>}, {pipeline_mode = #tpu.pipeline_mode<synchronous>, transform_indices = @transform_5, window_bounds = array<i64: 640, 160>}, {pipeline_mode = #tpu.pipeline_mode<synchronous>, transform_indices = @transform_6, window_bounds = array<i64: 1, 160>}, {pipeline_mode = #tpu.pipeline_mode<synchronous>, transform_indices = @transform_7, window_bounds = array<i64: 160, 160>}, {pipeline_mode = #tpu.pipeline_mode<synchronous>, transform_indices = @transform_8, window_bounds = array<i64: 1, 160>}, {pipeline_mode = #tpu.pipeline_mode<synchronous>, transform_indices = @transform_9, window_bounds = array<i64: 1, 160>}, {transform_indices = @transform_10, window_bounds = array<i64: 2, 735, 32>}]} {
    %c0 = arith.constant 0 : index
    %c0_0 = arith.constant 0 : index
    %0 = vector.load %arg3[%c0, %c0_0] : memref<1024x64xf32, #tpu.memory_space<vmem>>, vector<1024x64xf32>
    %c0_1 = arith.constant 0 : index
    %c0_2 = arith.constant 0 : index
    %1 = vector.load %arg4[%c0_1, %c0_2] : memref<1x64xf32, #tpu.memory_space<vmem>>, vector<1x64xf32>
    %c0_3 = arith.constant 0 : index
    %c0_4 = arith.constant 0 : index
    %2 = vector.load %arg6[%c0_3, %c0_4] : memref<640x160xf32, #tpu.memory_space<vmem>>, vector<640x160xf32>
    %c0_5 = arith.constant 0 : index
    %c0_6 = arith.constant 0 : index
    %3 = vector.load %arg7[%c0_5, %c0_6] : memref<1x160xf32, #tpu.memory_space<vmem>>, vector<1x160xf32>
    %c0_7 = arith.constant 0 : index
    %c0_8 = arith.constant 0 : index
    %4 = vector.load %arg8[%c0_7, %c0_8] : memref<160x160xf32, #tpu.memory_space<vmem>>, vector<160x160xf32>
    %c0_9 = arith.constant 0 : index
    %c0_10 = arith.constant 0 : index
    %5 = vector.load %arg9[%c0_9, %c0_10] : memref<1x160xf32, #tpu.memory_space<vmem>>, vector<1x160xf32>
    %c0_11 = arith.constant 0 : index
    %c0_12 = arith.constant 0 : index
    %6 = vector.load %arg10[%c0_11, %c0_12] : memref<1x160xf32, #tpu.memory_space<vmem>>, vector<1x160xf32>
    %c0_13 = arith.constant 0 : index
    %c0_14 = arith.constant 0 : index
    %c0_15 = arith.constant 0 : index
    %7 = vector.load %arg2[%c0_13, %c0_14, %c0_15] : memref<2x49x1024xf32, #tpu.memory_space<vmem>>, vector<1x49x1024xf32>
    %8 = vector.shape_cast %7 : vector<1x49x1024xf32> to vector<49x1024xf32>
    %cst = arith.constant dense<0.000000e+00> : vector<49x64xf32>
    %9 = tpu.matmul %8, %0, %cst {dimension_numbers = #tpu.dot_dimension_numbers<[1], [0], [0], [1], [0, 0, 1, 1], [], []>} : vector<49x1024xf32>, vector<1024x64xf32>, vector<49x64xf32> -> vector<49x64xf32>
    %10 = vector.broadcast %1 : vector<1x64xf32> to vector<49x64xf32>
    %11 = arith.addf %9, %10 : vector<49x64xf32>
    %c0_16 = arith.constant 0 : index
    %c0_17 = arith.constant 0 : index
    %c0_18 = arith.constant 0 : index
    %12 = vector.load %arg5[%c0_16, %c0_17, %c0_18] : memref<2x49x640xf32, #tpu.memory_space<vmem>>, vector<1x49x640xf32>
    %13 = vector.shape_cast %12 : vector<1x49x640xf32> to vector<49x640xf32>
    %cst_19 = arith.constant dense<0.000000e+00> : vector<49x160xf32>
    %14 = tpu.matmul %13, %2, %cst_19 {dimension_numbers = #tpu.dot_dimension_numbers<[1], [0], [0], [1], [0, 0, 1, 1], [], []>} : vector<49x640xf32>, vector<640x160xf32>, vector<49x160xf32> -> vector<49x160xf32>
    %15 = vector.broadcast %3 : vector<1x160xf32> to vector<49x160xf32>
    %16 = arith.addf %14, %15 : vector<49x160xf32>
    %17 = vector.extract_strided_slice %4 {offsets = [0, 0], sizes = [64, 64], strides = [1, 1]} : vector<160x160xf32> to vector<64x64xf32>
    %cst_20 = arith.constant dense<0.000000e+00> : vector<49x64xf32>
    %18 = tpu.matmul %11, %17, %cst_20 {dimension_numbers = #tpu.dot_dimension_numbers<[1], [0], [0], [1], [0, 0, 1, 1], [], []>} : vector<49x64xf32>, vector<64x64xf32>, vector<49x64xf32> -> vector<49x64xf32>
    %19 = arith.subf %11, %18 : vector<49x64xf32>
    %20 = arith.mulf %19, %19 : vector<49x64xf32>
    %cst_21 = arith.constant dense<0.000000e+00> : vector<49x64xf32>
    %21 = tpu.matmul %20, %17, %cst_21 {dimension_numbers = #tpu.dot_dimension_numbers<[1], [0], [0], [1], [0, 0, 1, 1], [], []>} : vector<49x64xf32>, vector<64x64xf32>, vector<49x64xf32> -> vector<49x64xf32>
    %cst_22 = arith.constant 9.99999974E-6 : f32
    %22 = vector.broadcast %cst_22 : f32 to vector<49x64xf32>
    %23 = arith.addf %21, %22 : vector<49x64xf32>
    %24 = math.rsqrt %23 : vector<49x64xf32>
    %25 = arith.mulf %19, %24 : vector<49x64xf32>
    %26 = vector.extract_strided_slice %5 {offsets = [0, 0], sizes = [1, 64], strides = [1, 1]} : vector<1x160xf32> to vector<1x64xf32>
    %27 = vector.broadcast %26 : vector<1x64xf32> to vector<49x64xf32>
    %28 = arith.mulf %25, %27 : vector<49x64xf32>
    %29 = vector.extract_strided_slice %6 {offsets = [0, 0], sizes = [1, 64], strides = [1, 1]} : vector<1x160xf32> to vector<1x64xf32>
    %30 = vector.broadcast %29 : vector<1x64xf32> to vector<49x64xf32>
    %31 = arith.addf %28, %30 : vector<49x64xf32>
    %cst_23 = arith.constant dense<0.000000e+00> : vector<49x160xf32>
    %32 = tpu.matmul %16, %4, %cst_23 {dimension_numbers = #tpu.dot_dimension_numbers<[1], [0], [0], [1], [0, 0, 1, 1], [], []>} : vector<49x160xf32>, vector<160x160xf32>, vector<49x160xf32> -> vector<49x160xf32>
    %33 = arith.subf %16, %32 : vector<49x160xf32>
    %34 = arith.mulf %33, %33 : vector<49x160xf32>
    %cst_24 = arith.constant dense<0.000000e+00> : vector<49x160xf32>
    %35 = tpu.matmul %34, %4, %cst_24 {dimension_numbers = #tpu.dot_dimension_numbers<[1], [0], [0], [1], [0, 0, 1, 1], [], []>} : vector<49x160xf32>, vector<160x160xf32>, vector<49x160xf32> -> vector<49x160xf32>
    %cst_25 = arith.constant 9.99999974E-6 : f32
    %36 = vector.broadcast %cst_25 : f32 to vector<49x160xf32>
    %37 = arith.addf %35, %36 : vector<49x160xf32>
    %38 = math.rsqrt %37 : vector<49x160xf32>
    %39 = arith.mulf %33, %38 : vector<49x160xf32>
    %40 = vector.broadcast %5 : vector<1x160xf32> to vector<49x160xf32>
    %41 = arith.mulf %39, %40 : vector<49x160xf32>
    %42 = vector.broadcast %6 : vector<1x160xf32> to vector<49x160xf32>
    %43 = arith.addf %41, %42 : vector<49x160xf32>
    %c0_26 = arith.constant 0 : index
    %c0_27 = arith.constant 0 : index
    %c0_28 = arith.constant 0 : index
    %44 = vector.load %arg1[%c0_26, %c0_27, %c0_28] : memref<2x392x32xf32, #tpu.memory_space<vmem>>, vector<1x392x32xf32>
    %45 = vector.shape_cast %44 : vector<1x392x32xf32> to vector<392x32xf32>
    %46 = vector.extract_strided_slice %4 {offsets = [0, 0], sizes = [32, 32], strides = [1, 1]} : vector<160x160xf32> to vector<32x32xf32>
    %cst_29 = arith.constant dense<0.000000e+00> : vector<392x32xf32>
    %47 = tpu.matmul %45, %46, %cst_29 {dimension_numbers = #tpu.dot_dimension_numbers<[1], [0], [0], [1], [0, 0, 1, 1], [], []>} : vector<392x32xf32>, vector<32x32xf32>, vector<392x32xf32> -> vector<392x32xf32>
    %48 = arith.subf %45, %47 : vector<392x32xf32>
    %49 = arith.mulf %48, %48 : vector<392x32xf32>
    %cst_30 = arith.constant dense<0.000000e+00> : vector<392x32xf32>
    %50 = tpu.matmul %49, %46, %cst_30 {dimension_numbers = #tpu.dot_dimension_numbers<[1], [0], [0], [1], [0, 0, 1, 1], [], []>} : vector<392x32xf32>, vector<32x32xf32>, vector<392x32xf32> -> vector<392x32xf32>
    %cst_31 = arith.constant 9.99999974E-6 : f32
    %51 = vector.broadcast %cst_31 : f32 to vector<392x32xf32>
    %52 = arith.addf %50, %51 : vector<392x32xf32>
    %53 = math.rsqrt %52 : vector<392x32xf32>
    %54 = arith.mulf %48, %53 : vector<392x32xf32>
    %55 = vector.extract_strided_slice %5 {offsets = [0, 0], sizes = [1, 32], strides = [1, 1]} : vector<1x160xf32> to vector<1x32xf32>
    %56 = vector.broadcast %55 : vector<1x32xf32> to vector<392x32xf32>
    %57 = arith.mulf %54, %56 : vector<392x32xf32>
    %58 = vector.extract_strided_slice %6 {offsets = [0, 0], sizes = [1, 32], strides = [1, 1]} : vector<1x160xf32> to vector<1x32xf32>
    %59 = vector.broadcast %58 : vector<1x32xf32> to vector<392x32xf32>
    %60 = arith.addf %57, %59 : vector<392x32xf32>
    %61 = vector.extract_strided_slice %31 {offsets = [0, 0], sizes = [49, 32], strides = [1, 1]} : vector<49x64xf32> to vector<49x32xf32>
    %c0_32 = arith.constant 0 : index
    %c0_33 = arith.constant 0 : index
    %c0_34 = arith.constant 0 : index
    %62 = vector.load %arg11[%c0_32, %c0_33, %c0_34] : memref<2x735x32xf32, #tpu.memory_space<vmem>>, vector<1x49x32xf32>
    %63 = vector.shape_cast %62 : vector<1x49x32xf32> to vector<49x32xf32>
    %64 = vector.shape_cast %61 : vector<49x32xf32> to vector<1x49x32xf32>
    tpu.vector_store %arg11[%c0_32, %c0_33, %c0_34], %64 {strides = array<i32>} : memref<2x735x32xf32, #tpu.memory_space<vmem>>, vector<1x49x32xf32>,
    %65 = vector.extract_strided_slice %31 {offsets = [0, 32], sizes = [49, 32], strides = [1, 1]} : vector<49x64xf32> to vector<49x32xf32>
    %c0_35 = arith.constant 0 : index
    %c49 = arith.constant 49 : index
    %c0_36 = arith.constant 0 : index
    %66 = vector.load %arg11[%c0_35, %c49, %c0_36] : memref<2x735x32xf32, #tpu.memory_space<vmem>>, vector<1x49x32xf32>
    %67 = vector.shape_cast %66 : vector<1x49x32xf32> to vector<49x32xf32>
    %68 = vector.shape_cast %65 : vector<49x32xf32> to vector<1x49x32xf32>
    tpu.vector_store %arg11[%c0_35, %c49, %c0_36], %68 {strides = array<i32>} : memref<2x735x32xf32, #tpu.memory_space<vmem>>, vector<1x49x32xf32>,
    %69 = vector.extract_strided_slice %43 {offsets = [0, 0], sizes = [49, 32], strides = [1, 1]} : vector<49x160xf32> to vector<49x32xf32>
    %c0_37 = arith.constant 0 : index
    %c98 = arith.constant 98 : index
    %c0_38 = arith.constant 0 : index
    %70 = vector.load %arg11[%c0_37, %c98, %c0_38] : memref<2x735x32xf32, #tpu.memory_space<vmem>>, vector<1x49x32xf32>
    %71 = vector.shape_cast %70 : vector<1x49x32xf32> to vector<49x32xf32>
    %72 = vector.shape_cast %69 : vector<49x32xf32> to vector<1x49x32xf32>
    tpu.vector_store %arg11[%c0_37, %c98, %c0_38], %72 {strides = array<i32>} : memref<2x735x32xf32, #tpu.memory_space<vmem>>, vector<1x49x32xf32>,
    %73 = vector.extract_strided_slice %43 {offsets = [0, 32], sizes = [49, 32], strides = [1, 1]} : vector<49x160xf32> to vector<49x32xf32>
    %c0_39 = arith.constant 0 : index
    %c147 = arith.constant 147 : index
    %c0_40 = arith.constant 0 : index
    %74 = vector.load %arg11[%c0_39, %c147, %c0_40] : memref<2x735x32xf32, #tpu.memory_space<vmem>>, vector<1x49x32xf32>
    %75 = vector.shape_cast %74 : vector<1x49x32xf32> to vector<49x32xf32>
    %76 = vector.shape_cast %73 : vector<49x32xf32> to vector<1x49x32xf32>
    tpu.vector_store %arg11[%c0_39, %c147, %c0_40], %76 {strides = array<i32>} : memref<2x735x32xf32, #tpu.memory_space<vmem>>, vector<1x49x32xf32>,
    %77 = vector.extract_strided_slice %43 {offsets = [0, 64], sizes = [49, 32], strides = [1, 1]} : vector<49x160xf32> to vector<49x32xf32>
    %c0_41 = arith.constant 0 : index
    %c196 = arith.constant 196 : index
    %c0_42 = arith.constant 0 : index
    %78 = vector.load %arg11[%c0_41, %c196, %c0_42] : memref<2x735x32xf32, #tpu.memory_space<vmem>>, vector<1x49x32xf32>
    %79 = vector.shape_cast %78 : vector<1x49x32xf32> to vector<49x32xf32>
    %80 = vector.shape_cast %77 : vector<49x32xf32> to vector<1x49x32xf32>
    tpu.vector_store %arg11[%c0_41, %c196, %c0_42], %80 {strides = array<i32>} : memref<2x735x32xf32, #tpu.memory_space<vmem>>, vector<1x49x32xf32>,
    %81 = vector.extract_strided_slice %43 {offsets = [0, 96], sizes = [49, 32], strides = [1, 1]} : vector<49x160xf32> to vector<49x32xf32>
    %c0_43 = arith.constant 0 : index
    %c245 = arith.constant 245 : index
    %c0_44 = arith.constant 0 : index
    %82 = vector.load %arg11[%c0_43, %c245, %c0_44] : memref<2x735x32xf32, #tpu.memory_space<vmem>>, vector<1x49x32xf32>
    %83 = vector.shape_cast %82 : vector<1x49x32xf32> to vector<49x32xf32>
    %84 = vector.shape_cast %81 : vector<49x32xf32> to vector<1x49x32xf32>
    tpu.vector_store %arg11[%c0_43, %c245, %c0_44], %84 {strides = array<i32>} : memref<2x735x32xf32, #tpu.memory_space<vmem>>, vector<1x49x32xf32>,
    %85 = vector.extract_strided_slice %43 {offsets = [0, 128], sizes = [49, 32], strides = [1, 1]} : vector<49x160xf32> to vector<49x32xf32>
    %c0_45 = arith.constant 0 : index
    %c294 = arith.constant 294 : index
    %c0_46 = arith.constant 0 : index
    %86 = vector.load %arg11[%c0_45, %c294, %c0_46] : memref<2x735x32xf32, #tpu.memory_space<vmem>>, vector<1x49x32xf32>
    %87 = vector.shape_cast %86 : vector<1x49x32xf32> to vector<49x32xf32>
    %88 = vector.shape_cast %85 : vector<49x32xf32> to vector<1x49x32xf32>
    tpu.vector_store %arg11[%c0_45, %c294, %c0_46], %88 {strides = array<i32>} : memref<2x735x32xf32, #tpu.memory_space<vmem>>, vector<1x49x32xf32>,
    %c0_47 = arith.constant 0 : index
    %c343 = arith.constant 343 : index
    %c0_48 = arith.constant 0 : index
    %89 = vector.load %arg11[%c0_47, %c343, %c0_48] : memref<2x735x32xf32, #tpu.memory_space<vmem>>, vector<1x392x32xf32>
    %90 = vector.shape_cast %89 : vector<1x392x32xf32> to vector<392x32xf32>
    %91 = vector.shape_cast %60 : vector<392x32xf32> to vector<1x392x32xf32>
    tpu.vector_store %arg11[%c0_47, %c343, %c0_48], %91 {strides = array<i32>} : memref<2x735x32xf32, #tpu.memory_space<vmem>>, vector<1x392x32xf32>,
    %c1 = arith.constant 1 : index
    %c0_49 = arith.constant 0 : index
    %c0_50 = arith.constant 0 : index
    %92 = vector.load %arg2[%c1, %c0_49, %c0_50] : memref<2x49x1024xf32, #tpu.memory_space<vmem>>, vector<1x49x1024xf32>
    %93 = vector.shape_cast %92 : vector<1x49x1024xf32> to vector<49x1024xf32>
    %cst_51 = arith.constant dense<0.000000e+00> : vector<49x64xf32>
    %94 = tpu.matmul %93, %0, %cst_51 {dimension_numbers = #tpu.dot_dimension_numbers<[1], [0], [0], [1], [0, 0, 1, 1], [], []>} : vector<49x1024xf32>, vector<1024x64xf32>, vector<49x64xf32> -> vector<49x64xf32>
    %95 = vector.broadcast %1 : vector<1x64xf32> to vector<49x64xf32>
    %96 = arith.addf %94, %95 : vector<49x64xf32>
    %c1_52 = arith.constant 1 : index
    %c0_53 = arith.constant 0 : index
    %c0_54 = arith.constant 0 : index
    %97 = vector.load %arg5[%c1_52, %c0_53, %c0_54] : memref<2x49x640xf32, #tpu.memory_space<vmem>>, vector<1x49x640xf32>
    %98 = vector.shape_cast %97 : vector<1x49x640xf32> to vector<49x640xf32>
    %cst_55 = arith.constant dense<0.000000e+00> : vector<49x160xf32>
    %99 = tpu.matmul %98, %2, %cst_55 {dimension_numbers = #tpu.dot_dimension_numbers<[1], [0], [0], [1], [0, 0, 1, 1], [], []>} : vector<49x640xf32>, vector<640x160xf32>, vector<49x160xf32> -> vector<49x160xf32>
    %100 = vector.broadcast %3 : vector<1x160xf32> to vector<49x160xf32>
    %101 = arith.addf %99, %100 : vector<49x160xf32>
    %102 = vector.extract_strided_slice %4 {offsets = [0, 0], sizes = [64, 64], strides = [1, 1]} : vector<160x160xf32> to vector<64x64xf32>
    %cst_56 = arith.constant dense<0.000000e+00> : vector<49x64xf32>
    %103 = tpu.matmul %96, %102, %cst_56 {dimension_numbers = #tpu.dot_dimension_numbers<[1], [0], [0], [1], [0, 0, 1, 1], [], []>} : vector<49x64xf32>, vector<64x64xf32>, vector<49x64xf32> -> vector<49x64xf32>
    %104 = arith.subf %96, %103 : vector<49x64xf32>
    %105 = arith.mulf %104, %104 : vector<49x64xf32>
    %cst_57 = arith.constant dense<0.000000e+00> : vector<49x64xf32>
    %106 = tpu.matmul %105, %102, %cst_57 {dimension_numbers = #tpu.dot_dimension_numbers<[1], [0], [0], [1], [0, 0, 1, 1], [], []>} : vector<49x64xf32>, vector<64x64xf32>, vector<49x64xf32> -> vector<49x64xf32>
    %cst_58 = arith.constant 9.99999974E-6 : f32
    %107 = vector.broadcast %cst_58 : f32 to vector<49x64xf32>
    %108 = arith.addf %106, %107 : vector<49x64xf32>
    %109 = math.rsqrt %108 : vector<49x64xf32>
    %110 = arith.mulf %104, %109 : vector<49x64xf32>
    %111 = vector.extract_strided_slice %5 {offsets = [0, 0], sizes = [1, 64], strides = [1, 1]} : vector<1x160xf32> to vector<1x64xf32>
    %112 = vector.broadcast %111 : vector<1x64xf32> to vector<49x64xf32>
    %113 = arith.mulf %110, %112 : vector<49x64xf32>
    %114 = vector.extract_strided_slice %6 {offsets = [0, 0], sizes = [1, 64], strides = [1, 1]} : vector<1x160xf32> to vector<1x64xf32>
    %115 = vector.broadcast %114 : vector<1x64xf32> to vector<49x64xf32>
    %116 = arith.addf %113, %115 : vector<49x64xf32>
    %cst_59 = arith.constant dense<0.000000e+00> : vector<49x160xf32>
    %117 = tpu.matmul %101, %4, %cst_59 {dimension_numbers = #tpu.dot_dimension_numbers<[1], [0], [0], [1], [0, 0, 1, 1], [], []>} : vector<49x160xf32>, vector<160x160xf32>, vector<49x160xf32> -> vector<49x160xf32>
    %118 = arith.subf %101, %117 : vector<49x160xf32>
    %119 = arith.mulf %118, %118 : vector<49x160xf32>
    %cst_60 = arith.constant dense<0.000000e+00> : vector<49x160xf32>
    %120 = tpu.matmul %119, %4, %cst_60 {dimension_numbers = #tpu.dot_dimension_numbers<[1], [0], [0], [1], [0, 0, 1, 1], [], []>} : vector<49x160xf32>, vector<160x160xf32>, vector<49x160xf32> -> vector<49x160xf32>
    %cst_61 = arith.constant 9.99999974E-6 : f32
    %121 = vector.broadcast %cst_61 : f32 to vector<49x160xf32>
    %122 = arith.addf %120, %121 : vector<49x160xf32>
    %123 = math.rsqrt %122 : vector<49x160xf32>
    %124 = arith.mulf %118, %123 : vector<49x160xf32>
    %125 = vector.broadcast %5 : vector<1x160xf32> to vector<49x160xf32>
    %126 = arith.mulf %124, %125 : vector<49x160xf32>
    %127 = vector.broadcast %6 : vector<1x160xf32> to vector<49x160xf32>
    %128 = arith.addf %126, %127 : vector<49x160xf32>
    %c1_62 = arith.constant 1 : index
    %c0_63 = arith.constant 0 : index
    %c0_64 = arith.constant 0 : index
    %129 = vector.load %arg1[%c1_62, %c0_63, %c0_64] : memref<2x392x32xf32, #tpu.memory_space<vmem>>, vector<1x392x32xf32>
    %130 = vector.shape_cast %129 : vector<1x392x32xf32> to vector<392x32xf32>
    %131 = vector.extract_strided_slice %4 {offsets = [0, 0], sizes = [32, 32], strides = [1, 1]} : vector<160x160xf32> to vector<32x32xf32>
    %cst_65 = arith.constant dense<0.000000e+00> : vector<392x32xf32>
    %132 = tpu.matmul %130, %131, %cst_65 {dimension_numbers = #tpu.dot_dimension_numbers<[1], [0], [0], [1], [0, 0, 1, 1], [], []>} : vector<392x32xf32>, vector<32x32xf32>, vector<392x32xf32> -> vector<392x32xf32>
    %133 = arith.subf %130, %132 : vector<392x32xf32>
    %134 = arith.mulf %133, %133 : vector<392x32xf32>
    %cst_66 = arith.constant dense<0.000000e+00> : vector<392x32xf32>
    %135 = tpu.matmul %134, %131, %cst_66 {dimension_numbers = #tpu.dot_dimension_numbers<[1], [0], [0], [1], [0, 0, 1, 1], [], []>} : vector<392x32xf32>, vector<32x32xf32>, vector<392x32xf32> -> vector<392x32xf32>
    %cst_67 = arith.constant 9.99999974E-6 : f32
    %136 = vector.broadcast %cst_67 : f32 to vector<392x32xf32>
    %137 = arith.addf %135, %136 : vector<392x32xf32>
    %138 = math.rsqrt %137 : vector<392x32xf32>
    %139 = arith.mulf %133, %138 : vector<392x32xf32>
    %140 = vector.extract_strided_slice %5 {offsets = [0, 0], sizes = [1, 32], strides = [1, 1]} : vector<1x160xf32> to vector<1x32xf32>
    %141 = vector.broadcast %140 : vector<1x32xf32> to vector<392x32xf32>
    %142 = arith.mulf %139, %141 : vector<392x32xf32>
    %143 = vector.extract_strided_slice %6 {offsets = [0, 0], sizes = [1, 32], strides = [1, 1]} : vector<1x160xf32> to vector<1x32xf32>
    %144 = vector.broadcast %143 : vector<1x32xf32> to vector<392x32xf32>
    %145 = arith.addf %142, %144 : vector<392x32xf32>
    %146 = vector.extract_strided_slice %116 {offsets = [0, 0], sizes = [49, 32], strides = [1, 1]} : vector<49x64xf32> to vector<49x32xf32>
    %c1_68 = arith.constant 1 : index
    %c0_69 = arith.constant 0 : index
    %c0_70 = arith.constant 0 : index
    %147 = vector.load %arg11[%c1_68, %c0_69, %c0_70] : memref<2x735x32xf32, #tpu.memory_space<vmem>>, vector<1x49x32xf32>
    %148 = vector.shape_cast %147 : vector<1x49x32xf32> to vector<49x32xf32>
    %149 = vector.shape_cast %146 : vector<49x32xf32> to vector<1x49x32xf32>
    tpu.vector_store %arg11[%c1_68, %c0_69, %c0_70], %149 {strides = array<i32>} : memref<2x735x32xf32, #tpu.memory_space<vmem>>, vector<1x49x32xf32>,
    %150 = vector.extract_strided_slice %116 {offsets = [0, 32], sizes = [49, 32], strides = [1, 1]} : vector<49x64xf32> to vector<49x32xf32>
    %c1_71 = arith.constant 1 : index
    %c49_72 = arith.constant 49 : index
    %c0_73 = arith.constant 0 : index
    %151 = vector.load %arg11[%c1_71, %c49_72, %c0_73] : memref<2x735x32xf32, #tpu.memory_space<vmem>>, vector<1x49x32xf32>
    %152 = vector.shape_cast %151 : vector<1x49x32xf32> to vector<49x32xf32>
    %153 = vector.shape_cast %150 : vector<49x32xf32> to vector<1x49x32xf32>
    tpu.vector_store %arg11[%c1_71, %c49_72, %c0_73], %153 {strides = array<i32>} : memref<2x735x32xf32, #tpu.memory_space<vmem>>, vector<1x49x32xf32>,
    %154 = vector.extract_strided_slice %128 {offsets = [0, 0], sizes = [49, 32], strides = [1, 1]} : vector<49x160xf32> to vector<49x32xf32>
    %c1_74 = arith.constant 1 : index
    %c98_75 = arith.constant 98 : index
    %c0_76 = arith.constant 0 : index
    %155 = vector.load %arg11[%c1_74, %c98_75, %c0_76] : memref<2x735x32xf32, #tpu.memory_space<vmem>>, vector<1x49x32xf32>
    %156 = vector.shape_cast %155 : vector<1x49x32xf32> to vector<49x32xf32>
    %157 = vector.shape_cast %154 : vector<49x32xf32> to vector<1x49x32xf32>
    tpu.vector_store %arg11[%c1_74, %c98_75, %c0_76], %157 {strides = array<i32>} : memref<2x735x32xf32, #tpu.memory_space<vmem>>, vector<1x49x32xf32>,
    %158 = vector.extract_strided_slice %128 {offsets = [0, 32], sizes = [49, 32], strides = [1, 1]} : vector<49x160xf32> to vector<49x32xf32>
    %c1_77 = arith.constant 1 : index
    %c147_78 = arith.constant 147 : index
    %c0_79 = arith.constant 0 : index
    %159 = vector.load %arg11[%c1_77, %c147_78, %c0_79] : memref<2x735x32xf32, #tpu.memory_space<vmem>>, vector<1x49x32xf32>
    %160 = vector.shape_cast %159 : vector<1x49x32xf32> to vector<49x32xf32>
    %161 = vector.shape_cast %158 : vector<49x32xf32> to vector<1x49x32xf32>
    tpu.vector_store %arg11[%c1_77, %c147_78, %c0_79], %161 {strides = array<i32>} : memref<2x735x32xf32, #tpu.memory_space<vmem>>, vector<1x49x32xf32>,
    %162 = vector.extract_strided_slice %128 {offsets = [0, 64], sizes = [49, 32], strides = [1, 1]} : vector<49x160xf32> to vector<49x32xf32>
    %c1_80 = arith.constant 1 : index
    %c196_81 = arith.constant 196 : index
    %c0_82 = arith.constant 0 : index
    %163 = vector.load %arg11[%c1_80, %c196_81, %c0_82] : memref<2x735x32xf32, #tpu.memory_space<vmem>>, vector<1x49x32xf32>
    %164 = vector.shape_cast %163 : vector<1x49x32xf32> to vector<49x32xf32>
    %165 = vector.shape_cast %162 : vector<49x32xf32> to vector<1x49x32xf32>
    tpu.vector_store %arg11[%c1_80, %c196_81, %c0_82], %165 {strides = array<i32>} : memref<2x735x32xf32, #tpu.memory_space<vmem>>, vector<1x49x32xf32>,
    %166 = vector.extract_strided_slice %128 {offsets = [0, 96], sizes = [49, 32], strides = [1, 1]} : vector<49x160xf32> to vector<49x32xf32>
    %c1_83 = arith.constant 1 : index
    %c245_84 = arith.constant 245 : index
    %c0_85 = arith.constant 0 : index
    %167 = vector.load %arg11[%c1_83, %c245_84, %c0_85] : memref<2x735x32xf32, #tpu.memory_space<vmem>>, vector<1x49x32xf32>
    %168 = vector.shape_cast %167 : vector<1x49x32xf32> to vector<49x32xf32>
    %169 = vector.shape_cast %166 : vector<49x32xf32> to vector<1x49x32xf32>
    tpu.vector_store %arg11[%c1_83, %c245_84, %c0_85], %169 {strides = array<i32>} : memref<2x735x32xf32, #tpu.memory_space<vmem>>, vector<1x49x32xf32>,
    %170 = vector.extract_strided_slice %128 {offsets = [0, 128], sizes = [49, 32], strides = [1, 1]} : vector<49x160xf32> to vector<49x32xf32>
    %c1_86 = arith.constant 1 : index
    %c294_87 = arith.constant 294 : index
    %c0_88 = arith.constant 0 : index
    %171 = vector.load %arg11[%c1_86, %c294_87, %c0_88] : memref<2x735x32xf32, #tpu.memory_space<vmem>>, vector<1x49x32xf32>
    %172 = vector.shape_cast %171 : vector<1x49x32xf32> to vector<49x32xf32>
    %173 = vector.shape_cast %170 : vector<49x32xf32> to vector<1x49x32xf32>
    tpu.vector_store %arg11[%c1_86, %c294_87, %c0_88], %173 {strides = array<i32>} : memref<2x735x32xf32, #tpu.memory_space<vmem>>, vector<1x49x32xf32>,
    %c1_89 = arith.constant 1 : index
    %c343_90 = arith.constant 343 : index
    %c0_91 = arith.constant 0 : index
    %174 = vector.load %arg11[%c1_89, %c343_90, %c0_91] : memref<2x735x32xf32, #tpu.memory_space<vmem>>, vector<1x392x32xf32>
    %175 = vector.shape_cast %174 : vector<1x392x32xf32> to vector<392x32xf32>
    %176 = vector.shape_cast %145 : vector<392x32xf32> to vector<1x392x32xf32>
    tpu.vector_store %arg11[%c1_89, %c343_90, %c0_91], %176 {strides = array<i32>} : memref<2x735x32xf32, #tpu.memory_space<vmem>>, vector<1x392x32xf32>,
    return
  }
  func.func @transform_0(%arg0: i32) -> (i32, i32, i32) {
    %c0_i32 = arith.constant 0 : i32
    %c0_i32_0 = arith.constant 0 : i32
    %c0_i32_1 = arith.constant 0 : i32
    return %arg0, %c0_i32, %c0_i32_0 : i32, i32, i32
  }
  func.func @transform_1(%arg0: i32) -> (i32, i32, i32) {
    %c0_i32 = arith.constant 0 : i32
    %c0_i32_0 = arith.constant 0 : i32
    %c0_i32_1 = arith.constant 0 : i32
    return %arg0, %c0_i32, %c0_i32_0 : i32, i32, i32
  }
  func.func @transform_2(%arg0: i32) -> (i32, i32) {
    %c0_i32 = arith.constant 0 : i32
    %c0_i32_0 = arith.constant 0 : i32
    %c0_i32_1 = arith.constant 0 : i32
    return %c0_i32, %c0_i32_0 : i32, i32
  }
  func.func @transform_3(%arg0: i32) -> (i32, i32) {
    %c0_i32 = arith.constant 0 : i32
    %c0_i32_0 = arith.constant 0 : i32
    %c0_i32_1 = arith.constant 0 : i32
    return %c0_i32, %c0_i32_0 : i32, i32
  }
  func.func @transform_4(%arg0: i32) -> (i32, i32, i32) {
    %c0_i32 = arith.constant 0 : i32
    %c0_i32_0 = arith.constant 0 : i32
    %c0_i32_1 = arith.constant 0 : i32
    return %arg0, %c0_i32, %c0_i32_0 : i32, i32, i32
  }
  func.func @transform_5(%arg0: i32) -> (i32, i32) {
    %c0_i32 = arith.constant 0 : i32
    %c0_i32_0 = arith.constant 0 : i32
    %c0_i32_1 = arith.constant 0 : i32
    return %c0_i32, %c0_i32_0 : i32, i32
  }
  func.func @transform_6(%arg0: i32) -> (i32, i32) {
    %c0_i32 = arith.constant 0 : i32
    %c0_i32_0 = arith.constant 0 : i32
    %c0_i32_1 = arith.constant 0 : i32
    return %c0_i32, %c0_i32_0 : i32, i32
  }
  func.func @transform_7(%arg0: i32) -> (i32, i32) {
    %c0_i32 = arith.constant 0 : i32
    %c0_i32_0 = arith.constant 0 : i32
    %c0_i32_1 = arith.constant 0 : i32
    return %c0_i32, %c0_i32_0 : i32, i32
  }
  func.func @transform_8(%arg0: i32) -> (i32, i32) {
    %c0_i32 = arith.constant 0 : i32
    %c0_i32_0 = arith.constant 0 : i32
    %c0_i32_1 = arith.constant 0 : i32
    return %c0_i32, %c0_i32_0 : i32, i32
  }
  func.func @transform_9(%arg0: i32) -> (i32, i32) {
    %c0_i32 = arith.constant 0 : i32
    %c0_i32_0 = arith.constant 0 : i32
    %c0_i32_1 = arith.constant 0 : i32
    return %c0_i32, %c0_i32_0 : i32, i32
  }
  func.func @transform_10(%arg0: i32) -> (i32, i32, i32) {
    %c0_i32 = arith.constant 0 : i32
    %c0_i32_0 = arith.constant 0 : i32
    %c0_i32_1 = arith.constant 0 : i32
    return %arg0, %c0_i32, %c0_i32_0 : i32, i32, i32
  }
}

</mosaic_0001>

<bundles_post_ra>
// kernel: _lambda_.1
= control target key start
LH: loop header
LB: loop body
LE: loop exit
PB: predicated region body
PF: predicated region fallthrough
CT: control target
= control target key end

     0   :  { %s9903_s13 = smov 0   ;;  %s14785_s0 = inlined_call_operand.vmem [shape: f32[4,392,32], index: 0, kind: input, shape index: {}]   ;;  %s14786_s1 = inlined_call_operand.vmem [shape: f32[4,49,1024], index: 1, kind: input, shape index: {}]   ;;  %s14787_s2 = inlined_call_operand.vmem [shape: f32[1024,64], index: 2, kind: input, shape index: {}]   ;;  %s14788_s3 = inlined_call_operand.vmem [shape: f32[1,64], index: 3, kind: input, shape index: {}]   ;;  %s14789_s4 = inlined_call_operand.vmem [shape: f32[4,49,640], index: 4, kind: input, shape index: {}]   ;;  %s14790_s5 = inlined_call_operand.vmem [shape: f32[640,160], index: 5, kind: input, shape index: {}]   ;;  %s14791_s6 = inlined_call_operand.vmem [shape: f32[1,160], index: 6, kind: input, shape index: {}]   ;;  %s14792_s7 = inlined_call_operand.vmem [shape: f32[160,160], index: 7, kind: input, shape index: {}]   ;;  %s14793_s8 = inlined_call_operand.vmem [shape: f32[1,160], index: 8, kind: input, shape index: {}]   ;;  %s14794_s9 = inlined_call_operand.vmem [shape: f32[1,160], index: 9, kind: input, shape index: {}]   ;;  %s14795_s10 = inlined_call_operand.vmem [shape: f32[4,735,32], index: 10, kind: output, shape index: {}]  }
   0x1 LB: > { %s6656_s14 = sadd.s32 4294967295, %s9840_s13   ;;  %p6660_p0 = scmp.ge.s32.totalorder %s9840_s13, 1  ;;  %s9840_s13 = sphi %s9903_s13, %s20_s13  }
   0x2   : > { %p338_p1 = scmp.lt.s32.totalorder %s9840_s13, 3 }
   0x4   : > { %p339_p2 = pnand %p6660_p0, %p338_p1 }
   0x6   : > { %342 = sbr.rel (%p339_p2) target bundleno = 2604 (0xa2c), region = 60 }
   0xd   : > { %v434_v0 = vld [vmem:[%s14787_s2 + $0x80] sm:$0xff]  ;;  %v435_v1 = vld [vmem:[%s14787_s2 + $0x88] sm:$0xff]  ;;  %v436_v11 = vld [vmem:[%s14787_s2 + $0x90] sm:$0xff]  ;;  %s9956_s21 = sshll.u32 %s6656_s14, 1  ;;  %vm9843_vm0 = vmmov 0   ;;  %vm1579_vm1 = vcmask 523264  }
   0xe   : > { %v418_v2 = vld [vmem:[%s14787_s2] sm:$0xff]  ;;  %v9920_v3 = vpack.c.bf16 %v435_v1, %v434_v0  ;;  %v419_v4 = vld [vmem:[%s14787_s2 + $0x8] sm:$0xff]  ;;  %v437_v13 = vld [vmem:[%s14787_s2 + $0x98] sm:$0xff]  ;;  %p391_p3 = scmp.lt.s32.totalorder %s9956_s21, 3  ;;  %vm1876_vm2 = vcmask 261120   ;;  %s9845_s28 = smov 96  }
   0xf   : > { %v466_v5 = vld [vmem:[%s14787_s2 + $0x180] sm:$0xff]  ;;  %v467_v6 = vld [vmem:[%s14787_s2 + $0x188] sm:$0xff]  ;;  %v9931_v7 = vpack.c.bf16 %v419_v4, %v418_v2  ;;  %v420_v14 = vld [vmem:[%s14787_s2 + $0x10] sm:$0xff]  ;;  %v9960_v16 = vpack.c.bf16 %v437_v13, %v436_v11  ;;  %vm3490_vm3 = vcmask 253952   ;;  %s9847_s16 = smov 32  }
  0x10   : > { %v9933_v8 = vpack.c.bf16 %v467_v6, %v466_v5  ;;  %v450_v9 = vld [vmem:[%s14787_s2 + $0x100] sm:$0xff]  ;;  %v451_v10 = vld [vmem:[%s14787_s2 + $0x108] sm:$0xff]  ;;  %8627 = vmatprep.subr.bf16.mxu0 %v9920_v3  ;;  %v421_v15 = vld [vmem:[%s14787_s2 + $0x18] sm:$0xff]  ;;  %s15383_s21 = smov (!%p391_p3, %s9956_s21), 3 }
  0x11   : > { %v9945_v12 = vpack.c.bf16 %v451_v10, %v450_v9  ;;  %8629 = vmatpush3.bf16.msra.mxu0 %v9931_v7  ;;  %v9962_v17 = vpack.c.bf16 %v421_v15, %v420_v14  ;;  %v468_v18 = vld [vmem:[%s14787_s2 + $0x190] sm:$0xff]  ;;  %v469_v19 = vld [vmem:[%s14787_s2 + $0x198] sm:$0xff]  ;;  %v438_v23 = vld [vmem:[%s14787_s2 + $0xa0] sm:$0xff]  ;;  %s9519_s27 = smul.u32 448, %s15383_s21 }
  0x12   : > { %8659 = vmatprep.subr.bf16.mxu1 %v9933_v8  ;;  %v452_v20 = vld [vmem:[%s14787_s2 + $0x110] sm:$0xff]  ;;  %v9974_v21 = vpack.c.bf16 %v469_v19, %v468_v18  ;;  %v453_v22 = vld [vmem:[%s14787_s2 + $0x118] sm:$0xff]  ;;  %v439_v24 = vld [vmem:[%s14787_s2 + $0xa8] sm:$0xff]  ;;  %8631 = vmatprep.subr.bf16.mxu0 %v9960_v16  ;;  %s9520_s30 = smul.u32 280, %s15383_s21 }
  0x13   : > { %15010 = vst [vmem:[#allocation2_spill] sm:$0xff] %v9945_v12  ;;  %8661 = vmatpush3.bf16.msra.mxu1 %v9945_v12  ;;  %v9986_v25 = vpack.c.bf16 %v453_v22, %v452_v20  ;;  %v9988_v26 = vpack.c.bf16 %v439_v24, %v438_v23  ;;  %v422_v27 = vld [vmem:[%s14787_s2 + $0x20] sm:$0xff]  ;;  %v423_v28 = vld [vmem:[%s14787_s2 + $0x28] sm:$0xff]  ;;  %v440_v35 = vld [vmem:[%s14787_s2 + $0xb0] sm:$0xff]  ;;  %s10135_s29 = scalar_lea.vmem %s14786_s1, %s9519_s27  ;;  %s9521_s24 = smul.u32 736, %s15383_s21 }
  0x14   : > { %15011 = vst [vmem:[#allocation3_spill] sm:$0xff] %v9974_v21  ;;  %v470_v29 = vld [vmem:[%s14787_s2 + $0x1a0] sm:$0xff]  ;;  %8663 = vmatprep.subr.bf16.mxu1 %v9974_v21  ;;  %v471_v30 = vld [vmem:[%s14787_s2 + $0x1a8] sm:$0xff]  ;;  %v10011_v33 = vpack.c.bf16 %v423_v28, %v422_v27  ;;  %v441_v36 = vld [vmem:[%s14787_s2 + $0xb8] sm:$0xff]  ;;  %s10680_s23 = scalar_lea.vmem %s14789_s4, %s9520_s30  ;;  %s9518_s30 = smul.u32 392, %s15383_s21 }
  0x15   : > { %15012 = vst [vmem:[#allocation4_spill] sm:$0xff] %v9986_v25  ;;  %v454_v31 = vld [vmem:[%s14787_s2 + $0x120] sm:$0xff]  ;;  %v455_v32 = vld [vmem:[%s14787_s2 + $0x128] sm:$0xff]  ;;  %8633 = vmatpush3.bf16.msra.mxu0 %v9962_v17  ;;  %v10013_v34 = vpack.c.bf16 %v471_v30, %v470_v29  ;;  %v424_v37 = vld [vmem:[%s14787_s2 + $0x30] sm:$0xff]  ;;  %v10028_v39 = vpack.c.bf16 %v441_v36, %v440_v35  ;;  %s11801_s14 = scalar_lea.vmem %s14795_s10, %s9521_s24  ;;  %s9846_s21 = smov 64  }
  0x16   : > { %8635 = vmatprep.subr.bf16.mxu0 %v9988_v26  ;;  %v10026_v38 = vpack.c.bf16 %v455_v32, %v454_v31  ;;  %v425_v40 = vld [vmem:[%s14787_s2 + $0x38] sm:$0xff]  ;;  %v472_v41 = vld [vmem:[%s14787_s2 + $0x1b0] sm:$0xff]  ;;  %v442_v46 = vld [vmem:[%s14787_s2 + $0xc0] sm:$0xff]  ;;  %s11927_s15 = scalar_lea.vmem %s14785_s0, %s9518_s30 }
  0x17   : > { %15013 = vst [vmem:[#allocation5_spill] sm:$0xff] %v10013_v34  ;;  %8665 = vmatpush3.bf16.msra.mxu1 %v9986_v25  ;;  %v473_v42 = vld [vmem:[%s14787_s2 + $0x1b8] sm:$0xff]  ;;  %v456_v44 = vld [vmem:[%s14787_s2 + $0x130] sm:$0xff]  ;;  %v443_v47 = vld [vmem:[%s14787_s2 + $0xc8] sm:$0xff]  ;;  %v10060_v48 = vpack.c.bf16 %v425_v40, %v424_v37 }
  0x18   : > { %15014 = vst [vmem:[#allocation6_spill] sm:$0xff] %v10026_v38  ;;  %8667 = vmatprep.subr.bf16.mxu1 %v10013_v34  ;;  %v10040_v43 = vpack.c.bf16 %v473_v42, %v472_v41  ;;  %v457_v45 = vld [vmem:[%s14787_s2 + $0x138] sm:$0xff]  ;;  %v474_v49 = vld [vmem:[%s14787_s2 + $0x1c0] sm:$0xff]  ;;  %v475_v50 = vld [vmem:[%s14787_s2 + $0x1c8] sm:$0xff]  ;;  %v10072_v52 = vpack.c.bf16 %v443_v47, %v442_v46 }
  0x19   : > { %8637 = vmatpush3.bf16.msra.mxu0 %v10011_v33  ;;  %v10070_v51 = vpack.c.bf16 %v457_v45, %v456_v44  ;;  %v426_v53 = vld [vmem:[%s14787_s2 + $0x40] sm:$0xff]  ;;  %v427_v54 = vld [vmem:[%s14787_s2 + $0x48] sm:$0xff]  ;;  %v10084_v56 = vpack.c.bf16 %v475_v50, %v474_v49  ;;  %v444_v58 = vld [vmem:[%s14787_s2 + $0xd0] sm:$0xff] }
  0x1a   : > { %15015 = vst [vmem:[#allocation7_spill] sm:$0xff] %v10040_v43  ;;  %8639 = vmatprep.subr.bf16.mxu0 %v10028_v39  ;;  %v458_v55 = vld [vmem:[%s14787_s2 + $0x140] sm:$0xff]  ;;  %v459_v57 = vld [vmem:[%s14787_s2 + $0x148] sm:$0xff]  ;;  %v445_v59 = vld [vmem:[%s14787_s2 + $0xd8] sm:$0xff]  ;;  %v10103_v62 = vpack.c.bf16 %v427_v54, %v426_v53 }
  0x1b   : > { %8669 = vmatpush3.bf16.msra.mxu1 %v10026_v38  ;;  %15016 = vst [vmem:[#allocation8_spill] sm:$0xff] %v10070_v51  ;;  %15017 = vst [vmem:[#allocation9_spill] sm:$0xff] %v10084_v56  ;;  %v476_v60 = vld [vmem:[%s14787_s2 + $0x1d0] sm:$0xff]  ;;  %v477_v61 = vld [vmem:[%s14787_s2 + $0x1d8] sm:$0xff]  ;;  %v10107_v63 = vpack.c.bf16 %v459_v57, %v458_v55  ;;  %v10109_v0 = vpack.c.bf16 %v445_v59, %v444_v58 }
  0x1c   : > { %8671 = vmatprep.subr.bf16.mxu1 %v10040_v43  ;;  %v428_v1 = vld [vmem:[%s14787_s2 + $0x50] sm:$0xff]  ;;  %v429_v2 = vld [vmem:[%s14787_s2 + $0x58] sm:$0xff]  ;;  %v10121_v5 = vpack.c.bf16 %v477_v61, %v476_v60  ;;  %v446_v9 = vld [vmem:[%s14787_s2 + $0xe0] sm:$0xff] }
  0x1d   : > { %8641 = vmatpush3.bf16.msra.mxu0 %v10060_v48  ;;  %15018 = vst [vmem:[#allocation10_spill] sm:$0xff] %v10107_v63  ;;  %v460_v4 = vld [vmem:[%s14787_s2 + $0x150] sm:$0xff]  ;;  %v461_v6 = vld [vmem:[%s14787_s2 + $0x158] sm:$0xff]  ;;  %v447_v10 = vld [vmem:[%s14787_s2 + $0xe8] sm:$0xff]  ;;  %v10144_v14 = vpack.c.bf16 %v429_v2, %v428_v1 }
  0x1e   : > { %8643 = vmatprep.subr.bf16.mxu0 %v10072_v52  ;;  %15019 = vst [vmem:[#allocation11_spill] sm:$0xff] %v10121_v5  ;;  %v478_v11 = vld [vmem:[%s14787_s2 + $0x1e0] sm:$0xff]  ;;  %v479_v13 = vld [vmem:[%s14787_s2 + $0x1e8] sm:$0xff]  ;;  %v10154_v19 = vpack.c.bf16 %v461_v6, %v460_v4  ;;  %v10156_v20 = vpack.c.bf16 %v447_v10, %v446_v9  ;;  %v448_v28 = vld [vmem:[%s14787_s2 + $0xf0] sm:$0xff] }
  0x1f   : > { %8673 = vmatpush3.bf16.msra.mxu1 %v10070_v51  ;;  %15020 = vst [vmem:[#allocation12_spill] sm:$0xff] %v10144_v14  ;;  %v430_v15 = vld [vmem:[%s14787_s2 + $0x60] sm:$0xff]  ;;  %v431_v18 = vld [vmem:[%s14787_s2 + $0x68] sm:$0xff]  ;;  %v10166_v27 = vpack.c.bf16 %v479_v13, %v478_v11  ;;  %v449_v29 = vld [vmem:[%s14787_s2 + $0xf8] sm:$0xff] }
  0x20   : > { %8675 = vmatprep.subr.bf16.mxu1 %v10084_v56  ;;  %15021 = vst [vmem:[#allocation13_spill] sm:$0xff] %v10154_v19  ;;  %15022 = vst [vmem:[#allocation14_spill] sm:$0xff] %v10156_v20  ;;  %v462_v22 = vld [vmem:[%s14787_s2 + $0x160] sm:$0xff]  ;;  %v463_v23 = vld [vmem:[%s14787_s2 + $0x168] sm:$0xff]  ;;  %v10182_v35 = vpack.c.bf16 %v431_v18, %v430_v15  ;;  %v10188_v37 = vpack.c.bf16 %v449_v29, %v448_v28 }
  0x21   : > { %8645 = vmatpush3.bf16.msra.mxu0 %v10103_v62  ;;  %v751_v24 = vld [vmem:[%s10135_s29 + $0x8] sm:$0xff]  ;;  %15023 = vst [vmem:[#allocation15_spill] sm:$0xff] %v10166_v27  ;;  %v753_v30 = vld [vmem:[%s10135_s29 + $0x18] sm:$0xff]  ;;  %v480_v31 = vld [vmem:[%s14787_s2 + $0x1f0] sm:$0xff]  ;;  %v10186_v36 = vpack.c.bf16 %v463_v23, %v462_v22 }
  0x22   : > { %8647 = vmatprep.subr.bf16.mxu0 %v10109_v0  ;;  %876 = vmatprep.mubr.f32.mxu0 %v751_v24  ;;  %v481_v32 = vld [vmem:[%s14787_s2 + $0x1f8] sm:$0xff]  ;;  %15024 = vst [vmem:[#allocation16_spill] sm:$0xff] %v10182_v35  ;;  %15026 = vst [vmem:[#allocation18_spill] sm:$0xff] %v10188_v37  ;;  %v432_v40 = vld [vmem:[%s14787_s2 + $0x70] sm:$0xff] }
  0x23   : > { %8677 = vmatpush3.bf16.msra.mxu1 %v10107_v63  ;;  %976 = vmatprep.mubr.f32.mxu1 %v753_v30  ;;  %15025 = vst [vmem:[#allocation17_spill] sm:$0xff] %v10186_v36  ;;  %v433_v41 = vld [vmem:[%s14787_s2 + $0x78] sm:$0xff]  ;;  %v464_v42 = vld [vmem:[%s14787_s2 + $0x170] sm:$0xff]  ;;  %v10200_v44 = vpack.c.bf16 %v481_v32, %v480_v31  ;;  %v498_v46 = vld [vmem:[%s14787_s2 + $0x280] sm:$0xff] }
  0x24   : > { %8679 = vmatprep.subr.bf16.mxu1 %v10121_v5  ;;  %v465_v45 = vld [vmem:[%s14787_s2 + $0x178] sm:$0xff]  ;;  %v499_v47 = vld [vmem:[%s14787_s2 + $0x288] sm:$0xff]  ;;  %v530_v49 = vld [vmem:[%s14787_s2 + $0x380] sm:$0xff]  ;;  %v10218_v53 = vpack.c.bf16 %v433_v41, %v432_v40 }
  0x25   : > { %8649 = vmatpush3.bf16.msra.mxu0 %v10144_v14  ;;  %15027 = vst [vmem:[#allocation19_spill] sm:$0xff] %v10200_v44  ;;  %v531_v50 = vld [vmem:[%s14787_s2 + $0x388] sm:$0xff]  ;;  %v10222_v54 = vpack.c.bf16 %v465_v45, %v464_v42  ;;  %v10224_v55 = vpack.c.bf16 %v499_v47, %v498_v46  ;;  %v482_v57 = vld [vmem:[%s14787_s2 + $0x200] sm:$0xff]  ;;  %v500_v1 = vld [vmem:[%s14787_s2 + $0x290] sm:$0xff] }
  0x26   : > { %8651 = vmatprep.subr.bf16.mxu0 %v10156_v20  ;;  %15028 = vst [vmem:[#allocation20_spill] sm:$0xff] %v10218_v53  ;;  %v483_v58 = vld [vmem:[%s14787_s2 + $0x208] sm:$0xff]  ;;  %v514_v59 = vld [vmem:[%s14787_s2 + $0x300] sm:$0xff]  ;;  %v10236_v60 = vpack.c.bf16 %v531_v50, %v530_v49  ;;  %v501_v2 = vld [vmem:[%s14787_s2 + $0x298] sm:$0xff] }
  0x27   : > { %8681 = vmatpush3.bf16.msra.mxu1 %v10154_v19  ;;  %15029 = vst [vmem:[#allocation21_spill] sm:$0xff] %v10222_v54  ;;  %15030 = vst [vmem:[#allocation22_spill] sm:$0xff] %v10224_v55  ;;  %v515_v61 = vld [vmem:[%s14787_s2 + $0x308] sm:$0xff]  ;;  %v532_v4 = vld [vmem:[%s14787_s2 + $0x390] sm:$0xff]  ;;  %v10255_v10 = vpack.c.bf16 %v483_v58, %v482_v57  ;;  %v10262_v15 = vpack.c.bf16 %v501_v2, %v500_v1 }
  0x28   : > { %8683 = vmatprep.subr.bf16.mxu1 %v10166_v27  ;;  %15031 = vst [vmem:[#allocation23_spill] sm:$0xff] %v10236_v60  ;;  %v533_v6 = vld [vmem:[%s14787_s2 + $0x398] sm:$0xff]  ;;  %v750_v9 = vld [vmem:[%s10135_s29] sm:$0xff]  ;;  %v752_v11 = vld [vmem:[%s10135_s29 + $0x10] sm:$0xff]  ;;  %v10260_v13 = vpack.c.bf16 %v515_v61, %v514_v59 }
  0x29   : > { %8653 = vmatpush3.bf16.msra.mxu0 %v10182_v35  ;;  %15032 = vst [vmem:[#allocation24_spill] sm:$0xff] %v10255_v10  ;;  %15034 = vst [vmem:[#allocation26_spill] sm:$0xff] %v10262_v15  ;;  %v484_v18 = vld [vmem:[%s14787_s2 + $0x210] sm:$0xff]  ;;  %v485_v22 = vld [vmem:[%s14787_s2 + $0x218] sm:$0xff]  ;;  %v10274_v24 = vpack.c.bf16 %v533_v6, %v532_v4 }
  0x2a   : > { %8655 = vmatprep.subr.bf16.mxu0 %v10188_v37  ;;  %15033 = vst [vmem:[#allocation25_spill] sm:$0xff] %v10260_v13  ;;  %v516_v23 = vld [vmem:[%s14787_s2 + $0x310] sm:$0xff]  ;;  %v517_v28 = vld [vmem:[%s14787_s2 + $0x318] sm:$0xff]  ;;  %v502_v29 = vld [vmem:[%s14787_s2 + $0x2a0] sm:$0xff]  ;;  %v10293_v41 = vpack.c.bf16 %v485_v22, %v484_v18 }
  0x2b   : > { %8685 = vmatpush3.bf16.msra.mxu1 %v10186_v36  ;;  %15035 = vst [vmem:[#allocation27_spill] sm:$0xff] %v10274_v24  ;;  %v503_v30 = vld [vmem:[%s14787_s2 + $0x2a8] sm:$0xff]  ;;  %v534_v32 = vld [vmem:[%s14787_s2 + $0x3a0] sm:$0xff]  ;;  %v761_v45 = vld [vmem:[%s10135_s29 + $0x58] sm:$0xff]  ;;  %v10300_v47 = vpack.c.bf16 %v517_v28, %v516_v23 }
  0x2c   : > { %8687 = vmatprep.subr.bf16.mxu1 %v10200_v44  ;;  %v759_v31 = vld [vmem:[%s10135_s29 + $0x48] sm:$0xff]  ;;  %15036 = vst [vmem:[#allocation28_spill] sm:$0xff] %v10293_v41  ;;  %v758_v42 = vld [vmem:[%s10135_s29 + $0x40] sm:$0xff]  ;;  %v760_v46 = vld [vmem:[%s10135_s29 + $0x50] sm:$0xff]  ;;  %v10302_v49 = vpack.c.bf16 %v503_v30, %v502_v29 }
  0x2d   : > { %8657 = vmatpush3.bf16.msra.mxu0 %v10218_v53  ;;  %v535_v40 = vld [vmem:[%s14787_s2 + $0x3a8] sm:$0xff]  ;;  %15037 = vst [vmem:[#allocation29_spill] sm:$0xff] %v10300_v47  ;;  %v486_v50 = vld [vmem:[%s14787_s2 + $0x220] sm:$0xff]  ;;  %v504_v1 = vld [vmem:[%s14787_s2 + $0x2b0] sm:$0xff] }
  0x2e   : > { %8691 = vmatprep.subr.bf16.mxu0 %v10224_v55  ;;  %15038 = vst [vmem:[#allocation30_spill] sm:$0xff] %v10302_v49  ;;  %v487_v57 = vld [vmem:[%s14787_s2 + $0x228] sm:$0xff]  ;;  %v518_v58 = vld [vmem:[%s14787_s2 + $0x320] sm:$0xff]  ;;  %v10314_v59 = vpack.c.bf16 %v535_v40, %v534_v32  ;;  %v505_v2 = vld [vmem:[%s14787_s2 + $0x2b8] sm:$0xff] }
  0x2f   : > { %8689 = vmatpush3.bf16.msra.mxu1 %v10222_v54  ;;  %v519_v61 = vld [vmem:[%s14787_s2 + $0x328] sm:$0xff]  ;;  %v536_v6 = vld [vmem:[%s14787_s2 + $0x3b0] sm:$0xff]  ;;  %v766_v18 = vld [vmem:[%s10135_s29 + $0x80] sm:$0xff]  ;;  %v10342_v29 = vpack.c.bf16 %v505_v2, %v504_v1 }
  0x30   : > { %8723 = vmatprep.subr.bf16.mxu1 %v10236_v60  ;;  %877 = vmatmul.mubr.f32.vlgmr.msra.gmra.mrb[0].mxu0 %v750_v9  ;;  %15039 = vst [vmem:[#allocation31_spill] sm:$0xff] %v10314_v59  ;;  %v767_v4 = vld [vmem:[%s10135_s29 + $0x88] sm:$0xff]  ;;  %v537_v9 = vld [vmem:[%s14787_s2 + $0x3b8] sm:$0xff]  ;;  %v768_v23 = vld [vmem:[%s10135_s29 + $0x90] sm:$0xff]  ;;  %v10340_v28 = vpack.c.bf16 %v519_v61, %v518_v58 }
  0x31   : > { %8693 = vmatpush3.bf16.msra.mxu0 %v10255_v10  ;;  %881 = vmatprep.mubr.f32.mxu0 %v759_v31  ;;  %v769_v22 = vld [vmem:[%s10135_s29 + $0x98] sm:$0xff]  ;;  %15042 = vst [vmem:[#allocation34_spill] sm:$0xff] %v10342_v29  ;;  %v488_v30 = vld [vmem:[%s14787_s2 + $0x230] sm:$0xff]  ;;  %v10354_v40 = vpack.c.bf16 %v537_v9, %v536_v6  ;;  %v539_v58 = vld [vmem:[%s14787_s2 + $0x3c8] sm:$0xff] }
  0x32   : > { %977 = vmatmul.mubr.f32.vlgmr.msra.gmra.mrb[0].mxu1 %v752_v11  ;;  %8695 = vmatprep.subr.bf16.mxu0 %v10262_v15  ;;  %v10333_v11 = vpack.c.bf16 %v487_v57, %v486_v50  ;;  %15041 = vst [vmem:[#allocation33_spill] sm:$0xff] %v10340_v28  ;;  %v489_v31 = vld [vmem:[%s14787_s2 + $0x238] sm:$0xff]  ;;  %v520_v32 = vld [vmem:[%s14787_s2 + $0x330] sm:$0xff]  ;;  %v775_v50 = vld [vmem:[%s10135_s29 + $0xc8] sm:$0xff] }
  0x33   : > { %8725 = vmatpush3.bf16.msra.mxu1 %v10260_v13  ;;  %981 = vmatprep.mubr.f32.mxu1 %v761_v45  ;;  %15043 = vst [vmem:[#allocation35_spill] sm:$0xff] %v10354_v40  ;;  %v506_v45 = vld [vmem:[%s14787_s2 + $0x2c0] sm:$0xff]  ;;  %v10373_v61 = vpack.c.bf16 %v489_v31, %v488_v30  ;;  %v777_v2 = vld [vmem:[%s10135_s29 + $0xd8] sm:$0xff]  ;;  %v523_v31 = vld [vmem:[%s14787_s2 + $0x348] sm:$0xff] }
  0x34   : > { %8727 = vmatprep.subr.bf16.mxu1 %v10274_v24  ;;  %882 = vmatmul.mubr.f32.gmra.mrb[2].mxu0 %v758_v42  ;;  %15040 = vst [vmem:[#allocation32_spill] sm:$0xff] %v10333_v11  ;;  %v521_v42 = vld [vmem:[%s14787_s2 + $0x338] sm:$0xff]  ;;  %v538_v57 = vld [vmem:[%s14787_s2 + $0x3c0] sm:$0xff]  ;;  %v800_v13 = vld [vmem:[%s10135_s29 + $0x190] sm:$0x1] }
  0x35   : > { %8697 = vmatpush3.bf16.msra.mxu0 %v10293_v41  ;;  %886 = vmatprep.mubr.f32.mxu0 %v767_v4  ;;  %15044 = vst [vmem:[#allocation36_spill] sm:$0xff] %v10373_v61  ;;  %v774_v1 = vld [vmem:[%s10135_s29 + $0xc0] sm:$0xff]  ;;  %v776_v4 = vld [vmem:[%s10135_s29 + $0xd0] sm:$0xff]  ;;  %v10380_v6 = vpack.c.bf16 %v521_v42, %v520_v32  ;;  %v10394_v30 = vpack.c.bf16 %v539_v58, %v538_v57  ;;  %v509_v42 = vld [vmem:[%s14787_s2 + $0x2d8] sm:$0xff] }
  0x36   : > { %982 = vmatmul.mubr.f32.gmra.mrb[2].mxu1 %v760_v46  ;;  %8699 = vmatprep.subr.bf16.mxu0 %v10302_v49  ;;  %v507_v46 = vld [vmem:[%s14787_s2 + $0x2c8] sm:$0xff]  ;;  %v508_v32 = vld [vmem:[%s14787_s2 + $0x2d0] sm:$0xff]  ;;  %v782_v58 = vld [vmem:[%s10135_s29 + $0x100] sm:$0xff] }
  0x37   : > { %8729 = vmatpush3.bf16.msra.mxu1 %v10300_v47  ;;  %986 = vmatprep.mubr.f32.mxu1 %v769_v22  ;;  %15045 = vst [vmem:[#allocation37_spill] sm:$0xff] %v10380_v6  ;;  %v10382_v9 = vpack.c.bf16 %v507_v46, %v506_v45  ;;  %v491_v22 = vld [vmem:[%s14787_s2 + $0x248] sm:$0xff]  ;;  %15047 = vst [vmem:[#allocation39_spill] sm:$0xff] %v10394_v30  ;;  %v540_v46 = vld [vmem:[%s14787_s2 + $0x3d0] sm:$0xff] }
  0x38   : > { %8731 = vmatprep.subr.bf16.mxu1 %v10314_v59  ;;  %887 = vmatmul.mubr.f32.gmra.mrb[4].mxu0 %v766_v18  ;;  %v490_v18 = vld [vmem:[%s14787_s2 + $0x240] sm:$0xff]  ;;  %v783_v45 = vld [vmem:[%s10135_s29 + $0x108] sm:$0xff]  ;;  %v492_v59 = vld [vmem:[%s14787_s2 + $0x250] sm:$0xff] }
  0x39   : > { %8701 = vmatpush3.bf16.msra.mxu0 %v10333_v11  ;;  %15046 = vst [vmem:[#allocation38_spill] sm:$0xff] %v10382_v9  ;;  %891 = vmatprep.mubr.f32.mxu0 %v775_v50  ;;  %v541_v50 = vld [vmem:[%s14787_s2 + $0x3d8] sm:$0xff]  ;;  %v10413_v57 = vpack.c.bf16 %v491_v22, %v490_v18  ;;  %v524_v18 = vld [vmem:[%s14787_s2 + $0x350] sm:$0xff]  ;;  %v494_v24 = vld [vmem:[%s14787_s2 + $0x260] sm:$0xff] }
  0x3a   : > { %987 = vmatmul.mubr.f32.gmra.mrb[4].mxu1 %v768_v23  ;;  %8703 = vmatprep.subr.bf16.mxu0 %v10342_v29  ;;  %v522_v23 = vld [vmem:[%s14787_s2 + $0x340] sm:$0xff]  ;;  %v10434_v22 = vpack.c.bf16 %v541_v50, %v540_v46  ;;  %v543_v46 = vld [vmem:[%s14787_s2 + $0x3e8] sm:$0xff]  ;;  %v792_v47 = vld [vmem:[%s10135_s29 + $0x150] sm:$0xff] }
  0x3b   : > { %8733 = vmatpush3.bf16.msra.mxu1 %v10340_v28  ;;  %991 = vmatprep.mubr.f32.mxu1 %v777_v2  ;;  %15048 = vst [vmem:[#allocation40_spill] sm:$0xff] %v10413_v57  ;;  %v784_v28 = vld [vmem:[%s10135_s29 + $0x110] sm:$0xff]  ;;  %v10422_v2 = vpack.c.bf16 %v509_v42, %v508_v32  ;;  %v511_v32 = vld [vmem:[%s14787_s2 + $0x2e8] sm:$0xff]  ;;  %v719_v5 = vld [vmem:[%s14792_s7 + $0x58] sm:$0xff] }
  0x3c   : > { %8735 = vmatprep.subr.bf16.mxu1 %v10354_v40  ;;  %892 = vmatmul.mubr.f32.gmra.mrb[6].mxu0 %v774_v1  ;;  %v785_v40 = vld [vmem:[%s10135_s29 + $0x118] sm:$0xff]  ;;  %v10420_v1 = vpack.c.bf16 %v523_v31, %v522_v23  ;;  %15051 = vst [vmem:[#allocation43_spill] sm:$0xff] %v10434_v22  ;;  %v510_v31 = vld [vmem:[%s14787_s2 + $0x2e0] sm:$0xff]  ;;  %v791_v42 = vld [vmem:[%s10135_s29 + $0x148] sm:$0xff] }
  0x3d   : > { %8705 = vmatpush3.bf16.msra.mxu0 %v10373_v61  ;;  %15050 = vst [vmem:[#allocation42_spill] sm:$0xff] %v10422_v2  ;;  %896 = vmatprep.mubr.f32.mxu0 %v783_v45  ;;  %v525_v23 = vld [vmem:[%s14787_s2 + $0x358] sm:$0xff]  ;;  %v542_v45 = vld [vmem:[%s14787_s2 + $0x3e0] sm:$0xff]  ;;  %v717_v19 = vld [vmem:[%s14792_s7 + $0x48] sm:$0xff] }
  0x3e   : > { %992 = vmatmul.mubr.f32.gmra.mrb[6].mxu1 %v776_v4  ;;  %8707 = vmatprep.subr.bf16.mxu0 %v10382_v9  ;;  %15049 = vst [vmem:[#allocation41_spill] sm:$0xff] %v10420_v1  ;;  %v493_v4 = vld [vmem:[%s14787_s2 + $0x258] sm:$0xff]  ;;  %v729_v51 = vld [vmem:[%s14792_s7 + $0xa8] sm:$0xff]  ;;  %v744_v35 = vld [vmem:[%s14792_s7 + $0x120] sm:$0xff] }
  0x3f   : > { %8737 = vmatpush3.bf16.msra.mxu1 %v10380_v6  ;;  %996 = vmatprep.mubr.f32.mxu1 %v785_v40  ;;  %v10453_v50 = vpack.c.bf16 %v493_v4, %v492_v59  ;;  %v793_v6 = vld [vmem:[%s10135_s29 + $0x158] sm:$0xff]  ;;  %v10460_v40 = vpack.c.bf16 %v525_v23, %v524_v18  ;;  %v495_v59 = vld [vmem:[%s14787_s2 + $0x268] sm:$0xff]  ;;  %v10474_v4 = vpack.c.bf16 %v543_v46, %v542_v45  ;;  %v512_v23 = vld [vmem:[%s14787_s2 + $0x2f0] sm:$0xff] }
  0x40   : > { %8739 = vmatprep.subr.bf16.mxu1 %v10394_v30  ;;  %897 = vmatmul.mubr.f32.gmra.mrb[8].mxu0 %v782_v58  ;;  %v790_v30 = vld [vmem:[%s10135_s29 + $0x140] sm:$0xff]  ;;  %v10462_v58 = vpack.c.bf16 %v511_v32, %v510_v31  ;;  %v527_v18 = vld [vmem:[%s14787_s2 + $0x368] sm:$0xff]  ;;  %v513_v31 = vld [vmem:[%s14787_s2 + $0x2f8] sm:$0xff]  ;;  %v10493_v46 = vpack.c.bf16 %v495_v59, %v494_v24 }
  0x41   : > { %8709 = vmatpush3.bf16.msra.mxu0 %v10413_v57  ;;  %15052 = vst [vmem:[#allocation44_spill] sm:$0xff] %v10453_v50  ;;  %15053 = vst [vmem:[#allocation45_spill] sm:$0xff] %v10460_v40  ;;  %901 = vmatprep.mubr.f32.mxu0 %v791_v42  ;;  %v799_v32 = vld [vmem:[%s10135_s29 + $0x188] sm:$0x1]  ;;  %v544_v42 = vld [vmem:[%s14787_s2 + $0x3f0] sm:$0xff] }
  0x42   : > { %997 = vmatmul.mubr.f32.gmra.mrb[8].mxu1 %v784_v28  ;;  %8711 = vmatprep.subr.bf16.mxu0 %v10422_v2  ;;  %15054 = vst [vmem:[#allocation46_spill] sm:$0xff] %v10462_v58  ;;  %v526_v28 = vld [vmem:[%s14787_s2 + $0x360] sm:$0xff]  ;;  %15055 = vst [vmem:[#allocation47_spill] sm:$0xff] %v10474_v4  ;;  %v545_v45 = vld [vmem:[%s14787_s2 + $0x3f8] sm:$0xff] }
  0x43   : > { %8741 = vmatpush3.bf16.msra.mxu1 %v10420_v1  ;;  %1001 = vmatprep.mubr.f32.mxu1 %v793_v6  ;;  %15056 = vst [vmem:[#allocation48_spill] sm:$0xff] %v10493_v46  ;;  %v801_v1 = vld [vmem:[%s10135_s29 + $0x198] sm:$0x1]  ;;  %v10500_v6 = vpack.c.bf16 %v527_v18, %v526_v28  ;;  %v10514_v59 = vpack.c.bf16 %v545_v45, %v544_v42  ;;  %v548_v18 = vld [vmem:[%s14790_s5 + $0x8] sm:$0xff]  ;;  %v746_v20 = vld [vmem:[%s14792_s7 + $0x130] sm:$0xff] }
  0x44   : > { %8743 = vmatprep.subr.bf16.mxu1 %v10434_v22  ;;  %902 = vmatmul.mubr.f32.gmra.mrb[10].mxu0 %v790_v30  ;;  %v798_v22 = vld [vmem:[%s10135_s29 + $0x180] sm:$0x1]  ;;  %v10502_v30 = vpack.c.bf16 %v513_v31, %v512_v23  ;;  %v497_v24 = vld [vmem:[%s14787_s2 + $0x278] sm:$0xff]  ;;  %v755_v31 = vld [vmem:[%s10135_s29 + $0x28] sm:$0xff]  ;;  %v11678_v14 = vpack.c.bf16 %v746_v20, %v744_v35 }
  0x45   : > { %8713 = vmatpush3.bf16.msra.mxu0 %v10453_v50  ;;  %15057 = vst [vmem:[#allocation49_spill] sm:$0xff] %v10500_v6  ;;  %v496_v50 = vld [vmem:[%s14787_s2 + $0x270] sm:$0xff]  ;;  %906 = vmatprep.mubr.f32.mxu0 %v799_v32  ;;  %15059 = vst [vmem:[#allocation51_spill] sm:$0xff] %v10514_v59  ;;  %v529_v28 = vld [vmem:[%s14787_s2 + $0x378] sm:$0xff] }
  0x46   : > { %1002 = vmatmul.mubr.f32.gmra.mrb[10].mxu1 %v792_v47  ;;  %8715 = vmatprep.subr.bf16.mxu0 %v10462_v58  ;;  %15058 = vst [vmem:[#allocation50_spill] sm:$0xff] %v10502_v30  ;;  %v528_v47 = vld [vmem:[%s14787_s2 + $0x370] sm:$0xff]  ;;  %v550_v23 = vld [vmem:[%s14790_s5 + $0x18] sm:$0xff]  ;;  %v10527_v32 = vpack.c.bf16 %v497_v24, %v496_v50  ;;  %v754_v24 = vld [vmem:[%s10135_s29 + $0x20] sm:$0xff] }
  0x47   : > { %8745 = vmatpush3.bf16.msra.mxu1 %v10460_v40  ;;  %1006 = vmatprep.mubr.f32.mxu1 %v801_v1  ;;  %v757_v42 = vld [vmem:[%s10135_s29 + $0x38] sm:$0xff]  ;;  %v10532_v45 = vpack.c.bf16 %v529_v28, %v528_v47  ;;  %v549_v1 = vld [vmem:[%s14790_s5 + $0x10] sm:$0xff]  ;;  %v763_v28 = vld [vmem:[%s10135_s29 + $0x68] sm:$0xff]  ;;  %15165 = vst [vmem:[#allocation155_spill] sm:$0xff] %v11678_v14 }
  0x48   : > { %8747 = vmatprep.subr.bf16.mxu1 %v10474_v4  ;;  %907 = vmatmul.mubr.f32.gmra.mrb[12].mxu0 %v798_v22  ;;  %15060 = vst [vmem:[#allocation52_spill] sm:$0xff] %v10527_v32  ;;  %v10534_v4 = vpack.c.bf16 %v550_v23, %v548_v18  ;;  %v552_v22 = vld [vmem:[%s14790_s5 + $0x28] sm:$0xff]  ;;  %v554_v50 = vld [vmem:[%s14790_s5 + $0x38] sm:$0xff]  ;;  %v756_v47 = vld [vmem:[%s10135_s29 + $0x30] sm:$0xff] }
  0x49   : > { %8717 = vmatpush3.bf16.msra.mxu0 %v10493_v46  ;;  %15061 = vst [vmem:[#allocation53_spill] sm:$0xff] %v10532_v45  ;;  %1076 = vmatprep.mubr.f32.mxu0 %v755_v31  ;;  %v765_v23 = vld [vmem:[%s10135_s29 + $0x78] sm:$0xff]  ;;  %v10558_v31 = vpack.c.bf16 %v554_v50, %v552_v22  ;;  %v764_v22 = vld [vmem:[%s10135_s29 + $0x70] sm:$0xff]  ;;  %v771_v50 = vld [vmem:[%s10135_s29 + $0xa8] sm:$0xff] }
  0x4a   : > { %1007 = vmatmul.mubr.f32.gmra.mrb[12].mxu1 %v800_v13  ;;  %8719 = vmatprep.subr.bf16.mxu0 %v10502_v30  ;;  %15062 = vst [vmem:[#allocation54_spill] sm:$0xff] %v10534_v4  ;;  %v547_v13 = vld [vmem:[%s14790_s5] sm:$0xff]  ;;  %v641_v46 = vld [vmem:[%s14790_s5 + $0x2f0] sm:$0xff]  ;;  %v1215_v58 = vld [vmem:[%s10680_s23 + $0x18] sm:$0xff] }
  0x4b   : > { %8749 = vmatpush3.bf16.msra.mxu1 %v10500_v6  ;;  %1176 = vmatprep.mubr.f32.mxu1 %v757_v42  ;;  %v10555_v18 = vpack.c.bf16 %v549_v1, %v547_v13  ;;  %15064 = vst [vmem:[#allocation56_spill] sm:$0xff] %v10558_v31  ;;  %v551_v42 = vld [vmem:[%s14790_s5 + $0x20] sm:$0xff]  ;;  %v558_v13 = vld [vmem:[%s14790_s5 + $0x58] sm:$0xff] }
  0x4c   : > { %8751 = vmatprep.subr.bf16.mxu1 %v10514_v59  ;;  %v556_v59 = vld [vmem:[%s14790_s5 + $0x48] sm:$0xff]  ;;  %v762_v1 = vld [vmem:[%s10135_s29 + $0x60] sm:$0xff]  ;;  %v773_v6 = vld [vmem:[%s10135_s29 + $0xb8] sm:$0xff] }
  0x4d   : > { %8721 = vmatpush3.bf16.msra.mxu0 %v10527_v32  ;;  %15063 = vst [vmem:[#allocation55_spill] sm:$0xff] %v10555_v18  ;;  %v10580_v40 = vpack.c.bf16 %v558_v13, %v556_v59  ;;  %v770_v59 = vld [vmem:[%s10135_s29 + $0xa0] sm:$0xff]  ;;  %v779_v13 = vld [vmem:[%s10135_s29 + $0xe8] sm:$0xff]  ;;  %v731_v43 = vld [vmem:[%s14792_s7 + $0xb8] sm:$0xff] }
  0x4e   : > { %8755 = vmatprep.subr.bf16.mxu0 %v10534_v4  ;;  %v623_v4 = vld [vmem:[%s14790_s5 + $0x260] sm:$0xff]  ;;  %v11564_v34 = vpack.c.bf16 %v731_v43, %v729_v51  ;;  %v735_v43 = vld [vmem:[%s14792_s7 + $0xd8] sm:$0xff] }
  0x4f   : > { %8753 = vmatpush3.bf16.msra.mxu1 %v10532_v45  ;;  %v553_v45 = vld [vmem:[%s14790_s5 + $0x30] sm:$0xff]  ;;  %15066 = vst [vmem:[#allocation58_spill] sm:$0xff] %v10580_v40  ;;  %v631_v32 = vld [vmem:[%s14790_s5 + $0x2a0] sm:$0xff] }
  0x50   : > { %1077 = vmatmul.mubr.f32.vlgmr.msra.gmra.mrb[14].mxu0 %v754_v24  ;;  %v10576_v24 = vpack.c.bf16 %v553_v45, %v551_v42  ;;  %v560_v45 = vld [vmem:[%s14790_s5 + $0x68] sm:$0xff]  ;;  %v772_v42 = vld [vmem:[%s10135_s29 + $0xb0] sm:$0xff]  ;;  %15154 = vst [vmem:[#allocation144_spill] sm:$0xff] %v11564_v34  ;;  %v707_v51 = vld [vmem:[%s14791_s6] sm:$0x3] }
  0x51   : > { %1081 = vmatprep.mubr.f32.mxu0 %v763_v28  ;;  %8757 = vmatpush1.bf16.msra.mxu0 %v10555_v18  ;;  %v557_v28 = vld [vmem:[%s14790_s5 + $0x50] sm:$0xff] }
  0x52   : > { %1177 = vmatmul.mubr.f32.vlgmr.msra.gmra.mrb[14].mxu1 %v756_v47  ;;  %15065 = vst [vmem:[#allocation57_spill] sm:$0xff] %v10576_v24  ;;  %8759 = vmatprep.subr.bf16.mxu0 %v10558_v31  ;;  %v555_v47 = vld [vmem:[%s14790_s5 + $0x40] sm:$0xff]  ;;  %v781_v31 = vld [vmem:[%s10135_s29 + $0xf8] sm:$0xff] }
  0x53   : > { %1181 = vmatprep.mubr.f32.mxu1 %v765_v23  ;;  %v562_v23 = vld [vmem:[%s14790_s5 + $0x78] sm:$0xff] }
  0x54   : > { %1082 = vmatmul.mubr.f32.gmra.mrb[16].mxu0 %v762_v1  ;;  %v10598_v1 = vpack.c.bf16 %v557_v28, %v555_v47  ;;  %v10602_v18 = vpack.c.bf16 %v562_v23, %v560_v45  ;;  %v566_v47 = vld [vmem:[%s14790_s5 + $0x98] sm:$0xff]  ;;  %v778_v28 = vld [vmem:[%s10135_s29 + $0xe0] sm:$0xff]  ;;  %v780_v45 = vld [vmem:[%s10135_s29 + $0xf0] sm:$0xff] }
  0x55   : > { %1086 = vmatprep.mubr.f32.mxu0 %v771_v50  ;;  %8761 = vmatpush1.bf16.msra.mxu0 %v10576_v24  ;;  %v564_v50 = vld [vmem:[%s14790_s5 + $0x88] sm:$0xff] }
  0x56   : > { %1182 = vmatmul.mubr.f32.gmra.mrb[16].mxu1 %v764_v22  ;;  %15067 = vst [vmem:[#allocation59_spill] sm:$0xff] %v10598_v1  ;;  %8763 = vmatprep.subr.bf16.mxu0 %v10580_v40  ;;  %15068 = vst [vmem:[#allocation60_spill] sm:$0xff] %v10602_v18  ;;  %v559_v22 = vld [vmem:[%s14790_s5 + $0x60] sm:$0xff]  ;;  %v787_v23 = vld [vmem:[%s10135_s29 + $0x128] sm:$0xff]  ;;  %v10624_v24 = vpack.c.bf16 %v566_v47, %v564_v50 }
  0x57   : > { %1186 = vmatprep.mubr.f32.mxu1 %v773_v6  ;;  %v561_v6 = vld [vmem:[%s14790_s5 + $0x70] sm:$0xff]  ;;  %v789_v40 = vld [vmem:[%s10135_s29 + $0x138] sm:$0xff]  ;;  %v795_v47 = vld [vmem:[%s10135_s29 + $0x168] sm:$0xff] }
  0x58   : > { %1087 = vmatmul.mubr.f32.gmra.mrb[18].mxu0 %v770_v59  ;;  %v10620_v59 = vpack.c.bf16 %v561_v6, %v559_v22  ;;  %15070 = vst [vmem:[#allocation62_spill] sm:$0xff] %v10624_v24  ;;  %v570_v22 = vld [vmem:[%s14790_s5 + $0xb8] sm:$0xff]  ;;  %v786_v6 = vld [vmem:[%s10135_s29 + $0x120] sm:$0xff]  ;;  %v788_v50 = vld [vmem:[%s10135_s29 + $0x130] sm:$0xff] }
  0x59   : > { %1091 = vmatprep.mubr.f32.mxu0 %v779_v13  ;;  %8765 = vmatpush1.bf16.msra.mxu0 %v10598_v1  ;;  %v568_v13 = vld [vmem:[%s14790_s5 + $0xa8] sm:$0xff] }
  0x5a   : > { %1187 = vmatmul.mubr.f32.gmra.mrb[18].mxu1 %v772_v42  ;;  %15069 = vst [vmem:[#allocation61_spill] sm:$0xff] %v10620_v59  ;;  %8767 = vmatprep.subr.bf16.mxu0 %v10602_v18  ;;  %v563_v42 = vld [vmem:[%s14790_s5 + $0x80] sm:$0xff]  ;;  %v797_v18 = vld [vmem:[%s10135_s29 + $0x178] sm:$0xff]  ;;  %v10646_v1 = vpack.c.bf16 %v570_v22, %v568_v13  ;;  %v796_v13 = vld [vmem:[%s10135_s29 + $0x170] sm:$0xff] }
  0x5b   : > { %1191 = vmatprep.mubr.f32.mxu1 %v781_v31  ;;  %v565_v31 = vld [vmem:[%s14790_s5 + $0x90] sm:$0xff]  ;;  %v803_v22 = vld [vmem:[%s10135_s29 + $0x1a8] sm:$0x1] }
  0x5c   : > { %1092 = vmatmul.mubr.f32.gmra.mrb[20].mxu0 %v778_v28  ;;  %v10642_v28 = vpack.c.bf16 %v565_v31, %v563_v42  ;;  %15072 = vst [vmem:[#allocation64_spill] sm:$0xff] %v10646_v1  ;;  %v574_v42 = vld [vmem:[%s14790_s5 + $0xd8] sm:$0xff]  ;;  %v794_v31 = vld [vmem:[%s10135_s29 + $0x160] sm:$0xff] }
  0x5d   : > { %1096 = vmatprep.mubr.f32.mxu0 %v787_v23  ;;  %8769 = vmatpush1.bf16.msra.mxu0 %v10620_v59  ;;  %v572_v23 = vld [vmem:[%s14790_s5 + $0xc8] sm:$0xff] }
  0x5e   : > { %1192 = vmatmul.mubr.f32.gmra.mrb[20].mxu1 %v780_v45  ;;  %15071 = vst [vmem:[#allocation63_spill] sm:$0xff] %v10642_v28  ;;  %8771 = vmatprep.subr.bf16.mxu0 %v10624_v24  ;;  %v567_v45 = vld [vmem:[%s14790_s5 + $0xa0] sm:$0xff]  ;;  %v10669_v59 = vpack.c.bf16 %v574_v42, %v572_v23  ;;  %v804_v23 = vld [vmem:[%s10135_s29 + $0x1b0] sm:$0x1] }
  0x5f   : > { %1196 = vmatprep.mubr.f32.mxu1 %v789_v40  ;;  %v569_v40 = vld [vmem:[%s14790_s5 + $0xb0] sm:$0xff] }
  0x60   : > { %1097 = vmatmul.mubr.f32.gmra.mrb[22].mxu0 %v786_v6  ;;  %v10665_v24 = vpack.c.bf16 %v569_v40, %v567_v45  ;;  %v805_v6 = vld [vmem:[%s10135_s29 + $0x1b8] sm:$0x1]  ;;  %15074 = vst [vmem:[#allocation66_spill] sm:$0xff] %v10669_v59  ;;  %v802_v40 = vld [vmem:[%s10135_s29 + $0x1a0] sm:$0x1] }
  0x61   : > { %1101 = vmatprep.mubr.f32.mxu0 %v795_v47  ;;  %8773 = vmatpush1.bf16.msra.mxu0 %v10642_v28  ;;  %v573_v47 = vld [vmem:[%s14790_s5 + $0xd0] sm:$0xff]  ;;  %v578_v45 = vld [vmem:[%s14790_s5 + $0xf8] sm:$0xff]  ;;  %v575_v28 = vld [vmem:[%s14790_s5 + $0xe0] sm:$0xff] }
  0x62   : > { %1197 = vmatmul.mubr.f32.gmra.mrb[22].mxu1 %v788_v50  ;;  %15073 = vst [vmem:[#allocation65_spill] sm:$0xff] %v10665_v24  ;;  %8775 = vmatprep.subr.bf16.mxu0 %v10646_v1  ;;  %v571_v50 = vld [vmem:[%s14790_s5 + $0xc0] sm:$0xff]  ;;  %v1213_v1 = vld [vmem:[%s10680_s23 + $0x8] sm:$0xff] }
  0x63   : > { %1201 = vmatprep.mubr.f32.mxu1 %v797_v18  ;;  %v576_v18 = vld [vmem:[%s14790_s5 + $0xe8] sm:$0xff]  ;;  %v10691_v42 = vpack.c.bf16 %v573_v47, %v571_v50 }
  0x64   : > { %1102 = vmatmul.mubr.f32.gmra.mrb[24].mxu0 %v794_v31  ;;  %v10695_v31 = vpack.c.bf16 %v578_v45, %v576_v18  ;;  %v579_v18 = vld [vmem:[%s14790_s5 + $0x100] sm:$0xff]  ;;  %v581_v45 = vld [vmem:[%s14790_s5 + $0x110] sm:$0xff] }
  0x65   : > { %1106 = vmatprep.mubr.f32.mxu0 %v803_v22  ;;  %8777 = vmatpush1.bf16.msra.mxu0 %v10665_v24  ;;  %15075 = vst [vmem:[#allocation67_spill] sm:$0xff] %v10691_v42  ;;  %v580_v22 = vld [vmem:[%s14790_s5 + $0x108] sm:$0xff]  ;;  %v619_v24 = vld [vmem:[%s14790_s5 + $0x240] sm:$0xff] }
  0x66   : > { %1202 = vmatmul.mubr.f32.gmra.mrb[24].mxu1 %v796_v13  ;;  %8779 = vmatprep.subr.bf16.mxu0 %v10669_v59  ;;  %15076 = vst [vmem:[#allocation68_spill] sm:$0xff] %v10695_v31  ;;  %v577_v13 = vld [vmem:[%s14790_s5 + $0xf0] sm:$0xff] }
  0x67   : > { %1206 = vmatprep.mubr.f32.mxu1 %v805_v6  ;;  %v582_v6 = vld [vmem:[%s14790_s5 + $0x118] sm:$0xff]  ;;  %v10710_v50 = vpack.c.bf16 %v577_v13, %v575_v28  ;;  %v583_v13 = vld [vmem:[%s14790_s5 + $0x120] sm:$0xff] }
  0x68   : > { %1107 = vmatmul.mubr.f32.gmra.mrb[26].mxu0 %v802_v40  ;;  %v10713_v47 = vpack.c.bf16 %v582_v6, %v580_v22  ;;  %v586_v28 = vld [vmem:[%s14790_s5 + $0x138] sm:$0xff]  ;;  %v10728_v40 = vpack.c.bf16 %v581_v45, %v579_v18  ;;  %v585_v22 = vld [vmem:[%s14790_s5 + $0x130] sm:$0xff]  ;;  %v588_v6 = vld [vmem:[%s14790_s5 + $0x148] sm:$0xff] }
  0x69   : > { %1322 = vmatprep.mubr.f32.mxu0 %v1213_v1  ;;  %8781 = vmatpush1.bf16.msra.mxu0 %v10691_v42  ;;  %15077 = vst [vmem:[#allocation69_spill] sm:$0xff] %v10710_v50  ;;  %v584_v1 = vld [vmem:[%s14790_s5 + $0x128] sm:$0xff]  ;;  %v590_v18 = vld [vmem:[%s14790_s5 + $0x158] sm:$0xff]  ;;  %v10746_v45 = vpack.c.bf16 %v585_v22, %v583_v13 }
  0x6a   : > { %1207 = vmatmul.mubr.f32.gmra.mrb[26].mxu1 %v804_v23  ;;  %8783 = vmatprep.subr.bf16.mxu0 %v10695_v31  ;;  %15078 = vst [vmem:[#allocation70_spill] sm:$0xff] %v10713_v47  ;;  %15079 = vst [vmem:[#allocation71_spill] sm:$0xff] %v10728_v40  ;;  %v10731_v23 = vpack.c.bf16 %v586_v28, %v584_v1  ;;  %v10749_v1 = vpack.c.bf16 %v590_v18, %v588_v6  ;;  %v587_v28 = vld [vmem:[%s14790_s5 + $0x140] sm:$0xff]  ;;  %v594_v13 = vld [vmem:[%s14790_s5 + $0x178] sm:$0xff] }
  0x6b   : > { %15081 = vst [vmem:[#allocation73_spill] sm:$0xff] %v10746_v45  ;;  %v591_v18 = vld [vmem:[%s14790_s5 + $0x160] sm:$0xff]  ;;  %v620_v42 = vld [vmem:[%s14790_s5 + $0x248] sm:$0xff] }
  0x6c   : > { %15080 = vst [vmem:[#allocation72_spill] sm:$0xff] %v10731_v23  ;;  %15082 = vst [vmem:[#allocation74_spill] sm:$0xff] %v10749_v1 }
  0x6d   : > { %8785 = vmatpush1.bf16.msra.mxu0 %v10710_v50  ;;  %v592_v50 = vld [vmem:[%s14790_s5 + $0x168] sm:$0xff] }
  0x6e   : > { %8787 = vmatprep.subr.bf16.mxu0 %v10713_v47  ;;  %v589_v47 = vld [vmem:[%s14790_s5 + $0x150] sm:$0xff]  ;;  %v10767_v6 = vpack.c.bf16 %v594_v13, %v592_v50  ;;  %v595_v13 = vld [vmem:[%s14790_s5 + $0x180] sm:$0xff] }
  0x6f   : > { %v10764_v22 = vpack.c.bf16 %v589_v47, %v587_v28  ;;  %v598_v47 = vld [vmem:[%s14790_s5 + $0x198] sm:$0xff] }
  0x70   : > { %15084 = vst [vmem:[#allocation76_spill] sm:$0xff] %v10767_v6 }
  0x71   : > { %8789 = vmatpush1.bf16.msra.mxu0 %v10728_v40  ;;  %15083 = vst [vmem:[#allocation75_spill] sm:$0xff] %v10764_v22  ;;  %v596_v40 = vld [vmem:[%s14790_s5 + $0x188] sm:$0xff] }
  0x72   : > { %8791 = vmatprep.subr.bf16.mxu0 %v10731_v23  ;;  %v593_v23 = vld [vmem:[%s14790_s5 + $0x170] sm:$0xff]  ;;  %v10785_v28 = vpack.c.bf16 %v598_v47, %v596_v40  ;;  %v599_v47 = vld [vmem:[%s14790_s5 + $0x1a0] sm:$0xff] }
  0x73   : > { %v10782_v50 = vpack.c.bf16 %v593_v23, %v591_v18  ;;  %v602_v23 = vld [vmem:[%s14790_s5 + $0x1b8] sm:$0xff] }
  0x74   : > { %15086 = vst [vmem:[#allocation78_spill] sm:$0xff] %v10785_v28 }
  0x75   : > { %8793 = vmatpush1.bf16.msra.mxu0 %v10746_v45  ;;  %15085 = vst [vmem:[#allocation77_spill] sm:$0xff] %v10782_v50  ;;  %v600_v45 = vld [vmem:[%s14790_s5 + $0x1a8] sm:$0xff] }
  0x76   : > { %8795 = vmatprep.subr.bf16.mxu0 %v10749_v1  ;;  %v597_v1 = vld [vmem:[%s14790_s5 + $0x190] sm:$0xff]  ;;  %v10803_v18 = vpack.c.bf16 %v602_v23, %v600_v45  ;;  %v603_v23 = vld [vmem:[%s14790_s5 + $0x1c0] sm:$0xff] }
  0x77   : > { %v10800_v40 = vpack.c.bf16 %v597_v1, %v595_v13  ;;  %v606_v1 = vld [vmem:[%s14790_s5 + $0x1d8] sm:$0xff] }
  0x78   : > { %15088 = vst [vmem:[#allocation80_spill] sm:$0xff] %v10803_v18 }
  0x79   : > { %8797 = vmatpush1.bf16.msra.mxu0 %v10764_v22  ;;  %15087 = vst [vmem:[#allocation79_spill] sm:$0xff] %v10800_v40  ;;  %v604_v22 = vld [vmem:[%s14790_s5 + $0x1c8] sm:$0xff] }
  0x7a   : > { %8799 = vmatprep.subr.bf16.mxu0 %v10767_v6  ;;  %v601_v6 = vld [vmem:[%s14790_s5 + $0x1b0] sm:$0xff]  ;;  %v10821_v13 = vpack.c.bf16 %v606_v1, %v604_v22  ;;  %v607_v1 = vld [vmem:[%s14790_s5 + $0x1e0] sm:$0xff] }
  0x7b   : > { %v10818_v45 = vpack.c.bf16 %v601_v6, %v599_v47  ;;  %v610_v6 = vld [vmem:[%s14790_s5 + $0x1f8] sm:$0xff] }
  0x7c   : > { %15090 = vst [vmem:[#allocation82_spill] sm:$0xff] %v10821_v13 }
  0x7d   : > { %8801 = vmatpush1.bf16.msra.mxu0 %v10782_v50  ;;  %15089 = vst [vmem:[#allocation81_spill] sm:$0xff] %v10818_v45  ;;  %v608_v50 = vld [vmem:[%s14790_s5 + $0x1e8] sm:$0xff] }
  0x7e   : > { %8803 = vmatprep.subr.bf16.mxu0 %v10785_v28  ;;  %v605_v28 = vld [vmem:[%s14790_s5 + $0x1d0] sm:$0xff]  ;;  %v10839_v47 = vpack.c.bf16 %v610_v6, %v608_v50  ;;  %v611_v6 = vld [vmem:[%s14790_s5 + $0x200] sm:$0xff] }
  0x7f   : > { %v10836_v22 = vpack.c.bf16 %v605_v28, %v603_v23  ;;  %v614_v28 = vld [vmem:[%s14790_s5 + $0x218] sm:$0xff] }
  0x80   : > { %15092 = vst [vmem:[#allocation84_spill] sm:$0xff] %v10839_v47 }
  0x81   : > { %8805 = vmatpush1.bf16.msra.mxu0 %v10800_v40  ;;  %15091 = vst [vmem:[#allocation83_spill] sm:$0xff] %v10836_v22  ;;  %v612_v40 = vld [vmem:[%s14790_s5 + $0x208] sm:$0xff] }
  0x82   : > { %8807 = vmatprep.subr.bf16.mxu0 %v10803_v18  ;;  %v609_v18 = vld [vmem:[%s14790_s5 + $0x1f0] sm:$0xff]  ;;  %v10857_v23 = vpack.c.bf16 %v614_v28, %v612_v40  ;;  %v1212_v40 = vld [vmem:[%s10680_s23] sm:$0xff] }
  0x83   : > { %v10854_v50 = vpack.c.bf16 %v609_v18, %v607_v1  ;;  %v618_v18 = vld [vmem:[%s14790_s5 + $0x238] sm:$0xff]  ;;  %v615_v28 = vld [vmem:[%s14790_s5 + $0x220] sm:$0xff] }
  0x84   : > { %15094 = vst [vmem:[#allocation86_spill] sm:$0xff] %v10857_v23 }
  0x85   : > { %8809 = vmatpush1.bf16.msra.mxu0 %v10818_v45  ;;  %15093 = vst [vmem:[#allocation85_spill] sm:$0xff] %v10854_v50  ;;  %v616_v45 = vld [vmem:[%s14790_s5 + $0x228] sm:$0xff] }
  0x86   : > { %8811 = vmatprep.subr.bf16.mxu0 %v10821_v13  ;;  %v613_v13 = vld [vmem:[%s14790_s5 + $0x210] sm:$0xff]  ;;  %v10883_v31 = vpack.c.bf16 %v618_v18, %v616_v45 }
  0x87   : > { %v10873_v1 = vpack.c.bf16 %v613_v13, %v611_v6  ;;  %v708_v13 = vld [vmem:[%s14792_s7] sm:$0xff]  ;;  %v710_v6 = vld [vmem:[%s14792_s7 + $0x10] sm:$0xff] }
  0x88   : > { %15096 = vst [vmem:[#allocation88_spill] sm:$0xff] %v10883_v31  ;;  %v10898_v45 = vpack.c.bf16 %v710_v6, %v708_v13  ;;  %v621_v13 = vld [vmem:[%s14790_s5 + $0x250] sm:$0xff] }
  0x89   : > { %8813 = vmatpush1.bf16.msra.mxu0 %v10836_v22  ;;  %15095 = vst [vmem:[#allocation87_spill] sm:$0xff] %v10873_v1  ;;  %v14841_v22 = vmov 0.0|0.0   ;;  %v10929_v6 = vpack.c.bf16 %v621_v13, %v619_v24  ;;  %v1228_v24 = vld [vmem:[%s10680_s23 + $0x80] sm:$0xff]  ;;  %v628_v13 = vld [vmem:[%s14790_s5 + $0x288] sm:$0xff] }
  0x8a   : > { %8815 = vmatprep.subr.bf16.mxu0 %v10839_v47  ;;  %v617_v47 = vld [vmem:[%s14790_s5 + $0x230] sm:$0xff]  ;;  %8914 = vmatprep.subr.bf16.mxu1 %v14841_v22  ;;  %v622_v22 = vld [vmem:[%s14790_s5 + $0x258] sm:$0xff]  ;;  %15097 = vst [vmem:[#allocation89_spill] sm:$0xff] %v10898_v45 }
  0x8b   : > { %v10901_v18 = vpack.c.bf16 %v617_v47, %v615_v28  ;;  %v10905_v59 = vpack.c.bf16 %v622_v22, %v620_v42  ;;  %8916 = vmatpush3.bf16.msra.mxu1 %v10898_v45  ;;  %v624_v47 = vld [vmem:[%s14790_s5 + $0x268] sm:$0xff]  ;;  %v626_v42 = vld [vmem:[%s14790_s5 + $0x278] sm:$0xff]  ;;  %v15100_v22 = vmov 0.0|0.0   ;;  %v714_v28 = vld [vmem:[%s14792_s7 + $0x30] sm:$0xff]  ;;  %15101 = vst [vmem:[#allocation92_spill] sm:$0xff] %v10929_v6 }
  0x8c   : > { %8917 = vmatprep.subr.bf16.mxu1 %v15100_v22 }
  0x8d   : > { %8817 = vmatpush1.bf16.msra.mxu0 %v10854_v50  ;;  %v1218_v50 = vld [vmem:[%s10680_s23 + $0x30] sm:$0xff]  ;;  %15098 = vst [vmem:[#allocation90_spill] sm:$0xff] %v10901_v18  ;;  %15099 = vst [vmem:[#allocation91_spill] sm:$0xff] %v10905_v59 }
  0x8e   : > { %8819 = vmatprep.subr.bf16.mxu0 %v10857_v23  ;;  %v1217_v23 = vld [vmem:[%s10680_s23 + $0x28] sm:$0xff] }
  0x90   : > { %1323 = vmatmul.mubr.f32.vlgmr.msra.gmra.mrb[28].mxu0 %v1212_v40  ;;  %v1223_v40 = vld [vmem:[%s10680_s23 + $0x58] sm:$0xff] }
  0x91   : > { %8821 = vmatpush1.bf16.msra.mxu0 %v10873_v1  ;;  %1328 = vmatprep.mubr.f32.mxu0 %v1218_v50  ;;  %v712_v50 = vld [vmem:[%s14792_s7 + $0x20] sm:$0xff] }
  0x92   : > { %8823 = vmatprep.subr.bf16.mxu0 %v10883_v31  ;;  %v1222_v31 = vld [vmem:[%s10680_s23 + $0x50] sm:$0xff]  ;;  %v10932_v1 = vpack.c.bf16 %v714_v28, %v712_v50  ;;  %v627_v28 = vld [vmem:[%s14790_s5 + $0x280] sm:$0xff] }
  0x94   : > { %1329 = vmatmul.mubr.f32.gmra.mrb[30].mxu0 %v1217_v23  ;;  %15102 = vst [vmem:[#allocation93_spill] sm:$0xff] %v10932_v1  ;;  %v10935_v23 = vpack.c.bf16 %v626_v42, %v624_v47  ;;  %8919 = vmatpush3.bf16.msra.mxu1 %v10932_v1  ;;  %v1227_v42 = vld [vmem:[%s10680_s23 + $0x78] sm:$0xff] }
  0x95   : > { %8825 = vmatpush1.bf16.msra.mxu0 %v10901_v18  ;;  %1334 = vmatprep.mubr.f32.mxu0 %v1223_v40  ;;  %v625_v18 = vld [vmem:[%s14790_s5 + $0x270] sm:$0xff]  ;;  %v630_v40 = vld [vmem:[%s14790_s5 + $0x298] sm:$0xff] }
  0x96   : > { %8827 = vmatprep.subr.bf16.mxu0 %v10905_v59  ;;  %15103 = vst [vmem:[#allocation94_spill] sm:$0xff] %v10935_v23  ;;  %8920 = vmatprep.subr.bf16.mxu1 %v15100_v22  ;;  %v10953_v47 = vpack.c.bf16 %v625_v18, %v623_v4  ;;  %v10957_v50 = vpack.c.bf16 %v630_v40, %v628_v13  ;;  %v1233_v59 = vld [vmem:[%s10680_s23 + $0xa8] sm:$0xff]  ;;  %v634_v18 = vld [vmem:[%s14790_s5 + $0x2b8] sm:$0xff]  ;;  %v718_v13 = vld [vmem:[%s14792_s7 + $0x50] sm:$0xff] }
  0x97   : > { %v632_v4 = vld [vmem:[%s14790_s5 + $0x2a8] sm:$0xff] }
  0x98   : > { %1335 = vmatmul.mubr.f32.gmra.mrb[32].mxu0 %v1222_v31  ;;  %15104 = vst [vmem:[#allocation95_spill] sm:$0xff] %v10953_v47  ;;  %15105 = vst [vmem:[#allocation96_spill] sm:$0xff] %v10957_v50  ;;  %v629_v31 = vld [vmem:[%s14790_s5 + $0x290] sm:$0xff] }
  0x99   : > { %8829 = vmatpush1.bf16.msra.mxu0 %v10929_v6  ;;  %1340 = vmatprep.mubr.f32.mxu0 %v1228_v24  ;;  %v716_v24 = vld [vmem:[%s14792_s7 + $0x40] sm:$0xff]  ;;  %v10979_v40 = vpack.c.bf16 %v629_v31, %v627_v28  ;;  %v1238_v28 = vld [vmem:[%s10680_s23 + $0xd0] sm:$0xff]  ;;  %v638_v31 = vld [vmem:[%s14790_s5 + $0x2d8] sm:$0xff] }
  0x9a   : > { %8831 = vmatprep.subr.bf16.mxu0 %v10935_v23  ;;  %v1232_v23 = vld [vmem:[%s10680_s23 + $0xa0] sm:$0xff]  ;;  %v10982_v6 = vpack.c.bf16 %v718_v13, %v716_v24 }
  0x9b   : > { %15106 = vst [vmem:[#allocation97_spill] sm:$0xff] %v10979_v40  ;;  %v635_v13 = vld [vmem:[%s14790_s5 + $0x2c0] sm:$0xff] }
  0x9c   : > { %1341 = vmatmul.mubr.f32.gmra.mrb[34].mxu0 %v1227_v42  ;;  %15107 = vst [vmem:[#allocation98_spill] sm:$0xff] %v10982_v6  ;;  %v10985_v42 = vpack.c.bf16 %v634_v18, %v632_v4  ;;  %8922 = vmatpush3.bf16.msra.mxu1 %v10982_v6  ;;  %v1237_v18 = vld [vmem:[%s10680_s23 + $0xc8] sm:$0xff] }
  0x9d   : > { %8833 = vmatpush1.bf16.msra.mxu0 %v10953_v47  ;;  %1346 = vmatprep.mubr.f32.mxu0 %v1233_v59  ;;  %v633_v47 = vld [vmem:[%s14790_s5 + $0x2b0] sm:$0xff]  ;;  %v636_v59 = vld [vmem:[%s14790_s5 + $0x2c8] sm:$0xff] }
  0x9e   : > { %8835 = vmatprep.subr.bf16.mxu0 %v10957_v50  ;;  %15108 = vst [vmem:[#allocation99_spill] sm:$0xff] %v10985_v42  ;;  %8923 = vmatprep.subr.bf16.mxu1 %v15100_v22  ;;  %v11003_v4 = vpack.c.bf16 %v633_v47, %v631_v32  ;;  %v11007_v24 = vpack.c.bf16 %v638_v31, %v636_v59  ;;  %v1243_v50 = vld [vmem:[%s10680_s23 + $0xf8] sm:$0x1]  ;;  %v640_v32 = vld [vmem:[%s14790_s5 + $0x2e8] sm:$0xff]  ;;  %v722_v59 = vld [vmem:[%s14792_s7 + $0x70] sm:$0xff] }
  0x9f   : > { %v642_v47 = vld [vmem:[%s14790_s5 + $0x2f8] sm:$0xff] }
  0xa0   : > { %1347 = vmatmul.mubr.f32.gmra.mrb[36].mxu0 %v1232_v23  ;;  %15109 = vst [vmem:[#allocation100_spill] sm:$0xff] %v11003_v4  ;;  %15110 = vst [vmem:[#allocation101_spill] sm:$0xff] %v11007_v24  ;;  %v637_v23 = vld [vmem:[%s14790_s5 + $0x2d0] sm:$0xff]  ;;  %v11035_v30 = vpack.c.bf16 %v642_v47, %v640_v32  ;;  %v643_v47 = vld [vmem:[%s14790_s5 + $0x300] sm:$0xff] }
  0xa1   : > { %8837 = vmatpush1.bf16.msra.mxu0 %v10979_v40  ;;  %1352 = vmatprep.mubr.f32.mxu0 %v1238_v28  ;;  %v720_v28 = vld [vmem:[%s14792_s7 + $0x60] sm:$0xff]  ;;  %v11029_v31 = vpack.c.bf16 %v637_v23, %v635_v13  ;;  %v646_v13 = vld [vmem:[%s14790_s5 + $0x318] sm:$0xff] }
  0xa2   : > { %8839 = vmatprep.subr.bf16.mxu0 %v10985_v42  ;;  %v1242_v42 = vld [vmem:[%s10680_s23 + $0xf0] sm:$0x1]  ;;  %v11032_v40 = vpack.c.bf16 %v722_v59, %v720_v28  ;;  %15113 = vst [vmem:[#allocation104_spill] sm:$0xff] %v11035_v30 }
  0xa3   : > { %15111 = vst [vmem:[#allocation102_spill] sm:$0xff] %v11029_v31  ;;  %v645_v28 = vld [vmem:[%s14790_s5 + $0x310] sm:$0xff] }
  0xa4   : > { %1353 = vmatmul.mubr.f32.gmra.mrb[38].mxu0 %v1237_v18  ;;  %15112 = vst [vmem:[#allocation103_spill] sm:$0xff] %v11032_v40  ;;  %v639_v18 = vld [vmem:[%s14790_s5 + $0x2e0] sm:$0xff]  ;;  %8925 = vmatpush3.bf16.msra.mxu1 %v11032_v40  ;;  %v11073_v59 = vpack.c.bf16 %v645_v28, %v643_v47  ;;  %v654_v47 = vld [vmem:[%s14790_s5 + $0x358] sm:$0xff] }
  0xa5   : > { %8841 = vmatpush1.bf16.msra.mxu0 %v11003_v4  ;;  %1358 = vmatprep.mubr.f32.mxu0 %v1243_v50  ;;  %v644_v50 = vld [vmem:[%s14790_s5 + $0x308] sm:$0xff]  ;;  %v11053_v23 = vpack.c.bf16 %v641_v46, %v639_v18  ;;  %v650_v46 = vld [vmem:[%s14790_s5 + $0x338] sm:$0xff] }
  0xa6   : > { %8843 = vmatprep.subr.bf16.mxu0 %v11007_v24  ;;  %8926 = vmatprep.subr.bf16.mxu1 %v15100_v22  ;;  %v11056_v32 = vpack.c.bf16 %v646_v13, %v644_v50  ;;  %15116 = vst [vmem:[#allocation107_spill] sm:$0xff] %v11073_v59  ;;  %v647_v50 = vld [vmem:[%s14790_s5 + $0x320] sm:$0xff]  ;;  %v649_v13 = vld [vmem:[%s14790_s5 + $0x330] sm:$0xff] }
  0xa7   : > { %15114 = vst [vmem:[#allocation105_spill] sm:$0xff] %v11053_v23  ;;  %v11091_v28 = vpack.c.bf16 %v649_v13, %v647_v50  ;;  %v658_v50 = vld [vmem:[%s14790_s5 + $0x378] sm:$0xff] }
  0xa8   : > { %1359 = vmatmul.mubr.f32.gmra.mrb[40].mxu0 %v1242_v42  ;;  %15115 = vst [vmem:[#allocation106_spill] sm:$0xff] %v11056_v32  ;;  %v14861_v42 = vmov 0.0  }
  0xa9   : > { %8845 = vmatpush1.bf16.msra.mxu0 %v11029_v31  ;;  %1429 = vmatprep.mubr.f32.mxu0 %v1215_v58  ;;  %v648_v58 = vld [vmem:[%s14790_s5 + $0x328] sm:$0xff]  ;;  %15118 = vst [vmem:[#allocation109_spill] sm:$0xff] %v11091_v28 }
  0xaa   : > { %8847 = vmatprep.subr.bf16.mxu0 %v11035_v30  ;;  %7874 = vmatprep.mubr.msk.f32.mxu1 %vm9843_vm0, %v14861_v42  ;;  %v11076_v18 = vpack.c.bf16 %v650_v46, %v648_v58  ;;  %v652_v42 = vld [vmem:[%s14790_s5 + $0x348] sm:$0xff]  ;;  %v651_v46 = vld [vmem:[%s14790_s5 + $0x340] sm:$0xff] }
  0xab   : > { %v11094_v58 = vpack.c.bf16 %v654_v47, %v652_v42  ;;  %v655_v47 = vld [vmem:[%s14790_s5 + $0x360] sm:$0xff]  ;;  %v1225_v31 = vld [vmem:[%s10680_s23 + $0x68] sm:$0xff] }
  0xac   : > { %15117 = vst [vmem:[#allocation108_spill] sm:$0xff] %v11076_v18  ;;  %v1220_v30 = vld [vmem:[%s10680_s23 + $0x40] sm:$0xff] }
  0xad   : > { %8849 = vmatpush1.bf16.msra.mxu0 %v11053_v23  ;;  %15119 = vst [vmem:[#allocation110_spill] sm:$0xff] %v11094_v58  ;;  %v656_v23 = vld [vmem:[%s14790_s5 + $0x368] sm:$0xff] }
  0xae   : > { %8851 = vmatprep.subr.bf16.mxu0 %v11056_v32  ;;  %v653_v32 = vld [vmem:[%s14790_s5 + $0x350] sm:$0xff]  ;;  %v11112_v13 = vpack.c.bf16 %v658_v50, %v656_v23  ;;  %v659_v50 = vld [vmem:[%s14790_s5 + $0x380] sm:$0xff] }
  0xaf   : > { %v11109_v42 = vpack.c.bf16 %v653_v32, %v651_v46  ;;  %v662_v32 = vld [vmem:[%s14790_s5 + $0x398] sm:$0xff] }
  0xb0   : > { %15121 = vst [vmem:[#allocation112_spill] sm:$0xff] %v11112_v13 }
  0xb1   : > { %8853 = vmatpush1.bf16.msra.mxu0 %v11073_v59  ;;  %15120 = vst [vmem:[#allocation111_spill] sm:$0xff] %v11109_v42  ;;  %v660_v59 = vld [vmem:[%s14790_s5 + $0x388] sm:$0xff] }
  0xb2   : > { %8855 = vmatprep.subr.bf16.mxu0 %v11076_v18  ;;  %v657_v18 = vld [vmem:[%s14790_s5 + $0x370] sm:$0xff]  ;;  %v11130_v46 = vpack.c.bf16 %v662_v32, %v660_v59  ;;  %v663_v32 = vld [vmem:[%s14790_s5 + $0x3a0] sm:$0xff] }
  0xb3   : > { %v11127_v23 = vpack.c.bf16 %v657_v18, %v655_v47  ;;  %v666_v18 = vld [vmem:[%s14790_s5 + $0x3b8] sm:$0xff] }
  0xb4   : > { %15123 = vst [vmem:[#allocation114_spill] sm:$0xff] %v11130_v46 }
  0xb5   : > { %8857 = vmatpush1.bf16.msra.mxu0 %v11091_v28  ;;  %15122 = vst [vmem:[#allocation113_spill] sm:$0xff] %v11127_v23  ;;  %v664_v28 = vld [vmem:[%s14790_s5 + $0x3a8] sm:$0xff] }
  0xb6   : > { %8859 = vmatprep.subr.bf16.mxu0 %v11094_v58  ;;  %v661_v58 = vld [vmem:[%s14790_s5 + $0x390] sm:$0xff]  ;;  %v11148_v47 = vpack.c.bf16 %v666_v18, %v664_v28  ;;  %v667_v18 = vld [vmem:[%s14790_s5 + $0x3c0] sm:$0xff] }
  0xb7   : > { %v11145_v59 = vpack.c.bf16 %v661_v58, %v659_v50  ;;  %v670_v58 = vld [vmem:[%s14790_s5 + $0x3d8] sm:$0xff] }
  0xb8   : > { %15125 = vst [vmem:[#allocation116_spill] sm:$0xff] %v11148_v47 }
  0xb9   : > { %8861 = vmatpush1.bf16.msra.mxu0 %v11109_v42  ;;  %15124 = vst [vmem:[#allocation115_spill] sm:$0xff] %v11145_v59  ;;  %v668_v42 = vld [vmem:[%s14790_s5 + $0x3c8] sm:$0xff] }
  0xba   : > { %8863 = vmatprep.subr.bf16.mxu0 %v11112_v13  ;;  %v665_v13 = vld [vmem:[%s14790_s5 + $0x3b0] sm:$0xff]  ;;  %v11166_v50 = vpack.c.bf16 %v670_v58, %v668_v42  ;;  %v671_v58 = vld [vmem:[%s14790_s5 + $0x3e0] sm:$0xff] }
  0xbb   : > { %v11163_v28 = vpack.c.bf16 %v665_v13, %v663_v32  ;;  %v674_v13 = vld [vmem:[%s14790_s5 + $0x3f8] sm:$0xff] }
  0xbc   : > { %15127 = vst [vmem:[#allocation118_spill] sm:$0xff] %v11166_v50 }
  0xbd   : > { %8865 = vmatpush1.bf16.msra.mxu0 %v11127_v23  ;;  %15126 = vst [vmem:[#allocation117_spill] sm:$0xff] %v11163_v28  ;;  %v672_v23 = vld [vmem:[%s14790_s5 + $0x3e8] sm:$0xff] }
  0xbe   : > { %8867 = vmatprep.subr.bf16.mxu0 %v11130_v46  ;;  %v669_v46 = vld [vmem:[%s14790_s5 + $0x3d0] sm:$0xff]  ;;  %v11184_v32 = vpack.c.bf16 %v674_v13, %v672_v23  ;;  %v675_v13 = vld [vmem:[%s14790_s5 + $0x400] sm:$0xff] }
  0xbf   : > { %v11181_v42 = vpack.c.bf16 %v669_v46, %v667_v18  ;;  %v678_v46 = vld [vmem:[%s14790_s5 + $0x418] sm:$0xff] }
  0xc0   : > { %15129 = vst [vmem:[#allocation120_spill] sm:$0xff] %v11184_v32 }
  0xc1   : > { %8869 = vmatpush1.bf16.msra.mxu0 %v11145_v59  ;;  %15128 = vst [vmem:[#allocation119_spill] sm:$0xff] %v11181_v42  ;;  %v676_v59 = vld [vmem:[%s14790_s5 + $0x408] sm:$0xff] }
  0xc2   : > { %8871 = vmatprep.subr.bf16.mxu0 %v11148_v47  ;;  %v673_v47 = vld [vmem:[%s14790_s5 + $0x3f0] sm:$0xff]  ;;  %v11202_v18 = vpack.c.bf16 %v678_v46, %v676_v59 }
  0xc3   : > { %v11199_v23 = vpack.c.bf16 %v673_v47, %v671_v58  ;;  %v682_v47 = vld [vmem:[%s14790_s5 + $0x438] sm:$0xff]  ;;  %v1214_v59 = vld [vmem:[%s10680_s23 + $0x10] sm:$0xff] }
  0xc4   : > { %15131 = vst [vmem:[#allocation122_spill] sm:$0xff] %v11202_v18 }
  0xc5   : > { %8873 = vmatpush1.bf16.msra.mxu0 %v11163_v28  ;;  %15130 = vst [vmem:[#allocation121_spill] sm:$0xff] %v11199_v23  ;;  %v680_v28 = vld [vmem:[%s14790_s5 + $0x428] sm:$0xff] }
  0xc6   : > { %8875 = vmatprep.subr.bf16.mxu0 %v11166_v50  ;;  %v677_v50 = vld [vmem:[%s14790_s5 + $0x410] sm:$0xff]  ;;  %v11221_v46 = vpack.c.bf16 %v682_v47, %v680_v28 }
  0xc7   : > { %v11218_v58 = vpack.c.bf16 %v677_v50, %v675_v13  ;;  %v686_v50 = vld [vmem:[%s14790_s5 + $0x458] sm:$0xff] }
  0xc8   : > { %15133 = vst [vmem:[#allocation124_spill] sm:$0xff] %v11221_v46  ;;  %v1219_v13 = vld [vmem:[%s10680_s23 + $0x38] sm:$0xff] }
  0xc9   : > { %8877 = vmatpush1.bf16.msra.mxu0 %v11181_v42  ;;  %15132 = vst [vmem:[#allocation123_spill] sm:$0xff] %v11218_v58  ;;  %v681_v42 = vld [vmem:[%s14790_s5 + $0x430] sm:$0xff] }
  0xca   : > { %8879 = vmatprep.subr.bf16.mxu0 %v11184_v32  ;;  %v679_v32 = vld [vmem:[%s14790_s5 + $0x420] sm:$0xff] }
  0xcb   : > { %v11237_v28 = vpack.c.bf16 %v681_v42, %v679_v32  ;;  %v688_v42 = vld [vmem:[%s14790_s5 + $0x468] sm:$0xff] }
  0xcd   : > { %8881 = vmatpush1.bf16.msra.mxu0 %v11199_v23  ;;  %v684_v23 = vld [vmem:[%s14790_s5 + $0x448] sm:$0xff]  ;;  %15134 = vst [vmem:[#allocation125_spill] sm:$0xff] %v11237_v28 }
  0xce   : > { %8883 = vmatprep.subr.bf16.mxu0 %v11202_v18  ;;  %v11241_v47 = vpack.c.bf16 %v686_v50, %v684_v23  ;;  %v683_v18 = vld [vmem:[%s14790_s5 + $0x440] sm:$0xff] }
  0xcf   : > { %v1224_v23 = vld [vmem:[%s10680_s23 + $0x60] sm:$0xff] }
  0xd0   : > { %1430 = vmatmul.mubr.f32.vlgmr.msra.gmra.mrb[28].mxu0 %v1214_v59  ;;  %15135 = vst [vmem:[#allocation126_spill] sm:$0xff] %v11241_v47  ;;  %v685_v59 = vld [vmem:[%s14790_s5 + $0x450] sm:$0xff] }
  0xd1   : > { %8885 = vmatpush1.bf16.msra.mxu0 %v11218_v58  ;;  %1435 = vmatprep.mubr.f32.mxu0 %v1220_v30  ;;  %v690_v30 = vld [vmem:[%s14790_s5 + $0x478] sm:$0xff]  ;;  %v11257_v32 = vpack.c.bf16 %v685_v59, %v683_v18  ;;  %v1230_v58 = vld [vmem:[%s10680_s23 + $0x90] sm:$0xff]  ;;  %v692_v18 = vld [vmem:[%s14790_s5 + $0x488] sm:$0xff] }
  0xd2   : > { %8887 = vmatprep.subr.bf16.mxu0 %v11221_v46  ;;  %v11261_v50 = vpack.c.bf16 %v690_v30, %v688_v42  ;;  %v687_v46 = vld [vmem:[%s14790_s5 + $0x460] sm:$0xff]  ;;  %v1229_v42 = vld [vmem:[%s10680_s23 + $0x88] sm:$0xff] }
  0xd3   : > { %15136 = vst [vmem:[#allocation127_spill] sm:$0xff] %v11257_v32 }
  0xd4   : > { %1436 = vmatmul.mubr.f32.gmra.mrb[30].mxu0 %v1219_v13  ;;  %15137 = vst [vmem:[#allocation128_spill] sm:$0xff] %v11261_v50  ;;  %v689_v13 = vld [vmem:[%s14790_s5 + $0x470] sm:$0xff] }
  0xd5   : > { %8889 = vmatpush1.bf16.msra.mxu0 %v11237_v28  ;;  %1441 = vmatprep.mubr.f32.mxu0 %v1225_v31  ;;  %v694_v31 = vld [vmem:[%s14790_s5 + $0x498] sm:$0xff]  ;;  %v11277_v59 = vpack.c.bf16 %v689_v13, %v687_v46  ;;  %v696_v46 = vld [vmem:[%s14790_s5 + $0x4a8] sm:$0xff] }
  0xd6   : > { %8891 = vmatprep.subr.bf16.mxu0 %v11241_v47  ;;  %v11281_v30 = vpack.c.bf16 %v694_v31, %v692_v18  ;;  %v691_v47 = vld [vmem:[%s14790_s5 + $0x480] sm:$0xff]  ;;  %v1235_v28 = vld [vmem:[%s10680_s23 + $0xb8] sm:$0xff]  ;;  %v1234_v18 = vld [vmem:[%s10680_s23 + $0xb0] sm:$0xff] }
  0xd7   : > { %15138 = vst [vmem:[#allocation129_spill] sm:$0xff] %v11277_v59 }
  0xd8   : > { %1442 = vmatmul.mubr.f32.gmra.mrb[32].mxu0 %v1224_v23  ;;  %15139 = vst [vmem:[#allocation130_spill] sm:$0xff] %v11281_v30  ;;  %v693_v23 = vld [vmem:[%s14790_s5 + $0x490] sm:$0xff] }
  0xd9   : > { %8893 = vmatpush1.bf16.msra.mxu0 %v11257_v32  ;;  %1447 = vmatprep.mubr.f32.mxu0 %v1230_v58  ;;  %v698_v58 = vld [vmem:[%s14790_s5 + $0x4b8] sm:$0xff]  ;;  %v11297_v13 = vpack.c.bf16 %v693_v23, %v691_v47  ;;  %v1240_v32 = vld [vmem:[%s10680_s23 + $0xe0] sm:$0xff]  ;;  %v700_v47 = vld [vmem:[%s14790_s5 + $0x4c8] sm:$0xff] }
  0xda   : > { %8895 = vmatprep.subr.bf16.mxu0 %v11261_v50  ;;  %v11301_v31 = vpack.c.bf16 %v698_v58, %v696_v46  ;;  %v695_v50 = vld [vmem:[%s14790_s5 + $0x4a0] sm:$0xff]  ;;  %v1239_v46 = vld [vmem:[%s10680_s23 + $0xd8] sm:$0xff] }
  0xdb   : > { %15140 = vst [vmem:[#allocation131_spill] sm:$0xff] %v11297_v13 }
  0xdc   : > { %1448 = vmatmul.mubr.f32.gmra.mrb[34].mxu0 %v1229_v42  ;;  %15141 = vst [vmem:[#allocation132_spill] sm:$0xff] %v11301_v31  ;;  %v697_v42 = vld [vmem:[%s14790_s5 + $0x4b0] sm:$0xff] }
  0xdd   : > { %8897 = vmatpush1.bf16.msra.mxu0 %v11277_v59  ;;  %1453 = vmatprep.mubr.f32.mxu0 %v1235_v28  ;;  %v702_v28 = vld [vmem:[%s14790_s5 + $0x4d8] sm:$0xff]  ;;  %v11317_v23 = vpack.c.bf16 %v697_v42, %v695_v50  ;;  %v701_v59 = vld [vmem:[%s14790_s5 + $0x4d0] sm:$0xff]  ;;  %v704_v50 = vld [vmem:[%s14790_s5 + $0x4e8] sm:$0xff] }
  0xde   : > { %8899 = vmatprep.subr.bf16.mxu0 %v11281_v30  ;;  %v11321_v58 = vpack.c.bf16 %v702_v28, %v700_v47  ;;  %v699_v30 = vld [vmem:[%s14790_s5 + $0x4c0] sm:$0xff] }
  0xdf   : > { %15142 = vst [vmem:[#allocation133_spill] sm:$0xff] %v11317_v23  ;;  %v11337_v42 = vpack.c.bf16 %v701_v59, %v699_v30  ;;  %v1244_v47 = vld [vmem:[%s10680_s23 + $0x100] sm:$0x1]  ;;  %v15147_v30 = vmov 0.0  }
  0xe0   : > { %1454 = vmatmul.mubr.f32.gmra.mrb[36].mxu0 %v1234_v18  ;;  %15143 = vst [vmem:[#allocation134_spill] sm:$0xff] %v11321_v58  ;;  %v1245_v18 = vld [vmem:[%s10680_s23 + $0x108] sm:$0x1] }
  0xe1   : > { %8901 = vmatpush1.bf16.msra.mxu0 %v11297_v13  ;;  %1459 = vmatprep.mubr.f32.mxu0 %v1240_v32  ;;  %v706_v32 = vld [vmem:[%s14790_s5 + $0x4f8] sm:$0xff]  ;;  %15144 = vst [vmem:[#allocation135_spill] sm:$0xff] %v11337_v42  ;;  %v705_v13 = vld [vmem:[%s14790_s5 + $0x4f0] sm:$0xff] }
  0xe2   : > { %8903 = vmatprep.subr.bf16.mxu0 %v11301_v31  ;;  %v11341_v28 = vpack.c.bf16 %v706_v32, %v704_v50  ;;  %v703_v31 = vld [vmem:[%s14790_s5 + $0x4e0] sm:$0xff]  ;;  %v1241_v32 = vld [vmem:[%s10680_s23 + $0xe8] sm:$0xff] }
  0xe3   : > { %v11350_v59 = vpack.c.bf16 %v705_v13, %v703_v31  ;;  %v1226_v13 = vld [vmem:[%s10680_s23 + $0x70] sm:$0xff]  ;;  %v1231_v31 = vld [vmem:[%s10680_s23 + $0x98] sm:$0xff]  ;;  %v1236_v50 = vld [vmem:[%s10680_s23 + $0xc0] sm:$0xff] }
  0xe4   : > { %1460 = vmatmul.mubr.f32.gmra.mrb[38].mxu0 %v1239_v46  ;;  %15145 = vst [vmem:[#allocation136_spill] sm:$0xff] %v11341_v28  ;;  %v1216_v46 = vld [vmem:[%s10680_s23 + $0x20] sm:$0xff] }
  0xe5   : > { %8905 = vmatpush1.bf16.msra.mxu0 %v11317_v23  ;;  %1465 = vmatprep.mubr.f32.mxu0 %v1245_v18  ;;  %15146 = vst [vmem:[#allocation137_spill] sm:$0xff] %v11350_v59  ;;  %v1221_v18 = vld [vmem:[%s10680_s23 + $0x48] sm:$0xff] }
  0xe6   : > { %8907 = vmatprep.subr.bf16.mxu0 %v11321_v58 }
  0xe8   : > { %1466 = vmatmul.mubr.f32.gmra.mrb[40].mxu0 %v1244_v47 }
  0xe9   : > { %8909 = vmatpush1.bf16.msra.mxu0 %v11337_v42  ;;  %1536 = vmatprep.mubr.f32.mxu0 %v15147_v30 }
  0xea   : > { %8911 = vmatprep.subr.bf16.mxu0 %v11341_v28 }
  0xed   : > { %8913 = vmatpush1.bf16.msra.mxu0 %v11350_v59 }
  0xee   : > { %9024 = vmatprep.subr.bf16.mxu0 %v15100_v22 }
  0xf0   : > { %1537 = vmatmul.mubr.f32.vlgmr.msra.gmra.mrb[28].mxu0 %v1216_v46  ;;  %v6669_v46 = vld [vmem:[%s14788_s3] ss:$0 sm:$0xff] }
  0xf1   : > { %1542 = vmatprep.mubr.f32.mxu0 %v15147_v30  ;;  %9026 = vmatpush3.bf16.msra.mxu0 %v10898_v45 }
  0xf2   : > { %9027 = vmatprep.subr.bf16.mxu0 %v15100_v22 }
  0xf4   : > { %1543 = vmatmul.mubr.f32.gmra.mrb[30].mxu0 %v1221_v18 }
  0xf5   : > { %1548 = vmatprep.mubr.f32.mxu0 %v15147_v30  ;;  %9029 = vmatpush3.bf16.msra.mxu0 %v10932_v1 }
  0xf6   : > { %9063 = vmatprep.subr.bf16.mxu0 %v9933_v8 }
  0xf8   : > { %1549 = vmatmul.mubr.f32.gmra.mrb[32].mxu0 %v1226_v13 }
  0xf9   : > { %1554 = vmatprep.mubr.f32.mxu0 %v15147_v30 }
  0xfc   : > { %1555 = vmatmul.mubr.f32.gmra.mrb[34].mxu0 %v1231_v31  ;;  %v1246_v31 = vld [vmem:[%s10680_s23 + $0x110] sm:$0x1] }
  0xfd   : > { %1560 = vmatprep.mubr.f32.mxu0 %v15147_v30 }
 0x100   : > { %1561 = vmatmul.mubr.f32.gmra.mrb[36].mxu0 %v1236_v50 }
 0x101   : > { %1566 = vmatprep.mubr.f32.mxu0 %v15147_v30 }
 0x103   : > { %v7194_v47 = vpop.f32.mrb[0].mxu0 }
 0x104   : > { %v7195_v18 = vpop.f32.mrb[1].mxu0  ;;  %1567 = vmatmul.mubr.f32.gmra.mrb[38].mxu0 %v1241_v32 }
 0x105   : > { %v7247_v8 = vpop.f32.mrb[0].mxu1  ;;  %v7196_v13 = vadd.f32 %v7195_v18, %v7194_v47  ;;  %1572 = vmatprep.mubr.f32.mxu0 %v15147_v30 }
 0x106   : > { %v7248_v59 = vpop.f32.mrb[1].mxu1 }
 0x107   : > { %v7249_v28 = vadd.f32 %v7248_v59, %v7247_v8  ;;  %v879_v42 = vadd.f32 %v7196_v13, %v6669_v46  ;;  %v7197_v58 = vpop.f32.mrb[2].mxu0 }
 0x108   : > { %v7198_v50 = vpop.f32.mrb[3].mxu0  ;;  %1573 = vmatmul.mubr.f32.gmra.mrb[40].mxu0 %v1246_v31 }
 0x109   : > { %v7250_v23 = vpop.f32.mrb[2].mxu1  ;;  %v979_v24 = vadd.f32 %v7249_v28, %v879_v42  ;;  %v7199_v4 = vadd.f32 %v7198_v50, %v7197_v58  ;;  %8095 = vmatprep.mubr.msk.f32.mxu0 %vm9843_vm0, %v15147_v30 }
 0x10a   : > { %v7251_v2 = vpop.f32.mrb[3].mxu1 }
 0x10b   : > { %v7252_v57 = vadd.f32 %v7251_v2, %v7250_v23  ;;  %v884_v9 = vadd.f32 %v7199_v4, %v6669_v46  ;;  %v7200_v47 = vpop.f32.mrb[4].mxu0 }
 0x10c   : > { %v7201_v18 = vpop.f32.mrb[5].mxu0 }
 0x10d   : > { %v7253_v32 = vpop.f32.mrb[4].mxu1  ;;  %v984_v59 = vadd.f32 %v7252_v57, %v884_v9  ;;  %v7202_v8 = vadd.f32 %v7201_v18, %v7200_v47 }
 0x10e   : > { %v7254_v61 = vpop.f32.mrb[5].mxu1 }
 0x10f   : > { %v7255_v29 = vadd.f32 %v7254_v61, %v7253_v32  ;;  %v889_v13 = vadd.f32 %v7202_v8, %v6669_v46  ;;  %v7203_v11 = vpop.f32.mrb[6].mxu0 }
 0x110   : > { %v7204_v49 = vpop.f32.mrb[7].mxu0 }
 0x111   : > { %v7256_v41 = vpop.f32.mrb[6].mxu1  ;;  %v989_v42 = vadd.f32 %v7255_v29, %v889_v13  ;;  %v7205_v58 = vadd.f32 %v7204_v49, %v7203_v11 }
 0x112   : > { %v7257_v28 = vpop.f32.mrb[7].mxu1 }
 0x113   : > { %v7258_v31 = vadd.f32 %v7257_v28, %v7256_v41  ;;  %v894_v2 = vadd.f32 %v7205_v58, %v6669_v46  ;;  %v7206_v23 = vpop.f32.mrb[8].mxu0 }
 0x114   : > { %v7207_v50 = vpop.f32.mrb[9].mxu0 }
 0x115   : > { %v7259_v15 = vpop.f32.mrb[8].mxu1  ;;  %v994_v4 = vadd.f32 %v7258_v31, %v894_v2  ;;  %v7208_v10 = vadd.f32 %v7207_v50, %v7206_v23 }
 0x116   : > { %v7260_v60 = vpop.f32.mrb[9].mxu1 }
 0x117   : > { %v7261_v54 = vadd.f32 %v7260_v60, %v7259_v15  ;;  %v899_v9 = vadd.f32 %v7208_v10, %v6669_v46  ;;  %v7209_v57 = vpop.f32.mrb[10].mxu0 }
 0x118   : > { %v7210_v47 = vpop.f32.mrb[11].mxu0 }
 0x119   : > { %v7262_v61 = vpop.f32.mrb[10].mxu1  ;;  %v11378_v18 = vadd.f32 %v7261_v54, %v899_v9  ;;  %v7211_v32 = vadd.f32 %v7210_v47, %v7209_v57 }
 0x11a   : > { %v7263_v8 = vpop.f32.mrb[11].mxu1 }
 0x11b   : > { %v7264_v29 = vadd.f32 %v7263_v8, %v7262_v61  ;;  %v904_v49 = vadd.f32 %v7211_v32, %v6669_v46  ;;  %v7212_v11 = vpop.f32.mrb[12].mxu0 }
 0x11c   : > { %v7213_v41 = vpop.f32.mrb[13].mxu0 }
 0x11d   : > { %v7265_v13 = vpop.f32.mrb[12].mxu1  ;;  %v11380_v58 = vadd.f32 %v7264_v29, %v904_v49  ;;  %v7214_v28 = vadd.f32 %v7213_v41, %v7212_v11 }
 0x11e   : > { %v7266_v31 = vpop.f32.mrb[13].mxu1 }
 0x11f   : > { %v7267_v2 = vadd.f32 %v7266_v31, %v7265_v13  ;;  %v909_v23 = vadd.f32 %v7214_v28, %v6669_v46 }
 0x121   : > { %v11382_v60 = vadd.f32 %v7267_v2, %v909_v23 }
 0x123   : > { %v7300_v10 = vpop.f32.mrb[14].mxu0 }
 0x124   : > { %v7301_v15 = vpop.f32.mrb[15].mxu0 }
 0x125   : > { %v7353_v50 = vpop.f32.mrb[14].mxu1  ;;  %v7302_v54 = vadd.f32 %v7301_v15, %v7300_v10 }
 0x126   : > { %v7354_v9 = vpop.f32.mrb[15].mxu1 }
 0x127   : > { %v7355_v57 = vadd.f32 %v7354_v9, %v7353_v50  ;;  %v1079_v47 = vadd.f32 %v7302_v54, %v979_v24  ;;  %v7303_v61 = vpop.f32.mrb[16].mxu0 }
 0x128   : > { %v7304_v32 = vpop.f32.mrb[17].mxu0 }
 0x129   : > { %v7356_v8 = vpop.f32.mrb[16].mxu1  ;;  %v11384_v44 = vadd.f32 %v7355_v57, %v1079_v47  ;;  %v7305_v29 = vadd.f32 %v7304_v32, %v7303_v61 }
 0x12a   : > { %v7357_v49 = vpop.f32.mrb[17].mxu1 }
 0x12b   : > { %v7358_v11 = vadd.f32 %v7357_v49, %v7356_v8  ;;  %v1084_v41 = vadd.f32 %v7305_v29, %v984_v59  ;;  %v7306_v46 = vpop.f32.mrb[18].mxu0  ;;  %7875 = vmatmul.mubr.msk.f32.vlgmr.msra.gmra.mrb[28].mxu1 %vm1579_vm1, %v11384_v44 }
 0x12c   : > { %v7307_v13 = vpop.f32.mrb[19].mxu0  ;;  %7877 = vmatprep.mubr.msk.f32.mxu1 %vm9843_vm0, %v15147_v30  ;;  %8928 = vmatpush3.bf16.msra.mxu1 %v10898_v45 }
 0x12d   : > { %v7359_v28 = vpop.f32.mrb[18].mxu1  ;;  %v11391_v24 = vadd.f32 %v7358_v11, %v1084_v41  ;;  %v7308_v31 = vadd.f32 %v7307_v13, %v7306_v46  ;;  %8929 = vmatprep.subr.bf16.mxu1 %v15100_v22 }
 0x12e   : > { %v7360_v2 = vpop.f32.mrb[19].mxu1 }
 0x12f   : > { %v7361_v23 = vadd.f32 %v7360_v2, %v7359_v28  ;;  %v1089_v10 = vadd.f32 %v7308_v31, %v989_v42  ;;  %v7309_v59 = vpop.f32.mrb[20].mxu0  ;;  %7878 = vmatmul.mubr.msk.f32.gmra.mrb[30].mxu1 %vm1579_vm1, %v11391_v24 }
 0x130   : > { %v7310_v15 = vpop.f32.mrb[21].mxu0  ;;  %7880 = vmatprep.mubr.msk.f32.mxu1 %vm9843_vm0, %v15147_v30  ;;  %8931 = vmatpush3.bf16.msra.mxu1 %v10932_v1 }
 0x131   : > { %v7362_v50 = vpop.f32.mrb[20].mxu1  ;;  %v11399_v54 = vadd.f32 %v7361_v23, %v1089_v10  ;;  %v7311_v9 = vadd.f32 %v7310_v15, %v7309_v59  ;;  %8932 = vmatprep.subr.bf16.mxu1 %v15100_v22 }
 0x132   : > { %v7363_v57 = vpop.f32.mrb[21].mxu1 }
 0x133   : > { %v7364_v47 = vadd.f32 %v7363_v57, %v7362_v50  ;;  %v1094_v61 = vadd.f32 %v7311_v9, %v994_v4  ;;  %v7312_v42 = vpop.f32.mrb[22].mxu0  ;;  %7881 = vmatmul.mubr.msk.f32.gmra.mrb[32].mxu1 %vm1579_vm1, %v11399_v54 }
 0x134   : > { %v7313_v32 = vpop.f32.mrb[23].mxu0  ;;  %7883 = vmatprep.mubr.msk.f32.mxu1 %vm9843_vm0, %v15147_v30  ;;  %8934 = vmatpush3.bf16.msra.mxu1 %v10982_v6 }
 0x135   : > { %v7365_v8 = vpop.f32.mrb[22].mxu1  ;;  %v11407_v29 = vadd.f32 %v7364_v47, %v1094_v61  ;;  %v7314_v49 = vadd.f32 %v7313_v32, %v7312_v42  ;;  %8935 = vmatprep.subr.bf16.mxu1 %v15100_v22  ;;  %v709_v32 = vld [vmem:[%s14792_s7 + $0x8] sm:$0xff] }
 0x136   : > { %v7366_v11 = vpop.f32.mrb[23].mxu1 }
 0x137   : > { %v7367_v41 = vadd.f32 %v7366_v11, %v7365_v8  ;;  %v1099_v4 = vadd.f32 %v7314_v49, %v11378_v18  ;;  %v7315_v46 = vpop.f32.mrb[24].mxu0  ;;  %7884 = vmatmul.mubr.msk.f32.gmra.mrb[34].mxu1 %vm1579_vm1, %v11407_v29 }
 0x138   : > { %v7316_v13 = vpop.f32.mrb[25].mxu0  ;;  %7886 = vmatprep.mubr.msk.f32.mxu1 %vm9843_vm0, %v15147_v30  ;;  %8937 = vmatpush3.bf16.msra.mxu1 %v11032_v40 }
 0x139   : > { %v7368_v28 = vpop.f32.mrb[24].mxu1  ;;  %v11416_v31 = vadd.f32 %v7367_v41, %v1099_v4  ;;  %v7317_v2 = vadd.f32 %v7316_v13, %v7315_v46 }
 0x13a   : > { %v7369_v23 = vpop.f32.mrb[25].mxu1 }
 0x13b   : > { %v7370_v10 = vadd.f32 %v7369_v23, %v7368_v28  ;;  %v1104_v59 = vadd.f32 %v7317_v2, %v11380_v58  ;;  %v7318_v15 = vpop.f32.mrb[26].mxu0  ;;  %7887 = vmatmul.mubr.msk.f32.gmra.mrb[36].mxu1 %vm1579_vm1, %v11416_v31 }
 0x13c   : > { %v7319_v18 = vpop.f32.mrb[27].mxu0  ;;  %7889 = vmatprep.mubr.msk.f32.mxu1 %vm9843_vm0, %v15147_v30 }
 0x13d   : > { %v7371_v50 = vpop.f32.mrb[26].mxu1  ;;  %v11423_v9 = vadd.f32 %v7370_v10, %v1104_v59  ;;  %v7320_v57 = vadd.f32 %v7319_v18, %v7318_v15 }
 0x13e   : > { %v7372_v47 = vpop.f32.mrb[27].mxu1 }
 0x13f   : > { %v7373_v61 = vadd.f32 %v7372_v47, %v7371_v50  ;;  %v1109_v42 = vadd.f32 %v7320_v57, %v11382_v60  ;;  %7890 = vmatmul.mubr.msk.f32.gmra.mrb[38].mxu1 %vm1579_vm1, %v11423_v9  ;;  %v711_v60 = vld [vmem:[%s14792_s7 + $0x18] sm:$0xff]  ;;  %v713_v47 = vld [vmem:[%s14792_s7 + $0x28] sm:$0xff] }
 0x140   : > { %7892 = vmatprep.mubr.msk.f32.mxu1 %vm9843_vm0, %v15147_v30  ;;  %v11442_v8 = vpack.c.bf16 %v711_v60, %v709_v32 }
 0x141   : > { %v11430_v58 = vadd.f32 %v7373_v61, %v1109_v42  ;;  %v715_v61 = vld [vmem:[%s14792_s7 + $0x38] sm:$0xff] }
 0x142   : > { %15148 = vst [vmem:[#allocation138_spill] sm:$0xff] %v11442_v8  ;;  %8939 = vmatprep.subr.bf16.mxu1 %v11442_v8  ;;  %v11484_v36 = vpack.c.bf16 %v715_v61, %v713_v47  ;;  %v11502_v47 = vpack.c.bf16 %v719_v5, %v717_v19 }
 0x143   : > { %7893 = vmatmul.mubr.msk.f32.gmra.mrb[40].mxu1 %vm1579_vm1, %v11430_v58 }
 0x144   : > { %7911 = vmatprep.mubr.msk.f32.mxu1 %vm9843_vm0, %v15147_v30  ;;  %15149 = vst [vmem:[#allocation139_spill] sm:$0xff] %v11484_v36  ;;  %15150 = vst [vmem:[#allocation140_spill] sm:$0xff] %v11502_v47 }
 0x1c3   : > { %v11445_v49 = vpop.f32.mrb[28].mxu0 }
 0x1c4   : > { %v11447_v11 = vpop.f32.mrb[29].mxu0 }
 0x1c7   : > { %v11449_v41 = vpop.f32.mrb[30].mxu0 }
 0x1c8   : > { %v11451_v4 = vpop.f32.mrb[31].mxu0 }
 0x1cb   : > { %v11453_v46 = vpop.f32.mrb[32].mxu0 }
 0x1cc   : > { %v11455_v13 = vpop.f32.mrb[33].mxu0 }
 0x1cf   : > { %v11457_v28 = vpop.f32.mrb[34].mxu0 }
 0x1d0   : > { %v11459_v2 = vpop.f32.mrb[35].mxu0 }
 0x1d3   : > { %v11461_v23 = vpop.f32.mrb[36].mxu0 }
 0x1d4   : > { %v11463_v10 = vpop.f32.mrb[37].mxu0 }
 0x1d7   : > { %v11465_v59 = vpop.f32.mrb[38].mxu0 }
 0x1d8   : > { %v11467_v15 = vpop.f32.mrb[39].mxu0 }
 0x1db   : > { %v11469_v18 = vpop.f32.mrb[40].mxu0 }
 0x1dc   : > { %v11471_v50 = vpop.f32.mrb[41].mxu0 }
 0x1fe   : > { %v1667_v57 = vpop.f32.mrb[28].mxu1 }
 0x1ff   : > { %v11480_v42 = vsub.f32 %v11384_v44, %v1667_v57  ;;  %v7876_v32 = vpop.f32.mrb[29].mxu1 }
 0x201   : > { %v1708_v60 = vmul.f32 %v11480_v42, %v11480_v42 }
 0x202   : > { %v1672_v27 = vpop.f32.mrb[30].mxu1 }
 0x203   : > { %v11493_v63 = vsub.f32 %v11391_v24, %v1672_v27  ;;  %v7879_v44 = vpop.f32.mrb[31].mxu1  ;;  %7912 = vmatmul.mubr.msk.f32.vlgmr.msra.gmra.mrb[42].mxu1 %vm1579_vm1, %v1708_v60  ;;  %v721_v27 = vld [vmem:[%s14792_s7 + $0x68] sm:$0xff]  ;;  %v723_v24 = vld [vmem:[%s14792_s7 + $0x78] sm:$0xff] }
 0x204   : > { %8941 = vmatpush1.bf16.msra.mxu1 %v10898_v45  ;;  %7914 = vmatprep.mubr.msk.f32.mxu1 %vm9843_vm0, %v15147_v30  ;;  %v11520_v19 = vpack.c.bf16 %v723_v24, %v721_v27  ;;  %v1248_v44 = vlaneseq }
 0x205   : > { %v1709_v57 = vmul.f32 %v11493_v63, %v11493_v63  ;;  %8943 = vmatprep.subr.bf16.mxu1 %v11484_v36 }
 0x206   : > { %v1677_v61 = vpop.f32.mrb[32].mxu1  ;;  %15151 = vst [vmem:[#allocation141_spill] sm:$0xff] %v11520_v19 }
 0x207   : > { %v11511_v32 = vsub.f32 %v11399_v54, %v1677_v61  ;;  %v7882_v60 = vpop.f32.mrb[33].mxu1  ;;  %7915 = vmatmul.mubr.msk.f32.gmra.mrb[44].mxu1 %vm1579_vm1, %v1709_v57  ;;  %v725_v54 = vld [vmem:[%s14792_s7 + $0x88] sm:$0xff]  ;;  %v727_v57 = vld [vmem:[%s14792_s7 + $0x98] sm:$0xff] }
 0x208   : > { %8945 = vmatpush1.bf16.msra.mxu1 %v10932_v1  ;;  %7917 = vmatprep.mubr.msk.f32.mxu1 %vm9843_vm0, %v15147_v30  ;;  %v11538_v24 = vpack.c.bf16 %v727_v57, %v725_v54 }
 0x209   : > { %v1710_v5 = vmul.f32 %v11511_v32, %v11511_v32  ;;  %8947 = vmatprep.subr.bf16.mxu1 %v11502_v47 }
 0x20a   : > { %v1682_v56 = vpop.f32.mrb[34].mxu1  ;;  %15152 = vst [vmem:[#allocation142_spill] sm:$0xff] %v11538_v24 }
 0x20b   : > { %v11529_v61 = vsub.f32 %v11407_v29, %v1682_v56  ;;  %v7885_v60 = vpop.f32.mrb[35].mxu1  ;;  %7918 = vmatmul.mubr.msk.f32.gmra.mrb[46].mxu1 %vm1579_vm1, %v1710_v5  ;;  %v724_v56 = vld [vmem:[%s14792_s7 + $0x80] sm:$0xff]  ;;  %v726_v29 = vld [vmem:[%s14792_s7 + $0x90] sm:$0xff]  ;;  %v1249_v5 = vshrl.u32 %v1248_v44, 7 }
 0x20c   : > { %8949 = vmatpush1.bf16.msra.mxu1 %v10982_v6  ;;  %7920 = vmatprep.mubr.msk.f32.mxu1 %vm9843_vm0, %v15147_v30  ;;  %v11559_v44 = vpack.c.bf16 %v726_v29, %v724_v56  ;;  %v733_v56 = vld [vmem:[%s14792_s7 + $0xc8] sm:$0xff] }
 0x20d   : > { %v1711_v27 = vmul.f32 %v11529_v61, %v11529_v61  ;;  %8951 = vmatprep.subr.bf16.mxu1 %v11520_v19  ;;  %v11595_v55 = vpack.c.bf16 %v735_v43, %v733_v56 }
 0x20e   : > { %v1687_v60 = vpop.f32.mrb[36].mxu1  ;;  %15153 = vst [vmem:[#allocation143_spill] sm:$0xff] %v11559_v44 }
 0x20f   : > { %v11553_v54 = vsub.f32 %v11416_v31, %v1687_v60  ;;  %v7888_v57 = vpop.f32.mrb[37].mxu1  ;;  %7921 = vmatmul.mubr.msk.f32.gmra.mrb[48].mxu1 %vm1579_vm1, %v1711_v27  ;;  %v728_v31 = vld [vmem:[%s14792_s7 + $0xa0] sm:$0xff]  ;;  %v730_v27 = vld [vmem:[%s14792_s7 + $0xb0] sm:$0xff]  ;;  %v11572_v60 = vsub.s32 1, %v1249_v5  ;;  %15157 = vst [vmem:[#allocation147_spill] sm:$0xff] %v11595_v55 }
 0x210   : > { %8953 = vmatpush1.bf16.msra.mxu1 %v11032_v40  ;;  %7923 = vmatprep.mubr.msk.f32.mxu1 %vm9843_vm0, %v15147_v30  ;;  %v11590_v21 = vpack.c.bf16 %v730_v27, %v728_v31  ;;  %v737_v27 = vld [vmem:[%s14792_s7 + $0xe8] sm:$0xff] }
 0x211   : > { %v1712_v38 = vmul.f32 %v11553_v54, %v11553_v54  ;;  %8955 = vmatprep.subr.bf16.mxu1 %v11538_v24  ;;  %15155 = vst [vmem:[#allocation145_spill] sm:$0xff] %v11572_v60 }
 0x212   : > { %v1692_v57 = vpop.f32.mrb[38].mxu1  ;;  %15156 = vst [vmem:[#allocation146_spill] sm:$0xff] %v11590_v21 }
 0x213   : > { %v11584_v29 = vsub.f32 %v11423_v9, %v1692_v57  ;;  %v7891_v25 = vpop.f32.mrb[39].mxu1  ;;  %7924 = vmatmul.mubr.msk.f32.gmra.mrb[50].mxu1 %vm1579_vm1, %v1712_v38  ;;  %v734_v38 = vld [vmem:[%s14792_s7 + $0xd0] sm:$0xff]  ;;  %v11604_v9 = vrot.slane %v707_v51, %v11572_v60  ;;  %v739_v57 = vld [vmem:[%s14792_s7 + $0xf8] sm:$0xff] }
 0x214   : > { %8957 = vmatpush1.bf16.msra.mxu1 %v11559_v44  ;;  %7926 = vmatprep.mubr.msk.f32.mxu1 %vm9843_vm0, %v15147_v30  ;;  %v732_v25 = vld [vmem:[%s14792_s7 + $0xc0] sm:$0xff]  ;;  %v11624_v37 = vpack.c.bf16 %v739_v57, %v737_v27 }
 0x215   : > { %v1713_v12 = vmul.f32 %v11584_v29, %v11584_v29  ;;  %8959 = vmatprep.subr.bf16.mxu1 %v11564_v34  ;;  %15158 = vst [vmem:[#allocation148_spill] sm:$0xff] %v11604_v9  ;;  %v11619_v60 = vpack.c.bf16 %v734_v38, %v732_v25  ;;  %v11634_v25 = vadd.f32 %v11447_v11, %v11604_v9  ;;  %v741_v38 = vld [vmem:[%s14792_s7 + $0x108] sm:$0xff]  ;;  %v740_v57 = vld [vmem:[%s14792_s7 + $0x100] sm:$0xff] }
 0x216   : > { %v1697_v31 = vpop.f32.mrb[40].mxu1  ;;  %15160 = vst [vmem:[#allocation150_spill] sm:$0xff] %v11624_v37  ;;  %v11705_v35 = vadd.f32 %v11455_v13, %v11604_v9 }
 0x217   : > { %v11613_v56 = vsub.f32 %v11430_v58, %v1697_v31  ;;  %v7894_v43 = vpop.f32.mrb[41].mxu1  ;;  %7927 = vmatmul.mubr.msk.f32.gmra.mrb[52].mxu1 %vm1579_vm1, %v1713_v12  ;;  %15159 = vst [vmem:[#allocation149_spill] sm:$0xff] %v11619_v60  ;;  %v736_v58 = vld [vmem:[%s14792_s7 + $0xe0] sm:$0xff]  ;;  %v738_v12 = vld [vmem:[%s14792_s7 + $0xf0] sm:$0xff]  ;;  %v743_v31 = vld [vmem:[%s14792_s7 + $0x118] sm:$0xff] }
 0x218   : > { %8961 = vmatpush1.bf16.msra.mxu1 %v11590_v21  ;;  %7929 = vmatprep.mubr.msk.f32.mxu1 %vm9843_vm0, %v15147_v30  ;;  %v11646_v27 = vpack.c.bf16 %v738_v12, %v736_v58  ;;  %v11649_v11 = vpack.c.bf16 %v743_v31, %v741_v38  ;;  %v742_v43 = vld [vmem:[%s14792_s7 + $0x110] sm:$0xff]  ;;  %v747_v58 = vld [vmem:[%s14792_s7 + $0x138] sm:$0xff]  ;;  %v11666_v38 = vsub.s32 0, %v1249_v5 }
 0x219   : > { %v1714_v53 = vmul.f32 %v11613_v56, %v11613_v56  ;;  %8963 = vmatprep.subr.bf16.mxu1 %v11595_v55  ;;  %v11664_v12 = vpack.c.bf16 %v742_v43, %v740_v57  ;;  %v11692_v43 = vadd.f32 %v11451_v4, %v11604_v9 }
 0x21a   : > { %15161 = vst [vmem:[#allocation151_spill] sm:$0xff] %v11646_v27  ;;  %15162 = vst [vmem:[#allocation152_spill] sm:$0xff] %v11649_v11  ;;  %v11681_v57 = vrot.slane %v707_v51, %v11666_v38 }
 0x21b   : > { %7930 = vmatmul.mubr.msk.f32.gmra.mrb[54].mxu1 %vm1579_vm1, %v1714_v53  ;;  %v745_v53 = vld [vmem:[%s14792_s7 + $0x128] sm:$0xff]  ;;  %15163 = vst [vmem:[#allocation153_spill] sm:$0xff] %v11664_v12 }
 0x21c   : > { %8965 = vmatpush1.bf16.msra.mxu1 %v11619_v60  ;;  %6684 = vmatprep.mubr.msk.f32.mxu1 %vm1876_vm2, %v11634_v25  ;;  %v11669_v31 = vpack.c.bf16 %v747_v58, %v745_v53  ;;  %15166 = vst [vmem:[#allocation156_spill] sm:$0xff] %v11681_v57  ;;  %v11687_v5 = vadd.f32 %v11445_v49, %v11681_v57 }
 0x21d   : > { %8967 = vmatprep.subr.bf16.mxu1 %v11624_v37  ;;  %v11700_v20 = vadd.f32 %v11449_v41, %v11681_v57  ;;  %v11713_v49 = vadd.f32 %v11453_v46, %v11681_v57  ;;  %v11718_v41 = vadd.f32 %v11459_v2, %v11604_v9  ;;  %v11726_v4 = vadd.f32 %v11457_v28, %v11681_v57 }
 0x21e   : > { %15164 = vst [vmem:[#allocation154_spill] sm:$0xff] %v11669_v31  ;;  %v11731_v46 = vadd.f32 %v11463_v10, %v11604_v9  ;;  %v11739_v13 = vadd.f32 %v11461_v23, %v11681_v57  ;;  %v11744_v28 = vadd.f32 %v11467_v15, %v11604_v9  ;;  %v11752_v2 = vadd.f32 %v11465_v59, %v11681_v57 }
 0x21f   : > { %v11757_v23 = vadd.f32 %v11471_v50, %v11604_v9  ;;  %v11765_v10 = vadd.f32 %v11469_v18, %v11681_v57  ;;  %v11780_v57 = vld [vmem:[%s14793_s8] sm:$0x3]  ;;  %v12173_v9 = vld [vmem:[%s11927_s15 + $0xf0] sm:$0xff] }
 0x220   : > { %8969 = vmatpush1.bf16.msra.mxu1 %v11646_v27 }
 0x221   : > { %8971 = vmatprep.subr.bf16.mxu1 %v11649_v11 }
 0x224   : > { %8973 = vmatpush1.bf16.msra.mxu1 %v11664_v12 }
 0x225   : > { %8975 = vmatprep.subr.bf16.mxu1 %v11669_v31 }
 0x228   : > { %8977 = vmatpush1.bf16.msra.mxu1 %v11678_v14 }
 0x229   : > { %8979 = vmatprep.subr.bf16.mxu1 %v11442_v8 }
 0x22b   : > { %1963 = vmatmul.mubr.f32.vlgmr.msra.gmra.mrb[56].mxu1 %v11687_v5 }
 0x22c   : > { %6685 = vmatprep.mubr.msk.f32.mxu1 %vm1876_vm2, %v11692_v43  ;;  %8981 = vmatpush1.bf16.msra.mxu1 %v10898_v45 }
 0x22d   : > { %8983 = vmatprep.subr.bf16.mxu1 %v11484_v36 }
 0x22f   : > { %1969 = vmatmul.mubr.f32.gmra.mrb[58].mxu1 %v11700_v20 }
 0x230   : > { %6686 = vmatprep.mubr.msk.f32.mxu1 %vm1876_vm2, %v11705_v35  ;;  %8985 = vmatpush1.bf16.msra.mxu1 %v10932_v1 }
 0x231   : > { %8987 = vmatprep.subr.bf16.mxu1 %v11502_v47 }
 0x233   : > { %1975 = vmatmul.mubr.f32.gmra.mrb[60].mxu1 %v11713_v49 }
 0x234   : > { %6687 = vmatprep.mubr.msk.f32.mxu1 %vm1876_vm2, %v11718_v41  ;;  %8989 = vmatpush1.bf16.msra.mxu1 %v10982_v6 }
 0x235   : > { %8991 = vmatprep.subr.bf16.mxu1 %v11520_v19 }
 0x237   : > { %1981 = vmatmul.mubr.f32.gmra.mrb[62].mxu1 %v11726_v4 }
 0x238   : > { %6688 = vmatprep.mubr.msk.f32.mxu1 %vm1876_vm2, %v11731_v46  ;;  %8993 = vmatpush1.bf16.msra.mxu1 %v11032_v40 }
 0x239   : > { %8995 = vmatprep.subr.bf16.mxu1 %v11538_v24  ;;  %v2262_v24 = vld [vmem:[%s11927_s15 + $0x118] sm:$0xff] }
 0x23b   : > { %1987 = vmatmul.mubr.f32.gmra.mrb[64].mxu1 %v11739_v13 }
 0x23c   : > { %6689 = vmatprep.mubr.msk.f32.mxu1 %vm1876_vm2, %v11744_v28  ;;  %8997 = vmatpush1.bf16.msra.mxu1 %v11559_v44  ;;  %v2261_v44 = vld [vmem:[%s11927_s15 + $0x110] sm:$0xff] }
 0x23d   : > { %8999 = vmatprep.subr.bf16.mxu1 %v11564_v34  ;;  %v2260_v34 = vld [vmem:[%s11927_s15 + $0x108] sm:$0xff] }
 0x23f   : > { %1993 = vmatmul.mubr.f32.gmra.mrb[66].mxu1 %v11752_v2 }
 0x240   : > { %6690 = vmatprep.mubr.msk.f32.mxu1 %vm1876_vm2, %v11757_v23  ;;  %9001 = vmatpush1.bf16.msra.mxu1 %v11590_v21  ;;  %v2259_v21 = vld [vmem:[%s11927_s15 + $0x100] sm:$0xff] }
 0x241   : > { %9003 = vmatprep.subr.bf16.mxu1 %v11595_v55  ;;  %v12180_v55 = vld [vmem:[%s11927_s15 + $0xf8] sm:$0xff] }
 0x243   : > { %1999 = vmatmul.mubr.f32.gmra.mrb[68].mxu1 %v11765_v10 }
 0x244   : > { %9005 = vmatpush1.bf16.msra.mxu1 %v11619_v60  ;;  %v12166_v60 = vld [vmem:[%s11927_s15 + $0xe8] sm:$0xff] }
 0x245   : > { %9007 = vmatprep.subr.bf16.mxu1 %v11624_v37 }
 0x248   : > { %9009 = vmatpush1.bf16.msra.mxu1 %v11646_v27 }
 0x249   : > { %9011 = vmatprep.subr.bf16.mxu1 %v11649_v11 }
 0x24c   : > { %9013 = vmatpush1.bf16.msra.mxu1 %v11664_v12 }
 0x24d   : > { %9015 = vmatprep.subr.bf16.mxu1 %v11669_v31 }
 0x250   : > { %9017 = vmatpush1.bf16.msra.mxu1 %v11678_v14  ;;  %v11785_v14 = vld [vmem:[%s14794_s9] sm:$0x3] }
 0x251   : > { %9018 = vmatprep.subr.bf16.mxu1 %v15100_v22 }
 0x2d6   : > { %v1802_v59 = vpop.f32.mrb[42].mxu1 }
 0x2d7   : > { %v1803_v15 = vadd.f32 1e-05, %v1802_v59  ;;  %v7913_v18 = vpop.f32.mrb[43].mxu1  ;;  %v11789_v59 = vrot.slane %v11780_v57, %v11666_v38 }
 0x2d9   : > { %9536 = vrsqrt.f32 %v1803_v15 }
 0x2da   : > { %v1807_v50 = vpop.f32.mrb[44].mxu1 }
 0x2db   : > { %v1808_v51 = vadd.f32 1e-05, %v1807_v50  ;;  %v7916_v53 = vpop.f32.mrb[45].mxu1 }
 0x2dc   : > { %v11794_v53 = vrot.slane %v11785_v14, %v11666_v38 }
 0x2dd   : > { %9538 = vrsqrt.f32 %v1808_v51 }
 0x2de   : > { %v1812_v58 = vpop.f32.mrb[46].mxu1 }
 0x2df   : > { %v1813_v31 = vadd.f32 1e-05, %v1812_v58  ;;  %v7919_v12 = vpop.f32.mrb[47].mxu1 }
 0x2e1   : > { %9540 = vrsqrt.f32 %v1813_v31 }
 0x2e2   : > { %v1817_v15 = vpop.f32.mrb[48].mxu1 }
 0x2e3   : > { %v9537_v18 = vpop.eup %9536  ;;  %v1818_v50 = vadd.f32 1e-05, %v1817_v15  ;;  %v7922_v51 = vpop.f32.mrb[49].mxu1 }
 0x2e4   : > { %v1843_v12 = vmul.f32 %v9537_v18, %v11480_v42 }
 0x2e5   : > { %9542 = vrsqrt.f32 %v1818_v50 }
 0x2e6   : > { %v1822_v58 = vpop.f32.mrb[50].mxu1  ;;  %v1856_v11 = vmul.f32 %v11789_v59, %v1843_v12 }
 0x2e7   : > { %v9539_v31 = vpop.eup %9538  ;;  %v1823_v27 = vadd.f32 1e-05, %v1822_v58  ;;  %v7925_v15 = vpop.f32.mrb[51].mxu1 }
 0x2e8   : > { %v1869_v51 = vadd.f32 %v11794_v53, %v1856_v11  ;;  %v1844_v38 = vmul.f32 %v9539_v31, %v11493_v63 }
 0x2e9   : > { %9544 = vrsqrt.f32 %v1823_v27 }
 0x2ea   : > { %3499 = vrot.lane.b32.xlu0 %v1869_v51, %s9845_s28  ;;  %3484 = vst.msk [vmem:[%s11801_s14] sm:$0xff] %vm1876_vm2, %v1869_v51  ;;  %v1827_v42 = vpop.f32.mrb[52].mxu1  ;;  %v1857_v18 = vmul.f32 %v11789_v59, %v1844_v38 }
 0x2eb   : > { %v9541_v50 = vpop.eup %9540  ;;  %v1828_v12 = vadd.f32 1e-05, %v1827_v42  ;;  %v7928_v37 = vpop.f32.mrb[53].mxu1 }
 0x2ec   : > { %v1870_v58 = vadd.f32 %v11794_v53, %v1857_v18  ;;  %v1845_v15 = vmul.f32 %v9541_v50, %v11511_v32 }
 0x2ed   : > { %9546 = vrsqrt.f32 %v1828_v12 }
 0x2ee   : > { %3501 = vrot.lane.b32.xlu0 %v1870_v58, %s9845_s28  ;;  %3485 = vst.msk [vmem:[%s11801_s14 + $0x8] sm:$0xff] %vm1876_vm2, %v1870_v58  ;;  %v1832_v63 = vpop.f32.mrb[54].mxu1  ;;  %v1858_v27 = vmul.f32 %v11789_v59, %v1845_v15 }
 0x2ef   : > { %v9543_v11 = vpop.eup %9542  ;;  %v1833_v31 = vadd.f32 1e-05, %v1832_v63  ;;  %v7931_v51 = vpop.f32.mrb[55].mxu1 }
 0x2f0   : > { %v1871_v38 = vadd.f32 %v11794_v53, %v1858_v27  ;;  %v1846_v37 = vmul.f32 %v9543_v11, %v11529_v61 }
 0x2f1   : > { %9548 = vrsqrt.f32 %v1833_v31 }
 0x2f2   : > { %3503 = vrot.lane.b32.xlu1 %v1871_v38, %s9845_s28  ;;  %3486 = vst.msk [vmem:[%s11801_s14 + $0x10] sm:$0xff] %vm1876_vm2, %v1871_v38  ;;  %v1859_v32 = vmul.f32 %v11789_v59, %v1846_v37 }
 0x2f3   : > { %v9545_v42 = vpop.eup %9544 }
 0x2f4   : > { %v1872_v18 = vadd.f32 %v11794_v53, %v1859_v32  ;;  %v1847_v50 = vmul.f32 %v9545_v42, %v11553_v54 }
 0x2f6   : > { %3505 = vrot.lane.b32.xlu1 %v1872_v18, %s9845_s28  ;;  %3487 = vst.msk [vmem:[%s11801_s14 + $0x18] sm:$0xff] %vm1876_vm2, %v1872_v18  ;;  %v1860_v12 = vmul.f32 %v11789_v59, %v1847_v50 }
 0x2f7   : > { %v9547_v61 = vpop.eup %9546 }
 0x2f8   : > { %v1873_v58 = vadd.f32 %v11794_v53, %v1860_v12  ;;  %v1848_v15 = vmul.f32 %v9547_v61, %v11584_v29 }
 0x2fa   : > { %3507 = vrot.lane.b32.xlu0 %v1873_v58, %s9845_s28  ;;  %3488 = vst.msk [vmem:[%s11801_s14 + $0x20] sm:$0xff] %vm1876_vm2, %v1873_v58  ;;  %v1861_v63 = vmul.f32 %v11789_v59, %v1848_v15 }
 0x2fb   : > { %v9549_v27 = vpop.eup %9548 }
 0x2fc   : > { %v1874_v54 = vadd.f32 %v11794_v53, %v1861_v63  ;;  %v1849_v11 = vmul.f32 %v9549_v27, %v11613_v56 }
 0x2fe   : > { %v1964_v31 = vpop.f32.mrb[56].mxu1  ;;  %3509 = vrot.lane.b32.xlu1 %v1874_v54, %s9845_s28  ;;  %3489 = vst.msk [vmem:[%s11801_s14 + $0x28] sm:$0xff] %vm1876_vm2, %v1874_v54  ;;  %v1862_v51 = vmul.f32 %v11789_v59, %v1849_v11 }
 0x2ff   : > { %v11840_v29 = vsub.f32 %v11687_v5, %v1964_v31  ;;  %v1966_v38 = vpop.f32.mrb[57].mxu1 }
 0x300   : > { %v11843_v37 = vsub.f32 %v11634_v25, %v1966_v38  ;;  %v1875_v32 = vadd.f32 %v11794_v53, %v1862_v51 }
 0x301   : > { %v2019_v18 = vmul.f32 %v11840_v29, %v11840_v29 }
 0x302   : > { %v2020_v56 = vmul.f32 %v11843_v37, %v11843_v37  ;;  %v1970_v42 = vpop.f32.mrb[58].mxu1  ;;  %3511 = vrot.lane.b32.xlu0 %v1875_v32, %s9845_s28  ;;  %3491 = vst.msk [vmem:[%s11801_s14 + $0x30] sm:$0x1] %vm3490_vm3, %v1875_v32 }
 0x303   : > { %v11854_v5 = vsub.f32 %v11700_v20, %v1970_v42  ;;  %v1972_v50 = vpop.f32.mrb[59].mxu1 }
 0x304   : > { %v11857_v25 = vsub.f32 %v11692_v43, %v1972_v50  ;;  %6691 = vmatprep.mubr.msk.f32.mxu1 %vm1876_vm2, %v2020_v56 }
 0x305   : > { %2119 = vmatmul.mubr.f32.vlgmr.msra.gmra.mrb[70].mxu1 %v2019_v18  ;;  %v2021_v20 = vmul.f32 %v11854_v5, %v11854_v5 }
 0x306   : > { %v2022_v12 = vmul.f32 %v11857_v25, %v11857_v25  ;;  %9020 = vmatpush3.bf16.msra.mxu1 %v10898_v45  ;;  %v1976_v61 = vpop.f32.mrb[60].mxu1 }
 0x307   : > { %v11864_v58 = vsub.f32 %v11713_v49, %v1976_v61  ;;  %v1978_v15 = vpop.f32.mrb[61].mxu1  ;;  %9021 = vmatprep.subr.bf16.mxu1 %v15100_v22 }
 0x308   : > { %v11870_v43 = vsub.f32 %v11705_v35, %v1978_v15  ;;  %6692 = vmatprep.mubr.msk.f32.mxu1 %vm1876_vm2, %v2022_v12 }
 0x309   : > { %2125 = vmatmul.mubr.f32.gmra.mrb[72].mxu1 %v2021_v20  ;;  %v2023_v11 = vmul.f32 %v11864_v58, %v11864_v58 }
 0x30a   : > { %v2024_v63 = vmul.f32 %v11870_v43, %v11870_v43  ;;  %v1982_v27 = vpop.f32.mrb[62].mxu1  ;;  %9023 = vmatpush3.bf16.msra.mxu1 %v10932_v1 }
 0x30b   : > { %v11877_v49 = vsub.f32 %v11726_v4, %v1982_v27  ;;  %v1984_v54 = vpop.f32.mrb[63].mxu1  ;;  %9031 = vmatprep.subr.bf16.mxu1 %v9920_v3  ;;  %v11949_v27 = vld [vmem:[%s11927_s15 + $0x10] sm:$0xff] }
 0x30c   : > { %v11883_v35 = vsub.f32 %v11718_v41, %v1984_v54  ;;  %6693 = vmatprep.mubr.msk.f32.mxu1 %vm1876_vm2, %v2024_v63  ;;  %v15171_v54 = vld [vmem:[#allocation20_spill] sm:$0xff] }
 0x30d   : > { %2131 = vmatmul.mubr.f32.gmra.mrb[74].mxu1 %v2023_v11  ;;  %v2025_v32 = vmul.f32 %v11877_v49, %v11877_v49  ;;  %v15172_v11 = vld [vmem:[#allocation22_spill] sm:$0xff] }
 0x30e   : > { %v2026_v31 = vmul.f32 %v11883_v35, %v11883_v35  ;;  %v1988_v51 = vpop.f32.mrb[64].mxu1 }
 0x30f   : > { %v11889_v38 = vsub.f32 %v11739_v13, %v1988_v51  ;;  %v1990_v4 = vpop.f32.mrb[65].mxu1  ;;  %v12019_v51 = vld [vmem:[%s11927_s15 + $0x50] sm:$0xff] }
 0x310   : > { %v11894_v56 = vsub.f32 %v11731_v46, %v1990_v4  ;;  %6694 = vmatprep.mubr.msk.f32.mxu1 %vm1876_vm2, %v2026_v31  ;;  %v12012_v31 = vld [vmem:[%s11927_s15 + $0x48] sm:$0xff]  ;;  %v12026_v4 = vld [vmem:[%s11927_s15 + $0x58] sm:$0xff] }
 0x311   : > { %2137 = vmatmul.mubr.f32.gmra.mrb[76].mxu1 %v2025_v32  ;;  %v2027_v18 = vmul.f32 %v11889_v38, %v11889_v38  ;;  %v12033_v32 = vld [vmem:[%s11927_s15 + $0x60] sm:$0xff] }
 0x312   : > { %v2028_v3 = vmul.f32 %v11894_v56, %v11894_v56  ;;  %v1994_v41 = vpop.f32.mrb[66].mxu1 }
 0x313   : > { %v11900_v42 = vsub.f32 %v11752_v2, %v1994_v41  ;;  %v1996_v13 = vpop.f32.mrb[67].mxu1  ;;  %v12047_v41 = vld [vmem:[%s11927_s15 + $0x70] sm:$0xff] }
 0x314   : > { %v11905_v50 = vsub.f32 %v11744_v28, %v1996_v13  ;;  %6695 = vmatprep.mubr.msk.f32.mxu1 %vm1876_vm2, %v2028_v3  ;;  %v12040_v3 = vld [vmem:[%s11927_s15 + $0x68] sm:$0xff]  ;;  %v12054_v13 = vld [vmem:[%s11927_s15 + $0x78] sm:$0xff] }
 0x315   : > { %2143 = vmatmul.mubr.f32.gmra.mrb[78].mxu1 %v2027_v18  ;;  %v2029_v61 = vmul.f32 %v11900_v42, %v11900_v42 }
 0x316   : > { %v2030_v46 = vmul.f32 %v11905_v50, %v11905_v50  ;;  %v2000_v12 = vpop.f32.mrb[68].mxu1 }
 0x317   : > { %v11913_v2 = vsub.f32 %v11765_v10, %v2000_v12  ;;  %v2002_v15 = vpop.f32.mrb[69].mxu1  ;;  %v11940_v10 = vld [vmem:[%s11927_s15 + $0x8] sm:$0xff] }
 0x318   : > { %v11917_v20 = vsub.f32 %v11757_v23, %v2002_v15  ;;  %6696 = vmatprep.mubr.msk.f32.mxu1 %vm1876_vm2, %v2030_v46  ;;  %v11933_v23 = vld [vmem:[%s11927_s15] sm:$0xff] }
 0x319   : > { %2149 = vmatmul.mubr.f32.gmra.mrb[80].mxu1 %v2029_v61  ;;  %v2031_v63 = vmul.f32 %v11913_v2, %v11913_v2  ;;  %v12063_v46 = vld [vmem:[%s11927_s15 + $0x80] sm:$0xff]  ;;  %v12072_v61 = vld [vmem:[%s11927_s15 + $0x88] sm:$0xff] }
 0x31a   : > { %v2032_v28 = vmul.f32 %v11917_v20, %v11917_v20 }
 0x31c   : > { %6697 = vmatprep.mubr.msk.f32.mxu1 %vm1876_vm2, %v2032_v28  ;;  %v12081_v28 = vld [vmem:[%s11927_s15 + $0x90] sm:$0xff] }
 0x31d   : > { %2155 = vmatmul.mubr.f32.gmra.mrb[82].mxu1 %v2031_v63 }
 0x31e   : > { %7940 = vmatprep.mubr.msk.f32.mxu1 %vm9843_vm0, %v15147_v30 }
 0x321   : > { %7941 = vmatmul.mubr.msk.f32.vlgmr.msra.gmra.mrb[84].mxu1 %vm1876_vm2, %v11933_v23 }
 0x322   : > { %7943 = vmatprep.mubr.msk.f32.mxu1 %vm9843_vm0, %v15147_v30  ;;  %9033 = vmatpush3.bf16.msra.mxu1 %v9931_v7  ;;  %v11958_v7 = vld [vmem:[%s11927_s15 + $0x18] sm:$0xff] }
 0x323   : > { %9035 = vmatprep.subr.bf16.mxu1 %v9960_v16  ;;  %v11967_v16 = vld [vmem:[%s11927_s15 + $0x20] sm:$0xff] }
 0x325   : > { %7944 = vmatmul.mubr.msk.f32.gmra.mrb[86].mxu1 %vm1876_vm2, %v11940_v10 }
 0x326   : > { %7946 = vmatprep.mubr.msk.f32.mxu1 %vm9843_vm0, %v15147_v30  ;;  %9037 = vmatpush3.bf16.msra.mxu1 %v9962_v17  ;;  %v11976_v17 = vld [vmem:[%s11927_s15 + $0x28] sm:$0xff] }
 0x327   : > { %9039 = vmatprep.subr.bf16.mxu1 %v9988_v26  ;;  %v11985_v26 = vld [vmem:[%s11927_s15 + $0x30] sm:$0xff] }
 0x329   : > { %7947 = vmatmul.mubr.msk.f32.gmra.mrb[88].mxu1 %vm1876_vm2, %v11949_v27 }
 0x32a   : > { %7949 = vmatprep.mubr.msk.f32.mxu1 %vm9843_vm0, %v15147_v30  ;;  %9041 = vmatpush3.bf16.msra.mxu1 %v10011_v33  ;;  %v15167_v33 = vld [vmem:[#allocation12_spill] sm:$0xff] }
 0x32b   : > { %9043 = vmatprep.subr.bf16.mxu1 %v10028_v39  ;;  %v15168_v39 = vld [vmem:[#allocation14_spill] sm:$0xff]  ;;  %15173 = vst [vmem:[#allocation12_spill] sm:$0xff] %v12173_v9 }
 0x32c   : > { %15174 = vst [vmem:[#allocation14_spill] sm:$0xff] %v12180_v55 }
 0x32d   : > { %7950 = vmatmul.mubr.msk.f32.gmra.mrb[90].mxu1 %vm1876_vm2, %v11958_v7 }
 0x32e   : > { %7952 = vmatprep.mubr.msk.f32.mxu1 %vm9843_vm0, %v15147_v30  ;;  %9045 = vmatpush3.bf16.msra.mxu1 %v10060_v48  ;;  %v11994_v48 = vld [vmem:[%s11927_s15 + $0x38] sm:$0xff] }
 0x32f   : > { %9047 = vmatprep.subr.bf16.mxu1 %v10072_v52  ;;  %v15169_v52 = vld [vmem:[#allocation16_spill] sm:$0xff] }
 0x331   : > { %7953 = vmatmul.mubr.msk.f32.gmra.mrb[92].mxu1 %vm1876_vm2, %v11967_v16 }
 0x332   : > { %7955 = vmatprep.mubr.msk.f32.mxu1 %vm9843_vm0, %v15147_v30  ;;  %9049 = vmatpush3.bf16.msra.mxu1 %v10103_v62  ;;  %v15170_v62 = vld [vmem:[#allocation18_spill] sm:$0xff] }
 0x333   : > { %9051 = vmatprep.subr.bf16.mxu1 %v10109_v0  ;;  %v12003_v0 = vld [vmem:[%s11927_s15 + $0x40] sm:$0xff] }
 0x335   : > { %7956 = vmatmul.mubr.msk.f32.gmra.mrb[94].mxu1 %vm1876_vm2, %v11976_v17 }
 0x336   : > { %7958 = vmatprep.mubr.msk.f32.mxu1 %vm9843_vm0, %v15147_v30  ;;  %9053 = vmatpush3.bf16.msra.mxu1 %v15167_v33  ;;  %v12090_v33 = vld [vmem:[%s11927_s15 + $0x98] sm:$0xff] }
 0x337   : > { %9055 = vmatprep.subr.bf16.mxu1 %v15168_v39 }
 0x339   : > { %7959 = vmatmul.mubr.msk.f32.gmra.mrb[96].mxu1 %vm1876_vm2, %v11985_v26 }
 0x33a   : > { %7961 = vmatprep.mubr.msk.f32.mxu1 %vm9843_vm0, %v15147_v30  ;;  %9057 = vmatpush3.bf16.msra.mxu1 %v15169_v52  ;;  %v12099_v52 = vld [vmem:[%s11927_s15 + $0xa0] sm:$0xff] }
 0x33b   : > { %9059 = vmatprep.subr.bf16.mxu1 %v15170_v62 }
 0x33d   : > { %7962 = vmatmul.mubr.msk.f32.gmra.mrb[98].mxu1 %vm1876_vm2, %v11994_v48 }
 0x33e   : > { %7964 = vmatprep.mubr.msk.f32.mxu1 %vm9843_vm0, %v15147_v30  ;;  %9061 = vmatpush3.bf16.msra.mxu1 %v15171_v54  ;;  %v12108_v54 = vld [vmem:[%s11927_s15 + $0xa8] sm:$0xff] }
 0x33f   : > { %9095 = vmatprep.subr.bf16.mxu1 %v15172_v11 }
 0x341   : > { %7965 = vmatmul.mubr.msk.f32.gmra.mrb[100].mxu1 %vm1876_vm2, %v12003_v0 }
 0x342   : > { %7967 = vmatprep.mubr.msk.f32.mxu1 %vm9843_vm0, %v15147_v30 }
 0x345   : > { %7968 = vmatmul.mubr.msk.f32.gmra.mrb[102].mxu1 %vm1876_vm2, %v12012_v31 }
 0x346   : > { %7970 = vmatprep.mubr.msk.f32.mxu1 %vm9843_vm0, %v15147_v30 }
 0x349   : > { %7971 = vmatmul.mubr.msk.f32.gmra.mrb[104].mxu1 %vm1876_vm2, %v12019_v51 }
 0x34a   : > { %7973 = vmatprep.mubr.msk.f32.mxu1 %vm9843_vm0, %v15147_v30 }
 0x34d   : > { %7974 = vmatmul.mubr.msk.f32.gmra.mrb[106].mxu1 %vm1876_vm2, %v12026_v4 }
 0x34e   : > { %7976 = vmatprep.mubr.msk.f32.mxu1 %vm9843_vm0, %v15147_v30 }
 0x351   : > { %7977 = vmatmul.mubr.msk.f32.gmra.mrb[108].mxu1 %vm1876_vm2, %v12033_v32 }
 0x352   : > { %7979 = vmatprep.mubr.msk.f32.mxu1 %vm9843_vm0, %v15147_v30 }
 0x355   : > { %7980 = vmatmul.mubr.msk.f32.gmra.mrb[110].mxu1 %vm1876_vm2, %v12040_v3 }
 0x356   : > { %7982 = vmatprep.mubr.msk.f32.mxu1 %vm9843_vm0, %v15147_v30 }
 0x359   : > { %7983 = vmatmul.mubr.msk.f32.gmra.mrb[112].mxu1 %vm1876_vm2, %v12047_v41 }
 0x35a   : > { %7985 = vmatprep.mubr.msk.f32.mxu1 %vm9843_vm0, %v15147_v30 }
 0x35c   : > { %v3500_v18 = vpop.permute.xlu0 %3499 }
 0x35d   : > { %3520 = vst.msk [vmem:[%s11801_s14 + $0x31] sm:$0xff] %vm1876_vm2, %v3500_v18  ;;  %7986 = vmatmul.mubr.msk.f32.gmra.mrb[114].mxu1 %vm1876_vm2, %v12054_v13  ;;  %v12117_v18 = vld [vmem:[%s11927_s15 + $0xb0] sm:$0xff] }
 0x35e   : > { %7988 = vmatprep.mubr.msk.f32.mxu1 %vm9843_vm0, %v15147_v30 }
 0x360   : > { %v3502_v12 = vpop.permute.xlu0 %3501 }
 0x361   : > { %3521 = vst.msk [vmem:[%s11801_s14 + $0x39] sm:$0xff] %vm1876_vm2, %v3502_v12  ;;  %7989 = vmatmul.mubr.msk.f32.gmra.mrb[116].mxu1 %vm1876_vm2, %v12063_v46  ;;  %v12124_v12 = vld [vmem:[%s11927_s15 + $0xb8] sm:$0xff] }
 0x362   : > { %7991 = vmatprep.mubr.msk.f32.mxu1 %vm9843_vm0, %v15147_v30 }
 0x364   : > { %v3504_v15 = vpop.permute.xlu1 %3503 }
 0x365   : > { %3522 = vst.msk [vmem:[%s11801_s14 + $0x41] sm:$0xff] %vm1876_vm2, %v3504_v15  ;;  %7992 = vmatmul.mubr.msk.f32.gmra.mrb[118].mxu1 %vm1876_vm2, %v12072_v61  ;;  %v12131_v15 = vld [vmem:[%s11927_s15 + $0xc0] sm:$0xff] }
 0x366   : > { %7994 = vmatprep.mubr.msk.f32.mxu1 %vm9843_vm0, %v15147_v30 }
 0x368   : > { %v3506_v63 = vpop.permute.xlu1 %3505 }
 0x369   : > { %3523 = vst.msk [vmem:[%s11801_s14 + $0x49] sm:$0xff] %vm1876_vm2, %v3506_v63  ;;  %7995 = vmatmul.mubr.msk.f32.gmra.mrb[120].mxu1 %vm1876_vm2, %v12081_v28  ;;  %v12138_v63 = vld [vmem:[%s11927_s15 + $0xc8] sm:$0xff] }
 0x36a   : > { %7997 = vmatprep.mubr.msk.f32.mxu1 %vm9843_vm0, %v15147_v30 }
 0x36c   : > { %v3508_v39 = vpop.permute.xlu0 %3507 }
 0x36d   : > { %3524 = vst.msk [vmem:[%s11801_s14 + $0x51] sm:$0xff] %vm1876_vm2, %v3508_v39  ;;  %7998 = vmatmul.mubr.msk.f32.gmra.mrb[122].mxu1 %vm1876_vm2, %v12090_v33  ;;  %v12145_v39 = vld [vmem:[%s11927_s15 + $0xd0] sm:$0xff] }
 0x36e   : > { %8000 = vmatprep.mubr.msk.f32.mxu1 %vm9843_vm0, %v15147_v30 }
 0x370   : > { %v3510_v62 = vpop.permute.xlu1 %3509 }
 0x371   : > { %3525 = vst.msk [vmem:[%s11801_s14 + $0x59] sm:$0xff] %vm1876_vm2, %v3510_v62  ;;  %8001 = vmatmul.mubr.msk.f32.gmra.mrb[124].mxu1 %vm1876_vm2, %v12099_v52  ;;  %v12152_v62 = vld [vmem:[%s11927_s15 + $0xd8] sm:$0xff] }
 0x372   : > { %8003 = vmatprep.mubr.msk.f32.mxu1 %vm9843_vm0, %v15147_v30 }
 0x374   : > { %v3512_v11 = vpop.permute.xlu0 %3511 }
 0x375   : > { %3526 = vst.msk [vmem:[%s11801_s14 + $0x61] sm:$0x1] %vm3490_vm3, %v3512_v11  ;;  %8004 = vmatmul.mubr.msk.f32.gmra.mrb[126].mxu1 %vm1876_vm2, %v12108_v54  ;;  %v12159_v11 = vld [vmem:[%s11927_s15 + $0xe0] sm:$0xff] }
 0x376   : > { %8006 = vmatprep.mubr.msk.f32.mxu1 %vm9843_vm0, %v15147_v30 }
 0x379   : > { %8007 = vmatmul.mubr.msk.f32.gmra.mrb[128].mxu1 %vm1876_vm2, %v12117_v18 }
 0x37a   : > { %8009 = vmatprep.mubr.msk.f32.mxu1 %vm9843_vm0, %v15147_v30 }
 0x37d   : > { %8010 = vmatmul.mubr.msk.f32.gmra.mrb[130].mxu1 %vm1876_vm2, %v12124_v12 }
 0x37e   : > { %8012 = vmatprep.mubr.msk.f32.mxu1 %vm9843_vm0, %v15147_v30 }
 0x381   : > { %8013 = vmatmul.mubr.msk.f32.gmra.mrb[132].mxu1 %vm1876_vm2, %v12131_v15 }
 0x382   : > { %8015 = vmatprep.mubr.msk.f32.mxu1 %vm9843_vm0, %v15147_v30 }
 0x385   : > { %8016 = vmatmul.mubr.msk.f32.gmra.mrb[134].mxu1 %vm1876_vm2, %v12138_v63 }
 0x386   : > { %8018 = vmatprep.mubr.msk.f32.mxu1 %vm9843_vm0, %v15147_v30 }
 0x389   : > { %8019 = vmatmul.mubr.msk.f32.gmra.mrb[136].mxu1 %vm1876_vm2, %v12145_v39 }
 0x38a   : > { %8021 = vmatprep.mubr.msk.f32.mxu1 %vm9843_vm0, %v15147_v30 }
 0x38d   : > { %8022 = vmatmul.mubr.msk.f32.gmra.mrb[138].mxu1 %vm1876_vm2, %v12152_v62 }
 0x38e   : > { %8024 = vmatprep.mubr.msk.f32.mxu1 %vm9843_vm0, %v15147_v30 }
 0x391   : > { %8025 = vmatmul.mubr.msk.f32.gmra.mrb[140].mxu1 %vm1876_vm2, %v12159_v11 }
 0x392   : > { %8027 = vmatprep.mubr.msk.f32.mxu1 %vm9843_vm0, %v15147_v30 }
 0x395   : > { %8028 = vmatmul.mubr.msk.f32.gmra.mrb[142].mxu1 %vm1876_vm2, %v12166_v60 }
 0x396   : > { %8030 = vmatprep.mubr.msk.f32.mxu1 %vm9843_vm0, %v15147_v30 }
 0x399   : > { %8031 = vmatmul.mubr.msk.f32.gmra.mrb[144].mxu1 %vm1876_vm2, %v12173_v9 }
 0x39a   : > { %8033 = vmatprep.mubr.msk.f32.mxu1 %vm9843_vm0, %v15147_v30 }
 0x39d   : > { %8034 = vmatmul.mubr.msk.f32.gmra.mrb[146].mxu1 %vm1876_vm2, %v12180_v55 }
 0x39e   : > { %8036 = vmatprep.mubr.msk.f32.mxu1 %vm9843_vm0, %v15147_v30 }
 0x3a1   : > { %8037 = vmatmul.mubr.msk.f32.gmra.mrb[148].mxu1 %vm1876_vm2, %v2259_v21  ;;  %v2263_v21 = vld [vmem:[%s11927_s15 + $0x120] sm:$0xff] }
 0x3a2   : > { %8039 = vmatprep.mubr.msk.f32.mxu1 %vm9843_vm0, %v15147_v30 }
 0x3a5   : > { %8040 = vmatmul.mubr.msk.f32.gmra.mrb[150].mxu1 %vm1876_vm2, %v2260_v34  ;;  %v2264_v34 = vld [vmem:[%s11927_s15 + $0x128] sm:$0xff] }
 0x3a6   : > { %8042 = vmatprep.mubr.msk.f32.mxu1 %vm9843_vm0, %v15147_v30 }
 0x3a9   : > { %8043 = vmatmul.mubr.msk.f32.gmra.mrb[152].mxu1 %vm1876_vm2, %v2261_v44  ;;  %v2265_v44 = vld [vmem:[%s11927_s15 + $0x130] sm:$0xff] }
 0x3aa   : > { %8045 = vmatprep.mubr.msk.f32.mxu1 %vm9843_vm0, %v15147_v30 }
 0x3ad   : > { %8046 = vmatmul.mubr.msk.f32.gmra.mrb[154].mxu1 %vm1876_vm2, %v2262_v24  ;;  %v2266_v24 = vld [vmem:[%s11927_s15 + $0x138] sm:$0xff] }
 0x3ae   : > { %8048 = vmatprep.mubr.msk.f32.mxu1 %vm9843_vm0, %v15147_v30 }
 0x3b1   : > { %8049 = vmatmul.mubr.msk.f32.gmra.mrb[156].mxu1 %vm1876_vm2, %v2263_v21  ;;  %v2267_v21 = vld [vmem:[%s11927_s15 + $0x140] sm:$0xff] }
 0x3b2   : > { %8051 = vmatprep.mubr.msk.f32.mxu1 %vm9843_vm0, %v15147_v30 }
 0x3b5   : > { %8052 = vmatmul.mubr.msk.f32.gmra.mrb[158].mxu1 %vm1876_vm2, %v2264_v34  ;;  %v2268_v34 = vld [vmem:[%s11927_s15 + $0x148] sm:$0xff] }
 0x3b6   : > { %8054 = vmatprep.mubr.msk.f32.mxu1 %vm9843_vm0, %v15147_v30 }
 0x3b9   : > { %8055 = vmatmul.mubr.msk.f32.gmra.mrb[160].mxu1 %vm1876_vm2, %v2265_v44  ;;  %v2269_v44 = vld [vmem:[%s11927_s15 + $0x150] sm:$0xff] }
 0x3ba   : > { %8057 = vmatprep.mubr.msk.f32.mxu1 %vm9843_vm0, %v15147_v30 }
 0x3bd   : > { %8058 = vmatmul.mubr.msk.f32.gmra.mrb[162].mxu1 %vm1876_vm2, %v2266_v24  ;;  %v2270_v24 = vld [vmem:[%s11927_s15 + $0x158] sm:$0xff] }
 0x3be   : > { %8060 = vmatprep.mubr.msk.f32.mxu1 %vm9843_vm0, %v15147_v30 }
 0x3c1   : > { %8061 = vmatmul.mubr.msk.f32.gmra.mrb[164].mxu1 %vm1876_vm2, %v2267_v21  ;;  %v2271_v21 = vld [vmem:[%s11927_s15 + $0x160] sm:$0xff] }
 0x3c2   : > { %8063 = vmatprep.mubr.msk.f32.mxu1 %vm9843_vm0, %v15147_v30 }
 0x3c5   : > { %8064 = vmatmul.mubr.msk.f32.gmra.mrb[166].mxu1 %vm1876_vm2, %v2268_v34  ;;  %v2272_v34 = vld [vmem:[%s11927_s15 + $0x168] sm:$0xff] }
 0x3c6   : > { %8066 = vmatprep.mubr.msk.f32.mxu1 %vm9843_vm0, %v15147_v30 }
 0x3c9   : > { %8067 = vmatmul.mubr.msk.f32.gmra.mrb[168].mxu1 %vm1876_vm2, %v2269_v44  ;;  %v2273_v44 = vld [vmem:[%s11927_s15 + $0x170] sm:$0xff] }
 0x3ca   : > { %8069 = vmatprep.mubr.msk.f32.mxu1 %vm9843_vm0, %v15147_v30 }
 0x3cd   : > { %8070 = vmatmul.mubr.msk.f32.gmra.mrb[170].mxu1 %vm1876_vm2, %v2270_v24 }
 0x3ce   : > { %8072 = vmatprep.mubr.msk.f32.mxu1 %vm9843_vm0, %v15147_v30 }
 0x3d1   : > { %8073 = vmatmul.mubr.msk.f32.gmra.mrb[172].mxu1 %vm1876_vm2, %v2271_v21  ;;  %v2274_v21 = vld [vmem:[%s11927_s15 + $0x178] sm:$0xff] }
 0x3d2   : > { %8075 = vmatprep.mubr.msk.f32.mxu1 %vm9843_vm0, %v15147_v30 }
 0x3d5   : > { %8076 = vmatmul.mubr.msk.f32.gmra.mrb[174].mxu1 %vm1876_vm2, %v2272_v34 }
 0x3d6   : > { %8078 = vmatprep.mubr.msk.f32.mxu1 %vm9843_vm0, %v15147_v30 }
 0x3d8   : > { %v2120_v19 = vpop.f32.mrb[70].mxu1 }
 0x3d9   : > { %v2121_v47 = vadd.f32 1e-05, %v2120_v19  ;;  %v2122_v24 = vpop.f32.mrb[71].mxu1  ;;  %8079 = vmatmul.mubr.msk.f32.gmra.mrb[176].mxu1 %vm1876_vm2, %v2273_v44  ;;  %v2275_v19 = vld [vmem:[%s11927_s15 + $0x180] sm:$0xff] }
 0x3da   : > { %v2123_v36 = vadd.f32 1e-05, %v2122_v24  ;;  %8081 = vmatprep.mubr.msk.f32.mxu1 %vm9843_vm0, %v15147_v30 }
 0x3db   : > { %9550 = vrsqrt.f32 %v2121_v47  ;;  %v15175_v47 = vld [vmem:[#allocation145_spill] sm:$0xff] }
 0x3dc   : > { %9552 = vrsqrt.f32 %v2123_v36  ;;  %v2126_v8 = vpop.f32.mrb[72].mxu1 }
 0x3dd   : > { %v2127_v40 = vadd.f32 1e-05, %v2126_v8  ;;  %v2128_v34 = vpop.f32.mrb[73].mxu1  ;;  %8082 = vmatmul.mubr.msk.f32.gmra.mrb[178].mxu1 %vm1876_vm2, %v2274_v21  ;;  %v12254_v21 = vrot.slane %v11780_v57, %v15175_v47 }
 0x3de   : > { %v2129_v6 = vadd.f32 1e-05, %v2128_v34  ;;  %8084 = vmatprep.mubr.msk.f32.mxu1 %vm9843_vm0, %v15147_v30 }
 0x3df   : > { %9554 = vrsqrt.f32 %v2127_v40  ;;  %15176 = vst [vmem:[#allocation16_spill] sm:$0xff] %v12254_v21 }
 0x3e0   : > { %9556 = vrsqrt.f32 %v2129_v6  ;;  %v2132_v44 = vpop.f32.mrb[74].mxu1 }
 0x3e1   : > { %v2133_v24 = vadd.f32 1e-05, %v2132_v44  ;;  %v2134_v1 = vpop.f32.mrb[75].mxu1  ;;  %8085 = vmatmul.mubr.msk.f32.gmra.mrb[180].mxu1 %vm1876_vm2, %v2275_v19  ;;  %v12260_v19 = vrot.slane %v11785_v14, %v15175_v47 }
 0x3e2   : > { %v2135_v45 = vadd.f32 1e-05, %v2134_v1 }
 0x3e3   : > { %9558 = vrsqrt.f32 %v2133_v24  ;;  %15177 = vst [vmem:[#allocation18_spill] sm:$0xff] %v12260_v19 }
 0x3e4   : > { %9560 = vrsqrt.f32 %v2135_v45  ;;  %v2138_v36 = vpop.f32.mrb[76].mxu1 }
 0x3e5   : > { %v9551_v8 = vpop.eup %9550  ;;  %v2139_v34 = vadd.f32 1e-05, %v2138_v36  ;;  %v2140_v22 = vpop.f32.mrb[77].mxu1 }
 0x3e6   : > { %v9553_v55 = vpop.eup %9552  ;;  %v2141_v9 = vadd.f32 1e-05, %v2140_v22  ;;  %v2175_v6 = vmul.f32 %v9551_v8, %v11840_v29 }
 0x3e7   : > { %v2176_v40 = vmul.f32 %v9553_v55, %v11843_v37  ;;  %9562 = vrsqrt.f32 %v2139_v34 }
 0x3e8   : > { %9564 = vrsqrt.f32 %v2141_v9  ;;  %v2144_v1 = vpop.f32.mrb[78].mxu1  ;;  %v2194_v45 = vmul.f32 %v2175_v6, %v11789_v59 }
 0x3e9   : > { %v9555_v57 = vpop.eup %9554  ;;  %v2195_v44 = vmul.f32 %v12254_v21, %v2176_v40  ;;  %v2145_v24 = vadd.f32 1e-05, %v2144_v1  ;;  %v2146_v36 = vpop.f32.mrb[79].mxu1 }
 0x3ea   : > { %v9557_v22 = vpop.eup %9556  ;;  %v2147_v29 = vadd.f32 1e-05, %v2146_v36  ;;  %v2213_v55 = vadd.f32 %v2194_v45, %v11794_v53  ;;  %v2177_v37 = vmul.f32 %v9555_v57, %v11854_v5 }
 0x3eb   : > { %v2214_v14 = vadd.f32 %v12260_v19, %v2195_v44  ;;  %v2178_v9 = vmul.f32 %v9557_v22, %v11857_v25  ;;  %9566 = vrsqrt.f32 %v2145_v24 }
 0x3ec   : > { %9568 = vrsqrt.f32 %v2147_v29  ;;  %v2150_v8 = vpop.f32.mrb[80].mxu1  ;;  %3569 = vrot.lane.b32.xlu0 %v2213_v55, %s9846_s21  ;;  %3527 = vst.msk [vmem:[%s11801_s14 + $0x62] sm:$0xff] %vm1876_vm2, %v2213_v55  ;;  %3541 = vrot.lane.b32.xlu1 %v2213_v55, %s9845_s28  ;;  %v2196_v47 = vmul.f32 %v2177_v37, %v11789_v59 }
 0x3ed   : > { %v9559_v34 = vpop.eup %9558  ;;  %3625 = vst.msk [vmem:[%s11801_s14 + $0x126] sm:$0xff] %vm1876_vm2, %v2214_v14  ;;  %v2197_v5 = vmul.f32 %v12254_v21, %v2178_v9  ;;  %v2151_v6 = vadd.f32 1e-05, %v2150_v8  ;;  %v2152_v25 = vpop.f32.mrb[81].mxu1 }
 0x3ee   : > { %v9561_v40 = vpop.eup %9560  ;;  %v2153_v1 = vadd.f32 1e-05, %v2152_v25  ;;  %v2215_v45 = vadd.f32 %v2196_v47, %v11794_v53  ;;  %v2179_v57 = vmul.f32 %v9559_v34, %v11864_v58 }
 0x3ef   : > { %v2216_v44 = vadd.f32 %v12260_v19, %v2197_v5  ;;  %v2180_v24 = vmul.f32 %v9561_v40, %v11870_v43  ;;  %9570 = vrsqrt.f32 %v2151_v6 }
 0x3f0   : > { %9572 = vrsqrt.f32 %v2153_v1  ;;  %3528 = vst.msk [vmem:[%s11801_s14 + $0x6a] sm:$0xff] %vm1876_vm2, %v2215_v45  ;;  %3543 = vrot.lane.b32.xlu0 %v2215_v45, %s9845_s28  ;;  %3597 = vrot.lane.b32.xlu1 %v2213_v55, %s9847_s16  ;;  %v2156_v36 = vpop.f32.mrb[82].mxu1  ;;  %v2198_v22 = vmul.f32 %v2179_v57, %v11789_v59 }
 0x3f1   : > { %v9563_v29 = vpop.eup %9562  ;;  %3626 = vst.msk [vmem:[%s11801_s14 + $0x12e] sm:$0xff] %vm1876_vm2, %v2216_v44  ;;  %v2199_v58 = vmul.f32 %v12254_v21, %v2180_v24  ;;  %v2157_v37 = vadd.f32 1e-05, %v2156_v36  ;;  %v2158_v43 = vpop.f32.mrb[83].mxu1 }
 0x3f2   : > { %v9565_v14 = vpop.eup %9564  ;;  %v2159_v9 = vadd.f32 1e-05, %v2158_v43  ;;  %v2217_v8 = vadd.f32 %v2198_v22, %v11794_v53  ;;  %v2181_v47 = vmul.f32 %v9563_v29, %v11877_v49  ;;  %v15178_v43 = vld [vmem:[#allocation2_spill] sm:$0xff] }
 0x3f3   : > { %v2218_v55 = vadd.f32 %v12260_v19, %v2199_v58  ;;  %v2182_v34 = vmul.f32 %v9565_v14, %v11883_v35  ;;  %9574 = vrsqrt.f32 %v2157_v37 }
 0x3f4   : > { %9576 = vrsqrt.f32 %v2159_v9  ;;  %3599 = vrot.lane.b32.xlu0 %v2215_v45, %s9847_s16  ;;  %3571 = vrot.lane.b32.xlu1 %v2215_v45, %s9846_s21  ;;  %v2489_v5 = vpop.f32.mrb[84].mxu1  ;;  %3529 = vst.msk [vmem:[%s11801_s14 + $0x72] sm:$0xff] %vm1876_vm2, %v2217_v8  ;;  %v2200_v6 = vmul.f32 %v2181_v47, %v11789_v59 }
 0x3f5   : > { %v9567_v25 = vpop.eup %9566  ;;  %3627 = vst.msk [vmem:[%s11801_s14 + $0x136] sm:$0xff] %vm1876_vm2, %v2218_v55  ;;  %v2201_v49 = vmul.f32 %v12254_v21, %v2182_v34  ;;  %v12301_v35 = vsub.f32 %v11933_v23, %v2489_v5  ;;  %v7942_v40 = vpop.f32.mrb[85].mxu1  ;;  %v15179_v34 = vld [vmem:[#allocation3_spill] sm:$0xff] }
 0x3f6   : > { %v9569_v1 = vpop.eup %9568  ;;  %v2219_v57 = vadd.f32 %v2200_v6, %v11794_v53  ;;  %v2183_v45 = vmul.f32 %v9567_v25, %v11889_v38 }
 0x3f7   : > { %v2220_v44 = vadd.f32 %v12260_v19, %v2201_v49  ;;  %v2184_v24 = vmul.f32 %v9569_v1, %v11894_v56  ;;  %v2782_v36 = vmul.f32 %v12301_v35, %v12301_v35 }
 0x3f8   : > { %3573 = vrot.lane.b32.xlu0 %v2217_v8, %s9846_s21  ;;  %3545 = vrot.lane.b32.xlu1 %v2217_v8, %s9845_s28  ;;  %v2494_v22 = vpop.f32.mrb[86].mxu1  ;;  %3530 = vst.msk [vmem:[%s11801_s14 + $0x7a] sm:$0xff] %vm1876_vm2, %v2219_v57  ;;  %v2202_v23 = vmul.f32 %v2183_v45, %v11789_v59  ;;  %v15180_v45 = vld [vmem:[#allocation4_spill] sm:$0xff] }
 0x3f9   : > { %v9571_v29 = vpop.eup %9570  ;;  %3628 = vst.msk [vmem:[%s11801_s14 + $0x13e] sm:$0xff] %vm1876_vm2, %v2220_v44  ;;  %v2203_v38 = vmul.f32 %v12254_v21, %v2184_v24  ;;  %v12318_v56 = vsub.f32 %v11940_v10, %v2494_v22  ;;  %v7945_v58 = vpop.f32.mrb[87].mxu1  ;;  %8096 = vmatmul.mubr.msk.f32.vlgmr.msra.gmra.mrb[42].mxu0 %vm1876_vm2, %v2782_v36  ;;  %v15181_v36 = vld [vmem:[#allocation5_spill] sm:$0xff] }
 0x3fa   : > { %v9573_v37 = vpop.eup %9572  ;;  %9065 = vmatpush3.bf16.msra.mxu0 %v15178_v43  ;;  %8098 = vmatprep.mubr.msk.f32.mxu0 %vm9843_vm0, %v15147_v30  ;;  %v2221_v14 = vadd.f32 %v2202_v23, %v11794_v53  ;;  %v2185_v9 = vmul.f32 %v9571_v29, %v11900_v42  ;;  %v15183_v43 = vld [vmem:[#allocation7_spill] sm:$0xff] }
 0x3fb   : > { %v2222_v47 = vadd.f32 %v12260_v19, %v2203_v38  ;;  %v2186_v55 = vmul.f32 %v9573_v37, %v11905_v50  ;;  %v2783_v10 = vmul.f32 %v12318_v56, %v12318_v56  ;;  %9067 = vmatprep.subr.bf16.mxu0 %v15179_v34  ;;  %v15182_v38 = vld [vmem:[#allocation6_spill] sm:$0xff]  ;;  %v15185_v34 = vld [vmem:[#allocation9_spill] sm:$0xff] }
 0x3fc   : > { %3547 = vrot.lane.b32.xlu0 %v2219_v57, %s9845_s28  ;;  %3601 = vrot.lane.b32.xlu1 %v2217_v8, %s9847_s16  ;;  %v2499_v5 = vpop.f32.mrb[88].mxu1  ;;  %3531 = vst.msk [vmem:[%s11801_s14 + $0x82] sm:$0xff] %vm1876_vm2, %v2221_v14  ;;  %v2204_v6 = vmul.f32 %v2185_v9, %v11789_v59 }
 0x3fd   : > { %v9575_v25 = vpop.eup %9574  ;;  %3629 = vst.msk [vmem:[%s11801_s14 + $0x146] sm:$0xff] %vm1876_vm2, %v2222_v47  ;;  %v2205_v42 = vmul.f32 %v12254_v21, %v2186_v55  ;;  %v12340_v50 = vsub.f32 %v11949_v27, %v2499_v5  ;;  %v7948_v49 = vpop.f32.mrb[89].mxu1  ;;  %8099 = vmatmul.mubr.msk.f32.gmra.mrb[44].mxu0 %vm1876_vm2, %v2783_v10  ;;  %v15184_v55 = vld [vmem:[#allocation8_spill] sm:$0xff] }
 0x3fe   : > { %v9577_v40 = vpop.eup %9576  ;;  %8101 = vmatprep.mubr.msk.f32.mxu0 %vm9843_vm0, %v15147_v30  ;;  %v2223_v8 = vadd.f32 %v2204_v6, %v11794_v53  ;;  %v2187_v1 = vmul.f32 %v9575_v25, %v11913_v2  ;;  %9069 = vmatpush3.bf16.msra.mxu0 %v15180_v45  ;;  %v15186_v25 = vld [vmem:[#allocation10_spill] sm:$0xff]  ;;  %v15187_v49 = vld [vmem:[#allocation11_spill] sm:$0xff] }
 0x3ff   : > { %v2224_v44 = vadd.f32 %v12260_v19, %v2205_v42  ;;  %v2188_v24 = vmul.f32 %v9577_v40, %v11917_v20  ;;  %v2784_v27 = vmul.f32 %v12340_v50, %v12340_v50  ;;  %9071 = vmatprep.subr.bf16.mxu0 %v15181_v36 }
 0x400   : > { %3603 = vrot.lane.b32.xlu0 %v2219_v57, %s9847_s16  ;;  %3575 = vrot.lane.b32.xlu1 %v2219_v57, %s9846_s21  ;;  %v2504_v22 = vpop.f32.mrb[90].mxu1  ;;  %3532 = vst.msk [vmem:[%s11801_s14 + $0x8a] sm:$0xff] %vm1876_vm2, %v2223_v8  ;;  %v2206_v2 = vmul.f32 %v2187_v1, %v11789_v59  ;;  %v15188_v1 = vld [vmem:[#allocation13_spill] sm:$0xff] }
 0x401   : > { %3630 = vst.msk [vmem:[%s11801_s14 + $0x14e] sm:$0xff] %vm1876_vm2, %v2224_v44  ;;  %v2207_v20 = vmul.f32 %v12254_v21, %v2188_v24  ;;  %v12362_v23 = vsub.f32 %v11958_v7, %v2504_v22  ;;  %v7951_v29 = vpop.f32.mrb[91].mxu1  ;;  %8102 = vmatmul.mubr.msk.f32.gmra.mrb[46].mxu0 %vm1876_vm2, %v2784_v27  ;;  %v15189_v44 = vld [vmem:[#allocation15_spill] sm:$0xff]  ;;  %v15190_v27 = vld [vmem:[#allocation17_spill] sm:$0xff] }
 0x402   : > { %8104 = vmatprep.mubr.msk.f32.mxu0 %vm9843_vm0, %v15147_v30  ;;  %v2225_v57 = vadd.f32 %v2206_v2, %v11794_v53  ;;  %9073 = vmatpush3.bf16.msra.mxu0 %v15182_v38  ;;  %v15191_v22 = vld [vmem:[#allocation19_spill] sm:$0xff]  ;;  %v15192_v29 = vld [vmem:[#allocation21_spill] sm:$0xff] }
 0x403   : > { %v2226_v58 = vadd.f32 %v12260_v19, %v2207_v20  ;;  %v2785_v37 = vmul.f32 %v12362_v23, %v12362_v23  ;;  %9075 = vmatprep.subr.bf16.mxu0 %v15183_v43  ;;  %v15268_v19 = vld [vmem:[#allocation29_spill] sm:$0xff] }
 0x404   : > { %3577 = vrot.lane.b32.xlu0 %v2221_v14, %s9846_s21  ;;  %3549 = vrot.lane.b32.xlu1 %v2221_v14, %s9845_s28  ;;  %v2509_v7 = vpop.f32.mrb[92].mxu1  ;;  %3533 = vst.msk [vmem:[%s11801_s14 + $0x92] sm:$0x1] %vm3490_vm3, %v2225_v57 }
 0x405   : > { %3631 = vst.msk [vmem:[%s11801_s14 + $0x156] sm:$0x1] %vm3490_vm3, %v2226_v58  ;;  %v12380_v9 = vsub.f32 %v11967_v16, %v2509_v7  ;;  %v7954_v47 = vpop.f32.mrb[93].mxu1  ;;  %8105 = vmatmul.mubr.msk.f32.gmra.mrb[48].mxu0 %vm1876_vm2, %v2785_v37  ;;  %v15193_v58 = vld [vmem:[#allocation23_spill] sm:$0xff] }
 0x406   : > { %8107 = vmatprep.mubr.msk.f32.mxu0 %vm9843_vm0, %v15147_v30  ;;  %9077 = vmatpush3.bf16.msra.mxu0 %v15184_v55 }
 0x407   : > { %v2786_v10 = vmul.f32 %v12380_v9, %v12380_v9  ;;  %9079 = vmatprep.subr.bf16.mxu0 %v15185_v34  ;;  %v6796_v34 = vld [vmem:[%s10135_s29 + $0x1c0] sm:$0xff] }
 0x408   : > { %3551 = vrot.lane.b32.xlu0 %v2223_v8, %s9845_s28  ;;  %3605 = vrot.lane.b32.xlu1 %v2221_v14, %s9847_s16  ;;  %v2514_v5 = vpop.f32.mrb[94].mxu1 }
 0x409   : > { %v12392_v16 = vsub.f32 %v11976_v17, %v2514_v5  ;;  %v7957_v6 = vpop.f32.mrb[95].mxu1  ;;  %8108 = vmatmul.mubr.msk.f32.gmra.mrb[50].mxu0 %vm1876_vm2, %v2786_v10 }
 0x40a   : > { %8110 = vmatprep.mubr.msk.f32.mxu0 %vm9843_vm0, %v15147_v30  ;;  %9081 = vmatpush3.bf16.msra.mxu0 %v15186_v25  ;;  %v15194_v25 = vld [vmem:[#allocation24_spill] sm:$0xff] }
 0x40b   : > { %v2787_v42 = vmul.f32 %v12392_v16, %v12392_v16  ;;  %9083 = vmatprep.subr.bf16.mxu0 %v15187_v49 }
 0x40c   : > { %3607 = vrot.lane.b32.xlu0 %v2223_v8, %s9847_s16  ;;  %3579 = vrot.lane.b32.xlu1 %v2223_v8, %s9846_s21  ;;  %v2519_v14 = vpop.f32.mrb[96].mxu1 }
 0x40d   : > { %v12404_v17 = vsub.f32 %v11985_v26, %v2519_v14  ;;  %v7960_v40 = vpop.f32.mrb[97].mxu1  ;;  %8111 = vmatmul.mubr.msk.f32.gmra.mrb[52].mxu0 %vm1876_vm2, %v2787_v42  ;;  %v15195_v42 = vld [vmem:[#allocation26_spill] sm:$0xff] }
 0x40e   : > { %8113 = vmatprep.mubr.msk.f32.mxu0 %vm9843_vm0, %v15147_v30  ;;  %9085 = vmatpush3.bf16.msra.mxu0 %v15188_v1  ;;  %v15196_v1 = vld [vmem:[#allocation28_spill] sm:$0xff] }
 0x40f   : > { %v2788_v45 = vmul.f32 %v12404_v17, %v12404_v17  ;;  %9087 = vmatprep.subr.bf16.mxu0 %v15189_v44  ;;  %v6804_v44 = vld [vmem:[%s10135_s29 + $0x200] sm:$0xff] }
 0x410   : > { %3581 = vrot.lane.b32.xlu0 %v2225_v57, %s9846_s21  ;;  %3553 = vrot.lane.b32.xlu1 %v2225_v57, %s9845_s28  ;;  %v2524_v8 = vpop.f32.mrb[98].mxu1 }
 0x411   : > { %v12416_v26 = vsub.f32 %v11994_v48, %v2524_v8  ;;  %v7963_v24 = vpop.f32.mrb[99].mxu1  ;;  %8114 = vmatmul.mubr.msk.f32.gmra.mrb[54].mxu0 %vm1876_vm2, %v2788_v45  ;;  %v6805_v45 = vld [vmem:[%s10135_s29 + $0x208] sm:$0xff] }
 0x412   : > { %8116 = vmatprep.mubr.msk.f32.mxu0 %vm9843_vm0, %v15147_v30  ;;  %9089 = vmatpush3.bf16.msra.mxu0 %v15190_v27  ;;  %v15197_v24 = vld [vmem:[#allocation30_spill] sm:$0xff] }
 0x413   : > { %v2789_v36 = vmul.f32 %v12416_v26, %v12416_v26  ;;  %9091 = vmatprep.subr.bf16.mxu0 %v15191_v22  ;;  %v15198_v22 = vld [vmem:[#allocation32_spill] sm:$0xff] }
 0x414   : > { %3609 = vrot.lane.b32.xlu1 %v2225_v57, %s9847_s16  ;;  %v2529_v2 = vpop.f32.mrb[100].mxu1 }
 0x415   : > { %v12427_v20 = vsub.f32 %v12003_v0, %v2529_v2  ;;  %v7966_v48 = vpop.f32.mrb[101].mxu1  ;;  %8117 = vmatmul.mubr.msk.f32.gmra.mrb[56].mxu0 %vm1876_vm2, %v2789_v36  ;;  %v6813_v2 = vld [vmem:[%s10135_s29 + $0x248] sm:$0xff] }
 0x416   : > { %8119 = vmatprep.mubr.msk.f32.mxu0 %vm9843_vm0, %v15147_v30  ;;  %9093 = vmatpush3.bf16.msra.mxu0 %v15192_v29  ;;  %v6812_v48 = vld [vmem:[%s10135_s29 + $0x240] sm:$0xff] }
 0x417   : > { %v2790_v38 = vmul.f32 %v12427_v20, %v12427_v20  ;;  %9127 = vmatprep.subr.bf16.mxu0 %v15193_v58 }
 0x418   : > { %v2534_v57 = vpop.f32.mrb[102].mxu1 }
 0x419   : > { %v12437_v37 = vsub.f32 %v12012_v31, %v2534_v57  ;;  %v7969_v0 = vpop.f32.mrb[103].mxu1  ;;  %8120 = vmatmul.mubr.msk.f32.gmra.mrb[58].mxu0 %vm1876_vm2, %v2790_v38  ;;  %v6797_v31 = vld [vmem:[%s10135_s29 + $0x1c8] sm:$0xff]  ;;  %v15199_v38 = vld [vmem:[#allocation34_spill] sm:$0xff] }
 0x41a   : > { %8122 = vmatprep.mubr.msk.f32.mxu0 %vm9843_vm0, %v15147_v30  ;;  %3802 = vmatprep.mubr.f32.mxu1 %v6797_v31  ;;  %v15200_v0 = vld [vmem:[#allocation36_spill] sm:$0xff]  ;;  %v15201_v31 = vld [vmem:[#allocation38_spill] sm:$0xff] }
 0x41b   : > { %v2791_v43 = vmul.f32 %v12437_v37, %v12437_v37  ;;  %3803 = vmatmul.mubr.f32.vlgmr.msra.gmra.mrb[182].mxu1 %v6796_v34 }
 0x41c   : > { %v2539_v7 = vpop.f32.mrb[104].mxu1  ;;  %9097 = vmatpush3.bf16.msra.mxu1 %v15194_v25  ;;  %3807 = vmatprep.mubr.f32.mxu1 %v6805_v45  ;;  %v6828_v25 = vld [vmem:[%s10135_s29 + $0x2c0] sm:$0xff]  ;;  %v6837_v45 = vld [vmem:[%s10135_s29 + $0x308] sm:$0xff] }
 0x41d   : > { %v12445_v47 = vsub.f32 %v12019_v51, %v2539_v7  ;;  %v7972_v55 = vpop.f32.mrb[105].mxu1  ;;  %8123 = vmatmul.mubr.msk.f32.gmra.mrb[60].mxu0 %vm1876_vm2, %v2791_v43  ;;  %9099 = vmatprep.subr.bf16.mxu1 %v15195_v42  ;;  %v6821_v43 = vld [vmem:[%s10135_s29 + $0x288] sm:$0xff]  ;;  %v6820_v7 = vld [vmem:[%s10135_s29 + $0x280] sm:$0xff] }
 0x41e   : > { %8125 = vmatprep.mubr.msk.f32.mxu0 %vm9843_vm0, %v15147_v30 }
 0x41f   : > { %v2792_v10 = vmul.f32 %v12445_v47, %v12445_v47  ;;  %3808 = vmatmul.mubr.f32.gmra.mrb[184].mxu1 %v6804_v44  ;;  %v6836_v44 = vld [vmem:[%s10135_s29 + $0x300] sm:$0xff] }
 0x420   : > { %v2544_v5 = vpop.f32.mrb[106].mxu1  ;;  %9101 = vmatpush3.bf16.msra.mxu1 %v15196_v1  ;;  %3812 = vmatprep.mubr.f32.mxu1 %v6813_v2  ;;  %v15204_v1 = vld [vmem:[#allocation44_spill] sm:$0xff]  ;;  %v6845_v2 = vld [vmem:[%s10135_s29 + $0x348] sm:$0x1] }
 0x421   : > { %v12455_v6 = vsub.f32 %v12026_v4, %v2544_v5  ;;  %v7975_v51 = vpop.f32.mrb[107].mxu1  ;;  %8126 = vmatmul.mubr.msk.f32.gmra.mrb[62].mxu0 %vm1876_vm2, %v2792_v10  ;;  %9103 = vmatprep.subr.bf16.mxu1 %v15197_v24  ;;  %v15202_v5 = vld [vmem:[#allocation40_spill] sm:$0xff]  ;;  %v15205_v24 = vld [vmem:[#allocation46_spill] sm:$0xff] }
 0x422   : > { %8128 = vmatprep.mubr.msk.f32.mxu0 %vm9843_vm0, %v15147_v30  ;;  %v6829_v51 = vld [vmem:[%s10135_s29 + $0x2c8] sm:$0xff] }
 0x423   : > { %v2793_v49 = vmul.f32 %v12455_v6, %v12455_v6  ;;  %3813 = vmatmul.mubr.f32.gmra.mrb[186].mxu1 %v6812_v48  ;;  %v6844_v48 = vld [vmem:[%s10135_s29 + $0x340] sm:$0x1] }
 0x424   : > { %v2549_v14 = vpop.f32.mrb[108].mxu1  ;;  %9105 = vmatpush3.bf16.msra.mxu1 %v15198_v22  ;;  %3817 = vmatprep.mubr.f32.mxu1 %v6821_v43  ;;  %v15206_v22 = vld [vmem:[#allocation48_spill] sm:$0xff]  ;;  %v6801_v43 = vld [vmem:[%s10135_s29 + $0x1e8] sm:$0xff] }
 0x425   : > { %v12465_v40 = vsub.f32 %v12033_v32, %v2549_v14  ;;  %v7978_v4 = vpop.f32.mrb[109].mxu1  ;;  %8129 = vmatmul.mubr.msk.f32.gmra.mrb[64].mxu0 %vm1876_vm2, %v2793_v49  ;;  %9107 = vmatprep.subr.bf16.mxu1 %v15199_v38  ;;  %v15203_v49 = vld [vmem:[#allocation42_spill] sm:$0xff] }
 0x426   : > { %8131 = vmatprep.mubr.msk.f32.mxu0 %vm9843_vm0, %v15147_v30  ;;  %v15207_v38 = vld [vmem:[#allocation50_spill] sm:$0xff] }
 0x427   : > { %v2794_v8 = vmul.f32 %v12465_v40, %v12465_v40  ;;  %3818 = vmatmul.mubr.f32.gmra.mrb[188].mxu1 %v6820_v7  ;;  %v6800_v7 = vld [vmem:[%s10135_s29 + $0x1e0] sm:$0xff] }
 0x428   : > { %v2554_v32 = vpop.f32.mrb[110].mxu1  ;;  %9109 = vmatpush3.bf16.msra.mxu1 %v15200_v0  ;;  %3822 = vmatprep.mubr.f32.mxu1 %v6829_v51  ;;  %v15208_v0 = vld [vmem:[#allocation52_spill] sm:$0xff]  ;;  %v6809_v51 = vld [vmem:[%s10135_s29 + $0x228] sm:$0xff] }
 0x429   : > { %v12477_v27 = vsub.f32 %v12040_v3, %v2554_v32  ;;  %v7981_v36 = vpop.f32.mrb[111].mxu1  ;;  %8132 = vmatmul.mubr.msk.f32.gmra.mrb[66].mxu0 %vm1876_vm2, %v2794_v8  ;;  %9111 = vmatprep.subr.bf16.mxu1 %v15201_v31 }
 0x42a   : > { %8134 = vmatprep.mubr.msk.f32.mxu0 %vm9843_vm0, %v15147_v30 }
 0x42b   : > { %v2795_v29 = vmul.f32 %v12477_v27, %v12477_v27  ;;  %3823 = vmatmul.mubr.f32.gmra.mrb[190].mxu1 %v6828_v25  ;;  %v15211_v25 = vld [vmem:[#allocation56_spill] sm:$0xff] }
 0x42c   : > { %v2559_v3 = vpop.f32.mrb[112].mxu1  ;;  %9113 = vmatpush3.bf16.msra.mxu1 %v15202_v5  ;;  %3827 = vmatprep.mubr.f32.mxu1 %v6837_v45  ;;  %v15210_v5 = vld [vmem:[#allocation55_spill] sm:$0xff] }
 0x42d   : > { %v12489_v58 = vsub.f32 %v12047_v41, %v2559_v3  ;;  %v7984_v57 = vpop.f32.mrb[113].mxu1  ;;  %8135 = vmatmul.mubr.msk.f32.gmra.mrb[68].mxu0 %vm1876_vm2, %v2795_v29  ;;  %9115 = vmatprep.subr.bf16.mxu1 %v15203_v49  ;;  %v6808_v49 = vld [vmem:[%s10135_s29 + $0x220] sm:$0xff]  ;;  %v6817_v45 = vld [vmem:[%s10135_s29 + $0x268] sm:$0xff] }
 0x42e   : > { %8137 = vmatprep.mubr.msk.f32.mxu0 %vm9843_vm0, %v15147_v30 }
 0x42f   : > { %v2796_v55 = vmul.f32 %v12489_v58, %v12489_v58  ;;  %3828 = vmatmul.mubr.f32.gmra.mrb[192].mxu1 %v6836_v44  ;;  %v15213_v44 = vld [vmem:[#allocation58_spill] sm:$0xff] }
 0x430   : > { %v2564_v41 = vpop.f32.mrb[114].mxu1  ;;  %9117 = vmatpush3.bf16.msra.mxu1 %v15204_v1  ;;  %3832 = vmatprep.mubr.f32.mxu1 %v6845_v2  ;;  %v15212_v1 = vld [vmem:[#allocation57_spill] sm:$0xff]  ;;  %v15215_v2 = vld [vmem:[#allocation60_spill] sm:$0xff] }
 0x431   : > { %v12501_v10 = vsub.f32 %v12054_v13, %v2564_v41  ;;  %v7987_v34 = vpop.f32.mrb[115].mxu1  ;;  %8138 = vmatmul.mubr.msk.f32.gmra.mrb[70].mxu0 %vm1876_vm2, %v2796_v55  ;;  %9119 = vmatprep.subr.bf16.mxu1 %v15205_v24  ;;  %v15209_v55 = vld [vmem:[#allocation54_spill] sm:$0xff] }
 0x432   : > { %8140 = vmatprep.mubr.msk.f32.mxu0 %vm9843_vm0, %v15147_v30  ;;  %v6816_v24 = vld [vmem:[%s10135_s29 + $0x260] sm:$0xff] }
 0x433   : > { %v2797_v42 = vmul.f32 %v12501_v10, %v12501_v10  ;;  %3833 = vmatmul.mubr.f32.gmra.mrb[194].mxu1 %v6844_v48 }
 0x434   : > { %v2569_v13 = vpop.f32.mrb[116].mxu1  ;;  %9121 = vmatpush3.bf16.msra.mxu1 %v15206_v22  ;;  %4002 = vmatprep.mubr.f32.mxu1 %v6801_v43  ;;  %v15214_v22 = vld [vmem:[#allocation59_spill] sm:$0xff]  ;;  %v15216_v43 = vld [vmem:[#allocation61_spill] sm:$0xff] }
 0x435   : > { %v12513_v14 = vsub.f32 %v12063_v46, %v2569_v13  ;;  %v7990_v4 = vpop.f32.mrb[117].mxu1  ;;  %8141 = vmatmul.mubr.msk.f32.gmra.mrb[72].mxu0 %vm1876_vm2, %v2797_v42  ;;  %9123 = vmatprep.subr.bf16.mxu1 %v15207_v38  ;;  %v6825_v38 = vld [vmem:[%s10135_s29 + $0x2a8] sm:$0xff] }
 0x436   : > { %8143 = vmatprep.mubr.msk.f32.mxu0 %vm9843_vm0, %v15147_v30 }
 0x437   : > { %v2798_v8 = vmul.f32 %v12513_v14, %v12513_v14 }
 0x438   : > { %v2574_v46 = vpop.f32.mrb[118].mxu1  ;;  %9125 = vmatpush3.bf16.msra.mxu1 %v15208_v0 }
 0x439   : > { %v12525_v32 = vsub.f32 %v12072_v61, %v2574_v46  ;;  %v7993_v36 = vpop.f32.mrb[119].mxu1  ;;  %8144 = vmatmul.mubr.msk.f32.gmra.mrb[74].mxu0 %vm1876_vm2, %v2798_v8  ;;  %9159 = vmatprep.subr.bf16.mxu1 %v15209_v55  ;;  %v6833_v55 = vld [vmem:[%s10135_s29 + $0x2e8] sm:$0xff] }
 0x43a   : > { %8146 = vmatprep.mubr.msk.f32.mxu0 %vm9843_vm0, %v15147_v30 }
 0x43b   : > { %v2799_v29 = vmul.f32 %v12525_v32, %v12525_v32  ;;  %4003 = vmatmul.mubr.f32.vlgmr.msra.gmra.mrb[196].mxu1 %v6800_v7 }
 0x43c   : > { %v2579_v61 = vpop.f32.mrb[120].mxu1  ;;  %9161 = vmatpush1.bf16.msra.mxu1 %v15210_v5  ;;  %4007 = vmatprep.mubr.f32.mxu1 %v6809_v51  ;;  %v15218_v51 = vld [vmem:[#allocation63_spill] sm:$0xff] }
 0x43d   : > { %v12537_v3 = vsub.f32 %v12081_v28, %v2579_v61  ;;  %v7996_v57 = vpop.f32.mrb[121].mxu1  ;;  %8147 = vmatmul.mubr.msk.f32.gmra.mrb[76].mxu0 %vm1876_vm2, %v2799_v29  ;;  %9163 = vmatprep.subr.bf16.mxu1 %v15211_v25 }
 0x43e   : > { %8149 = vmatprep.mubr.msk.f32.mxu0 %vm9843_vm0, %v15147_v30  ;;  %v6824_v57 = vld [vmem:[%s10135_s29 + $0x2a0] sm:$0xff] }
 0x43f   : > { %v2800_v31 = vmul.f32 %v12537_v3, %v12537_v3  ;;  %4008 = vmatmul.mubr.f32.gmra.mrb[198].mxu1 %v6808_v49 }
 0x440   : > { %v2584_v28 = vpop.f32.mrb[122].mxu1  ;;  %9165 = vmatpush1.bf16.msra.mxu1 %v15212_v1  ;;  %4012 = vmatprep.mubr.f32.mxu1 %v6817_v45  ;;  %v15220_v45 = vld [vmem:[#allocation65_spill] sm:$0xff] }
 0x441   : > { %v12549_v41 = vsub.f32 %v12090_v33, %v2584_v28  ;;  %v7999_v34 = vpop.f32.mrb[123].mxu1  ;;  %8150 = vmatmul.mubr.msk.f32.gmra.mrb[78].mxu0 %vm1876_vm2, %v2800_v31  ;;  %9167 = vmatprep.subr.bf16.mxu1 %v15213_v44 }
 0x442   : > { %8152 = vmatprep.mubr.msk.f32.mxu0 %vm9843_vm0, %v15147_v30  ;;  %v6832_v34 = vld [vmem:[%s10135_s29 + $0x2e0] sm:$0xff] }
 0x443   : > { %v2801_v42 = vmul.f32 %v12549_v41, %v12549_v41  ;;  %4013 = vmatmul.mubr.f32.gmra.mrb[200].mxu1 %v6816_v24  ;;  %v15221_v24 = vld [vmem:[#allocation66_spill] sm:$0xff] }
 0x444   : > { %v2589_v33 = vpop.f32.mrb[124].mxu1  ;;  %9169 = vmatpush1.bf16.msra.mxu1 %v15214_v22  ;;  %4017 = vmatprep.mubr.f32.mxu1 %v6825_v38 }
 0x445   : > { %v12561_v13 = vsub.f32 %v12099_v52, %v2589_v33  ;;  %v8002_v4 = vpop.f32.mrb[125].mxu1  ;;  %8153 = vmatmul.mubr.msk.f32.gmra.mrb[80].mxu0 %vm1876_vm2, %v2801_v42  ;;  %9171 = vmatprep.subr.bf16.mxu1 %v15215_v2  ;;  %v6841_v42 = vld [vmem:[%s10135_s29 + $0x328] sm:$0xff] }
 0x446   : > { %8155 = vmatprep.mubr.msk.f32.mxu0 %vm9843_vm0, %v15147_v30  ;;  %v6840_v4 = vld [vmem:[%s10135_s29 + $0x320] sm:$0xff]  ;;  %v15222_v2 = vld [vmem:[#allocation67_spill] sm:$0xff] }
 0x447   : > { %v2802_v8 = vmul.f32 %v12561_v13, %v12561_v13  ;;  %4018 = vmatmul.mubr.f32.gmra.mrb[202].mxu1 %v6824_v57 }
 0x448   : > { %v2594_v52 = vpop.f32.mrb[126].mxu1  ;;  %9173 = vmatpush1.bf16.msra.mxu1 %v15216_v43  ;;  %4022 = vmatprep.mubr.f32.mxu1 %v6833_v55  ;;  %v15224_v43 = vld [vmem:[#allocation69_spill] sm:$0xff] }
 0x449   : > { %v12573_v46 = vsub.f32 %v12108_v54, %v2594_v52  ;;  %v8005_v36 = vpop.f32.mrb[127].mxu1  ;;  %8156 = vmatmul.mubr.msk.f32.gmra.mrb[82].mxu0 %vm1876_vm2, %v2802_v8  ;;  %v6849_v8 = vld [vmem:[%s10135_s29 + $0x368] sm:$0x1] }
 0x44a   : > { %8158 = vmatprep.mubr.msk.f32.mxu0 %vm9843_vm0, %v15147_v30  ;;  %v6848_v36 = vld [vmem:[%s10135_s29 + $0x360] sm:$0x1] }
 0x44b   : > { %v2803_v48 = vmul.f32 %v12573_v46, %v12573_v46  ;;  %4023 = vmatmul.mubr.f32.gmra.mrb[204].mxu1 %v6832_v34 }
 0x44c   : > { %v2599_v29 = vpop.f32.mrb[128].mxu1  ;;  %4027 = vmatprep.mubr.f32.mxu1 %v6841_v42 }
 0x44d   : > { %v12584_v61 = vsub.f32 %v12117_v18, %v2599_v29  ;;  %v8008_v54 = vpop.f32.mrb[129].mxu1  ;;  %8159 = vmatmul.mubr.msk.f32.gmra.mrb[84].mxu0 %vm1876_vm2, %v2803_v48  ;;  %v15217_v18 = vld [vmem:[#allocation62_spill] sm:$0xff]  ;;  %v15223_v29 = vld [vmem:[#allocation68_spill] sm:$0xff] }
 0x44e   : > { %8161 = vmatprep.mubr.msk.f32.mxu0 %vm9843_vm0, %v15147_v30  ;;  %9175 = vmatprep.subr.bf16.mxu1 %v15217_v18 }
 0x44f   : > { %v2804_v0 = vmul.f32 %v12584_v61, %v12584_v61  ;;  %9177 = vmatpush1.bf16.msra.mxu1 %v15218_v51  ;;  %v15226_v51 = vld [vmem:[#allocation71_spill] sm:$0xff] }
 0x450   : > { %v2604_v7 = vpop.f32.mrb[130].mxu1  ;;  %4028 = vmatmul.mubr.f32.gmra.mrb[206].mxu1 %v6840_v4 }
 0x451   : > { %v12596_v31 = vsub.f32 %v12124_v12, %v2604_v7  ;;  %v8011_v28 = vpop.f32.mrb[131].mxu1  ;;  %8162 = vmatmul.mubr.msk.f32.gmra.mrb[86].mxu0 %vm1876_vm2, %v2804_v0  ;;  %v15219_v12 = vld [vmem:[#allocation64_spill] sm:$0xff]  ;;  %4032 = vmatprep.mubr.f32.mxu1 %v6849_v8  ;;  %v15225_v7 = vld [vmem:[#allocation70_spill] sm:$0xff] }
 0x452   : > { %8164 = vmatprep.mubr.msk.f32.mxu0 %vm9843_vm0, %v15147_v30  ;;  %9179 = vmatprep.subr.bf16.mxu1 %v15219_v12 }
 0x453   : > { %v2805_v5 = vmul.f32 %v12596_v31, %v12596_v31  ;;  %9181 = vmatpush1.bf16.msra.mxu1 %v15220_v45  ;;  %v15228_v45 = vld [vmem:[#allocation73_spill] sm:$0xff] }
 0x454   : > { %v2609_v25 = vpop.f32.mrb[132].mxu1  ;;  %9183 = vmatprep.subr.bf16.mxu1 %v15221_v24  ;;  %4033 = vmatmul.mubr.f32.gmra.mrb[208].mxu1 %v6848_v36 }
 0x455   : > { %v12608_v49 = vsub.f32 %v12131_v15, %v2609_v25  ;;  %v8014_v33 = vpop.f32.mrb[133].mxu1  ;;  %8165 = vmatmul.mubr.msk.f32.gmra.mrb[88].mxu0 %vm1876_vm2, %v2805_v5  ;;  %v15227_v25 = vld [vmem:[#allocation72_spill] sm:$0xff] }
 0x456   : > { %8167 = vmatprep.mubr.msk.f32.mxu0 %vm9843_vm0, %v15147_v30 }
 0x457   : > { %v2806_v1 = vmul.f32 %v12608_v49, %v12608_v49  ;;  %9185 = vmatpush1.bf16.msra.mxu1 %v15222_v2  ;;  %v15230_v2 = vld [vmem:[#allocation75_spill] sm:$0xff] }
 0x458   : > { %v2614_v44 = vpop.f32.mrb[134].mxu1  ;;  %9187 = vmatprep.subr.bf16.mxu1 %v15223_v29  ;;  %v15232_v29 = vld [vmem:[#allocation12_spill] sm:$0xff] }
 0x459   : > { %v12620_v15 = vsub.f32 %v12138_v63, %v2614_v44  ;;  %v8017_v52 = vpop.f32.mrb[135].mxu1  ;;  %8168 = vmatmul.mubr.msk.f32.gmra.mrb[90].mxu0 %vm1876_vm2, %v2806_v1  ;;  %v15229_v44 = vld [vmem:[#allocation74_spill] sm:$0xff] }
 0x45a   : > { %8170 = vmatprep.mubr.msk.f32.mxu0 %vm9843_vm0, %v15147_v30 }
 0x45b   : > { %v2807_v22 = vmul.f32 %v12620_v15, %v12620_v15  ;;  %9189 = vmatpush1.bf16.msra.mxu1 %v15224_v43 }
 0x45c   : > { %v2619_v48 = vpop.f32.mrb[136].mxu1  ;;  %9191 = vmatprep.subr.bf16.mxu1 %v15225_v7 }
 0x45d   : > { %v12631_v63 = vsub.f32 %v12145_v39, %v2619_v48  ;;  %v8020_v38 = vpop.f32.mrb[137].mxu1  ;;  %8171 = vmatmul.mubr.msk.f32.gmra.mrb[92].mxu0 %vm1876_vm2, %v2807_v22  ;;  %v15231_v48 = vld [vmem:[#allocation76_spill] sm:$0xff] }
 0x45e   : > { %v3570_v54 = vpop.permute.xlu0 %3569  ;;  %v3542_v57 = vpop.permute.xlu1 %3541  ;;  %8173 = vmatprep.mubr.msk.f32.mxu0 %vm9843_vm0, %v15147_v30 }
 0x45f   : > { %v2808_v0 = vmul.f32 %v12631_v63, %v12631_v63  ;;  %3590 = vst.msk [vmem:[%s11801_s14 + $0xc4] sm:$0xff] %vm1876_vm2, %v3570_v54  ;;  %3562 = vst.msk [vmem:[%s11801_s14 + $0x93] sm:$0xff] %vm1876_vm2, %v3542_v57  ;;  %9193 = vmatpush1.bf16.msra.mxu1 %v15226_v51 }
 0x460   : > { %v2624_v39 = vpop.f32.mrb[138].mxu1  ;;  %9195 = vmatprep.subr.bf16.mxu1 %v15227_v25 }
 0x461   : > { %v12645_v55 = vsub.f32 %v12152_v62, %v2624_v39  ;;  %v8023_v18 = vpop.f32.mrb[139].mxu1  ;;  %8174 = vmatmul.mubr.msk.f32.gmra.mrb[94].mxu0 %vm1876_vm2, %v2808_v0  ;;  %v15233_v39 = vld [vmem:[#allocation77_spill] sm:$0xff] }
 0x462   : > { %v3544_v28 = vpop.permute.xlu0 %3543  ;;  %v3598_v34 = vpop.permute.xlu1 %3597  ;;  %8176 = vmatprep.mubr.msk.f32.mxu0 %vm9843_vm0, %v15147_v30  ;;  %v15234_v18 = vld [vmem:[#allocation78_spill] sm:$0xff] }
 0x463   : > { %v2809_v5 = vmul.f32 %v12645_v55, %v12645_v55  ;;  %3563 = vst.msk [vmem:[%s11801_s14 + $0x9b] sm:$0xff] %vm1876_vm2, %v3544_v28  ;;  %3618 = vst.msk [vmem:[%s11801_s14 + $0xf5] sm:$0xff] %vm1876_vm2, %v3598_v34  ;;  %9197 = vmatpush1.bf16.msra.mxu1 %v15228_v45  ;;  %v15235_v28 = vld [vmem:[#allocation14_spill] sm:$0xff] }
 0x464   : > { %v2629_v62 = vpop.f32.mrb[140].mxu1  ;;  %9199 = vmatprep.subr.bf16.mxu1 %v15229_v44 }
 0x465   : > { %v12659_v42 = vsub.f32 %v12159_v11, %v2629_v62  ;;  %v8026_v12 = vpop.f32.mrb[141].mxu1  ;;  %8177 = vmatmul.mubr.msk.f32.gmra.mrb[96].mxu0 %vm1876_vm2, %v2809_v5 }
 0x466   : > { %v3600_v33 = vpop.permute.xlu0 %3599  ;;  %v3572_v4 = vpop.permute.xlu1 %3571  ;;  %8179 = vmatprep.mubr.msk.f32.mxu0 %vm9843_vm0, %v15147_v30  ;;  %v15236_v12 = vld [vmem:[#allocation79_spill] sm:$0xff] }
 0x467   : > { %v2810_v1 = vmul.f32 %v12659_v42, %v12659_v42  ;;  %3619 = vst.msk [vmem:[%s11801_s14 + $0xfd] sm:$0xff] %vm1876_vm2, %v3600_v33  ;;  %3591 = vst.msk [vmem:[%s11801_s14 + $0xcc] sm:$0xff] %vm1876_vm2, %v3572_v4  ;;  %9201 = vmatpush1.bf16.msra.mxu1 %v15230_v2  ;;  %v15237_v4 = vld [vmem:[#allocation80_spill] sm:$0xff]  ;;  %v15239_v2 = vld [vmem:[#allocation82_spill] sm:$0xff] }
 0x468   : > { %v2634_v11 = vpop.f32.mrb[142].mxu1  ;;  %9203 = vmatprep.subr.bf16.mxu1 %v15231_v48 }
 0x469   : > { %v12673_v8 = vsub.f32 %v12166_v60, %v2634_v11  ;;  %v8029_v24 = vpop.f32.mrb[143].mxu1  ;;  %8180 = vmatmul.mubr.msk.f32.gmra.mrb[98].mxu0 %vm1876_vm2, %v2810_v1  ;;  %v9816_v1 = vld [vmem:[%s11927_s15 + $0x100] sm:$0xff] }
 0x46a   : > { %v3574_v52 = vpop.permute.xlu0 %3573  ;;  %v3546_v36 = vpop.permute.xlu1 %3545  ;;  %8182 = vmatprep.mubr.msk.f32.mxu0 %vm9843_vm0, %v15147_v30 }
 0x46b   : > { %v2811_v22 = vmul.f32 %v12673_v8, %v12673_v8  ;;  %3592 = vst.msk [vmem:[%s11801_s14 + $0xd4] sm:$0xff] %vm1876_vm2, %v3574_v52  ;;  %3564 = vst.msk [vmem:[%s11801_s14 + $0xa3] sm:$0xff] %vm1876_vm2, %v3546_v36  ;;  %9205 = vmatpush1.bf16.msra.mxu1 %v15233_v39  ;;  %v15238_v36 = vld [vmem:[#allocation81_spill] sm:$0xff] }
 0x46c   : > { %v2639_v60 = vpop.f32.mrb[144].mxu1  ;;  %9207 = vmatprep.subr.bf16.mxu1 %v15234_v18  ;;  %v9818_v18 = vld [vmem:[%s11927_s15 + $0x110] sm:$0xff] }
 0x46d   : > { %v12687_v38 = vsub.f32 %v15232_v29, %v2639_v60  ;;  %v8032_v54 = vpop.f32.mrb[145].mxu1  ;;  %8183 = vmatmul.mubr.msk.f32.gmra.mrb[100].mxu0 %vm1876_vm2, %v2811_v22  ;;  %v9817_v60 = vld [vmem:[%s11927_s15 + $0x108] sm:$0xff] }
 0x46e   : > { %v3548_v57 = vpop.permute.xlu0 %3547  ;;  %v3602_v0 = vpop.permute.xlu1 %3601  ;;  %8185 = vmatprep.mubr.msk.f32.mxu0 %vm9843_vm0, %v15147_v30 }
 0x46f   : > { %v2812_v43 = vmul.f32 %v12687_v38, %v12687_v38  ;;  %3565 = vst.msk [vmem:[%s11801_s14 + $0xab] sm:$0xff] %vm1876_vm2, %v3548_v57  ;;  %3620 = vst.msk [vmem:[%s11801_s14 + $0x105] sm:$0xff] %vm1876_vm2, %v3602_v0  ;;  %9209 = vmatpush1.bf16.msra.mxu1 %v15236_v12  ;;  %v15242_v12 = vld [vmem:[#allocation85_spill] sm:$0xff] }
 0x470   : > { %v2644_v7 = vpop.f32.mrb[146].mxu1  ;;  %9211 = vmatprep.subr.bf16.mxu1 %v15237_v4  ;;  %v15243_v4 = vld [vmem:[#allocation86_spill] sm:$0xff] }
 0x471   : > { %v12701_v34 = vsub.f32 %v15235_v28, %v2644_v7  ;;  %v8035_v5 = vpop.f32.mrb[147].mxu1  ;;  %8186 = vmatmul.mubr.msk.f32.gmra.mrb[102].mxu0 %vm1876_vm2, %v2812_v43  ;;  %v15240_v43 = vld [vmem:[#allocation83_spill] sm:$0xff]  ;;  %v15241_v7 = vld [vmem:[#allocation84_spill] sm:$0xff] }
 0x472   : > { %v3604_v51 = vpop.permute.xlu0 %3603  ;;  %v3576_v62 = vpop.permute.xlu1 %3575  ;;  %8188 = vmatprep.mubr.msk.f32.mxu0 %vm9843_vm0, %v15147_v30 }
 0x473   : > { %v2813_v25 = vmul.f32 %v12701_v34, %v12701_v34  ;;  %3621 = vst.msk [vmem:[%s11801_s14 + $0x10d] sm:$0xff] %vm1876_vm2, %v3604_v51  ;;  %3593 = vst.msk [vmem:[%s11801_s14 + $0xdc] sm:$0xff] %vm1876_vm2, %v3576_v62  ;;  %9213 = vmatpush1.bf16.msra.mxu1 %v15238_v36 }
 0x474   : > { %v2649_v33 = vpop.f32.mrb[148].mxu1  ;;  %9215 = vmatprep.subr.bf16.mxu1 %v15239_v2  ;;  %v9820_v2 = vld [vmem:[%s11927_s15 + $0x120] sm:$0xff] }
 0x475   : > { %v12715_v45 = vsub.f32 %v9816_v1, %v2649_v33  ;;  %v8038_v11 = vpop.f32.mrb[149].mxu1  ;;  %8189 = vmatmul.mubr.msk.f32.gmra.mrb[104].mxu0 %vm1876_vm2, %v2813_v25  ;;  %v9819_v1 = vld [vmem:[%s11927_s15 + $0x118] sm:$0xff] }
 0x476   : > { %v3578_v44 = vpop.permute.xlu0 %3577  ;;  %v3550_v24 = vpop.permute.xlu1 %3549  ;;  %8191 = vmatprep.mubr.msk.f32.mxu0 %vm9843_vm0, %v15147_v30 }
 0x477   : > { %v2814_v52 = vmul.f32 %v12715_v45, %v12715_v45  ;;  %3594 = vst.msk [vmem:[%s11801_s14 + $0xe4] sm:$0xff] %vm1876_vm2, %v3578_v44  ;;  %3566 = vst.msk [vmem:[%s11801_s14 + $0xb3] sm:$0xff] %vm1876_vm2, %v3550_v24  ;;  %9217 = vmatpush1.bf16.msra.mxu1 %v15240_v43  ;;  %v9821_v43 = vld [vmem:[%s11927_s15 + $0x128] sm:$0xff] }
 0x478   : > { %v2654_v22 = vpop.f32.mrb[150].mxu1  ;;  %9219 = vmatprep.subr.bf16.mxu1 %v15241_v7 }
 0x479   : > { %v12729_v48 = vsub.f32 %v9817_v60, %v2654_v22  ;;  %v8041_v29 = vpop.f32.mrb[151].mxu1  ;;  %8192 = vmatmul.mubr.msk.f32.gmra.mrb[106].mxu0 %vm1876_vm2, %v2814_v52 }
 0x47a   : > { %v3552_v54 = vpop.permute.xlu0 %3551  ;;  %v3606_v57 = vpop.permute.xlu1 %3605  ;;  %8194 = vmatprep.mubr.msk.f32.mxu0 %vm9843_vm0, %v15147_v30 }
 0x47b   : > { %v2815_v0 = vmul.f32 %v12729_v48, %v12729_v48  ;;  %3567 = vst.msk [vmem:[%s11801_s14 + $0xbb] sm:$0xff] %vm1876_vm2, %v3552_v54  ;;  %3622 = vst.msk [vmem:[%s11801_s14 + $0x115] sm:$0xff] %vm1876_vm2, %v3606_v57  ;;  %9221 = vmatpush1.bf16.msra.mxu1 %v15242_v12 }
 0x47c   : > { %v2659_v39 = vpop.f32.mrb[152].mxu1  ;;  %9223 = vmatprep.subr.bf16.mxu1 %v15243_v4  ;;  %v9823_v4 = vld [vmem:[%s11927_s15 + $0x138] sm:$0xff] }
 0x47d   : > { %v12743_v28 = vsub.f32 %v9818_v18, %v2659_v39  ;;  %v8044_v5 = vpop.f32.mrb[153].mxu1  ;;  %8195 = vmatmul.mubr.msk.f32.gmra.mrb[108].mxu0 %vm1876_vm2, %v2815_v0 }
 0x47e   : > { %v3608_v51 = vpop.permute.xlu0 %3607  ;;  %v3580_v62 = vpop.permute.xlu1 %3579  ;;  %8197 = vmatprep.mubr.msk.f32.mxu0 %vm9843_vm0, %v15147_v30 }
 0x47f   : > { %v2816_v25 = vmul.f32 %v12743_v28, %v12743_v28  ;;  %3623 = vst.msk [vmem:[%s11801_s14 + $0x11d] sm:$0xff] %vm1876_vm2, %v3608_v51  ;;  %3595 = vst.msk [vmem:[%s11801_s14 + $0xec] sm:$0xff] %vm1876_vm2, %v3580_v62  ;;  %v9822_v51 = vld [vmem:[%s11927_s15 + $0x130] sm:$0xff] }
 0x480   : > { %v2664_v33 = vpop.f32.mrb[154].mxu1 }
 0x481   : > { %v12757_v11 = vsub.f32 %v9819_v1, %v2664_v33  ;;  %v8047_v44 = vpop.f32.mrb[155].mxu1  ;;  %8198 = vmatmul.mubr.msk.f32.gmra.mrb[110].mxu0 %vm1876_vm2, %v2816_v25 }
 0x482   : > { %v3582_v24 = vpop.permute.xlu0 %3581  ;;  %v3554_v52 = vpop.permute.xlu1 %3553  ;;  %8200 = vmatprep.mubr.msk.f32.mxu0 %vm9843_vm0, %v15147_v30 }
 0x483   : > { %v2817_v36 = vmul.f32 %v12757_v11, %v12757_v11  ;;  %3596 = vst.msk [vmem:[%s11801_s14 + $0xf4] sm:$0x1] %vm3490_vm3, %v3582_v24  ;;  %3568 = vst.msk [vmem:[%s11801_s14 + $0xc3] sm:$0x1] %vm3490_vm3, %v3554_v52 }
 0x484   : > { %v2669_v22 = vpop.f32.mrb[156].mxu1 }
 0x485   : > { %v12769_v60 = vsub.f32 %v9820_v2, %v2669_v22  ;;  %v8050_v29 = vpop.f32.mrb[157].mxu1  ;;  %8201 = vmatmul.mubr.msk.f32.gmra.mrb[112].mxu0 %vm1876_vm2, %v2817_v36  ;;  %v9824_v36 = vld [vmem:[%s11927_s15 + $0x140] sm:$0xff] }
 0x486   : > { %v3610_v54 = vpop.permute.xlu1 %3609  ;;  %8203 = vmatprep.mubr.msk.f32.mxu0 %vm9843_vm0, %v15147_v30 }
 0x487   : > { %v2818_v57 = vmul.f32 %v12769_v60, %v12769_v60  ;;  %3624 = vst.msk [vmem:[%s11801_s14 + $0x125] sm:$0x1] %vm3490_vm3, %v3610_v54 }
 0x488   : > { %v2674_v0 = vpop.f32.mrb[158].mxu1 }
 0x489   : > { %v12779_v39 = vsub.f32 %v9821_v43, %v2674_v0  ;;  %v8053_v7 = vpop.f32.mrb[159].mxu1  ;;  %8204 = vmatmul.mubr.msk.f32.gmra.mrb[114].mxu0 %vm1876_vm2, %v2818_v57  ;;  %v9825_v57 = vld [vmem:[%s11927_s15 + $0x148] sm:$0xff] }
 0x48a   : > { %8206 = vmatprep.mubr.msk.f32.mxu0 %vm9843_vm0, %v15147_v30 }
 0x48b   : > { %v2819_v18 = vmul.f32 %v12779_v39, %v12779_v39 }
 0x48c   : > { %v2679_v5 = vpop.f32.mrb[160].mxu1 }
 0x48d   : > { %v12787_v62 = vsub.f32 %v9822_v51, %v2679_v5  ;;  %v8056_v25 = vpop.f32.mrb[161].mxu1  ;;  %8207 = vmatmul.mubr.msk.f32.gmra.mrb[116].mxu0 %vm1876_vm2, %v2819_v18  ;;  %v6853_v5 = vld [vmem:[%s10680_s23 + $0x120] sm:$0xff]  ;;  %v9826_v51 = vld [vmem:[%s11927_s15 + $0x150] sm:$0xff] }
 0x48e   : > { %8209 = vmatprep.mubr.msk.f32.mxu0 %vm9843_vm0, %v15147_v30  ;;  %4238 = vmatprep.mubr.f32.mxu1 %v6853_v5 }
 0x48f   : > { %v2820_v12 = vmul.f32 %v12787_v62, %v12787_v62 }
 0x490   : > { %v2684_v33 = vpop.f32.mrb[162].mxu1 }
 0x491   : > { %v12795_v1 = vsub.f32 %v9823_v4, %v2684_v33  ;;  %v8059_v44 = vpop.f32.mrb[163].mxu1  ;;  %8210 = vmatmul.mubr.msk.f32.gmra.mrb[118].mxu0 %vm1876_vm2, %v2820_v12  ;;  %v6852_v33 = vld [vmem:[%s10680_s23 + $0x118] sm:$0xff] }
 0x492   : > { %8212 = vmatprep.mubr.msk.f32.mxu0 %vm9843_vm0, %v15147_v30  ;;  %4239 = vmatmul.mubr.f32.vlgmr.msra.gmra.mrb[210].mxu1 %v6852_v33  ;;  %v15244_v44 = vld [vmem:[#allocation87_spill] sm:$0xff]  ;;  %v15248_v33 = vld [vmem:[#allocation92_spill] sm:$0xff] }
 0x493   : > { %v2821_v24 = vmul.f32 %v12795_v1, %v12795_v1  ;;  %9225 = vmatpush1.bf16.msra.mxu1 %v15244_v44  ;;  %v15249_v44 = vld [vmem:[#allocation94_spill] sm:$0xff] }
 0x494   : > { %v2689_v52 = vpop.f32.mrb[164].mxu1 }
 0x495   : > { %v12803_v22 = vsub.f32 %v9824_v36, %v2689_v52  ;;  %v8062_v2 = vpop.f32.mrb[165].mxu1  ;;  %8213 = vmatmul.mubr.msk.f32.gmra.mrb[120].mxu0 %vm1876_vm2, %v2821_v24  ;;  %v15245_v52 = vld [vmem:[#allocation88_spill] sm:$0xff]  ;;  %v9827_v36 = vld [vmem:[%s11927_s15 + $0x158] sm:$0xff] }
 0x496   : > { %8215 = vmatprep.mubr.msk.f32.mxu0 %vm9843_vm0, %v15147_v30  ;;  %9227 = vmatprep.subr.bf16.mxu1 %v15245_v52 }
 0x497   : > { %v2822_v29 = vmul.f32 %v12803_v22, %v12803_v22 }
 0x498   : > { %v2694_v54 = vpop.f32.mrb[166].mxu1 }
 0x499   : > { %v12811_v0 = vsub.f32 %v9825_v57, %v2694_v54  ;;  %v8065_v43 = vpop.f32.mrb[167].mxu1  ;;  %8216 = vmatmul.mubr.msk.f32.gmra.mrb[122].mxu0 %vm1876_vm2, %v2822_v29  ;;  %v15246_v57 = vld [vmem:[#allocation90_spill] sm:$0xff] }
 0x49a   : > { %8218 = vmatprep.mubr.msk.f32.mxu0 %vm9843_vm0, %v15147_v30  ;;  %9229 = vmatpush1.bf16.msra.mxu1 %v15246_v57 }
 0x49b   : > { %v2823_v7 = vmul.f32 %v12811_v0, %v12811_v0 }
 0x49c   : > { %v2699_v18 = vpop.f32.mrb[168].mxu1 }
 0x49d   : > { %v12820_v25 = vsub.f32 %v9826_v51, %v2699_v18  ;;  %v8068_v12 = vpop.f32.mrb[169].mxu1  ;;  %8219 = vmatmul.mubr.msk.f32.gmra.mrb[124].mxu0 %vm1876_vm2, %v2823_v7  ;;  %v15247_v7 = vld [vmem:[#allocation91_spill] sm:$0xff]  ;;  %v9828_v18 = vld [vmem:[%s11927_s15 + $0x160] sm:$0xff] }
 0x49e   : > { %8221 = vmatprep.mubr.msk.f32.mxu0 %vm9843_vm0, %v15147_v30  ;;  %9231 = vmatprep.subr.bf16.mxu1 %v15247_v7  ;;  %v9830_v7 = vld [vmem:[%s11927_s15 + $0x170] sm:$0xff] }
 0x49f   : > { %v2824_v4 = vmul.f32 %v12820_v25, %v12820_v25  ;;  %9233 = vmatpush1.bf16.msra.mxu1 %v15248_v33  ;;  %v15254_v33 = vld [vmem:[#allocation97_spill] sm:$0xff] }
 0x4a0   : > { %v2704_v24 = vpop.f32.mrb[170].mxu1  ;;  %9235 = vmatprep.subr.bf16.mxu1 %v15249_v44  ;;  %v15255_v44 = vld [vmem:[#allocation99_spill] sm:$0xff] }
 0x4a1   : > { %v12831_v2 = vsub.f32 %v9827_v36, %v2704_v24  ;;  %v8071_v29 = vpop.f32.mrb[171].mxu1  ;;  %8222 = vmatmul.mubr.msk.f32.gmra.mrb[126].mxu0 %vm1876_vm2, %v2824_v4  ;;  %v9829_v24 = vld [vmem:[%s11927_s15 + $0x168] sm:$0xff] }
 0x4a2   : > { %8224 = vmatprep.mubr.msk.f32.mxu0 %vm9843_vm0, %v15147_v30 }
 0x4a3   : > { %v2825_v54 = vmul.f32 %v12831_v2, %v12831_v2 }
 0x4a4   : > { %v2709_v43 = vpop.f32.mrb[172].mxu1 }
 0x4a5   : > { %v12841_v5 = vsub.f32 %v9828_v18, %v2709_v43  ;;  %v8074_v51 = vpop.f32.mrb[173].mxu1  ;;  %8225 = vmatmul.mubr.msk.f32.gmra.mrb[128].mxu0 %vm1876_vm2, %v2825_v54  ;;  %v15251_v54 = vld [vmem:[#allocation95_spill] sm:$0xff]  ;;  %v15252_v43 = vld [vmem:[#allocation96_spill] sm:$0xff] }
 0x4a6   : > { %8227 = vmatprep.mubr.msk.f32.mxu0 %vm9843_vm0, %v15147_v30  ;;  %9237 = vmatpush1.bf16.msra.mxu1 %v15251_v54 }
 0x4a7   : > { %v2826_v12 = vmul.f32 %v12841_v5, %v12841_v5  ;;  %9239 = vmatprep.subr.bf16.mxu1 %v15252_v43 }
 0x4a8   : > { %v2714_v4 = vpop.f32.mrb[174].mxu1 }
 0x4a9   : > { %v12851_v52 = vsub.f32 %v9829_v24, %v2714_v4  ;;  %v8077_v36 = vpop.f32.mrb[175].mxu1  ;;  %8228 = vmatmul.mubr.msk.f32.gmra.mrb[130].mxu0 %vm1876_vm2, %v2826_v12  ;;  %v9831_v24 = vld [vmem:[%s11927_s15 + $0x178] sm:$0xff] }
 0x4aa   : > { %8230 = vmatprep.mubr.msk.f32.mxu0 %vm9843_vm0, %v15147_v30  ;;  %9241 = vmatpush1.bf16.msra.mxu1 %v15254_v33 }
 0x4ab   : > { %15250 = vst [vmem:[#allocation20_spill] sm:$0xff] %v12851_v52  ;;  %v2827_v29 = vmul.f32 %v12851_v52, %v12851_v52  ;;  %9243 = vmatprep.subr.bf16.mxu1 %v15255_v44  ;;  %v6799_v44 = vld [vmem:[%s10135_s29 + $0x1d8] sm:$0xff]  ;;  %v15295_v52 = vld [vmem:[#allocation122_spill] sm:$0xff] }
 0x4ac   : > { %v2719_v57 = vpop.f32.mrb[176].mxu1 }
 0x4ad   : > { %v12861_v18 = vsub.f32 %v9830_v7, %v2719_v57  ;;  %v8080_v51 = vpop.f32.mrb[177].mxu1  ;;  %8231 = vmatmul.mubr.msk.f32.gmra.mrb[132].mxu0 %vm1876_vm2, %v2827_v29  ;;  %v15257_v57 = vld [vmem:[#allocation100_spill] sm:$0xff]  ;;  %v15258_v7 = vld [vmem:[#allocation101_spill] sm:$0xff] }
 0x4ae   : > { %8233 = vmatprep.mubr.msk.f32.mxu0 %vm9843_vm0, %v15147_v30  ;;  %9245 = vmatpush1.bf16.msra.mxu1 %v15257_v57  ;;  %v9832_v51 = vld [vmem:[%s11927_s15 + $0x180] sm:$0xff]  ;;  %v6798_v57 = vld [vmem:[%s10135_s29 + $0x1d0] sm:$0xff] }
 0x4af   : > { %15253 = vst [vmem:[#allocation22_spill] sm:$0xff] %v12861_v18  ;;  %v2828_v12 = vmul.f32 %v12861_v18, %v12861_v18  ;;  %9247 = vmatprep.subr.bf16.mxu1 %v15258_v7  ;;  %v15262_v7 = vld [vmem:[#allocation105_spill] sm:$0xff]  ;;  %v6810_v18 = vld [vmem:[%s10135_s29 + $0x230] sm:$0xff] }
 0x4b0   : > { %v2724_v4 = vpop.f32.mrb[178].mxu1 }
 0x4b1   : > { %v12871_v36 = vsub.f32 %v9831_v24, %v2724_v4  ;;  %v8083_v54 = vpop.f32.mrb[179].mxu1  ;;  %8234 = vmatmul.mubr.msk.f32.gmra.mrb[134].mxu0 %vm1876_vm2, %v2828_v12  ;;  %v15260_v24 = vld [vmem:[#allocation102_spill] sm:$0xff] }
 0x4b2   : > { %8236 = vmatprep.mubr.msk.f32.mxu0 %vm9843_vm0, %v15147_v30  ;;  %9249 = vmatpush1.bf16.msra.mxu1 %v15260_v24  ;;  %v15261_v54 = vld [vmem:[#allocation104_spill] sm:$0xff]  ;;  %v15265_v24 = vld [vmem:[#allocation27_spill] sm:$0xff] }
 0x4b3   : > { %15256 = vst [vmem:[#allocation145_spill] sm:$0xff] %v12871_v36  ;;  %v2829_v29 = vmul.f32 %v12871_v36, %v12871_v36  ;;  %9251 = vmatprep.subr.bf16.mxu1 %v15261_v54  ;;  %v6815_v54 = vld [vmem:[%s10135_s29 + $0x258] sm:$0xff]  ;;  %v15281_v36 = vld [vmem:[#allocation114_spill] sm:$0xff] }
 0x4b4   : > { %v2729_v43 = vpop.f32.mrb[180].mxu1 }
 0x4b5   : > { %v12881_v33 = vsub.f32 %v9832_v51, %v2729_v43  ;;  %v8086_v4 = vpop.f32.mrb[181].mxu1  ;;  %8237 = vmatmul.mubr.msk.f32.gmra.mrb[136].mxu0 %vm1876_vm2, %v2829_v29  ;;  %v6807_v43 = vld [vmem:[%s10135_s29 + $0x218] sm:$0xff]  ;;  %v15263_v29 = vld [vmem:[#allocation106_spill] sm:$0xff] }
 0x4b6   : > { %8239 = vmatprep.mubr.msk.f32.mxu0 %vm9843_vm0, %v15147_v30  ;;  %9253 = vmatpush1.bf16.msra.mxu1 %v15262_v7  ;;  %v15264_v51 = vld [vmem:[#allocation25_spill] sm:$0xff]  ;;  %v6806_v4 = vld [vmem:[%s10135_s29 + $0x210] sm:$0xff] }
 0x4b7   : > { %15259 = vst [vmem:[#allocation2_spill] sm:$0xff] %v12881_v33  ;;  %v2830_v12 = vmul.f32 %v12881_v33, %v12881_v33  ;;  %9255 = vmatprep.subr.bf16.mxu1 %v15263_v29  ;;  %v6814_v7 = vld [vmem:[%s10135_s29 + $0x250] sm:$0xff]  ;;  %v15270_v29 = vld [vmem:[#allocation109_spill] sm:$0xff] }
 0x4b8   : > { %v6867_v33 = vld [vmem:[%s10680_s23 + $0x190] sm:$0xff] }
 0x4b9   : > { %8240 = vmatmul.mubr.msk.f32.gmra.mrb[138].mxu0 %vm1876_vm2, %v2830_v12  ;;  %v15266_v12 = vld [vmem:[#allocation107_spill] sm:$0xff] }
 0x4ba   : > { %3902 = vmatprep.mubr.f32.mxu0 %v6799_v44  ;;  %9257 = vmatpush1.bf16.msra.mxu1 %v15266_v12  ;;  %v15267_v44 = vld [vmem:[#allocation108_spill] sm:$0xff]  ;;  %v6857_v12 = vld [vmem:[%s10680_s23 + $0x140] sm:$0xff] }
 0x4bb   : > { %9259 = vmatprep.subr.bf16.mxu1 %v15267_v44  ;;  %v6831_v44 = vld [vmem:[%s10135_s29 + $0x2d8] sm:$0xff] }
 0x4bd   : > { %3903 = vmatmul.mubr.f32.vlgmr.msra.gmra.mrb[140].mxu0 %v6798_v57  ;;  %v15269_v57 = vld [vmem:[#allocation31_spill] sm:$0xff] }
 0x4be   : > { %9129 = vmatpush3.bf16.msra.mxu0 %v15264_v51  ;;  %3907 = vmatprep.mubr.f32.mxu0 %v6807_v43  ;;  %v6823_v43 = vld [vmem:[%s10135_s29 + $0x298] sm:$0xff]  ;;  %v6858_v51 = vld [vmem:[%s10680_s23 + $0x148] sm:$0xff] }
 0x4bf   : > { %9131 = vmatprep.subr.bf16.mxu0 %v15265_v24  ;;  %9261 = vmatpush1.bf16.msra.mxu1 %v15270_v29  ;;  %v15271_v24 = vld [vmem:[#allocation110_spill] sm:$0xff]  ;;  %v6863_v29 = vld [vmem:[%s10680_s23 + $0x170] sm:$0xff] }
 0x4c0   : > { %9263 = vmatprep.subr.bf16.mxu1 %v15271_v24  ;;  %4244 = vmatprep.mubr.f32.mxu1 %v6858_v51  ;;  %v15275_v24 = vld [vmem:[#allocation37_spill] sm:$0xff]  ;;  %v6830_v51 = vld [vmem:[%s10135_s29 + $0x2d0] sm:$0xff] }
 0x4c1   : > { %3908 = vmatmul.mubr.f32.gmra.mrb[142].mxu0 %v6806_v4  ;;  %v15272_v4 = vld [vmem:[#allocation33_spill] sm:$0xff]  ;;  %4245 = vmatmul.mubr.f32.gmra.mrb[212].mxu1 %v6857_v12 }
 0x4c2   : > { %9133 = vmatpush3.bf16.msra.mxu0 %v15268_v19  ;;  %3912 = vmatprep.mubr.f32.mxu0 %v6815_v54  ;;  %v6822_v19 = vld [vmem:[%s10135_s29 + $0x290] sm:$0xff]  ;;  %v15273_v54 = vld [vmem:[#allocation35_spill] sm:$0xff]  ;;  %v6868_v12 = vld [vmem:[%s10680_s23 + $0x198] sm:$0xff] }
 0x4c3   : > { %9135 = vmatprep.subr.bf16.mxu0 %v15269_v57  ;;  %v15274_v57 = vld [vmem:[#allocation111_spill] sm:$0xff]  ;;  %4250 = vmatprep.mubr.f32.mxu1 %v6863_v29  ;;  %v15278_v29 = vld [vmem:[#allocation113_spill] sm:$0xff] }
 0x4c4   : > { %9265 = vmatpush1.bf16.msra.mxu1 %v15274_v57 }
 0x4c5   : > { %3913 = vmatmul.mubr.f32.gmra.mrb[144].mxu0 %v6814_v7  ;;  %v6862_v7 = vld [vmem:[%s10680_s23 + $0x168] sm:$0xff] }
 0x4c6   : > { %9137 = vmatpush3.bf16.msra.mxu0 %v15272_v4  ;;  %3917 = vmatprep.mubr.f32.mxu0 %v6823_v43  ;;  %v15276_v4 = vld [vmem:[#allocation39_spill] sm:$0xff]  ;;  %v6839_v43 = vld [vmem:[%s10135_s29 + $0x318] sm:$0xff] }
 0x4c7   : > { %9139 = vmatprep.subr.bf16.mxu0 %v15273_v54  ;;  %v15277_v54 = vld [vmem:[#allocation112_spill] sm:$0xff]  ;;  %4251 = vmatmul.mubr.f32.gmra.mrb[214].mxu1 %v6862_v7 }
 0x4c8   : > { %9267 = vmatprep.subr.bf16.mxu1 %v15277_v54  ;;  %v6847_v54 = vld [vmem:[%s10135_s29 + $0x358] sm:$0x1]  ;;  %4256 = vmatprep.mubr.f32.mxu1 %v6868_v12 }
 0x4c9   : > { %3918 = vmatmul.mubr.f32.gmra.mrb[146].mxu0 %v6822_v19  ;;  %9269 = vmatpush1.bf16.msra.mxu1 %v15278_v29  ;;  %v15282_v29 = vld [vmem:[#allocation115_spill] sm:$0xff]  ;;  %v6803_v12 = vld [vmem:[%s10135_s29 + $0x1f8] sm:$0xff] }
 0x4ca   : > { %9141 = vmatpush3.bf16.msra.mxu0 %v15275_v24  ;;  %3922 = vmatprep.mubr.f32.mxu0 %v6831_v44  ;;  %v15279_v24 = vld [vmem:[#allocation41_spill] sm:$0xff]  ;;  %v6838_v44 = vld [vmem:[%s10135_s29 + $0x310] sm:$0xff] }
 0x4cb   : > { %9143 = vmatprep.subr.bf16.mxu0 %v15276_v4  ;;  %v15280_v4 = vld [vmem:[#allocation43_spill] sm:$0xff]  ;;  %9271 = vmatprep.subr.bf16.mxu1 %v15281_v36 }
 0x4cc   : > { %v3044_v21 = vpop.f32.mrb[42].mxu0  ;;  %4257 = vmatmul.mubr.f32.gmra.mrb[216].mxu1 %v6867_v33  ;;  %v15285_v33 = vld [vmem:[#allocation116_spill] sm:$0xff] }
 0x4cd   : > { %v3045_v57 = vadd.f32 1e-05, %v3044_v21  ;;  %v8097_v19 = vpop.f32.mrb[43].mxu0  ;;  %3923 = vmatmul.mubr.f32.gmra.mrb[148].mxu0 %v6830_v51  ;;  %v6873_v21 = vld [vmem:[%s10680_s23 + $0x1c0] sm:$0xff]  ;;  %9273 = vmatpush1.bf16.msra.mxu1 %v15282_v29  ;;  %v15286_v29 = vld [vmem:[#allocation117_spill] sm:$0xff] }
 0x4ce   : > { %9145 = vmatpush3.bf16.msra.mxu0 %v15279_v24  ;;  %3927 = vmatprep.mubr.f32.mxu0 %v6839_v43  ;;  %v6872_v43 = vld [vmem:[%s10680_s23 + $0x1b8] sm:$0xff] }
 0x4cf   : > { %9578 = vrsqrt.f32 %v3045_v57  ;;  %9147 = vmatprep.subr.bf16.mxu0 %v15280_v4  ;;  %v15283_v24 = vld [vmem:[#allocation45_spill] sm:$0xff]  ;;  %v6846_v57 = vld [vmem:[%s10135_s29 + $0x350] sm:$0x1]  ;;  %v15284_v4 = vld [vmem:[#allocation47_spill] sm:$0xff]  ;;  %4262 = vmatprep.mubr.f32.mxu1 %v6873_v21 }
 0x4d0   : > { %v3049_v7 = vpop.f32.mrb[44].mxu0  ;;  %9275 = vmatprep.subr.bf16.mxu1 %v15285_v33  ;;  %4263 = vmatmul.mubr.f32.gmra.mrb[218].mxu1 %v6872_v43  ;;  %v6883_v43 = vld [vmem:[%s10680_s23 + $0x210] sm:$0x1] }
 0x4d1   : > { %v3050_v51 = vadd.f32 1e-05, %v3049_v7  ;;  %v8100_v19 = vpop.f32.mrb[45].mxu0  ;;  %3928 = vmatmul.mubr.f32.gmra.mrb[150].mxu0 %v6838_v44  ;;  %v6878_v7 = vld [vmem:[%s10680_s23 + $0x1e8] sm:$0xff]  ;;  %9277 = vmatpush1.bf16.msra.mxu1 %v15286_v29 }
 0x4d2   : > { %9149 = vmatpush3.bf16.msra.mxu0 %v15283_v24  ;;  %3932 = vmatprep.mubr.f32.mxu0 %v6847_v54  ;;  %v6877_v24 = vld [vmem:[%s10680_s23 + $0x1e0] sm:$0xff]  ;;  %v15287_v54 = vld [vmem:[#allocation49_spill] sm:$0xff]  ;;  %v6882_v29 = vld [vmem:[%s10680_s23 + $0x208] sm:$0x1] }
 0x4d3   : > { %9580 = vrsqrt.f32 %v3050_v51  ;;  %9151 = vmatprep.subr.bf16.mxu0 %v15284_v4  ;;  %v15288_v51 = vld [vmem:[#allocation51_spill] sm:$0xff]  ;;  %4268 = vmatprep.mubr.f32.mxu1 %v6878_v7  ;;  %v15289_v4 = vld [vmem:[#allocation118_spill] sm:$0xff]  ;;  %v6802_v7 = vld [vmem:[%s10135_s29 + $0x1f0] sm:$0xff] }
 0x4d4   : > { %v3054_v36 = vpop.f32.mrb[46].mxu0  ;;  %9279 = vmatprep.subr.bf16.mxu1 %v15289_v4  ;;  %4269 = vmatmul.mubr.f32.gmra.mrb[220].mxu1 %v6877_v24  ;;  %v6811_v24 = vld [vmem:[%s10135_s29 + $0x238] sm:$0xff] }
 0x4d5   : > { %v3055_v44 = vadd.f32 1e-05, %v3054_v36  ;;  %v8103_v19 = vpop.f32.mrb[47].mxu0  ;;  %3933 = vmatmul.mubr.f32.gmra.mrb[152].mxu0 %v6846_v57  ;;  %4274 = vmatprep.mubr.f32.mxu1 %v6883_v43  ;;  %v6855_v43 = vld [vmem:[%s10680_s23 + $0x130] sm:$0xff] }
 0x4d6   : > { %9153 = vmatpush3.bf16.msra.mxu0 %v15287_v54  ;;  %4102 = vmatprep.mubr.f32.mxu0 %v6803_v12  ;;  %v15290_v19 = vld [vmem:[#allocation119_spill] sm:$0xff]  ;;  %v15292_v54 = vld [vmem:[#allocation120_spill] sm:$0xff] }
 0x4d7   : > { %9582 = vrsqrt.f32 %v3055_v44  ;;  %9155 = vmatprep.subr.bf16.mxu0 %v15288_v51  ;;  %9281 = vmatpush1.bf16.msra.mxu1 %v15290_v19  ;;  %v15291_v44 = vld [vmem:[#allocation53_spill] sm:$0xff]  ;;  %v15293_v51 = vmov 0.0|0.0  }
 0x4d8   : > { %v3059_v21 = vpop.f32.mrb[48].mxu0  ;;  %9283 = vmatprep.subr.bf16.mxu1 %v15292_v54  ;;  %4275 = vmatmul.mubr.f32.gmra.mrb[222].mxu1 %v6882_v29  ;;  %v15294_v19 = vld [vmem:[#allocation121_spill] sm:$0xff] }
 0x4d9   : > { %v9579_v36 = vpop.eup %9578  ;;  %v3060_v57 = vadd.f32 1e-05, %v3059_v21  ;;  %v8106_v33 = vpop.f32.mrb[49].mxu0  ;;  %4345 = vmatprep.mubr.f32.mxu1 %v6855_v43  ;;  %v15296_v29 = vld [vmem:[#allocation89_spill] sm:$0xff]  ;;  %v15297_v43 = vld [vmem:[#allocation123_spill] sm:$0xff] }
 0x4da   : > { %v3337_v12 = vmul.f32 %v9579_v36, %v12301_v35  ;;  %9157 = vmatpush3.bf16.msra.mxu0 %v15291_v44  ;;  %v6854_v44 = vld [vmem:[%s10680_s23 + $0x128] sm:$0xff] }
 0x4db   : > { %9584 = vrsqrt.f32 %v3060_v57  ;;  %9318 = vmatprep.subr.bf16.mxu0 %v15293_v51  ;;  %9285 = vmatpush1.bf16.msra.mxu1 %v15294_v19  ;;  %v6827_v19 = vld [vmem:[%s10135_s29 + $0x2b8] sm:$0xff] }
 0x4dc   : > { %v3386_v21 = vmul.f32 %v3337_v12, %v11789_v59  ;;  %v3064_v4 = vpop.f32.mrb[50].mxu0  ;;  %v6819_v12 = vld [vmem:[%s10135_s29 + $0x278] sm:$0xff]  ;;  %9287 = vmatprep.subr.bf16.mxu1 %v15295_v52 }
 0x4dd   : > { %v9581_v33 = vpop.eup %9580  ;;  %v3065_v35 = vadd.f32 1e-05, %v3064_v4  ;;  %4103 = vmatmul.mubr.f32.vlgmr.msra.gmra.mrb[154].mxu0 %v6802_v7  ;;  %v8109_v36 = vpop.f32.mrb[51].mxu0 }
 0x4de   : > { %v3435_v57 = vadd.f32 %v3386_v21, %v11794_v53  ;;  %v3338_v54 = vmul.f32 %v9581_v33, %v12318_v56  ;;  %4107 = vmatprep.mubr.f32.mxu0 %v6811_v24  ;;  %9320 = vmatpush3.bf16.msra.mxu0 %v15296_v29  ;;  %v15298_v36 = vld [vmem:[#allocation124_spill] sm:$0xff] }
 0x4df   : > { %9586 = vrsqrt.f32 %v3065_v35  ;;  %4346 = vmatmul.mubr.f32.vlgmr.msra.gmra.mrb[210].mxu1 %v6854_v44  ;;  %9321 = vmatprep.subr.bf16.mxu0 %v15293_v51  ;;  %v6818_v35 = vld [vmem:[%s10135_s29 + $0x270] sm:$0xff]  ;;  %v6860_v44 = vld [vmem:[%s10680_s23 + $0x158] sm:$0xff] }
 0x4e0   : > { %3632 = vst.msk [vmem:[%s11801_s14 + $0x157] sm:$0xff] %vm1876_vm2, %v3435_v57  ;;  %v3387_v7 = vmul.f32 %v3338_v54, %v11789_v59  ;;  %v3069_v4 = vpop.f32.mrb[52].mxu0  ;;  %9289 = vmatpush1.bf16.msra.mxu1 %v15297_v43  ;;  %v15299_v57 = vld [vmem:[#allocation93_spill] sm:$0xff]  ;;  %4351 = vmatprep.mubr.f32.mxu1 %v6860_v44  ;;  %v6826_v43 = vld [vmem:[%s10135_s29 + $0x2b0] sm:$0xff]  ;;  %v15302_v44 = vld [vmem:[#allocation98_spill] sm:$0xff] }
 0x4e1   : > { %v9583_v56 = vpop.eup %9582  ;;  %v3070_v24 = vadd.f32 1e-05, %v3069_v4  ;;  %4108 = vmatmul.mubr.f32.gmra.mrb[156].mxu0 %v6810_v18  ;;  %v8112_v21 = vpop.f32.mrb[53].mxu0  ;;  %9291 = vmatprep.subr.bf16.mxu1 %v15298_v36  ;;  %v6865_v36 = vld [vmem:[%s10680_s23 + $0x180] sm:$0xff] }
 0x4e2   : > { %v3436_v52 = vadd.f32 %v3387_v7, %v11794_v53  ;;  %v3339_v33 = vmul.f32 %v9583_v56, %v12340_v50  ;;  %4112 = vmatprep.mubr.f32.mxu0 %v6819_v12  ;;  %9323 = vmatpush3.bf16.msra.mxu0 %v15299_v57  ;;  %v6859_v7 = vld [vmem:[%s10680_s23 + $0x150] sm:$0xff]  ;;  %v15300_v56 = vld [vmem:[#allocation125_spill] sm:$0xff] }
 0x4e3   : > { %9588 = vrsqrt.f32 %v3070_v24  ;;  %9324 = vmatprep.subr.bf16.mxu0 %v15293_v51  ;;  %4352 = vmatmul.mubr.f32.gmra.mrb[212].mxu1 %v6859_v7 }
 0x4e4   : > { %3633 = vst.msk [vmem:[%s11801_s14 + $0x15f] sm:$0xff] %vm1876_vm2, %v3436_v52  ;;  %v3388_v18 = vmul.f32 %v3339_v33, %v11789_v59  ;;  %v3074_v54 = vpop.f32.mrb[54].mxu0  ;;  %9293 = vmatpush1.bf16.msra.mxu1 %v15300_v56  ;;  %v6835_v52 = vld [vmem:[%s10135_s29 + $0x2f8] sm:$0xff]  ;;  %v15301_v33 = vld [vmem:[#allocation126_spill] sm:$0xff]  ;;  %4357 = vmatprep.mubr.f32.mxu1 %v6865_v36  ;;  %v6834_v56 = vld [vmem:[%s10135_s29 + $0x2f0] sm:$0xff] }
 0x4e5   : > { %v9585_v50 = vpop.eup %9584  ;;  %v3075_v12 = vadd.f32 1e-05, %v3074_v54  ;;  %4113 = vmatmul.mubr.f32.gmra.mrb[158].mxu0 %v6818_v35  ;;  %v8115_v4 = vpop.f32.mrb[55].mxu0  ;;  %9295 = vmatprep.subr.bf16.mxu1 %v15301_v33  ;;  %v6870_v33 = vld [vmem:[%s10680_s23 + $0x1a8] sm:$0xff] }
 0x4e6   : > { %v3437_v24 = vadd.f32 %v3388_v18, %v11794_v53  ;;  %v3340_v21 = vmul.f32 %v9585_v50, %v12362_v23  ;;  %4117 = vmatprep.mubr.f32.mxu0 %v6827_v19  ;;  %9326 = vmatpush3.bf16.msra.mxu0 %v15302_v44  ;;  %v6864_v23 = vld [vmem:[%s10680_s23 + $0x178] sm:$0xff]  ;;  %v15303_v50 = vld [vmem:[#allocation127_spill] sm:$0xff] }
 0x4e7   : > { %9590 = vrsqrt.f32 %v3075_v12  ;;  %9327 = vmatprep.subr.bf16.mxu0 %v15293_v51  ;;  %4358 = vmatmul.mubr.f32.gmra.mrb[214].mxu1 %v6864_v23  ;;  %v15305_v36 = vld [vmem:[#allocation103_spill] sm:$0xff] }
 0x4e8   : > { %3634 = vst.msk [vmem:[%s11801_s14 + $0x167] sm:$0xff] %vm1876_vm2, %v3437_v24  ;;  %v3389_v35 = vmul.f32 %v3340_v21, %v11789_v59  ;;  %v3079_v54 = vpop.f32.mrb[56].mxu0  ;;  %9297 = vmatpush1.bf16.msra.mxu1 %v15303_v50  ;;  %v6843_v24 = vld [vmem:[%s10135_s29 + $0x338] sm:$0xff]  ;;  %v15304_v21 = vld [vmem:[#allocation128_spill] sm:$0xff]  ;;  %4363 = vmatprep.mubr.f32.mxu1 %v6870_v33 }
 0x4e9   : > { %v9587_v19 = vpop.eup %9586  ;;  %v3080_v18 = vadd.f32 1e-05, %v3079_v54  ;;  %4118 = vmatmul.mubr.f32.gmra.mrb[160].mxu0 %v6826_v43  ;;  %v8118_v7 = vpop.f32.mrb[57].mxu0  ;;  %9299 = vmatprep.subr.bf16.mxu1 %v15304_v21  ;;  %v6842_v50 = vld [vmem:[%s10135_s29 + $0x330] sm:$0xff] }
 0x4ea   : > { %v3438_v12 = vadd.f32 %v3389_v35, %v11794_v53  ;;  %v3341_v4 = vmul.f32 %v9587_v19, %v12380_v9  ;;  %4122 = vmatprep.mubr.f32.mxu0 %v6835_v52  ;;  %9329 = vmatpush3.bf16.msra.mxu0 %v15305_v36  ;;  %v6869_v9 = vld [vmem:[%s10680_s23 + $0x1a0] sm:$0xff]  ;;  %v15306_v19 = vld [vmem:[#allocation129_spill] sm:$0xff]  ;;  %v6875_v21 = vld [vmem:[%s10680_s23 + $0x1d0] sm:$0xff] }
 0x4eb   : > { %9592 = vrsqrt.f32 %v3080_v18  ;;  %9330 = vmatprep.subr.bf16.mxu0 %v15293_v51  ;;  %4364 = vmatmul.mubr.f32.gmra.mrb[216].mxu1 %v6869_v9  ;;  %v15308_v9 = vld [vmem:[#allocation131_spill] sm:$0xff] }
 0x4ec   : > { %3635 = vst.msk [vmem:[%s11801_s14 + $0x16f] sm:$0xff] %vm1876_vm2, %v3438_v12  ;;  %v3390_v43 = vmul.f32 %v3341_v4, %v11789_v59  ;;  %v3084_v54 = vpop.f32.mrb[58].mxu0  ;;  %9301 = vmatpush1.bf16.msra.mxu1 %v15306_v19  ;;  %v6851_v12 = vld [vmem:[%s10135_s29 + $0x378] sm:$0x1]  ;;  %v15307_v4 = vld [vmem:[#allocation130_spill] sm:$0xff]  ;;  %4369 = vmatprep.mubr.f32.mxu1 %v6875_v21  ;;  %v15309_v19 = vld [vmem:[#allocation132_spill] sm:$0xff] }
 0x4ed   : > { %v9589_v52 = vpop.eup %9588  ;;  %v3085_v35 = vadd.f32 1e-05, %v3084_v54  ;;  %4123 = vmatmul.mubr.f32.gmra.mrb[162].mxu0 %v6834_v56  ;;  %v8121_v23 = vpop.f32.mrb[59].mxu0  ;;  %9303 = vmatprep.subr.bf16.mxu1 %v15307_v4  ;;  %v6879_v4 = vld [vmem:[%s10680_s23 + $0x1f0] sm:$0xff] }
 0x4ee   : > { %v3439_v18 = vadd.f32 %v3390_v43, %v11794_v53  ;;  %v3342_v7 = vmul.f32 %v9589_v52, %v12392_v16  ;;  %4127 = vmatprep.mubr.f32.mxu0 %v6843_v24  ;;  %v6874_v43 = vld [vmem:[%s10680_s23 + $0x1c8] sm:$0xff]  ;;  %v6850_v23 = vld [vmem:[%s10135_s29 + $0x370] sm:$0x1] }
 0x4ef   : > { %9594 = vrsqrt.f32 %v3085_v35  ;;  %4370 = vmatmul.mubr.f32.gmra.mrb[218].mxu1 %v6874_v43 }
 0x4f0   : > { %3636 = vst.msk [vmem:[%s11801_s14 + $0x177] sm:$0xff] %vm1876_vm2, %v3439_v18  ;;  %v3391_v56 = vmul.f32 %v3342_v7, %v11789_v59  ;;  %v3089_v33 = vpop.f32.mrb[60].mxu0  ;;  %9305 = vmatpush1.bf16.msra.mxu1 %v15308_v9  ;;  %v6880_v18 = vld [vmem:[%s10680_s23 + $0x1f8] sm:$0xff] }
 0x4f1   : > { %v9591_v54 = vpop.eup %9590  ;;  %v3090_v16 = vadd.f32 1e-05, %v3089_v33  ;;  %4128 = vmatmul.mubr.f32.gmra.mrb[164].mxu0 %v6842_v50  ;;  %v8124_v24 = vpop.f32.mrb[61].mxu0  ;;  %9307 = vmatprep.subr.bf16.mxu1 %v15309_v19  ;;  %v15312_v19 = vld [vmem:[#allocation135_spill] sm:$0xff] }
 0x4f2   : > { %v3440_v52 = vadd.f32 %v3391_v56, %v11794_v53  ;;  %v3343_v35 = vmul.f32 %v9591_v54, %v12404_v17  ;;  %4132 = vmatprep.mubr.f32.mxu0 %v6851_v12  ;;  %4375 = vmatprep.mubr.f32.mxu1 %v6880_v18  ;;  %v15310_v12 = vld [vmem:[#allocation133_spill] sm:$0xff]  ;;  %v15311_v54 = vld [vmem:[#allocation134_spill] sm:$0xff] }
 0x4f3   : > { %9596 = vrsqrt.f32 %v3090_v16  ;;  %4376 = vmatmul.mubr.f32.gmra.mrb[220].mxu1 %v6879_v4  ;;  %v6885_v16 = vld [vmem:[%s10680_s23 + $0x220] sm:$0x1] }
 0x4f4   : > { %3637 = vst.msk [vmem:[%s11801_s14 + $0x17f] sm:$0xff] %vm1876_vm2, %v3440_v52  ;;  %v3392_v7 = vmul.f32 %v3343_v35, %v11789_v59  ;;  %v3094_v50 = vpop.f32.mrb[62].mxu0  ;;  %9309 = vmatpush1.bf16.msra.mxu1 %v15310_v12  ;;  %4381 = vmatprep.mubr.f32.mxu1 %v6885_v16  ;;  %v6884_v52 = vld [vmem:[%s10680_s23 + $0x218] sm:$0x1] }
 0x4f5   : > { %v9593_v21 = vpop.eup %9592  ;;  %v3095_v56 = vadd.f32 1e-05, %v3094_v50  ;;  %4133 = vmatmul.mubr.f32.gmra.mrb[166].mxu0 %v6850_v23  ;;  %v8127_v17 = vpop.f32.mrb[63].mxu0  ;;  %9311 = vmatprep.subr.bf16.mxu1 %v15311_v54  ;;  %v15313_v50 = vld [vmem:[#allocation136_spill] sm:$0xff] }
 0x4f6   : > { %v3441_v33 = vadd.f32 %v3392_v7, %v11794_v53  ;;  %v3344_v43 = vmul.f32 %v9593_v21, %v12416_v26  ;;  %8258 = vmatprep.mubr.msk.f32.mxu0 %vm9843_vm0, %v15147_v30 }
 0x4f7   : > { %9598 = vrsqrt.f32 %v3095_v56  ;;  %4382 = vmatmul.mubr.f32.gmra.mrb[222].mxu1 %v6884_v52 }
 0x4f8   : > { %3638 = vst.msk [vmem:[%s11801_s14 + $0x187] sm:$0xff] %vm1876_vm2, %v3441_v33  ;;  %v3393_v24 = vmul.f32 %v3344_v43, %v11789_v59  ;;  %v3099_v9 = vpop.f32.mrb[64].mxu0  ;;  %9313 = vmatpush1.bf16.msra.mxu1 %v15312_v19  ;;  %4452 = vmatprep.mubr.f32.mxu1 %v15147_v30  ;;  %v15314_v33 = vld [vmem:[#allocation137_spill] sm:$0xff] }
 0x4f9   : > { %v9595_v35 = vpop.eup %9594  ;;  %v3100_v23 = vadd.f32 1e-05, %v3099_v9  ;;  %v8130_v26 = vpop.f32.mrb[65].mxu0  ;;  %9315 = vmatprep.subr.bf16.mxu1 %v15313_v50  ;;  %v6856_v43 = vld [vmem:[%s10680_s23 + $0x138] sm:$0xff] }
 0x4fa   : > { %v3442_v18 = vadd.f32 %v3393_v24, %v11794_v53  ;;  %v3345_v7 = vmul.f32 %v9595_v35, %v12427_v20 }
 0x4fb   : > { %9600 = vrsqrt.f32 %v3100_v23 }
 0x4fc   : > { %3639 = vst.msk [vmem:[%s11801_s14 + $0x18f] sm:$0xff] %vm1876_vm2, %v3442_v18  ;;  %v3394_v4 = vmul.f32 %v3345_v7, %v11789_v59  ;;  %v3104_v21 = vpop.f32.mrb[66].mxu0  ;;  %9317 = vmatpush1.bf16.msra.mxu1 %v15314_v33 }
 0x4fd   : > { %v9597_v56 = vpop.eup %9596  ;;  %v3105_v17 = vadd.f32 1e-05, %v3104_v21  ;;  %v8133_v12 = vpop.f32.mrb[67].mxu0  ;;  %9428 = vmatprep.subr.bf16.mxu1 %v15293_v51 }
 0x4fe   : > { %v3443_v20 = vadd.f32 %v3394_v4, %v11794_v53  ;;  %v3346_v54 = vmul.f32 %v9597_v56, %v12437_v37  ;;  %v7542_v4 = vpop.f32.mrb[182].mxu1 }
 0x4ff   : > { %9602 = vrsqrt.f32 %v3105_v17  ;;  %4453 = vmatmul.mubr.f32.vlgmr.msra.gmra.mrb[210].mxu1 %v6856_v43 }
 0x500   : > { %3640 = vst.msk [vmem:[%s11801_s14 + $0x197] sm:$0xff] %vm1876_vm2, %v3443_v20  ;;  %v3395_v16 = vmul.f32 %v3346_v54, %v11789_v59  ;;  %v3109_v24 = vpop.f32.mrb[68].mxu0  ;;  %4458 = vmatprep.mubr.f32.mxu1 %v15147_v30  ;;  %9430 = vmatpush3.bf16.msra.mxu1 %v15296_v29 }
 0x501   : > { %v9599_v9 = vpop.eup %9598  ;;  %v3110_v52 = vadd.f32 1e-05, %v3109_v24  ;;  %v8136_v35 = vpop.f32.mrb[69].mxu0  ;;  %9431 = vmatprep.subr.bf16.mxu1 %v15293_v51 }
 0x502   : > { %v3444_v23 = vadd.f32 %v3395_v16, %v11794_v53  ;;  %v3347_v37 = vmul.f32 %v9599_v9, %v12445_v47  ;;  %v7543_v47 = vpop.f32.mrb[183].mxu1 }
 0x503   : > { %9604 = vrsqrt.f32 %v3110_v52  ;;  %v7545_v17 = vpop.f32.mrb[184].mxu1 }
 0x504   : > { %3641 = vst.msk [vmem:[%s11801_s14 + $0x19f] sm:$0xff] %vm1876_vm2, %v3444_v23  ;;  %v3396_v26 = vmul.f32 %v3347_v37, %v11789_v59  ;;  %v3114_v19 = vpop.f32.mrb[70].mxu0  ;;  %9433 = vmatpush3.bf16.msra.mxu1 %v15299_v57  ;;  %v7546_v43 = vpop.f32.mrb[185].mxu1 }
 0x505   : > { %v9601_v18 = vpop.eup %9600  ;;  %v3115_v7 = vadd.f32 1e-05, %v3114_v19  ;;  %v8139_v50 = vpop.f32.mrb[71].mxu0 }
 0x506   : > { %v3445_v21 = vadd.f32 %v3396_v26, %v11794_v53  ;;  %v3348_v56 = vmul.f32 %v9601_v18, %v12455_v6  ;;  %v7548_v24 = vpop.f32.mrb[186].mxu1 }
 0x507   : > { %9606 = vrsqrt.f32 %v3115_v7  ;;  %v7549_v35 = vpop.f32.mrb[187].mxu1 }
 0x508   : > { %3642 = vst.msk [vmem:[%s11801_s14 + $0x1a7] sm:$0xff] %vm1876_vm2, %v3445_v21  ;;  %v3397_v12 = vmul.f32 %v3348_v56, %v11789_v59  ;;  %v3119_v33 = vpop.f32.mrb[72].mxu0  ;;  %v7551_v6 = vpop.f32.mrb[188].mxu1 }
 0x509   : > { %v9603_v20 = vpop.eup %9602  ;;  %v3120_v54 = vadd.f32 1e-05, %v3119_v33  ;;  %v8142_v16 = vpop.f32.mrb[73].mxu0 }
 0x50a   : > { %v3446_v9 = vadd.f32 %v3397_v12, %v11794_v53  ;;  %v3349_v52 = vmul.f32 %v9603_v20, %v12465_v40  ;;  %v7552_v26 = vpop.f32.mrb[189].mxu1 }
 0x50b   : > { %9608 = vrsqrt.f32 %v3120_v54  ;;  %v7554_v50 = vpop.f32.mrb[190].mxu1  ;;  %v13078_v54 = vadd.f32 %v7543_v47, %v7542_v4 }
 0x50c   : > { %3643 = vst.msk [vmem:[%s11801_s14 + $0x1af] sm:$0xff] %vm1876_vm2, %v3446_v9  ;;  %v3398_v23 = vmul.f32 %v3349_v52, %v11789_v59  ;;  %v3124_v37 = vpop.f32.mrb[74].mxu0  ;;  %v7555_v12 = vpop.f32.mrb[191].mxu1 }
 0x50d   : > { %v9605_v19 = vpop.eup %9604  ;;  %v3125_v18 = vadd.f32 1e-05, %v3124_v37  ;;  %v8145_v7 = vpop.f32.mrb[75].mxu0 }
 0x50e   : > { %v3447_v21 = vadd.f32 %v3398_v23, %v11794_v53  ;;  %v3350_v56 = vmul.f32 %v9605_v19, %v12477_v27  ;;  %v7557_v40 = vpop.f32.mrb[192].mxu1 }
 0x50f   : > { %9610 = vrsqrt.f32 %v3125_v18  ;;  %v7558_v16 = vpop.f32.mrb[193].mxu1 }
 0x510   : > { %3644 = vst.msk [vmem:[%s11801_s14 + $0x1b7] sm:$0xff] %vm1876_vm2, %v3447_v21  ;;  %v3399_v33 = vmul.f32 %v3350_v56, %v11789_v59  ;;  %v3129_v20 = vpop.f32.mrb[76].mxu0  ;;  %v7560_v7 = vpop.f32.mrb[194].mxu1 }
 0x511   : > { %v9607_v9 = vpop.eup %9606  ;;  %v3130_v52 = vadd.f32 1e-05, %v3129_v20  ;;  %v8148_v37 = vpop.f32.mrb[77].mxu0 }
 0x512   : > { %v3448_v23 = vadd.f32 %v3399_v33, %v11794_v53  ;;  %v3351_v27 = vmul.f32 %v9607_v9, %v12489_v58  ;;  %v7561_v19 = vpop.f32.mrb[195].mxu1  ;;  %v13089_v58 = vadd.f32 %v7546_v43, %v7545_v17 }
 0x513   : > { %9612 = vrsqrt.f32 %v3130_v52  ;;  %v7648_v18 = vpop.f32.mrb[196].mxu1 }
 0x514   : > { %3645 = vst.msk [vmem:[%s11801_s14 + $0x1bf] sm:$0xff] %vm1876_vm2, %v3448_v23  ;;  %v3400_v21 = vmul.f32 %v3351_v27, %v11789_v59  ;;  %v3134_v56 = vpop.f32.mrb[78].mxu0  ;;  %v7649_v4 = vpop.f32.mrb[197].mxu1 }
 0x515   : > { %v9609_v47 = vpop.eup %9608  ;;  %v3135_v36 = vadd.f32 1e-05, %v3134_v56  ;;  %v8151_v44 = vpop.f32.mrb[79].mxu0  ;;  %v13085_v20 = vadd.f32 %v7649_v4, %v7648_v18  ;;  %v13103_v4 = vadd.f32 %v7552_v26, %v7551_v6  ;;  %v13112_v6 = vadd.f32 %v7555_v12, %v7554_v50 }
 0x516   : > { %v3449_v37 = vadd.f32 %v3400_v21, %v11794_v53  ;;  %v3352_v33 = vmul.f32 %v9609_v47, %v12501_v10  ;;  %v7651_v56 = vpop.f32.mrb[198].mxu1  ;;  %v13096_v10 = vadd.f32 %v7549_v35, %v7548_v24  ;;  %v13114_v26 = vadd.f32 %v7558_v16, %v7557_v40  ;;  %v6861_v40 = vld [vmem:[%s10680_s23 + $0x160] sm:$0xff] }
 0x517   : > { %9614 = vrsqrt.f32 %v3135_v36  ;;  %v7652_v21 = vpop.f32.mrb[199].mxu1  ;;  %4459 = vmatmul.mubr.f32.gmra.mrb[212].mxu1 %v6861_v40 }
 0x518   : > { %3646 = vst.msk [vmem:[%s11801_s14 + $0x1c7] sm:$0xff] %vm1876_vm2, %v3449_v37  ;;  %v3401_v9 = vmul.f32 %v3352_v33, %v11789_v59  ;;  %v3139_v52 = vpop.f32.mrb[80].mxu0  ;;  %v13098_v36 = vadd.f32 %v7652_v21, %v7651_v56  ;;  %v7654_v33 = vpop.f32.mrb[200].mxu1  ;;  %4464 = vmatprep.mubr.f32.mxu1 %v15147_v30 }
 0x519   : > { %v9611_v23 = vpop.eup %9610  ;;  %v3140_v27 = vadd.f32 1e-05, %v3139_v52  ;;  %v8154_v57 = vpop.f32.mrb[81].mxu0 }
 0x51a   : > { %v3450_v44 = vadd.f32 %v3401_v9, %v11794_v53  ;;  %v3353_v18 = vmul.f32 %v9611_v23, %v12513_v14  ;;  %v7655_v52 = vpop.f32.mrb[201].mxu1 }
 0x51b   : > { %9616 = vrsqrt.f32 %v3140_v27  ;;  %v13107_v24 = vadd.f32 %v7655_v52, %v7654_v33  ;;  %v13116_v27 = vadd.f32 %v7561_v19, %v7560_v7 }
 0x51c   : > { %3647 = vst.msk [vmem:[%s11801_s14 + $0x1cf] sm:$0xff] %vm1876_vm2, %v3450_v44  ;;  %v3402_v17 = vmul.f32 %v3353_v18, %v11789_v59  ;;  %v3144_v43 = vpop.f32.mrb[82].mxu0  ;;  %v7657_v18 = vpop.f32.mrb[202].mxu1 }
 0x51d   : > { %v9613_v57 = vpop.eup %9612  ;;  %v3145_v47 = vadd.f32 1e-05, %v3144_v43  ;;  %v8157_v37 = vpop.f32.mrb[83].mxu0 }
 0x51e   : > { %v3451_v14 = vadd.f32 %v3402_v17, %v11794_v53  ;;  %v3354_v9 = vmul.f32 %v9613_v57, %v12525_v32  ;;  %v7658_v43 = vpop.f32.mrb[203].mxu1 }
 0x51f   : > { %9618 = vrsqrt.f32 %v3145_v47  ;;  %v13120_v57 = vadd.f32 %v7658_v43, %v7657_v18  ;;  %v7660_v47 = vpop.f32.mrb[204].mxu1 }
 0x520   : > { %3648 = vst.msk [vmem:[%s11801_s14 + $0x1d7] sm:$0xff] %vm1876_vm2, %v3451_v14  ;;  %v3403_v35 = vmul.f32 %v3354_v9, %v11789_v59  ;;  %v3149_v23 = vpop.f32.mrb[84].mxu0  ;;  %v7661_v33 = vpop.f32.mrb[205].mxu1 }
 0x521   : > { %v9615_v56 = vpop.eup %9614  ;;  %v3150_v44 = vadd.f32 1e-05, %v3149_v23  ;;  %v8160_v32 = vpop.f32.mrb[85].mxu0  ;;  %v13129_v14 = vadd.f32 %v7661_v33, %v7660_v47 }
 0x522   : > { %v3452_v21 = vadd.f32 %v3403_v35, %v11794_v53  ;;  %v3355_v17 = vmul.f32 %v9615_v56, %v12537_v3  ;;  %v6866_v35 = vld [vmem:[%s10680_s23 + $0x188] sm:$0xff] }
 0x523   : > { %9620 = vrsqrt.f32 %v3150_v44  ;;  %v7663_v32 = vpop.f32.mrb[206].mxu1  ;;  %4465 = vmatmul.mubr.f32.gmra.mrb[214].mxu1 %v6866_v35 }
 0x524   : > { %3649 = vst.msk [vmem:[%s11801_s14 + $0x1df] sm:$0xff] %vm1876_vm2, %v3452_v21  ;;  %v3404_v50 = vmul.f32 %v3355_v17, %v11789_v59  ;;  %v3154_v12 = vpop.f32.mrb[86].mxu0  ;;  %v7664_v21 = vpop.f32.mrb[207].mxu1  ;;  %4470 = vmatprep.mubr.f32.mxu1 %v15147_v30 }
 0x525   : > { %v9617_v16 = vpop.eup %9616  ;;  %v3155_v7 = vadd.f32 1e-05, %v3154_v12  ;;  %v8163_v19 = vpop.f32.mrb[87].mxu0  ;;  %v13138_v17 = vadd.f32 %v7664_v21, %v7663_v32  ;;  %v6871_v12 = vld [vmem:[%s10680_s23 + $0x1b0] sm:$0xff] }
 0x526   : > { %v3453_v37 = vadd.f32 %v3404_v50, %v11794_v53  ;;  %v3356_v3 = vmul.f32 %v9617_v16, %v12549_v41 }
 0x527   : > { %9622 = vrsqrt.f32 %v3155_v7  ;;  %v7666_v19 = vpop.f32.mrb[208].mxu1  ;;  %4471 = vmatmul.mubr.f32.gmra.mrb[216].mxu1 %v6871_v12 }
 0x528   : > { %3650 = vst.msk [vmem:[%s11801_s14 + $0x1e7] sm:$0xff] %vm1876_vm2, %v3453_v37  ;;  %v3405_v9 = vmul.f32 %v3356_v3, %v11789_v59  ;;  %v3159_v52 = vpop.f32.mrb[88].mxu0  ;;  %v7667_v37 = vpop.f32.mrb[209].mxu1  ;;  %4476 = vmatprep.mubr.f32.mxu1 %v15147_v30 }
 0x529   : > { %v9619_v23 = vpop.eup %9618  ;;  %v3160_v56 = vadd.f32 1e-05, %v3159_v52  ;;  %v8166_v44 = vpop.f32.mrb[89].mxu0  ;;  %v13147_v3 = vadd.f32 %v7667_v37, %v7666_v19  ;;  %v6876_v52 = vld [vmem:[%s10680_s23 + $0x1d8] sm:$0xff] }
 0x52a   : > { %v3454_v41 = vadd.f32 %v3405_v9, %v11794_v53  ;;  %v3357_v18 = vmul.f32 %v9619_v23, %v12561_v13 }
 0x52b   : > { %9624 = vrsqrt.f32 %v3160_v56  ;;  %4477 = vmatmul.mubr.f32.gmra.mrb[218].mxu1 %v6876_v52 }
 0x52c   : > { %3651 = vst.msk [vmem:[%s11801_s14 + $0x1ef] sm:$0xff] %vm1876_vm2, %v3454_v41  ;;  %v3406_v43 = vmul.f32 %v3357_v18, %v11789_v59  ;;  %v3164_v50 = vpop.f32.mrb[90].mxu0  ;;  %4482 = vmatprep.mubr.f32.mxu1 %v15147_v30  ;;  %v6881_v18 = vld [vmem:[%s10680_s23 + $0x200] sm:$0xff] }
 0x52d   : > { %v9621_v40 = vpop.eup %9620  ;;  %v3165_v16 = vadd.f32 1e-05, %v3164_v50  ;;  %v8169_v7 = vpop.f32.mrb[91].mxu0 }
 0x52e   : > { %v3455_v13 = vadd.f32 %v3406_v43, %v11794_v53  ;;  %v3358_v47 = vmul.f32 %v9621_v40, %v12573_v46  ;;  %v6886_v7 = vld [vmem:[%s10680_s23 + $0x228] sm:$0x1] }
 0x52f   : > { %9626 = vrsqrt.f32 %v3165_v16  ;;  %4483 = vmatmul.mubr.f32.gmra.mrb[220].mxu1 %v6881_v18 }
 0x530   : > { %3652 = vst.msk [vmem:[%s11801_s14 + $0x1f7] sm:$0xff] %vm1876_vm2, %v3455_v13  ;;  %v3407_v33 = vmul.f32 %v3358_v47, %v11789_v59  ;;  %v3169_v9 = vpop.f32.mrb[92].mxu0  ;;  %4488 = vmatprep.mubr.f32.mxu1 %v15147_v30 }
 0x531   : > { %v9623_v35 = vpop.eup %9622  ;;  %v3170_v23 = vadd.f32 1e-05, %v3169_v9  ;;  %v8172_v56 = vpop.f32.mrb[93].mxu0 }
 0x532   : > { %v3456_v46 = vadd.f32 %v3407_v33, %v11794_v53  ;;  %v3359_v44 = vmul.f32 %v9623_v35, %v12584_v61 }
 0x533   : > { %9628 = vrsqrt.f32 %v3170_v23  ;;  %4489 = vmatmul.mubr.f32.gmra.mrb[222].mxu1 %v6886_v7 }
 0x534   : > { %3653 = vst.msk [vmem:[%s11801_s14 + $0x1ff] sm:$0xff] %vm1876_vm2, %v3456_v46  ;;  %v3408_v32 = vmul.f32 %v3359_v44, %v11789_v59  ;;  %v3174_v41 = vpop.f32.mrb[94].mxu0  ;;  %8479 = vmatprep.mubr.msk.f32.mxu1 %vm9843_vm0, %v15147_v30 }
 0x535   : > { %v9625_v21 = vpop.eup %9624  ;;  %v3175_v43 = vadd.f32 1e-05, %v3174_v41  ;;  %v8175_v50 = vpop.f32.mrb[95].mxu0 }
 0x536   : > { %v3457_v12 = vadd.f32 %v3408_v32, %v11794_v53  ;;  %v3360_v40 = vmul.f32 %v9625_v21, %v12596_v31 }
 0x537   : > { %9630 = vrsqrt.f32 %v3175_v43 }
 0x538   : > { %3654 = vst.msk [vmem:[%s11801_s14 + $0x207] sm:$0xff] %vm1876_vm2, %v3457_v12  ;;  %v3409_v61 = vmul.f32 %v3360_v40, %v11789_v59  ;;  %v3179_v16 = vpop.f32.mrb[96].mxu0 }
 0x539   : > { %v9627_v19 = vpop.eup %9626  ;;  %v3180_v13 = vadd.f32 1e-05, %v3179_v16  ;;  %v8178_v47 = vpop.f32.mrb[97].mxu0 }
 0x53a   : > { %v3458_v37 = vadd.f32 %v3409_v61, %v11794_v53  ;;  %v3361_v33 = vmul.f32 %v9627_v19, %v12608_v49 }
 0x53b   : > { %9632 = vrsqrt.f32 %v3180_v13 }
 0x53c   : > { %3655 = vst.msk [vmem:[%s11801_s14 + $0x20f] sm:$0xff] %vm1876_vm2, %v3458_v37  ;;  %v3410_v31 = vmul.f32 %v3361_v33, %v11789_v59  ;;  %v3184_v9 = vpop.f32.mrb[98].mxu0 }
 0x53d   : > { %v9629_v52 = vpop.eup %9628  ;;  %v3185_v35 = vadd.f32 1e-05, %v3184_v9  ;;  %v8181_v23 = vpop.f32.mrb[99].mxu0 }
 0x53e   : > { %v3459_v56 = vadd.f32 %v3410_v31, %v11794_v53  ;;  %v3362_v46 = vmul.f32 %v9629_v52, %v12620_v15 }
 0x53f   : > { %9634 = vrsqrt.f32 %v3185_v35 }
 0x540   : > { %3656 = vst.msk [vmem:[%s11801_s14 + $0x217] sm:$0xff] %vm1876_vm2, %v3459_v56  ;;  %v3411_v49 = vmul.f32 %v3362_v46, %v11789_v59  ;;  %v3189_v44 = vpop.f32.mrb[100].mxu0 }
 0x541   : > { %v9631_v32 = vpop.eup %9630  ;;  %v3190_v41 = vadd.f32 1e-05, %v3189_v44  ;;  %v8184_v18 = vpop.f32.mrb[101].mxu0 }
 0x542   : > { %v3460_v21 = vadd.f32 %v3411_v49, %v11794_v53  ;;  %v3363_v43 = vmul.f32 %v9631_v32, %v12631_v63 }
 0x543   : > { %9636 = vrsqrt.f32 %v3190_v41 }
 0x544   : > { %3657 = vst.msk [vmem:[%s11801_s14 + $0x21f] sm:$0xff] %vm1876_vm2, %v3460_v21  ;;  %v3412_v50 = vmul.f32 %v3363_v43, %v11789_v59  ;;  %v3194_v15 = vpop.f32.mrb[102].mxu0 }
 0x545   : > { %v9633_v12 = vpop.eup %9632  ;;  %v3195_v40 = vadd.f32 1e-05, %v3194_v15  ;;  %v8187_v61 = vpop.f32.mrb[103].mxu0 }
 0x546   : > { %v3461_v16 = vadd.f32 %v3412_v50, %v11794_v53  ;;  %v3364_v7 = vmul.f32 %v9633_v12, %v12645_v55 }
 0x547   : > { %9638 = vrsqrt.f32 %v3195_v40 }
 0x548   : > { %3658 = vst.msk [vmem:[%s11801_s14 + $0x227] sm:$0xff] %vm1876_vm2, %v3461_v16  ;;  %v3413_v19 = vmul.f32 %v3364_v7, %v11789_v59  ;;  %v3199_v63 = vpop.f32.mrb[104].mxu0 }
 0x549   : > { %v9635_v13 = vpop.eup %9634  ;;  %v3200_v47 = vadd.f32 1e-05, %v3199_v63  ;;  %v8190_v37 = vpop.f32.mrb[105].mxu0 }
 0x54a   : > { %v3462_v33 = vadd.f32 %v3413_v19, %v11794_v53  ;;  %v3365_v31 = vmul.f32 %v9635_v13, %v12659_v42 }
 0x54b   : > { %9640 = vrsqrt.f32 %v3200_v47 }
 0x54c   : > { %3659 = vst.msk [vmem:[%s11801_s14 + $0x22f] sm:$0xff] %vm1876_vm2, %v3462_v33  ;;  %v3414_v9 = vmul.f32 %v3365_v31, %v11789_v59  ;;  %v3204_v55 = vpop.f32.mrb[106].mxu0 }
 0x54d   : > { %v9637_v52 = vpop.eup %9636  ;;  %v3205_v35 = vadd.f32 1e-05, %v3204_v55  ;;  %v8193_v23 = vpop.f32.mrb[107].mxu0 }
 0x54e   : > { %v3463_v56 = vadd.f32 %v3414_v9, %v11794_v53  ;;  %v3366_v46 = vmul.f32 %v9637_v52, %v12673_v8 }
 0x54f   : > { %9642 = vrsqrt.f32 %v3205_v35 }
 0x550   : > { %3660 = vst.msk [vmem:[%s11801_s14 + $0x237] sm:$0xff] %vm1876_vm2, %v3463_v56  ;;  %v3415_v49 = vmul.f32 %v3366_v46, %v11789_v59  ;;  %v3209_v42 = vpop.f32.mrb[108].mxu0 }
 0x551   : > { %v9639_v44 = vpop.eup %9638  ;;  %v3210_v32 = vadd.f32 1e-05, %v3209_v42  ;;  %v8196_v41 = vpop.f32.mrb[109].mxu0 }
 0x552   : > { %v3464_v18 = vadd.f32 %v3415_v49, %v11794_v53  ;;  %v3367_v21 = vmul.f32 %v9639_v44, %v12687_v38 }
 0x553   : > { %9644 = vrsqrt.f32 %v3210_v32 }
 0x554   : > { %3661 = vst.msk [vmem:[%s11801_s14 + $0x23f] sm:$0xff] %vm1876_vm2, %v3464_v18  ;;  %v3416_v43 = vmul.f32 %v3367_v21, %v11789_v59  ;;  %v3214_v8 = vpop.f32.mrb[110].mxu0 }
 0x555   : > { %v9641_v50 = vpop.eup %9640  ;;  %v3215_v15 = vadd.f32 1e-05, %v3214_v8  ;;  %v8199_v12 = vpop.f32.mrb[111].mxu0 }
 0x556   : > { %v3465_v40 = vadd.f32 %v3416_v43, %v11794_v53  ;;  %v3368_v61 = vmul.f32 %v9641_v50, %v12701_v34 }
 0x557   : > { %9646 = vrsqrt.f32 %v3215_v15 }
 0x558   : > { %3662 = vst.msk [vmem:[%s11801_s14 + $0x247] sm:$0xff] %vm1876_vm2, %v3465_v40  ;;  %v3417_v16 = vmul.f32 %v3368_v61, %v11789_v59  ;;  %v3219_v38 = vpop.f32.mrb[112].mxu0 }
 0x559   : > { %v9643_v7 = vpop.eup %9642  ;;  %v3220_v19 = vadd.f32 1e-05, %v3219_v38  ;;  %v8202_v63 = vpop.f32.mrb[113].mxu0 }
 0x55a   : > { %v3466_v13 = vadd.f32 %v3417_v16, %v11794_v53  ;;  %v3369_v47 = vmul.f32 %v9643_v7, %v12715_v45 }
 0x55b   : > { %9648 = vrsqrt.f32 %v3220_v19 }
 0x55c   : > { %3663 = vst.msk [vmem:[%s11801_s14 + $0x24f] sm:$0xff] %vm1876_vm2, %v3466_v13  ;;  %v3418_v37 = vmul.f32 %v3369_v47, %v11789_v59  ;;  %v3224_v34 = vpop.f32.mrb[114].mxu0 }
 0x55d   : > { %v9645_v33 = vpop.eup %9644  ;;  %v3225_v31 = vadd.f32 1e-05, %v3224_v34  ;;  %v8205_v9 = vpop.f32.mrb[115].mxu0 }
 0x55e   : > { %v3467_v55 = vadd.f32 %v3418_v37, %v11794_v53  ;;  %v3370_v52 = vmul.f32 %v9645_v33, %v12729_v48 }
 0x55f   : > { %9650 = vrsqrt.f32 %v3225_v31 }
 0x560   : > { %3664 = vst.msk [vmem:[%s11801_s14 + $0x257] sm:$0xff] %vm1876_vm2, %v3467_v55  ;;  %v3419_v35 = vmul.f32 %v3370_v52, %v11789_v59  ;;  %v3229_v45 = vpop.f32.mrb[116].mxu0 }
 0x561   : > { %v9647_v23 = vpop.eup %9646  ;;  %v3230_v56 = vadd.f32 1e-05, %v3229_v45  ;;  %v8208_v46 = vpop.f32.mrb[117].mxu0 }
 0x562   : > { %v3468_v49 = vadd.f32 %v3419_v35, %v11794_v53  ;;  %v3371_v42 = vmul.f32 %v9647_v23, %v12743_v28 }
 0x563   : > { %9652 = vrsqrt.f32 %v3230_v56 }
 0x564   : > { %3665 = vst.msk [vmem:[%s11801_s14 + $0x25f] sm:$0xff] %vm1876_vm2, %v3468_v49  ;;  %v3420_v44 = vmul.f32 %v3371_v42, %v11789_v59  ;;  %v3234_v48 = vpop.f32.mrb[118].mxu0 }
 0x565   : > { %v9649_v32 = vpop.eup %9648  ;;  %v3235_v41 = vadd.f32 1e-05, %v3234_v48  ;;  %v8211_v18 = vpop.f32.mrb[119].mxu0 }
 0x566   : > { %v3469_v21 = vadd.f32 %v3420_v44, %v11794_v53  ;;  %v3372_v43 = vmul.f32 %v9649_v32, %v12757_v11 }
 0x567   : > { %9654 = vrsqrt.f32 %v3235_v41 }
 0x568   : > { %3666 = vst.msk [vmem:[%s11801_s14 + $0x267] sm:$0xff] %vm1876_vm2, %v3469_v21  ;;  %v3421_v8 = vmul.f32 %v3372_v43, %v11789_v59  ;;  %v3239_v28 = vpop.f32.mrb[120].mxu0 }
 0x569   : > { %v9651_v50 = vpop.eup %9650  ;;  %v3240_v15 = vadd.f32 1e-05, %v3239_v28  ;;  %v8214_v12 = vpop.f32.mrb[121].mxu0 }
 0x56a   : > { %v3470_v40 = vadd.f32 %v3421_v8, %v11794_v53  ;;  %v3373_v61 = vmul.f32 %v9651_v50, %v12769_v60 }
 0x56b   : > { %9656 = vrsqrt.f32 %v3240_v15 }
 0x56c   : > { %3667 = vst.msk [vmem:[%s11801_s14 + $0x26f] sm:$0xff] %vm1876_vm2, %v3470_v40  ;;  %v3422_v16 = vmul.f32 %v3373_v61, %v11789_v59  ;;  %v3244_v11 = vpop.f32.mrb[122].mxu0 }
 0x56d   : > { %v9653_v38 = vpop.eup %9652  ;;  %v3245_v7 = vadd.f32 1e-05, %v3244_v11  ;;  %v8217_v19 = vpop.f32.mrb[123].mxu0 }
 0x56e   : > { %v3471_v63 = vadd.f32 %v3422_v16, %v11794_v53  ;;  %v3374_v13 = vmul.f32 %v9653_v38, %v12779_v39 }
 0x56f   : > { %9658 = vrsqrt.f32 %v3245_v7 }
 0x570   : > { %3668 = vst.msk [vmem:[%s11801_s14 + $0x277] sm:$0xff] %vm1876_vm2, %v3471_v63  ;;  %v3423_v47 = vmul.f32 %v3374_v13, %v11789_v59  ;;  %v3249_v60 = vpop.f32.mrb[124].mxu0 }
 0x571   : > { %v9655_v37 = vpop.eup %9654  ;;  %v3250_v34 = vadd.f32 1e-05, %v3249_v60  ;;  %v8220_v33 = vpop.f32.mrb[125].mxu0 }
 0x572   : > { %v3472_v31 = vadd.f32 %v3423_v47, %v11794_v53  ;;  %v3375_v9 = vmul.f32 %v9655_v37, %v12787_v62 }
 0x573   : > { %9660 = vrsqrt.f32 %v3250_v34 }
 0x574   : > { %3669 = vst.msk [vmem:[%s11801_s14 + $0x27f] sm:$0xff] %vm1876_vm2, %v3472_v31  ;;  %v3424_v55 = vmul.f32 %v3375_v9, %v11789_v59  ;;  %v3254_v39 = vpop.f32.mrb[126].mxu0 }
 0x575   : > { %v9657_v52 = vpop.eup %9656  ;;  %v3255_v35 = vadd.f32 1e-05, %v3254_v39  ;;  %v8223_v45 = vpop.f32.mrb[127].mxu0 }
 0x576   : > { %v3473_v23 = vadd.f32 %v3424_v55, %v11794_v53  ;;  %v3376_v56 = vmul.f32 %v9657_v52, %v12795_v1  ;;  %v15315_v45 = vld [vmem:[#allocation20_spill] sm:$0xff] }
 0x577   : > { %9662 = vrsqrt.f32 %v3255_v35 }
 0x578   : > { %3670 = vst.msk [vmem:[%s11801_s14 + $0x287] sm:$0xff] %vm1876_vm2, %v3473_v23  ;;  %v3425_v46 = vmul.f32 %v3376_v56, %v11789_v59  ;;  %v3259_v62 = vpop.f32.mrb[128].mxu0 }
 0x579   : > { %v9659_v49 = vpop.eup %9658  ;;  %v3260_v42 = vadd.f32 1e-05, %v3259_v62  ;;  %v8226_v44 = vpop.f32.mrb[129].mxu0 }
 0x57a   : > { %v3474_v48 = vadd.f32 %v3425_v46, %v11794_v53  ;;  %v3377_v32 = vmul.f32 %v9659_v49, %v12803_v22 }
 0x57b   : > { %9664 = vrsqrt.f32 %v3260_v42 }
 0x57c   : > { %3671 = vst.msk [vmem:[%s11801_s14 + $0x28f] sm:$0xff] %vm1876_vm2, %v3474_v48  ;;  %v3426_v41 = vmul.f32 %v3377_v32, %v11789_v59  ;;  %v3264_v1 = vpop.f32.mrb[130].mxu0  ;;  %v15316_v48 = vld [vmem:[#allocation22_spill] sm:$0xff] }
 0x57d   : > { %v9661_v18 = vpop.eup %9660  ;;  %v3265_v21 = vadd.f32 1e-05, %v3264_v1  ;;  %v8229_v43 = vpop.f32.mrb[131].mxu0 }
 0x57e   : > { %v3475_v8 = vadd.f32 %v3426_v41, %v11794_v53  ;;  %v3378_v28 = vmul.f32 %v9661_v18, %v12811_v0 }
 0x57f   : > { %9666 = vrsqrt.f32 %v3265_v21 }
 0x580   : > { %3672 = vst.msk [vmem:[%s11801_s14 + $0x297] sm:$0xff] %vm1876_vm2, %v3475_v8  ;;  %v3427_v50 = vmul.f32 %v3378_v28, %v11789_v59  ;;  %v3269_v22 = vpop.f32.mrb[132].mxu0 }
 0x581   : > { %v9663_v15 = vpop.eup %9662  ;;  %v3270_v12 = vadd.f32 1e-05, %v3269_v22  ;;  %v8232_v40 = vpop.f32.mrb[133].mxu0 }
 0x582   : > { %v3476_v61 = vadd.f32 %v3427_v50, %v11794_v53  ;;  %v3379_v16 = vmul.f32 %v9663_v15, %v12820_v25  ;;  %v15317_v50 = vld [vmem:[#allocation145_spill] sm:$0xff] }
 0x583   : > { %9668 = vrsqrt.f32 %v3270_v12 }
 0x584   : > { %3673 = vst.msk [vmem:[%s11801_s14 + $0x29f] sm:$0xff] %vm1876_vm2, %v3476_v61  ;;  %v3428_v11 = vmul.f32 %v3379_v16, %v11789_v59  ;;  %v3274_v0 = vpop.f32.mrb[134].mxu0 }
 0x585   : > { %v9665_v38 = vpop.eup %9664  ;;  %v3275_v7 = vadd.f32 1e-05, %v3274_v0  ;;  %v8235_v19 = vpop.f32.mrb[135].mxu0 }
 0x586   : > { %v3477_v63 = vadd.f32 %v3428_v11, %v11794_v53  ;;  %v3380_v13 = vmul.f32 %v9665_v38, %v12831_v2 }
 0x587   : > { %9670 = vrsqrt.f32 %v3275_v7  ;;  %v15318_v7 = vld [vmem:[#allocation2_spill] sm:$0xff] }
 0x588   : > { %3674 = vst.msk [vmem:[%s11801_s14 + $0x2a7] sm:$0xff] %vm1876_vm2, %v3477_v63  ;;  %v3429_v47 = vmul.f32 %v3380_v13, %v11789_v59  ;;  %v3279_v25 = vpop.f32.mrb[136].mxu0 }
 0x589   : > { %v9667_v60 = vpop.eup %9666  ;;  %v3280_v37 = vadd.f32 1e-05, %v3279_v25  ;;  %v8238_v34 = vpop.f32.mrb[137].mxu0 }
 0x58a   : > { %v3478_v33 = vadd.f32 %v3429_v47, %v11794_v53  ;;  %v3381_v31 = vmul.f32 %v9667_v60, %v12841_v5  ;;  %v9833_v5 = vld [vmem:[%s14788_s3] ss:$0 sm:$0xff] }
 0x58b   : > { %9672 = vrsqrt.f32 %v3280_v37  ;;  %v3805_v46 = vadd.f32 %v9833_v5, %v13078_v54  ;;  %v3810_v18 = vadd.f32 %v9833_v5, %v13089_v58  ;;  %v3815_v61 = vadd.f32 %v9833_v5, %v13096_v10 }
 0x58c   : > { %3675 = vst.msk [vmem:[%s11801_s14 + $0x2af] sm:$0xff] %vm1876_vm2, %v3478_v33  ;;  %v3430_v9 = vmul.f32 %v3381_v31, %v11789_v59  ;;  %v3284_v2 = vpop.f32.mrb[138].mxu0  ;;  %v3825_v31 = vadd.f32 %v9833_v5, %v13112_v6 }
 0x58d   : > { %v9669_v55 = vpop.eup %9668  ;;  %v3285_v39 = vadd.f32 1e-05, %v3284_v2  ;;  %v8241_v52 = vpop.f32.mrb[139].mxu0 }
 0x58e   : > { %v3479_v35 = vadd.f32 %v3430_v9, %v11794_v53  ;;  %v3382_v23 = vmul.f32 %v9669_v55, %v15315_v45 }
 0x58f   : > { %9674 = vrsqrt.f32 %v3285_v39  ;;  %v3830_v39 = vadd.f32 %v9833_v5, %v13114_v26 }
 0x590   : > { %3676 = vst.msk [vmem:[%s11801_s14 + $0x2b7] sm:$0xff] %vm1876_vm2, %v3479_v35  ;;  %v3431_v56 = vmul.f32 %v3382_v23, %v11789_v59  ;;  %v7595_v62 = vpop.f32.mrb[140].mxu0 }
 0x591   : > { %v9671_v49 = vpop.eup %9670  ;;  %v7596_v42 = vpop.f32.mrb[141].mxu0 }
 0x592   : > { %v3480_v44 = vadd.f32 %v3431_v56, %v11794_v53  ;;  %v3383_v32 = vmul.f32 %v9671_v49, %v15316_v48  ;;  %v7597_v41 = vadd.f32 %v7596_v42, %v7595_v62 }
 0x594   : > { %3677 = vst.msk [vmem:[%s11801_s14 + $0x2bf] sm:$0xff] %vm1876_vm2, %v3480_v44  ;;  %v3432_v1 = vmul.f32 %v3383_v32, %v11789_v59  ;;  %v3905_v21 = vadd.f32 %v7597_v41, %v3805_v46  ;;  %v7598_v43 = vpop.f32.mrb[142].mxu0 }
 0x595   : > { %v9673_v8 = vpop.eup %9672  ;;  %v7599_v28 = vpop.f32.mrb[143].mxu0 }
 0x596   : > { %v3481_v54 = vadd.f32 %v3432_v1, %v11794_v53  ;;  %v3384_v22 = vmul.f32 %v9673_v8, %v15317_v50  ;;  %v4005_v15 = vadd.f32 %v13085_v20, %v3905_v21  ;;  %v7600_v12 = vadd.f32 %v7599_v28, %v7598_v43  ;;  %v15320_v50 = vld [vmem:[#allocation98_spill] sm:$0xff] }
 0x597   : > { %v3820_v20 = vadd.f32 %v9833_v5, %v13103_v4 }
 0x598   : > { %3678 = vst.msk [vmem:[%s11801_s14 + $0x2c7] sm:$0xff] %vm1876_vm2, %v3481_v54  ;;  %v3433_v40 = vmul.f32 %v3384_v22, %v11789_v59  ;;  %v3910_v16 = vadd.f32 %v7600_v12, %v3810_v18  ;;  %v7601_v58 = vpop.f32.mrb[144].mxu0 }
 0x599   : > { %v9675_v11 = vpop.eup %9674  ;;  %v7602_v0 = vpop.f32.mrb[145].mxu0 }
 0x59a   : > { %v3482_v38 = vadd.f32 %v3433_v40, %v11794_v53  ;;  %v3385_v19 = vmul.f32 %v9675_v11, %v15318_v7  ;;  %v4010_v63 = vadd.f32 %v13098_v36, %v3910_v16  ;;  %v7603_v13 = vadd.f32 %v7602_v0, %v7601_v58  ;;  %v15322_v11 = vld [vmem:[#allocation138_spill] sm:$0xff] }
 0x59c   : > { %3679 = vst.msk [vmem:[%s11801_s14 + $0x2cf] sm:$0xff] %vm1876_vm2, %v3482_v38  ;;  %v3434_v47 = vmul.f32 %v3385_v19, %v11789_v59  ;;  %v3915_v25 = vadd.f32 %v7603_v13, %v3815_v61  ;;  %v7604_v10 = vpop.f32.mrb[146].mxu0  ;;  %v15321_v61 = vld [vmem:[#allocation103_spill] sm:$0xff] }
 0x59d   : > { %v7605_v60 = vpop.f32.mrb[147].mxu0 }
 0x59e   : > { %v3483_v37 = vadd.f32 %v3434_v47, %v11794_v53  ;;  %v4015_v34 = vadd.f32 %v13107_v24, %v3915_v25  ;;  %v7606_v33 = vadd.f32 %v7605_v60, %v7604_v10  ;;  %v3835_v24 = vadd.f32 %v9833_v5, %v13116_v27  ;;  %v15319_v5 = vld [vmem:[#allocation93_spill] sm:$0xff] }
 0x5a0   : > { %3680 = vst.msk [vmem:[%s11801_s14 + $0x2d7] sm:$0xff] %vm1876_vm2, %v3483_v37  ;;  %v3920_v36 = vadd.f32 %v7606_v33, %v3820_v20  ;;  %v7607_v9 = vpop.f32.mrb[148].mxu0 }
 0x5a1   : > { %v7608_v2 = vpop.f32.mrb[149].mxu0 }
 0x5a2   : > { %v4020_v55 = vadd.f32 %v13120_v57, %v3920_v36  ;;  %v7609_v4 = vadd.f32 %v7608_v2, %v7607_v9 }
 0x5a4   : > { %v3925_v52 = vadd.f32 %v7609_v4, %v3825_v31  ;;  %v7610_v35 = vpop.f32.mrb[150].mxu0 }
 0x5a5   : > { %v7611_v45 = vpop.f32.mrb[151].mxu0 }
 0x5a6   : > { %v4025_v23 = vadd.f32 %v13129_v14, %v3925_v52  ;;  %v7612_v56 = vadd.f32 %v7611_v45, %v7610_v35 }
 0x5a8   : > { %v3930_v46 = vadd.f32 %v7612_v56, %v3830_v39  ;;  %v7613_v62 = vpop.f32.mrb[152].mxu0 }
 0x5a9   : > { %v7614_v49 = vpop.f32.mrb[153].mxu0 }
 0x5aa   : > { %v4030_v6 = vadd.f32 %v13138_v17, %v3930_v46  ;;  %v7615_v42 = vadd.f32 %v7614_v49, %v7613_v62  ;;  %v15323_v49 = vld [vmem:[#allocation139_spill] sm:$0xff] }
 0x5ac   : > { %v3935_v44 = vadd.f32 %v7615_v42, %v3835_v24 }
 0x5ae   : > { %v4035_v57 = vadd.f32 %v13147_v3, %v3935_v44 }
 0x5b0   : > { %v7701_v48 = vpop.f32.mrb[154].mxu0 }
 0x5b1   : > { %v7702_v32 = vpop.f32.mrb[155].mxu0 }
 0x5b2   : > { %v7703_v26 = vadd.f32 %v7702_v32, %v7701_v48  ;;  %v15324_v48 = vld [vmem:[#allocation140_spill] sm:$0xff] }
 0x5b4   : > { %v4105_v41 = vadd.f32 %v7703_v26, %v4005_v15  ;;  %v7704_v1 = vpop.f32.mrb[156].mxu0 }
 0x5b5   : > { %v7705_v18 = vpop.f32.mrb[157].mxu0 }
 0x5b6   : > { %v7706_v21 = vadd.f32 %v7705_v18, %v7704_v1  ;;  %8259 = vmatmul.mubr.msk.f32.vlgmr.msra.gmra.mrb[168].mxu0 %vm1579_vm1, %v4105_v41  ;;  %v15325_v18 = vld [vmem:[#allocation141_spill] sm:$0xff] }
 0x5b7   : > { %8261 = vmatprep.mubr.msk.f32.mxu0 %vm9843_vm0, %v15147_v30  ;;  %9332 = vmatpush3.bf16.msra.mxu0 %v15296_v29 }
 0x5b8   : > { %v4110_v27 = vadd.f32 %v7706_v21, %v4010_v63  ;;  %v7707_v14 = vpop.f32.mrb[158].mxu0  ;;  %9333 = vmatprep.subr.bf16.mxu0 %v15293_v51 }
 0x5b9   : > { %v7708_v17 = vpop.f32.mrb[159].mxu0 }
 0x5ba   : > { %v7709_v3 = vadd.f32 %v7708_v17, %v7707_v14  ;;  %8262 = vmatmul.mubr.msk.f32.gmra.mrb[170].mxu0 %vm1579_vm1, %v4110_v27 }
 0x5bb   : > { %8264 = vmatprep.mubr.msk.f32.mxu0 %vm9843_vm0, %v15147_v30  ;;  %9335 = vmatpush3.bf16.msra.mxu0 %v15319_v5 }
 0x5bc   : > { %v4115_v43 = vadd.f32 %v7709_v3, %v4015_v34  ;;  %v7710_v8 = vpop.f32.mrb[160].mxu0  ;;  %9336 = vmatprep.subr.bf16.mxu0 %v15293_v51  ;;  %v15326_v3 = vld [vmem:[#allocation142_spill] sm:$0xff] }
 0x5bd   : > { %v7711_v28 = vpop.f32.mrb[161].mxu0 }
 0x5be   : > { %v7712_v54 = vadd.f32 %v7711_v28, %v7710_v8  ;;  %8265 = vmatmul.mubr.msk.f32.gmra.mrb[172].mxu0 %vm1579_vm1, %v4115_v43 }
 0x5bf   : > { %8267 = vmatprep.mubr.msk.f32.mxu0 %vm9843_vm0, %v15147_v30  ;;  %9338 = vmatpush3.bf16.msra.mxu0 %v15320_v50 }
 0x5c0   : > { %v4120_v22 = vadd.f32 %v7712_v54, %v4020_v55  ;;  %v7713_v15 = vpop.f32.mrb[162].mxu0  ;;  %9339 = vmatprep.subr.bf16.mxu0 %v15293_v51  ;;  %v15327_v54 = vld [vmem:[#allocation143_spill] sm:$0xff] }
 0x5c1   : > { %v7714_v12 = vpop.f32.mrb[163].mxu0 }
 0x5c2   : > { %v7715_v40 = vadd.f32 %v7714_v12, %v7713_v15  ;;  %8268 = vmatmul.mubr.msk.f32.gmra.mrb[174].mxu0 %vm1579_vm1, %v4120_v22  ;;  %v15328_v15 = vld [vmem:[#allocation144_spill] sm:$0xff] }
 0x5c3   : > { %8270 = vmatprep.mubr.msk.f32.mxu0 %vm9843_vm0, %v15147_v30  ;;  %9341 = vmatpush3.bf16.msra.mxu0 %v15321_v61 }
 0x5c4   : > { %v4125_v16 = vadd.f32 %v7715_v40, %v4025_v23  ;;  %v7716_v58 = vpop.f32.mrb[164].mxu0  ;;  %9343 = vmatprep.subr.bf16.mxu0 %v15322_v11 }
 0x5c5   : > { %v7717_v0 = vpop.f32.mrb[165].mxu0 }
 0x5c6   : > { %v7718_v38 = vadd.f32 %v7717_v0, %v7716_v58  ;;  %8271 = vmatmul.mubr.msk.f32.gmra.mrb[176].mxu0 %vm1579_vm1, %v4125_v16  ;;  %v15329_v58 = vld [vmem:[#allocation146_spill] sm:$0xff] }
 0x5c7   : > { %8273 = vmatprep.mubr.msk.f32.mxu0 %vm9843_vm0, %v15147_v30 }
 0x5c8   : > { %v4130_v7 = vadd.f32 %v7718_v38, %v4030_v6  ;;  %v7719_v19 = vpop.f32.mrb[166].mxu0  ;;  %v15330_v38 = vld [vmem:[#allocation147_spill] sm:$0xff] }
 0x5c9   : > { %v7720_v63 = vpop.f32.mrb[167].mxu0 }
 0x5ca   : > { %v7721_v13 = vadd.f32 %v7720_v63, %v7719_v19  ;;  %8274 = vmatmul.mubr.msk.f32.gmra.mrb[178].mxu0 %vm1579_vm1, %v4130_v7  ;;  %v15332_v63 = vld [vmem:[#allocation149_spill] sm:$0xff] }
 0x5cb   : > { %8276 = vmatprep.mubr.msk.f32.mxu0 %vm9843_vm0, %v15147_v30 }
 0x5cc   : > { %v4135_v20 = vadd.f32 %v7721_v13, %v4035_v57  ;;  %v15333_v13 = vld [vmem:[#allocation150_spill] sm:$0xff] }
 0x5ce   : > { %8277 = vmatmul.mubr.msk.f32.gmra.mrb[180].mxu0 %vm1579_vm1, %v4135_v20 }
 0x5cf   : > { %8295 = vmatprep.mubr.msk.f32.mxu0 %vm9843_vm0, %v15147_v30 }
 0x5d2   : > { %v13343_v47 = vpop.f32.mrb[210].mxu1 }
 0x5d3   : > { %v13345_v25 = vpop.f32.mrb[211].mxu1 }
 0x5ea   : > { %v13347_v10 = vpop.f32.mrb[212].mxu1 }
 0x5eb   : > { %v13349_v60 = vpop.f32.mrb[213].mxu1 }
 0x5f6   : > { %v13351_v37 = vpop.f32.mrb[214].mxu1 }
 0x5f7   : > { %v13353_v34 = vpop.f32.mrb[215].mxu1 }
 0x5fa   : > { %v13355_v33 = vpop.f32.mrb[216].mxu1 }
 0x5fb   : > { %v13357_v31 = vpop.f32.mrb[217].mxu1 }
 0x5fe   : > { %v13359_v36 = vpop.f32.mrb[218].mxu1 }
 0x5ff   : > { %v13361_v9 = vpop.f32.mrb[219].mxu1 }
 0x602   : > { %v13363_v2 = vpop.f32.mrb[220].mxu1 }
 0x603   : > { %v13365_v55 = vpop.f32.mrb[221].mxu1 }
 0x606   : > { %v13367_v4 = vpop.f32.mrb[222].mxu1 }
 0x607   : > { %v13369_v39 = vpop.f32.mrb[223].mxu1 }
 0x689   : > { %v4582_v52 = vpop.f32.mrb[168].mxu0 }
 0x68a   : > { %v13371_v35 = vsub.f32 %v4105_v41, %v4582_v52  ;;  %v8260_v45 = vpop.f32.mrb[169].mxu0  ;;  %v15335_v52 = vld [vmem:[#allocation152_spill] sm:$0xff] }
 0x68b   : > { %v15336_v45 = vld [vmem:[#allocation153_spill] sm:$0xff] }
 0x68c   : > { %v4623_v23 = vmul.f32 %v13371_v35, %v13371_v35 }
 0x68d   : > { %v4587_v56 = vpop.f32.mrb[170].mxu0 }
 0x68e   : > { %v13375_v24 = vsub.f32 %v4110_v27, %v4587_v56  ;;  %v8263_v46 = vpop.f32.mrb[171].mxu0  ;;  %8296 = vmatmul.mubr.msk.f32.vlgmr.msra.gmra.mrb[182].mxu0 %vm1579_vm1, %v4623_v23  ;;  %v15337_v23 = vld [vmem:[#allocation154_spill] sm:$0xff]  ;;  %v15338_v56 = vld [vmem:[#allocation155_spill] sm:$0xff] }
 0x68f   : > { %9345 = vmatpush1.bf16.msra.mxu0 %v15296_v29  ;;  %8298 = vmatprep.mubr.msk.f32.mxu0 %vm9843_vm0, %v15147_v30 }
 0x690   : > { %v4624_v62 = vmul.f32 %v13375_v24, %v13375_v24  ;;  %9347 = vmatprep.subr.bf16.mxu0 %v15323_v49 }
 0x691   : > { %v4592_v6 = vpop.f32.mrb[172].mxu0 }
 0x692   : > { %v13384_v42 = vsub.f32 %v4115_v43, %v4592_v6  ;;  %v8266_v44 = vpop.f32.mrb[173].mxu0  ;;  %8299 = vmatmul.mubr.msk.f32.gmra.mrb[184].mxu0 %vm1579_vm1, %v4624_v62 }
 0x693   : > { %9349 = vmatpush1.bf16.msra.mxu0 %v15319_v5  ;;  %8301 = vmatprep.mubr.msk.f32.mxu0 %vm9843_vm0, %v15147_v30 }
 0x694   : > { %v4625_v57 = vmul.f32 %v13384_v42, %v13384_v42  ;;  %9351 = vmatprep.subr.bf16.mxu0 %v15324_v48 }
 0x695   : > { %v4597_v32 = vpop.f32.mrb[174].mxu0 }
 0x696   : > { %v13393_v26 = vsub.f32 %v4120_v22, %v4597_v32  ;;  %v8269_v41 = vpop.f32.mrb[175].mxu0  ;;  %8302 = vmatmul.mubr.msk.f32.gmra.mrb[186].mxu0 %vm1579_vm1, %v4625_v57 }
 0x697   : > { %9353 = vmatpush1.bf16.msra.mxu0 %v15320_v50  ;;  %8304 = vmatprep.mubr.msk.f32.mxu0 %vm9843_vm0, %v15147_v30 }
 0x698   : > { %v4626_v1 = vmul.f32 %v13393_v26, %v13393_v26  ;;  %9355 = vmatprep.subr.bf16.mxu0 %v15325_v18 }
 0x699   : > { %v4602_v21 = vpop.f32.mrb[176].mxu0 }
 0x69a   : > { %v13402_v27 = vsub.f32 %v4125_v16, %v4602_v21  ;;  %v8272_v14 = vpop.f32.mrb[177].mxu0  ;;  %8305 = vmatmul.mubr.msk.f32.gmra.mrb[188].mxu0 %vm1579_vm1, %v4626_v1 }
 0x69b   : > { %9357 = vmatpush1.bf16.msra.mxu0 %v15321_v61  ;;  %8307 = vmatprep.mubr.msk.f32.mxu0 %vm9843_vm0, %v15147_v30 }
 0x69c   : > { %v4627_v17 = vmul.f32 %v13402_v27, %v13402_v27  ;;  %9359 = vmatprep.subr.bf16.mxu0 %v15326_v3 }
 0x69d   : > { %v4607_v43 = vpop.f32.mrb[178].mxu0 }
 0x69e   : > { %v13411_v8 = vsub.f32 %v4130_v7, %v4607_v43  ;;  %v8275_v28 = vpop.f32.mrb[179].mxu0  ;;  %8308 = vmatmul.mubr.msk.f32.gmra.mrb[190].mxu0 %vm1579_vm1, %v4627_v17  ;;  %v15331_v7 = vld [vmem:[#allocation148_spill] sm:$0xff] }
 0x69f   : > { %9361 = vmatpush1.bf16.msra.mxu0 %v15327_v54  ;;  %8310 = vmatprep.mubr.msk.f32.mxu0 %vm9843_vm0, %v15147_v30  ;;  %v13431_v19 = vadd.f32 %v13345_v25, %v15331_v7  ;;  %v15339_v25 = vld [vmem:[#allocation156_spill] sm:$0xff]  ;;  %v13450_v62 = vadd.f32 %v13349_v60, %v15331_v7 }
 0x6a0   : > { %v4628_v22 = vmul.f32 %v13411_v8, %v13411_v8  ;;  %9363 = vmatprep.subr.bf16.mxu0 %v15328_v15  ;;  %v13445_v46 = vadd.f32 %v13343_v47, %v15339_v25  ;;  %v13458_v6 = vadd.f32 %v13347_v10, %v15339_v25  ;;  %v13471_v47 = vadd.f32 %v13351_v37, %v15339_v25 }
 0x6a1   : > { %v4612_v12 = vpop.f32.mrb[180].mxu0  ;;  %v13476_v10 = vadd.f32 %v13357_v31, %v15331_v7  ;;  %v13484_v60 = vadd.f32 %v13355_v33, %v15339_v25  ;;  %v13489_v37 = vadd.f32 %v13361_v9, %v15331_v7  ;;  %v13515_v33 = vadd.f32 %v13369_v39, %v15331_v7 }
 0x6a2   : > { %v13420_v40 = vsub.f32 %v4135_v20, %v4612_v12  ;;  %v8278_v16 = vpop.f32.mrb[181].mxu0  ;;  %8311 = vmatmul.mubr.msk.f32.gmra.mrb[192].mxu0 %vm1579_vm1, %v4628_v22  ;;  %v15334_v20 = vld [vmem:[#allocation151_spill] sm:$0xff]  ;;  %v13523_v31 = vadd.f32 %v13367_v4, %v15339_v25 }
 0x6a3   : > { %9365 = vmatpush1.bf16.msra.mxu0 %v15329_v58  ;;  %8313 = vmatprep.mubr.msk.f32.mxu0 %vm9843_vm0, %v15147_v30 }
 0x6a4   : > { %v4629_v0 = vmul.f32 %v13420_v40, %v13420_v40  ;;  %9367 = vmatprep.subr.bf16.mxu0 %v15330_v38 }
 0x6a6   : > { %8314 = vmatmul.mubr.msk.f32.gmra.mrb[194].mxu0 %vm1579_vm1, %v4629_v0 }
 0x6a7   : > { %9369 = vmatpush1.bf16.msra.mxu0 %v15332_v63  ;;  %6901 = vmatprep.mubr.msk.f32.mxu0 %vm1876_vm2, %v13431_v19 }
 0x6a8   : > { %9371 = vmatprep.subr.bf16.mxu0 %v15333_v13 }
 0x6ab   : > { %9373 = vmatpush1.bf16.msra.mxu0 %v15334_v20 }
 0x6ac   : > { %9375 = vmatprep.subr.bf16.mxu0 %v15335_v52 }
 0x6af   : > { %9377 = vmatpush1.bf16.msra.mxu0 %v15336_v45 }
 0x6b0   : > { %9379 = vmatprep.subr.bf16.mxu0 %v15337_v23 }
 0x6b3   : > { %9381 = vmatpush1.bf16.msra.mxu0 %v15338_v56 }
 0x6b4   : > { %9383 = vmatprep.subr.bf16.mxu0 %v15322_v11  ;;  %v13463_v11 = vadd.f32 %v13353_v34, %v15331_v7  ;;  %v13502_v34 = vadd.f32 %v13365_v55, %v15331_v7 }
 0x6b6   : > { %4865 = vmatmul.mubr.f32.vlgmr.msra.gmra.mrb[196].mxu0 %v13445_v46 }
 0x6b7   : > { %6902 = vmatprep.mubr.msk.f32.mxu0 %vm1876_vm2, %v13450_v62  ;;  %9385 = vmatpush1.bf16.msra.mxu0 %v15296_v29 }
 0x6b8   : > { %9387 = vmatprep.subr.bf16.mxu0 %v15323_v49 }
 0x6ba   : > { %4871 = vmatmul.mubr.f32.gmra.mrb[198].mxu0 %v13458_v6 }
 0x6bb   : > { %6903 = vmatprep.mubr.msk.f32.mxu0 %vm1876_vm2, %v13463_v11  ;;  %9389 = vmatpush1.bf16.msra.mxu0 %v15319_v5 }
 0x6bc   : > { %9391 = vmatprep.subr.bf16.mxu0 %v15324_v48 }
 0x6be   : > { %4877 = vmatmul.mubr.f32.gmra.mrb[200].mxu0 %v13471_v47 }
 0x6bf   : > { %6904 = vmatprep.mubr.msk.f32.mxu0 %vm1876_vm2, %v13476_v10  ;;  %9393 = vmatpush1.bf16.msra.mxu0 %v15320_v50  ;;  %v13497_v50 = vadd.f32 %v13359_v36, %v15339_v25 }
 0x6c0   : > { %9395 = vmatprep.subr.bf16.mxu0 %v15325_v18 }
 0x6c2   : > { %4883 = vmatmul.mubr.f32.gmra.mrb[202].mxu0 %v13484_v60 }
 0x6c3   : > { %6905 = vmatprep.mubr.msk.f32.mxu0 %vm1876_vm2, %v13489_v37  ;;  %9397 = vmatpush1.bf16.msra.mxu0 %v15321_v61  ;;  %v13510_v61 = vadd.f32 %v13363_v2, %v15339_v25 }
 0x6c4   : > { %9399 = vmatprep.subr.bf16.mxu0 %v15326_v3 }
 0x6c6   : > { %4889 = vmatmul.mubr.f32.gmra.mrb[204].mxu0 %v13497_v50 }
 0x6c7   : > { %6906 = vmatprep.mubr.msk.f32.mxu0 %vm1876_vm2, %v13502_v34  ;;  %9401 = vmatpush1.bf16.msra.mxu0 %v15327_v54 }
 0x6c8   : > { %9403 = vmatprep.subr.bf16.mxu0 %v15328_v15 }
 0x6ca   : > { %4895 = vmatmul.mubr.f32.gmra.mrb[206].mxu0 %v13510_v61 }
 0x6cb   : > { %6907 = vmatprep.mubr.msk.f32.mxu0 %vm1876_vm2, %v13515_v33  ;;  %9405 = vmatpush1.bf16.msra.mxu0 %v15329_v58 }
 0x6cc   : > { %9407 = vmatprep.subr.bf16.mxu0 %v15330_v38 }
 0x6ce   : > { %4901 = vmatmul.mubr.f32.gmra.mrb[208].mxu0 %v13523_v31 }
 0x6cf   : > { %9409 = vmatpush1.bf16.msra.mxu0 %v15332_v63 }
 0x6d0   : > { %9411 = vmatprep.subr.bf16.mxu0 %v15333_v13 }
 0x6d3   : > { %9413 = vmatpush1.bf16.msra.mxu0 %v15334_v20 }
 0x6d4   : > { %9415 = vmatprep.subr.bf16.mxu0 %v15335_v52 }
 0x6d7   : > { %9417 = vmatpush1.bf16.msra.mxu0 %v15336_v45 }
 0x6d8   : > { %9419 = vmatprep.subr.bf16.mxu0 %v15337_v23 }
 0x6db   : > { %9421 = vmatpush1.bf16.msra.mxu0 %v15338_v56 }
 0x6dc   : > { %9422 = vmatprep.subr.bf16.mxu0 %v15293_v51 }
 0x761   : > { %v4717_v36 = vpop.f32.mrb[182].mxu0 }
 0x762   : > { %v4718_v9 = vadd.f32 1e-05, %v4717_v36  ;;  %v8297_v2 = vpop.f32.mrb[183].mxu0 }
 0x764   : > { %9676 = vrsqrt.f32 %v4718_v9 }
 0x765   : > { %v4722_v55 = vpop.f32.mrb[184].mxu0 }
 0x766   : > { %v4723_v4 = vadd.f32 1e-05, %v4722_v55  ;;  %v8300_v39 = vpop.f32.mrb[185].mxu0 }
 0x768   : > { %9678 = vrsqrt.f32 %v4723_v4 }
 0x769   : > { %v4727_v49 = vpop.f32.mrb[186].mxu0 }
 0x76a   : > { %v4728_v44 = vadd.f32 1e-05, %v4727_v49  ;;  %v8303_v57 = vpop.f32.mrb[187].mxu0 }
 0x76c   : > { %9680 = vrsqrt.f32 %v4728_v44 }
 0x76d   : > { %v4732_v48 = vpop.f32.mrb[188].mxu0 }
 0x76e   : > { %v9677_v32 = vpop.eup %9676  ;;  %v4733_v41 = vadd.f32 1e-05, %v4732_v48  ;;  %v8306_v1 = vpop.f32.mrb[189].mxu0 }
 0x76f   : > { %v4758_v18 = vmul.f32 %v9677_v32, %v13371_v35 }
 0x770   : > { %9682 = vrsqrt.f32 %v4733_v41 }
 0x771   : > { %v4737_v21 = vpop.f32.mrb[190].mxu0  ;;  %v4765_v14 = vmul.f32 %v4758_v18, %v11789_v59 }
 0x772   : > { %v9679_v17 = vpop.eup %9678  ;;  %v4738_v3 = vadd.f32 1e-05, %v4737_v21  ;;  %v8309_v43 = vpop.f32.mrb[191].mxu0 }
 0x773   : > { %v4772_v28 = vadd.f32 %v4765_v14, %v11794_v53  ;;  %v4759_v54 = vmul.f32 %v9679_v17, %v13375_v24 }
 0x774   : > { %9684 = vrsqrt.f32 %v4738_v3 }
 0x775   : > { %6392 = vrot.lane.b32.xlu0 %v4772_v28, %s9845_s28  ;;  %7062 = vst.msk [vmem:[%s11801_s14 + $0x2e0] sm:$0xff] %vm1876_vm2, %v4772_v28  ;;  %v4742_v22 = vpop.f32.mrb[192].mxu0  ;;  %v4766_v35 = vmul.f32 %v4759_v54, %v11789_v59 }
 0x776   : > { %v9681_v15 = vpop.eup %9680  ;;  %v4743_v12 = vadd.f32 1e-05, %v4742_v22  ;;  %v8312_v16 = vpop.f32.mrb[193].mxu0 }
 0x777   : > { %v4773_v58 = vadd.f32 %v4766_v35, %v11794_v53  ;;  %v4760_v0 = vmul.f32 %v9681_v15, %v13384_v42 }
 0x778   : > { %9686 = vrsqrt.f32 %v4743_v12 }
 0x779   : > { %6394 = vrot.lane.b32.xlu1 %v4773_v58, %s9845_s28  ;;  %7063 = vst.msk [vmem:[%s11801_s14 + $0x2e8] sm:$0xff] %vm1876_vm2, %v4773_v58  ;;  %v4747_v24 = vpop.f32.mrb[194].mxu0  ;;  %v4767_v38 = vmul.f32 %v4760_v0, %v11789_v59 }
 0x77a   : > { %v9683_v7 = vpop.eup %9682  ;;  %v4748_v63 = vadd.f32 1e-05, %v4747_v24  ;;  %v8315_v13 = vpop.f32.mrb[195].mxu0 }
 0x77b   : > { %v4774_v20 = vadd.f32 %v4767_v38, %v11794_v53  ;;  %v4761_v52 = vmul.f32 %v9683_v7, %v13393_v26  ;;  %v13674_v13 = vld [vmem:[%s11927_s15 + $0x198] sm:$0xff] }
 0x77c   : > { %9688 = vrsqrt.f32 %v4748_v63 }
 0x77d   : > { %6396 = vrot.lane.b32.xlu0 %v4774_v20, %s9845_s28  ;;  %7064 = vst.msk [vmem:[%s11801_s14 + $0x2f0] sm:$0xff] %vm1876_vm2, %v4774_v20  ;;  %v4768_v42 = vmul.f32 %v4761_v52, %v11789_v59  ;;  %v13681_v20 = vld [vmem:[%s11927_s15 + $0x1a0] sm:$0xff]  ;;  %v13688_v52 = vld [vmem:[%s11927_s15 + $0x1a8] sm:$0xff] }
 0x77e   : > { %v9685_v45 = vpop.eup %9684 }
 0x77f   : > { %v4775_v23 = vadd.f32 %v4768_v42, %v11794_v53  ;;  %v4762_v56 = vmul.f32 %v9685_v45, %v13402_v27  ;;  %v13695_v42 = vld [vmem:[%s11927_s15 + $0x1b0] sm:$0xff]  ;;  %v13702_v45 = vld [vmem:[%s11927_s15 + $0x1b8] sm:$0xff] }
 0x781   : > { %6398 = vrot.lane.b32.xlu1 %v4775_v23, %s9845_s28  ;;  %7065 = vst.msk [vmem:[%s11801_s14 + $0x2f8] sm:$0xff] %vm1876_vm2, %v4775_v23  ;;  %v4769_v25 = vmul.f32 %v4762_v56, %v11789_v59  ;;  %v13709_v23 = vld [vmem:[%s11927_s15 + $0x1c0] sm:$0xff]  ;;  %v13716_v56 = vld [vmem:[%s11927_s15 + $0x1c8] sm:$0xff] }
 0x782   : > { %v9687_v26 = vpop.eup %9686 }
 0x783   : > { %v4776_v36 = vadd.f32 %v4769_v25, %v11794_v53  ;;  %v4763_v9 = vmul.f32 %v9687_v26, %v13411_v8  ;;  %v13723_v25 = vld [vmem:[%s11927_s15 + $0x1d0] sm:$0xff]  ;;  %v13730_v26 = vld [vmem:[%s11927_s15 + $0x1d8] sm:$0xff] }
 0x785   : > { %6400 = vrot.lane.b32.xlu0 %v4776_v36, %s9845_s28  ;;  %7066 = vst.msk [vmem:[%s11801_s14 + $0x300] sm:$0xff] %vm1876_vm2, %v4776_v36  ;;  %v4770_v2 = vmul.f32 %v4763_v9, %v11789_v59  ;;  %v13737_v36 = vld [vmem:[%s11927_s15 + $0x1e0] sm:$0xff]  ;;  %v13744_v9 = vld [vmem:[%s11927_s15 + $0x1e8] sm:$0xff] }
 0x786   : > { %v9689_v55 = vpop.eup %9688 }
 0x787   : > { %v4777_v27 = vadd.f32 %v4770_v2, %v11794_v53  ;;  %v4764_v4 = vmul.f32 %v9689_v55, %v13420_v40  ;;  %v13751_v2 = vld [vmem:[%s11927_s15 + $0x1f0] sm:$0xff]  ;;  %v13758_v55 = vld [vmem:[%s11927_s15 + $0x1f8] sm:$0xff] }
 0x789   : > { %v4866_v39 = vpop.f32.mrb[196].mxu0  ;;  %6402 = vrot.lane.b32.xlu1 %v4777_v27, %s9845_s28  ;;  %7067 = vst.msk [vmem:[%s11801_s14 + $0x308] sm:$0xff] %vm1876_vm2, %v4777_v27  ;;  %v4771_v49 = vmul.f32 %v4764_v4, %v11789_v59  ;;  %v13765_v27 = vld [vmem:[%s11927_s15 + $0x200] sm:$0xff] }
 0x78a   : > { %v13574_v8 = vsub.f32 %v13445_v46, %v4866_v39  ;;  %v4868_v44 = vpop.f32.mrb[197].mxu0  ;;  %v13774_v39 = vld [vmem:[%s11927_s15 + $0x208] sm:$0xff] }
 0x78b   : > { %v13577_v57 = vsub.f32 %v13431_v19, %v4868_v44  ;;  %v4778_v48 = vadd.f32 %v4771_v49, %v11794_v53  ;;  %v13783_v44 = vld [vmem:[%s11927_s15 + $0x210] sm:$0xff] }
 0x78c   : > { %v4921_v41 = vmul.f32 %v13574_v8, %v13574_v8 }
 0x78d   : > { %v4922_v32 = vmul.f32 %v13577_v57, %v13577_v57  ;;  %v4872_v40 = vpop.f32.mrb[198].mxu0  ;;  %6404 = vrot.lane.b32.xlu0 %v4778_v48, %s9845_s28  ;;  %7068 = vst.msk [vmem:[%s11801_s14 + $0x310] sm:$0x1] %vm3490_vm3, %v4778_v48 }
 0x78e   : > { %v13588_v46 = vsub.f32 %v13458_v6, %v4872_v40  ;;  %v4874_v1 = vpop.f32.mrb[199].mxu0 }
 0x78f   : > { %v13591_v19 = vsub.f32 %v13450_v62, %v4874_v1  ;;  %6908 = vmatprep.mubr.msk.f32.mxu0 %vm1876_vm2, %v4922_v32  ;;  %v13792_v32 = vld [vmem:[%s11927_s15 + $0x218] sm:$0xff] }
 0x790   : > { %5021 = vmatmul.mubr.f32.vlgmr.msra.gmra.mrb[210].mxu0 %v4921_v41  ;;  %v4923_v14 = vmul.f32 %v13588_v46, %v13588_v46  ;;  %v13801_v41 = vld [vmem:[%s11927_s15 + $0x220] sm:$0xff] }
 0x791   : > { %v4924_v18 = vmul.f32 %v13591_v19, %v13591_v19  ;;  %9424 = vmatpush3.bf16.msra.mxu0 %v15296_v29  ;;  %v4878_v21 = vpop.f32.mrb[200].mxu0 }
 0x792   : > { %v13600_v17 = vsub.f32 %v13471_v47, %v4878_v21  ;;  %v4880_v6 = vpop.f32.mrb[201].mxu0  ;;  %9425 = vmatprep.subr.bf16.mxu0 %v15293_v51 }
 0x793   : > { %v13604_v62 = vsub.f32 %v13463_v11, %v4880_v6  ;;  %6909 = vmatprep.mubr.msk.f32.mxu0 %vm1876_vm2, %v4924_v18  ;;  %v13810_v18 = vld [vmem:[%s11927_s15 + $0x228] sm:$0xff] }
 0x794   : > { %5027 = vmatmul.mubr.f32.gmra.mrb[212].mxu0 %v4923_v14  ;;  %v4925_v43 = vmul.f32 %v13600_v17, %v13600_v17  ;;  %v13819_v14 = vld [vmem:[%s11927_s15 + $0x230] sm:$0xff] }
 0x795   : > { %v4926_v3 = vmul.f32 %v13604_v62, %v13604_v62  ;;  %v4884_v29 = vpop.f32.mrb[202].mxu0  ;;  %9427 = vmatpush3.bf16.msra.mxu0 %v15319_v5 }
 0x796   : > { %v13613_v47 = vsub.f32 %v13484_v60, %v4884_v29  ;;  %v4886_v28 = vpop.f32.mrb[203].mxu0  ;;  %v13835_v29 = vld [vmem:[%s11927_s15 + $0x240] sm:$0xff] }
 0x797   : > { %v13616_v51 = vsub.f32 %v13476_v10, %v4886_v28  ;;  %6910 = vmatprep.mubr.msk.f32.mxu0 %vm1876_vm2, %v4926_v3  ;;  %v13828_v3 = vld [vmem:[%s11927_s15 + $0x238] sm:$0xff]  ;;  %v13849_v28 = vld [vmem:[%s11927_s15 + $0x250] sm:$0xff] }
 0x798   : > { %5033 = vmatmul.mubr.f32.gmra.mrb[214].mxu0 %v4925_v43  ;;  %v4927_v5 = vmul.f32 %v13613_v47, %v13613_v47  ;;  %v13842_v43 = vld [vmem:[%s11927_s15 + $0x248] sm:$0xff] }
 0x799   : > { %v4928_v11 = vmul.f32 %v13616_v51, %v13616_v51  ;;  %v4890_v54 = vpop.f32.mrb[204].mxu0 }
 0x79a   : > { %v13624_v22 = vsub.f32 %v13497_v50, %v4890_v54  ;;  %v4892_v35 = vpop.f32.mrb[205].mxu0  ;;  %v13863_v54 = vld [vmem:[%s11927_s15 + $0x260] sm:$0xff] }
 0x79b   : > { %v13627_v60 = vsub.f32 %v13489_v37, %v4892_v35  ;;  %6911 = vmatprep.mubr.msk.f32.mxu0 %vm1876_vm2, %v4928_v11  ;;  %v13856_v11 = vld [vmem:[%s11927_s15 + $0x258] sm:$0xff]  ;;  %v13877_v35 = vld [vmem:[%s11927_s15 + $0x270] sm:$0xff] }
 0x79c   : > { %5039 = vmatmul.mubr.f32.gmra.mrb[216].mxu0 %v4927_v5  ;;  %v4929_v12 = vmul.f32 %v13624_v22, %v13624_v22  ;;  %v13870_v5 = vld [vmem:[%s11927_s15 + $0x268] sm:$0xff] }
 0x79d   : > { %v4930_v10 = vmul.f32 %v13627_v60, %v13627_v60  ;;  %v4896_v15 = vpop.f32.mrb[206].mxu0 }
 0x79e   : > { %v13635_v16 = vsub.f32 %v13510_v61, %v4896_v15  ;;  %v4898_v58 = vpop.f32.mrb[207].mxu0  ;;  %v13891_v15 = vld [vmem:[%s11927_s15 + $0x280] sm:$0xff] }
 0x79f   : > { %v13638_v50 = vsub.f32 %v13502_v34, %v4898_v58  ;;  %6912 = vmatprep.mubr.msk.f32.mxu0 %vm1876_vm2, %v4930_v10  ;;  %v13884_v10 = vld [vmem:[%s11927_s15 + $0x278] sm:$0xff]  ;;  %15340 = vst [vmem:[#allocation3_spill] sm:$0xff] %v13891_v15  ;;  %v13905_v58 = vld [vmem:[%s11927_s15 + $0x290] sm:$0xff] }
 0x7a0   : > { %5045 = vmatmul.mubr.f32.gmra.mrb[218].mxu0 %v4929_v12  ;;  %v4931_v24 = vmul.f32 %v13635_v16, %v13635_v16  ;;  %v13898_v12 = vld [vmem:[%s11927_s15 + $0x288] sm:$0xff]  ;;  %15342 = vst [vmem:[#allocation5_spill] sm:$0xff] %v13905_v58 }
 0x7a1   : > { %v4932_v37 = vmul.f32 %v13638_v50, %v13638_v50  ;;  %v4902_v0 = vpop.f32.mrb[208].mxu0  ;;  %15341 = vst [vmem:[#allocation4_spill] sm:$0xff] %v13898_v12 }
 0x7a2   : > { %v13646_v38 = vsub.f32 %v13523_v31, %v4902_v0  ;;  %v4904_v61 = vpop.f32.mrb[209].mxu0  ;;  %v13667_v31 = vld [vmem:[%s11927_s15 + $0x190] sm:$0xff]  ;;  %v13919_v0 = vld [vmem:[%s11927_s15 + $0x2a0] sm:$0xff] }
 0x7a3   : > { %v13649_v34 = vsub.f32 %v13515_v33, %v4904_v61  ;;  %6913 = vmatprep.mubr.msk.f32.mxu0 %vm1876_vm2, %v4932_v37  ;;  %v13660_v33 = vld [vmem:[%s11927_s15 + $0x188] sm:$0xff]  ;;  %v13912_v37 = vld [vmem:[%s11927_s15 + $0x298] sm:$0xff]  ;;  %15344 = vst [vmem:[#allocation7_spill] sm:$0xff] %v13919_v0  ;;  %v13933_v61 = vld [vmem:[%s11927_s15 + $0x2b0] sm:$0xff] }
 0x7a4   : > { %5051 = vmatmul.mubr.f32.gmra.mrb[220].mxu0 %v4931_v24  ;;  %v4933_v63 = vmul.f32 %v13646_v38, %v13646_v38  ;;  %15343 = vst [vmem:[#allocation6_spill] sm:$0xff] %v13912_v37  ;;  %v13926_v24 = vld [vmem:[%s11927_s15 + $0x2a8] sm:$0xff]  ;;  %15346 = vst [vmem:[#allocation9_spill] sm:$0xff] %v13933_v61 }
 0x7a5   : > { %v4934_v7 = vmul.f32 %v13649_v34, %v13649_v34  ;;  %15345 = vst [vmem:[#allocation8_spill] sm:$0xff] %v13926_v24 }
 0x7a7   : > { %6914 = vmatprep.mubr.msk.f32.mxu0 %vm1876_vm2, %v4934_v7  ;;  %v13940_v7 = vld [vmem:[%s11927_s15 + $0x2b8] sm:$0xff] }
 0x7a8   : > { %5057 = vmatmul.mubr.f32.gmra.mrb[222].mxu0 %v4933_v63  ;;  %15347 = vst [vmem:[#allocation10_spill] sm:$0xff] %v13940_v7  ;;  %v13947_v63 = vld [vmem:[%s11927_s15 + $0x2c0] sm:$0xff] }
 0x7a9   : > { %8324 = vmatprep.mubr.msk.f32.mxu0 %vm9843_vm0, %v15147_v30  ;;  %15348 = vst [vmem:[#allocation11_spill] sm:$0xff] %v13947_v63 }
 0x7ac   : > { %8325 = vmatmul.mubr.msk.f32.vlgmr.msra.gmra.mrb[224].mxu0 %vm1876_vm2, %v13660_v33 }
 0x7ad   : > { %8327 = vmatprep.mubr.msk.f32.mxu0 %vm9843_vm0, %v15147_v30 }
 0x7b0   : > { %8328 = vmatmul.mubr.msk.f32.gmra.mrb[226].mxu0 %vm1876_vm2, %v13667_v31 }
 0x7b1   : > { %8330 = vmatprep.mubr.msk.f32.mxu0 %vm9843_vm0, %v15147_v30 }
 0x7b4   : > { %8331 = vmatmul.mubr.msk.f32.gmra.mrb[228].mxu0 %vm1876_vm2, %v13674_v13 }
 0x7b5   : > { %8333 = vmatprep.mubr.msk.f32.mxu0 %vm9843_vm0, %v15147_v30 }
 0x7b8   : > { %8334 = vmatmul.mubr.msk.f32.gmra.mrb[230].mxu0 %vm1876_vm2, %v13681_v20 }
 0x7b9   : > { %8336 = vmatprep.mubr.msk.f32.mxu0 %vm9843_vm0, %v15147_v30 }
 0x7bc   : > { %8337 = vmatmul.mubr.msk.f32.gmra.mrb[232].mxu0 %vm1876_vm2, %v13688_v52 }
 0x7bd   : > { %8339 = vmatprep.mubr.msk.f32.mxu0 %vm9843_vm0, %v15147_v30 }
 0x7c0   : > { %8340 = vmatmul.mubr.msk.f32.gmra.mrb[234].mxu0 %vm1876_vm2, %v13695_v42 }
 0x7c1   : > { %8342 = vmatprep.mubr.msk.f32.mxu0 %vm9843_vm0, %v15147_v30 }
 0x7c4   : > { %8343 = vmatmul.mubr.msk.f32.gmra.mrb[236].mxu0 %vm1876_vm2, %v13702_v45 }
 0x7c5   : > { %8345 = vmatprep.mubr.msk.f32.mxu0 %vm9843_vm0, %v15147_v30 }
 0x7c8   : > { %8346 = vmatmul.mubr.msk.f32.gmra.mrb[238].mxu0 %vm1876_vm2, %v13709_v23 }
 0x7c9   : > { %8348 = vmatprep.mubr.msk.f32.mxu0 %vm9843_vm0, %v15147_v30 }
 0x7cc   : > { %8349 = vmatmul.mubr.msk.f32.gmra.mrb[240].mxu0 %vm1876_vm2, %v13716_v56 }
 0x7cd   : > { %8351 = vmatprep.mubr.msk.f32.mxu0 %vm9843_vm0, %v15147_v30 }
 0x7d0   : > { %8352 = vmatmul.mubr.msk.f32.gmra.mrb[242].mxu0 %vm1876_vm2, %v13723_v25 }
 0x7d1   : > { %8354 = vmatprep.mubr.msk.f32.mxu0 %vm9843_vm0, %v15147_v30 }
 0x7d4   : > { %8355 = vmatmul.mubr.msk.f32.gmra.mrb[244].mxu0 %vm1876_vm2, %v13730_v26 }
 0x7d5   : > { %8357 = vmatprep.mubr.msk.f32.mxu0 %vm9843_vm0, %v15147_v30 }
 0x7d8   : > { %8358 = vmatmul.mubr.msk.f32.gmra.mrb[246].mxu0 %vm1876_vm2, %v13737_v36 }
 0x7d9   : > { %8360 = vmatprep.mubr.msk.f32.mxu0 %vm9843_vm0, %v15147_v30 }
 0x7dc   : > { %8361 = vmatmul.mubr.msk.f32.gmra.mrb[248].mxu0 %vm1876_vm2, %v13744_v9 }
 0x7dd   : > { %8363 = vmatprep.mubr.msk.f32.mxu0 %vm9843_vm0, %v15147_v30 }
 0x7e0   : > { %8364 = vmatmul.mubr.msk.f32.gmra.mrb[250].mxu0 %vm1876_vm2, %v13751_v2 }
 0x7e1   : > { %8366 = vmatprep.mubr.msk.f32.mxu0 %vm9843_vm0, %v15147_v30 }
 0x7e4   : > { %8367 = vmatmul.mubr.msk.f32.gmra.mrb[252].mxu0 %vm1876_vm2, %v13758_v55 }
 0x7e5   : > { %8369 = vmatprep.mubr.msk.f32.mxu0 %vm9843_vm0, %v15147_v30 }
 0x7e7   : > { %v6393_v4 = vpop.permute.xlu0 %6392 }
 0x7e8   : > { %7069 = vst.msk [vmem:[%s11801_s14 + $0x311] sm:$0xff] %vm1876_vm2, %v6393_v4  ;;  %8370 = vmatmul.mubr.msk.f32.gmra.mrb[254].mxu0 %vm1876_vm2, %v13765_v27  ;;  %v13954_v4 = vld [vmem:[%s11927_s15 + $0x2c8] sm:$0xff] }
 0x7e9   : > { %8372 = vmatprep.mubr.msk.f32.mxu0 %vm9843_vm0, %v15147_v30  ;;  %15349 = vst [vmem:[#allocation13_spill] sm:$0xff] %v13954_v4 }
 0x7eb   : > { %v6395_v49 = vpop.permute.xlu1 %6394 }
 0x7ec   : > { %7070 = vst.msk [vmem:[%s11801_s14 + $0x319] sm:$0xff] %vm1876_vm2, %v6395_v49  ;;  %8373 = vmatmul.mubr.msk.f32.gmra.mrb[0].mxu0 %vm1876_vm2, %v13774_v39  ;;  %v13961_v49 = vld [vmem:[%s11927_s15 + $0x2d0] sm:$0xff] }
 0x7ed   : > { %8375 = vmatprep.mubr.msk.f32.mxu0 %vm9843_vm0, %v15147_v30  ;;  %15350 = vst [vmem:[#allocation15_spill] sm:$0xff] %v13961_v49 }
 0x7ef   : > { %v6397_v48 = vpop.permute.xlu0 %6396 }
 0x7f0   : > { %7071 = vst.msk [vmem:[%s11801_s14 + $0x321] sm:$0xff] %vm1876_vm2, %v6397_v48  ;;  %8376 = vmatmul.mubr.msk.f32.gmra.mrb[2].mxu0 %vm1876_vm2, %v13783_v44  ;;  %v13968_v48 = vld [vmem:[%s11927_s15 + $0x2d8] sm:$0xff] }
 0x7f1   : > { %8378 = vmatprep.mubr.msk.f32.mxu0 %vm9843_vm0, %v15147_v30  ;;  %15351 = vst [vmem:[#allocation17_spill] sm:$0xff] %v13968_v48 }
 0x7f3   : > { %v6399_v40 = vpop.permute.xlu1 %6398 }
 0x7f4   : > { %7072 = vst.msk [vmem:[%s11801_s14 + $0x329] sm:$0xff] %vm1876_vm2, %v6399_v40  ;;  %8379 = vmatmul.mubr.msk.f32.gmra.mrb[4].mxu0 %vm1876_vm2, %v13792_v32  ;;  %v13975_v40 = vld [vmem:[%s11927_s15 + $0x2e0] sm:$0xff] }
 0x7f5   : > { %8381 = vmatprep.mubr.msk.f32.mxu0 %vm9843_vm0, %v15147_v30  ;;  %15352 = vst [vmem:[#allocation19_spill] sm:$0xff] %v13975_v40 }
 0x7f7   : > { %v6401_v1 = vpop.permute.xlu0 %6400 }
 0x7f8   : > { %7073 = vst.msk [vmem:[%s11801_s14 + $0x331] sm:$0xff] %vm1876_vm2, %v6401_v1  ;;  %8382 = vmatmul.mubr.msk.f32.gmra.mrb[6].mxu0 %vm1876_vm2, %v13801_v41  ;;  %v13982_v1 = vld [vmem:[%s11927_s15 + $0x2e8] sm:$0xff] }
 0x7f9   : > { %8384 = vmatprep.mubr.msk.f32.mxu0 %vm9843_vm0, %v15147_v30  ;;  %15353 = vst [vmem:[#allocation21_spill] sm:$0xff] %v13982_v1 }
 0x7fb   : > { %v6403_v21 = vpop.permute.xlu1 %6402 }
 0x7fc   : > { %7074 = vst.msk [vmem:[%s11801_s14 + $0x339] sm:$0xff] %vm1876_vm2, %v6403_v21  ;;  %8385 = vmatmul.mubr.msk.f32.gmra.mrb[8].mxu0 %vm1876_vm2, %v13810_v18  ;;  %v13989_v21 = vld [vmem:[%s11927_s15 + $0x2f0] sm:$0xff] }
 0x7fd   : > { %8387 = vmatprep.mubr.msk.f32.mxu0 %vm9843_vm0, %v15147_v30  ;;  %15354 = vst [vmem:[#allocation23_spill] sm:$0xff] %v13989_v21 }
 0x7ff   : > { %v6405_v6 = vpop.permute.xlu0 %6404 }
 0x800   : > { %7075 = vst.msk [vmem:[%s11801_s14 + $0x341] sm:$0x1] %vm3490_vm3, %v6405_v6  ;;  %8388 = vmatmul.mubr.msk.f32.gmra.mrb[10].mxu0 %vm1876_vm2, %v13819_v14  ;;  %v13996_v6 = vld [vmem:[%s11927_s15 + $0x2f8] sm:$0xff] }
 0x801   : > { %8390 = vmatprep.mubr.msk.f32.mxu0 %vm9843_vm0, %v15147_v30  ;;  %15355 = vst [vmem:[#allocation24_spill] sm:$0xff] %v13996_v6 }
 0x804   : > { %8391 = vmatmul.mubr.msk.f32.gmra.mrb[12].mxu0 %vm1876_vm2, %v13828_v3 }
 0x805   : > { %8393 = vmatprep.mubr.msk.f32.mxu0 %vm9843_vm0, %v15147_v30 }
 0x808   : > { %8394 = vmatmul.mubr.msk.f32.gmra.mrb[14].mxu0 %vm1876_vm2, %v13835_v29 }
 0x809   : > { %8396 = vmatprep.mubr.msk.f32.mxu0 %vm9843_vm0, %v15147_v30 }
 0x80c   : > { %8397 = vmatmul.mubr.msk.f32.gmra.mrb[16].mxu0 %vm1876_vm2, %v13842_v43 }
 0x80d   : > { %8399 = vmatprep.mubr.msk.f32.mxu0 %vm9843_vm0, %v15147_v30 }
 0x810   : > { %8400 = vmatmul.mubr.msk.f32.gmra.mrb[18].mxu0 %vm1876_vm2, %v13849_v28 }
 0x811   : > { %8402 = vmatprep.mubr.msk.f32.mxu0 %vm9843_vm0, %v15147_v30 }
 0x814   : > { %8403 = vmatmul.mubr.msk.f32.gmra.mrb[20].mxu0 %vm1876_vm2, %v13856_v11 }
 0x815   : > { %8405 = vmatprep.mubr.msk.f32.mxu0 %vm9843_vm0, %v15147_v30 }
 0x818   : > { %8406 = vmatmul.mubr.msk.f32.gmra.mrb[22].mxu0 %vm1876_vm2, %v13863_v54 }
 0x819   : > { %8408 = vmatprep.mubr.msk.f32.mxu0 %vm9843_vm0, %v15147_v30 }
 0x81c   : > { %8409 = vmatmul.mubr.msk.f32.gmra.mrb[24].mxu0 %vm1876_vm2, %v13870_v5 }
 0x81d   : > { %8411 = vmatprep.mubr.msk.f32.mxu0 %vm9843_vm0, %v15147_v30 }
 0x820   : > { %8412 = vmatmul.mubr.msk.f32.gmra.mrb[26].mxu0 %vm1876_vm2, %v13877_v35 }
 0x821   : > { %8414 = vmatprep.mubr.msk.f32.mxu0 %vm9843_vm0, %v15147_v30 }
 0x824   : > { %8415 = vmatmul.mubr.msk.f32.gmra.mrb[28].mxu0 %vm1876_vm2, %v13884_v10 }
 0x825   : > { %8417 = vmatprep.mubr.msk.f32.mxu0 %vm9843_vm0, %v15147_v30 }
 0x828   : > { %8418 = vmatmul.mubr.msk.f32.gmra.mrb[30].mxu0 %vm1876_vm2, %v13891_v15 }
 0x829   : > { %8420 = vmatprep.mubr.msk.f32.mxu0 %vm9843_vm0, %v15147_v30 }
 0x82c   : > { %8421 = vmatmul.mubr.msk.f32.gmra.mrb[32].mxu0 %vm1876_vm2, %v13898_v12 }
 0x82d   : > { %8423 = vmatprep.mubr.msk.f32.mxu0 %vm9843_vm0, %v15147_v30 }
 0x830   : > { %8424 = vmatmul.mubr.msk.f32.gmra.mrb[34].mxu0 %vm1876_vm2, %v13905_v58 }
 0x831   : > { %8426 = vmatprep.mubr.msk.f32.mxu0 %vm9843_vm0, %v15147_v30 }
 0x834   : > { %8427 = vmatmul.mubr.msk.f32.gmra.mrb[36].mxu0 %vm1876_vm2, %v13912_v37 }
 0x835   : > { %8429 = vmatprep.mubr.msk.f32.mxu0 %vm9843_vm0, %v15147_v30 }
 0x838   : > { %8430 = vmatmul.mubr.msk.f32.gmra.mrb[38].mxu0 %vm1876_vm2, %v13919_v0 }
 0x839   : > { %8432 = vmatprep.mubr.msk.f32.mxu0 %vm9843_vm0, %v15147_v30 }
 0x83c   : > { %8433 = vmatmul.mubr.msk.f32.gmra.mrb[40].mxu0 %vm1876_vm2, %v13926_v24 }
 0x83d   : > { %8435 = vmatprep.mubr.msk.f32.mxu0 %vm9843_vm0, %v15147_v30 }
 0x840   : > { %8436 = vmatmul.mubr.msk.f32.gmra.mrb[42].mxu0 %vm1876_vm2, %v13933_v61 }
 0x841   : > { %8438 = vmatprep.mubr.msk.f32.mxu0 %vm9843_vm0, %v15147_v30 }
 0x844   : > { %8439 = vmatmul.mubr.msk.f32.gmra.mrb[44].mxu0 %vm1876_vm2, %v13940_v7 }
 0x845   : > { %8441 = vmatprep.mubr.msk.f32.mxu0 %vm9843_vm0, %v15147_v30 }
 0x848   : > { %8442 = vmatmul.mubr.msk.f32.gmra.mrb[46].mxu0 %vm1876_vm2, %v13947_v63 }
 0x849   : > { %8444 = vmatprep.mubr.msk.f32.mxu0 %vm9843_vm0, %v15147_v30 }
 0x84c   : > { %8445 = vmatmul.mubr.msk.f32.gmra.mrb[48].mxu0 %vm1876_vm2, %v13954_v4  ;;  %v14003_v4 = vld [vmem:[%s11927_s15 + $0x300] sm:$0xff] }
 0x84d   : > { %8447 = vmatprep.mubr.msk.f32.mxu0 %vm9843_vm0, %v15147_v30  ;;  %15356 = vst [vmem:[#allocation26_spill] sm:$0xff] %v14003_v4 }
 0x850   : > { %8448 = vmatmul.mubr.msk.f32.gmra.mrb[50].mxu0 %vm1876_vm2, %v13961_v49 }
 0x851   : > { %8450 = vmatprep.mubr.msk.f32.mxu0 %vm9843_vm0, %v15147_v30 }
 0x854   : > { %8451 = vmatmul.mubr.msk.f32.gmra.mrb[52].mxu0 %vm1876_vm2, %v13968_v48 }
 0x855   : > { %8453 = vmatprep.mubr.msk.f32.mxu0 %vm9843_vm0, %v15147_v30 }
 0x858   : > { %8454 = vmatmul.mubr.msk.f32.gmra.mrb[54].mxu0 %vm1876_vm2, %v13975_v40 }
 0x859   : > { %8456 = vmatprep.mubr.msk.f32.mxu0 %vm9843_vm0, %v15147_v30 }
 0x85c   : > { %8457 = vmatmul.mubr.msk.f32.gmra.mrb[56].mxu0 %vm1876_vm2, %v13982_v1 }
 0x85d   : > { %8459 = vmatprep.mubr.msk.f32.mxu0 %vm9843_vm0, %v15147_v30 }
 0x860   : > { %8460 = vmatmul.mubr.msk.f32.gmra.mrb[58].mxu0 %vm1876_vm2, %v13989_v21 }
 0x861   : > { %8462 = vmatprep.mubr.msk.f32.mxu0 %vm9843_vm0, %v15147_v30 }
 0x863   : > { %v5022_v40 = vpop.f32.mrb[210].mxu0 }
 0x864   : > { %v5023_v48 = vadd.f32 1e-05, %v5022_v40  ;;  %v5024_v49 = vpop.f32.mrb[211].mxu0  ;;  %8463 = vmatmul.mubr.msk.f32.gmra.mrb[60].mxu0 %vm1876_vm2, %v13996_v6  ;;  %v14010_v40 = vld [vmem:[%s11927_s15 + $0x308] sm:$0xff] }
 0x865   : > { %v5025_v1 = vadd.f32 1e-05, %v5024_v49  ;;  %8465 = vmatprep.mubr.msk.f32.mxu0 %vm9843_vm0, %v15147_v30  ;;  %15357 = vst [vmem:[#allocation28_spill] sm:$0xff] %v14010_v40 }
 0x866   : > { %9690 = vrsqrt.f32 %v5023_v48 }
 0x867   : > { %9692 = vrsqrt.f32 %v5025_v1  ;;  %v5028_v21 = vpop.f32.mrb[212].mxu0 }
 0x868   : > { %v5029_v63 = vadd.f32 1e-05, %v5028_v21  ;;  %v5030_v7 = vpop.f32.mrb[213].mxu0  ;;  %8466 = vmatmul.mubr.msk.f32.gmra.mrb[62].mxu0 %vm1876_vm2, %v14003_v4 }
 0x869   : > { %v5031_v61 = vadd.f32 1e-05, %v5030_v7  ;;  %8468 = vmatprep.mubr.msk.f32.mxu0 %vm9843_vm0, %v15147_v30 }
 0x86a   : > { %9694 = vrsqrt.f32 %v5029_v63 }
 0x86b   : > { %9696 = vrsqrt.f32 %v5031_v61  ;;  %v5034_v49 = vpop.f32.mrb[214].mxu0 }
 0x86c   : > { %v5035_v6 = vadd.f32 1e-05, %v5034_v49  ;;  %v5036_v24 = vpop.f32.mrb[215].mxu0  ;;  %8469 = vmatmul.mubr.msk.f32.gmra.mrb[64].mxu0 %vm1876_vm2, %v14010_v40 }
 0x86d   : > { %v5037_v48 = vadd.f32 1e-05, %v5036_v24  ;;  %v15358_v24 = vld [vmem:[#allocation16_spill] sm:$0xff] }
 0x86e   : > { %9698 = vrsqrt.f32 %v5035_v6 }
 0x86f   : > { %9700 = vrsqrt.f32 %v5037_v48  ;;  %v5040_v1 = vpop.f32.mrb[216].mxu0 }
 0x870   : > { %v9691_v21 = vpop.eup %9690  ;;  %v5041_v4 = vadd.f32 1e-05, %v5040_v1  ;;  %v5042_v7 = vpop.f32.mrb[217].mxu0 }
 0x871   : > { %v9693_v0 = vpop.eup %9692  ;;  %v5043_v37 = vadd.f32 1e-05, %v5042_v7  ;;  %v5077_v58 = vmul.f32 %v9691_v21, %v13574_v8  ;;  %v15359_v21 = vld [vmem:[#allocation18_spill] sm:$0xff] }
 0x872   : > { %v5078_v63 = vmul.f32 %v9693_v0, %v13577_v57  ;;  %9702 = vrsqrt.f32 %v5041_v4 }
 0x873   : > { %9704 = vrsqrt.f32 %v5043_v37  ;;  %v5046_v61 = vpop.f32.mrb[218].mxu0  ;;  %v5091_v49 = vmul.f32 %v5077_v58, %v11789_v59 }
 0x874   : > { %v9695_v40 = vpop.eup %9694  ;;  %v5092_v6 = vmul.f32 %v5078_v63, %v15358_v24  ;;  %v5047_v48 = vadd.f32 1e-05, %v5046_v61  ;;  %v5048_v12 = vpop.f32.mrb[219].mxu0 }
 0x875   : > { %v9697_v1 = vpop.eup %9696  ;;  %v5049_v15 = vadd.f32 1e-05, %v5048_v12  ;;  %v5105_v7 = vadd.f32 %v5091_v49, %v11794_v53  ;;  %v5079_v8 = vmul.f32 %v9695_v40, %v13588_v46 }
 0x876   : > { %v5106_v57 = vadd.f32 %v5092_v6, %v15359_v21  ;;  %v5080_v37 = vmul.f32 %v9697_v1, %v13591_v19  ;;  %9706 = vrsqrt.f32 %v5047_v48 }
 0x877   : > { %9708 = vrsqrt.f32 %v5049_v15  ;;  %v5052_v0 = vpop.f32.mrb[220].mxu0  ;;  %6462 = vrot.lane.b32.xlu0 %v5105_v7, %s9846_s21  ;;  %7076 = vst.msk [vmem:[%s11801_s14 + $0x342] sm:$0xff] %vm1876_vm2, %v5105_v7  ;;  %6434 = vrot.lane.b32.xlu1 %v5105_v7, %s9845_s28  ;;  %v5093_v12 = vmul.f32 %v5079_v8, %v11789_v59 }
 0x878   : > { %v9699_v58 = vpop.eup %9698  ;;  %7104 = vst.msk [vmem:[%s11801_s14 + $0x406] sm:$0xff] %vm1876_vm2, %v5106_v57  ;;  %v5094_v46 = vmul.f32 %v5080_v37, %v15358_v24  ;;  %v5053_v4 = vadd.f32 1e-05, %v5052_v0  ;;  %v5054_v19 = vpop.f32.mrb[221].mxu0 }
 0x879   : > { %v9701_v40 = vpop.eup %9700  ;;  %v5055_v15 = vadd.f32 1e-05, %v5054_v19  ;;  %v5107_v63 = vadd.f32 %v5093_v12, %v11794_v53  ;;  %v5081_v61 = vmul.f32 %v9699_v58, %v13600_v17 }
 0x87a   : > { %v5108_v49 = vadd.f32 %v5094_v46, %v15359_v21  ;;  %v5082_v6 = vmul.f32 %v9701_v40, %v13604_v62  ;;  %9710 = vrsqrt.f32 %v5053_v4 }
 0x87b   : > { %9712 = vrsqrt.f32 %v5055_v15  ;;  %7077 = vst.msk [vmem:[%s11801_s14 + $0x34a] sm:$0xff] %vm1876_vm2, %v5107_v63  ;;  %6436 = vrot.lane.b32.xlu0 %v5107_v63, %s9845_s28  ;;  %6490 = vrot.lane.b32.xlu1 %v5105_v7, %s9847_s16  ;;  %v5058_v48 = vpop.f32.mrb[222].mxu0  ;;  %v5095_v1 = vmul.f32 %v5081_v61, %v11789_v59 }
 0x87c   : > { %v9703_v8 = vpop.eup %9702  ;;  %7105 = vst.msk [vmem:[%s11801_s14 + $0x40e] sm:$0xff] %vm1876_vm2, %v5108_v49  ;;  %v5096_v17 = vmul.f32 %v5082_v6, %v15358_v24  ;;  %v5059_v57 = vadd.f32 1e-05, %v5058_v48  ;;  %v5060_v62 = vpop.f32.mrb[223].mxu0 }
 0x87d   : > { %v9705_v37 = vpop.eup %9704  ;;  %v5061_v0 = vadd.f32 1e-05, %v5060_v62  ;;  %v5109_v12 = vadd.f32 %v5095_v1, %v11794_v53  ;;  %v5083_v58 = vmul.f32 %v9703_v8, %v13613_v47 }
 0x87e   : > { %v5110_v7 = vadd.f32 %v5096_v17, %v15359_v21  ;;  %v5084_v46 = vmul.f32 %v9705_v37, %v13616_v51  ;;  %9714 = vrsqrt.f32 %v5059_v57 }
 0x87f   : > { %9716 = vrsqrt.f32 %v5061_v0  ;;  %6492 = vrot.lane.b32.xlu0 %v5107_v63, %s9847_s16  ;;  %6464 = vrot.lane.b32.xlu1 %v5107_v63, %s9846_s21  ;;  %v5382_v4 = vpop.f32.mrb[224].mxu0  ;;  %7078 = vst.msk [vmem:[%s11801_s14 + $0x352] sm:$0xff] %vm1876_vm2, %v5109_v12  ;;  %v5097_v19 = vmul.f32 %v5083_v58, %v11789_v59 }
 0x880   : > { %v9707_v40 = vpop.eup %9706  ;;  %7106 = vst.msk [vmem:[%s11801_s14 + $0x416] sm:$0xff] %vm1876_vm2, %v5110_v7  ;;  %v5098_v47 = vmul.f32 %v5084_v46, %v15358_v24  ;;  %v14055_v51 = vsub.f32 %v13660_v33, %v5382_v4  ;;  %v8326_v15 = vpop.f32.mrb[225].mxu0 }
 0x881   : > { %v9709_v61 = vpop.eup %9708  ;;  %v5111_v49 = vadd.f32 %v5097_v19, %v11794_v53  ;;  %v5085_v63 = vmul.f32 %v9707_v40, %v13624_v22 }
 0x882   : > { %v5112_v6 = vadd.f32 %v5098_v47, %v15359_v21  ;;  %v5086_v48 = vmul.f32 %v9709_v61, %v13627_v60  ;;  %v5675_v1 = vmul.f32 %v14055_v51, %v14055_v51 }
 0x883   : > { %6466 = vrot.lane.b32.xlu0 %v5109_v12, %s9846_s21  ;;  %6438 = vrot.lane.b32.xlu1 %v5109_v12, %s9845_s28  ;;  %v5387_v8 = vpop.f32.mrb[226].mxu0  ;;  %7079 = vst.msk [vmem:[%s11801_s14 + $0x35a] sm:$0xff] %vm1876_vm2, %v5111_v49  ;;  %v5099_v33 = vmul.f32 %v5085_v63, %v11789_v59 }
 0x884   : > { %v9711_v17 = vpop.eup %9710  ;;  %7107 = vst.msk [vmem:[%s11801_s14 + $0x41e] sm:$0xff] %vm1876_vm2, %v5112_v6  ;;  %v5100_v22 = vmul.f32 %v5086_v48, %v15358_v24  ;;  %v14072_v60 = vsub.f32 %v13667_v31, %v5387_v8  ;;  %v8329_v57 = vpop.f32.mrb[227].mxu0  ;;  %8480 = vmatmul.mubr.msk.f32.vlgmr.msra.gmra.mrb[224].mxu1 %vm1876_vm2, %v5675_v1 }
 0x885   : > { %v9713_v62 = vpop.eup %9712  ;;  %8482 = vmatprep.mubr.msk.f32.mxu1 %vm9843_vm0, %v15147_v30  ;;  %v5113_v37 = vadd.f32 %v5099_v33, %v11794_v53  ;;  %v5087_v0 = vmul.f32 %v9711_v17, %v13635_v16 }
 0x886   : > { %v5114_v58 = vadd.f32 %v5100_v22, %v15359_v21  ;;  %v5088_v7 = vmul.f32 %v9713_v62, %v13638_v50  ;;  %v5676_v31 = vmul.f32 %v14072_v60, %v14072_v60 }
 0x887   : > { %6440 = vrot.lane.b32.xlu0 %v5111_v49, %s9845_s28  ;;  %6494 = vrot.lane.b32.xlu1 %v5109_v12, %s9847_s16  ;;  %v5392_v46 = vpop.f32.mrb[228].mxu0  ;;  %7080 = vst.msk [vmem:[%s11801_s14 + $0x362] sm:$0xff] %vm1876_vm2, %v5113_v37  ;;  %v5101_v4 = vmul.f32 %v5087_v0, %v11789_v59 }
 0x888   : > { %v9715_v19 = vpop.eup %9714  ;;  %7108 = vst.msk [vmem:[%s11801_s14 + $0x426] sm:$0xff] %vm1876_vm2, %v5114_v58  ;;  %v5102_v16 = vmul.f32 %v5088_v7, %v15358_v24  ;;  %v14092_v50 = vsub.f32 %v13674_v13, %v5392_v46  ;;  %v8332_v40 = vpop.f32.mrb[229].mxu0  ;;  %8483 = vmatmul.mubr.msk.f32.gmra.mrb[226].mxu1 %vm1876_vm2, %v5676_v31 }
 0x889   : > { %v9717_v47 = vpop.eup %9716  ;;  %8485 = vmatprep.mubr.msk.f32.mxu1 %vm9843_vm0, %v15147_v30  ;;  %v5115_v12 = vadd.f32 %v5101_v4, %v11794_v53  ;;  %v5089_v15 = vmul.f32 %v9715_v19, %v13646_v38 }
 0x88a   : > { %v5116_v61 = vadd.f32 %v5102_v16, %v15359_v21  ;;  %v5090_v63 = vmul.f32 %v9717_v47, %v13649_v34  ;;  %v5677_v6 = vmul.f32 %v14092_v50, %v14092_v50 }
 0x88b   : > { %6496 = vrot.lane.b32.xlu0 %v5111_v49, %s9847_s16  ;;  %6468 = vrot.lane.b32.xlu1 %v5111_v49, %s9846_s21  ;;  %v5397_v13 = vpop.f32.mrb[230].mxu0  ;;  %7081 = vst.msk [vmem:[%s11801_s14 + $0x36a] sm:$0xff] %vm1876_vm2, %v5115_v12  ;;  %v5103_v48 = vmul.f32 %v5089_v15, %v11789_v59 }
 0x88c   : > { %7109 = vst.msk [vmem:[%s11801_s14 + $0x42e] sm:$0xff] %vm1876_vm2, %v5116_v61  ;;  %v5104_v38 = vmul.f32 %v5090_v63, %v15358_v24  ;;  %v14112_v34 = vsub.f32 %v13681_v20, %v5397_v13  ;;  %v8335_v1 = vpop.f32.mrb[231].mxu0  ;;  %8486 = vmatmul.mubr.msk.f32.gmra.mrb[228].mxu1 %vm1876_vm2, %v5677_v6 }
 0x88d   : > { %8488 = vmatprep.mubr.msk.f32.mxu1 %vm9843_vm0, %v15147_v30  ;;  %v5117_v49 = vadd.f32 %v5103_v48, %v11794_v53 }
 0x88e   : > { %v5118_v8 = vadd.f32 %v5104_v38, %v15359_v21  ;;  %v5678_v33 = vmul.f32 %v14112_v34, %v14112_v34 }
 0x88f   : > { %6470 = vrot.lane.b32.xlu0 %v5113_v37, %s9846_s21  ;;  %6442 = vrot.lane.b32.xlu1 %v5113_v37, %s9845_s28  ;;  %v5402_v24 = vpop.f32.mrb[232].mxu0  ;;  %7082 = vst.msk [vmem:[%s11801_s14 + $0x372] sm:$0x1] %vm3490_vm3, %v5117_v49 }
 0x890   : > { %7110 = vst.msk [vmem:[%s11801_s14 + $0x436] sm:$0x1] %vm3490_vm3, %v5118_v8  ;;  %v14128_v20 = vsub.f32 %v13688_v52, %v5402_v24  ;;  %v8338_v17 = vpop.f32.mrb[233].mxu0  ;;  %8489 = vmatmul.mubr.msk.f32.gmra.mrb[230].mxu1 %vm1876_vm2, %v5678_v33 }
 0x891   : > { %8491 = vmatprep.mubr.msk.f32.mxu1 %vm9843_vm0, %v15147_v30 }
 0x892   : > { %v5679_v21 = vmul.f32 %v14128_v20, %v14128_v20 }
 0x893   : > { %6444 = vrot.lane.b32.xlu0 %v5115_v12, %s9845_s28  ;;  %6498 = vrot.lane.b32.xlu1 %v5113_v37, %s9847_s16  ;;  %v5407_v22 = vpop.f32.mrb[234].mxu0 }
 0x894   : > { %v14138_v57 = vsub.f32 %v13695_v42, %v5407_v22  ;;  %v8341_v62 = vpop.f32.mrb[235].mxu0  ;;  %8492 = vmatmul.mubr.msk.f32.gmra.mrb[232].mxu1 %vm1876_vm2, %v5679_v21 }
 0x895   : > { %8494 = vmatprep.mubr.msk.f32.mxu1 %vm9843_vm0, %v15147_v30 }
 0x896   : > { %v5680_v52 = vmul.f32 %v14138_v57, %v14138_v57 }
 0x897   : > { %6472 = vrot.lane.b32.xlu1 %v5115_v12, %s9846_s21  ;;  %v5412_v0 = vpop.f32.mrb[236].mxu0  ;;  %6474 = vrot.lane.b32.xlu0 %v5117_v49, %s9846_s21 }
 0x898   : > { %v14148_v37 = vsub.f32 %v13702_v45, %v5412_v0  ;;  %v8344_v58 = vpop.f32.mrb[237].mxu0  ;;  %8495 = vmatmul.mubr.msk.f32.gmra.mrb[234].mxu1 %vm1876_vm2, %v5680_v52 }
 0x899   : > { %8497 = vmatprep.mubr.msk.f32.mxu1 %vm9843_vm0, %v15147_v30 }
 0x89a   : > { %v5681_v42 = vmul.f32 %v14148_v37, %v14148_v37 }
 0x89b   : > { %v5417_v7 = vpop.f32.mrb[238].mxu0  ;;  %6500 = vrot.lane.b32.xlu0 %v5115_v12, %s9847_s16  ;;  %6446 = vrot.lane.b32.xlu1 %v5117_v49, %s9845_s28 }
 0x89c   : > { %v14158_v31 = vsub.f32 %v13709_v23, %v5417_v7  ;;  %v8347_v46 = vpop.f32.mrb[239].mxu0  ;;  %8498 = vmatmul.mubr.msk.f32.gmra.mrb[236].mxu1 %vm1876_vm2, %v5681_v42 }
 0x89d   : > { %8500 = vmatprep.mubr.msk.f32.mxu1 %vm9843_vm0, %v15147_v30 }
 0x89e   : > { %v5682_v45 = vmul.f32 %v14158_v31, %v14158_v31 }
 0x89f   : > { %v5422_v4 = vpop.f32.mrb[240].mxu0  ;;  %6502 = vrot.lane.b32.xlu1 %v5117_v49, %s9847_s16 }
 0x8a0   : > { %v14167_v19 = vsub.f32 %v13716_v56, %v5422_v4  ;;  %v8350_v16 = vpop.f32.mrb[241].mxu0  ;;  %8501 = vmatmul.mubr.msk.f32.gmra.mrb[238].mxu1 %vm1876_vm2, %v5682_v45 }
 0x8a1   : > { %8503 = vmatprep.mubr.msk.f32.mxu1 %vm9843_vm0, %v15147_v30 }
 0x8a2   : > { %v5683_v23 = vmul.f32 %v14167_v19, %v14167_v19 }
 0x8a3   : > { %v5427_v40 = vpop.f32.mrb[242].mxu0 }
 0x8a4   : > { %v14175_v47 = vsub.f32 %v13723_v25, %v5427_v40  ;;  %v8353_v12 = vpop.f32.mrb[243].mxu0  ;;  %8504 = vmatmul.mubr.msk.f32.gmra.mrb[240].mxu1 %vm1876_vm2, %v5683_v23 }
 0x8a5   : > { %8506 = vmatprep.mubr.msk.f32.mxu1 %vm9843_vm0, %v15147_v30 }
 0x8a6   : > { %v5684_v56 = vmul.f32 %v14175_v47, %v14175_v47 }
 0x8a7   : > { %v5432_v15 = vpop.f32.mrb[244].mxu0 }
 0x8a8   : > { %v14183_v61 = vsub.f32 %v13730_v26, %v5432_v15  ;;  %v8356_v63 = vpop.f32.mrb[245].mxu0  ;;  %8507 = vmatmul.mubr.msk.f32.gmra.mrb[242].mxu1 %vm1876_vm2, %v5684_v56 }
 0x8a9   : > { %8509 = vmatprep.mubr.msk.f32.mxu1 %vm9843_vm0, %v15147_v30 }
 0x8aa   : > { %v5685_v25 = vmul.f32 %v14183_v61, %v14183_v61 }
 0x8ab   : > { %v5437_v6 = vpop.f32.mrb[246].mxu0 }
 0x8ac   : > { %v14191_v13 = vsub.f32 %v13737_v36, %v5437_v6  ;;  %v8359_v48 = vpop.f32.mrb[247].mxu0  ;;  %8510 = vmatmul.mubr.msk.f32.gmra.mrb[244].mxu1 %vm1876_vm2, %v5685_v25 }
 0x8ad   : > { %8512 = vmatprep.mubr.msk.f32.mxu1 %vm9843_vm0, %v15147_v30 }
 0x8ae   : > { %v5686_v26 = vmul.f32 %v14191_v13, %v14191_v13 }
 0x8af   : > { %v5442_v38 = vpop.f32.mrb[248].mxu0 }
 0x8b0   : > { %v14199_v1 = vsub.f32 %v13744_v9, %v5442_v38  ;;  %v8362_v49 = vpop.f32.mrb[249].mxu0  ;;  %8513 = vmatmul.mubr.msk.f32.gmra.mrb[246].mxu1 %vm1876_vm2, %v5686_v26 }
 0x8b1   : > { %8515 = vmatprep.mubr.msk.f32.mxu1 %vm9843_vm0, %v15147_v30 }
 0x8b2   : > { %v5687_v36 = vmul.f32 %v14199_v1, %v14199_v1 }
 0x8b3   : > { %v5447_v8 = vpop.f32.mrb[250].mxu0 }
 0x8b4   : > { %v14207_v33 = vsub.f32 %v13751_v2, %v5447_v8  ;;  %v8365_v24 = vpop.f32.mrb[251].mxu0  ;;  %8516 = vmatmul.mubr.msk.f32.gmra.mrb[248].mxu1 %vm1876_vm2, %v5687_v36 }
 0x8b5   : > { %8518 = vmatprep.mubr.msk.f32.mxu1 %vm9843_vm0, %v15147_v30 }
 0x8b6   : > { %v5688_v9 = vmul.f32 %v14207_v33, %v14207_v33 }
 0x8b7   : > { %v5452_v17 = vpop.f32.mrb[252].mxu0 }
 0x8b8   : > { %v14215_v21 = vsub.f32 %v13758_v55, %v5452_v17  ;;  %v8368_v22 = vpop.f32.mrb[253].mxu0  ;;  %8519 = vmatmul.mubr.msk.f32.gmra.mrb[250].mxu1 %vm1876_vm2, %v5688_v9 }
 0x8b9   : > { %8521 = vmatprep.mubr.msk.f32.mxu1 %vm9843_vm0, %v15147_v30 }
 0x8ba   : > { %v5689_v2 = vmul.f32 %v14215_v21, %v14215_v21 }
 0x8bb   : > { %v5457_v62 = vpop.f32.mrb[254].mxu0 }
 0x8bc   : > { %v14223_v52 = vsub.f32 %v13765_v27, %v5457_v62  ;;  %v8371_v0 = vpop.f32.mrb[255].mxu0  ;;  %8522 = vmatmul.mubr.msk.f32.gmra.mrb[252].mxu1 %vm1876_vm2, %v5689_v2 }
 0x8bd   : > { %8524 = vmatprep.mubr.msk.f32.mxu1 %vm9843_vm0, %v15147_v30 }
 0x8be   : > { %v5690_v55 = vmul.f32 %v14223_v52, %v14223_v52 }
 0x8bf   : > { %v5462_v58 = vpop.f32.mrb[0].mxu0 }
 0x8c0   : > { %v14231_v42 = vsub.f32 %v13774_v39, %v5462_v58  ;;  %v8374_v7 = vpop.f32.mrb[1].mxu0  ;;  %8525 = vmatmul.mubr.msk.f32.gmra.mrb[254].mxu1 %vm1876_vm2, %v5690_v55 }
 0x8c1   : > { %8527 = vmatprep.mubr.msk.f32.mxu1 %vm9843_vm0, %v15147_v30 }
 0x8c2   : > { %v5691_v27 = vmul.f32 %v14231_v42, %v14231_v42 }
 0x8c3   : > { %v5467_v46 = vpop.f32.mrb[2].mxu0 }
 0x8c4   : > { %v14239_v45 = vsub.f32 %v13783_v44, %v5467_v46  ;;  %v8377_v4 = vpop.f32.mrb[3].mxu0  ;;  %8528 = vmatmul.mubr.msk.f32.gmra.mrb[0].mxu1 %vm1876_vm2, %v5691_v27 }
 0x8c5   : > { %8530 = vmatprep.mubr.msk.f32.mxu1 %vm9843_vm0, %v15147_v30 }
 0x8c6   : > { %v5692_v39 = vmul.f32 %v14239_v45, %v14239_v45 }
 0x8c7   : > { %v5472_v16 = vpop.f32.mrb[4].mxu0 }
 0x8c8   : > { %v14247_v23 = vsub.f32 %v13792_v32, %v5472_v16  ;;  %v8380_v40 = vpop.f32.mrb[5].mxu0  ;;  %8531 = vmatmul.mubr.msk.f32.gmra.mrb[2].mxu1 %vm1876_vm2, %v5692_v39 }
 0x8c9   : > { %8533 = vmatprep.mubr.msk.f32.mxu1 %vm9843_vm0, %v15147_v30 }
 0x8ca   : > { %v5693_v44 = vmul.f32 %v14247_v23, %v14247_v23 }
 0x8cb   : > { %v5477_v12 = vpop.f32.mrb[6].mxu0 }
 0x8cc   : > { %v14255_v56 = vsub.f32 %v13801_v41, %v5477_v12  ;;  %v8383_v15 = vpop.f32.mrb[7].mxu0  ;;  %8534 = vmatmul.mubr.msk.f32.gmra.mrb[4].mxu1 %vm1876_vm2, %v5693_v44 }
 0x8cd   : > { %8536 = vmatprep.mubr.msk.f32.mxu1 %vm9843_vm0, %v15147_v30 }
 0x8ce   : > { %v5694_v32 = vmul.f32 %v14255_v56, %v14255_v56 }
 0x8cf   : > { %v5482_v63 = vpop.f32.mrb[8].mxu0 }
 0x8d0   : > { %v14263_v25 = vsub.f32 %v13810_v18, %v5482_v63  ;;  %v8386_v6 = vpop.f32.mrb[9].mxu0  ;;  %8537 = vmatmul.mubr.msk.f32.gmra.mrb[6].mxu1 %vm1876_vm2, %v5694_v32 }
 0x8d1   : > { %8539 = vmatprep.mubr.msk.f32.mxu1 %vm9843_vm0, %v15147_v30 }
 0x8d2   : > { %v5695_v41 = vmul.f32 %v14263_v25, %v14263_v25 }
 0x8d3   : > { %v5487_v48 = vpop.f32.mrb[10].mxu0 }
 0x8d4   : > { %v14271_v26 = vsub.f32 %v13819_v14, %v5487_v48  ;;  %v8389_v38 = vpop.f32.mrb[11].mxu0  ;;  %8540 = vmatmul.mubr.msk.f32.gmra.mrb[8].mxu1 %vm1876_vm2, %v5695_v41 }
 0x8d5   : > { %8542 = vmatprep.mubr.msk.f32.mxu1 %vm9843_vm0, %v15147_v30 }
 0x8d6   : > { %v5696_v18 = vmul.f32 %v14271_v26, %v14271_v26 }
 0x8d7   : > { %v5492_v49 = vpop.f32.mrb[12].mxu0 }
 0x8d8   : > { %v14279_v36 = vsub.f32 %v13828_v3, %v5492_v49  ;;  %v8392_v8 = vpop.f32.mrb[13].mxu0  ;;  %8543 = vmatmul.mubr.msk.f32.gmra.mrb[10].mxu1 %vm1876_vm2, %v5696_v18 }
 0x8d9   : > { %8545 = vmatprep.mubr.msk.f32.mxu1 %vm9843_vm0, %v15147_v30 }
 0x8da   : > { %v5697_v14 = vmul.f32 %v14279_v36, %v14279_v36 }
 0x8db   : > { %v5497_v24 = vpop.f32.mrb[14].mxu0 }
 0x8dc   : > { %v14287_v9 = vsub.f32 %v13835_v29, %v5497_v24  ;;  %v8395_v17 = vpop.f32.mrb[15].mxu0  ;;  %8546 = vmatmul.mubr.msk.f32.gmra.mrb[12].mxu1 %vm1876_vm2, %v5697_v14 }
 0x8dd   : > { %8548 = vmatprep.mubr.msk.f32.mxu1 %vm9843_vm0, %v15147_v30 }
 0x8de   : > { %v5698_v3 = vmul.f32 %v14287_v9, %v14287_v9 }
 0x8df   : > { %v5502_v22 = vpop.f32.mrb[16].mxu0 }
 0x8e0   : > { %v14295_v2 = vsub.f32 %v13842_v43, %v5502_v22  ;;  %v8398_v62 = vpop.f32.mrb[17].mxu0  ;;  %8549 = vmatmul.mubr.msk.f32.gmra.mrb[14].mxu1 %vm1876_vm2, %v5698_v3 }
 0x8e1   : > { %8551 = vmatprep.mubr.msk.f32.mxu1 %vm9843_vm0, %v15147_v30 }
 0x8e2   : > { %v5699_v29 = vmul.f32 %v14295_v2, %v14295_v2 }
 0x8e3   : > { %v5507_v0 = vpop.f32.mrb[18].mxu0 }
 0x8e4   : > { %v14303_v55 = vsub.f32 %v13849_v28, %v5507_v0  ;;  %v8401_v58 = vpop.f32.mrb[19].mxu0  ;;  %8552 = vmatmul.mubr.msk.f32.gmra.mrb[16].mxu1 %vm1876_vm2, %v5699_v29 }
 0x8e5   : > { %8554 = vmatprep.mubr.msk.f32.mxu1 %vm9843_vm0, %v15147_v30 }
 0x8e6   : > { %v5700_v43 = vmul.f32 %v14303_v55, %v14303_v55 }
 0x8e7   : > { %v5512_v7 = vpop.f32.mrb[20].mxu0 }
 0x8e8   : > { %v14311_v27 = vsub.f32 %v13856_v11, %v5512_v7  ;;  %v8404_v46 = vpop.f32.mrb[21].mxu0  ;;  %8555 = vmatmul.mubr.msk.f32.gmra.mrb[18].mxu1 %vm1876_vm2, %v5700_v43 }
 0x8e9   : > { %v6463_v28 = vpop.permute.xlu0 %6462  ;;  %v6435_v4 = vpop.permute.xlu1 %6434  ;;  %8557 = vmatprep.mubr.msk.f32.mxu1 %vm9843_vm0, %v15147_v30 }
 0x8ea   : > { %v5701_v39 = vmul.f32 %v14311_v27, %v14311_v27  ;;  %7090 = vst.msk [vmem:[%s11801_s14 + $0x3a4] sm:$0xff] %vm1876_vm2, %v6463_v28  ;;  %7083 = vst.msk [vmem:[%s11801_s14 + $0x373] sm:$0xff] %vm1876_vm2, %v6435_v4  ;;  %v15361_v4 = vld [vmem:[#allocation4_spill] sm:$0xff] }
 0x8eb   : > { %v5517_v16 = vpop.f32.mrb[22].mxu0 }
 0x8ec   : > { %v14323_v11 = vsub.f32 %v13863_v54, %v5517_v16  ;;  %v8407_v40 = vpop.f32.mrb[23].mxu0  ;;  %8558 = vmatmul.mubr.msk.f32.gmra.mrb[20].mxu1 %vm1876_vm2, %v5701_v39 }
 0x8ed   : > { %v6437_v44 = vpop.permute.xlu0 %6436  ;;  %v6491_v12 = vpop.permute.xlu1 %6490  ;;  %8560 = vmatprep.mubr.msk.f32.mxu1 %vm9843_vm0, %v15147_v30 }
 0x8ee   : > { %v5702_v15 = vmul.f32 %v14323_v11, %v14323_v11  ;;  %7084 = vst.msk [vmem:[%s11801_s14 + $0x37b] sm:$0xff] %vm1876_vm2, %v6437_v44  ;;  %7097 = vst.msk [vmem:[%s11801_s14 + $0x3d5] sm:$0xff] %vm1876_vm2, %v6491_v12 }
 0x8ef   : > { %v5522_v32 = vpop.f32.mrb[24].mxu0 }
 0x8f0   : > { %v14335_v54 = vsub.f32 %v13870_v5, %v5522_v32  ;;  %v8410_v63 = vpop.f32.mrb[25].mxu0  ;;  %8561 = vmatmul.mubr.msk.f32.gmra.mrb[22].mxu1 %vm1876_vm2, %v5702_v15  ;;  %v15362_v32 = vld [vmem:[#allocation5_spill] sm:$0xff] }
 0x8f1   : > { %v6493_v6 = vpop.permute.xlu0 %6492  ;;  %v6465_v41 = vpop.permute.xlu1 %6464  ;;  %8563 = vmatprep.mubr.msk.f32.mxu1 %vm9843_vm0, %v15147_v30 }
 0x8f2   : > { %v5703_v48 = vmul.f32 %v14335_v54, %v14335_v54  ;;  %7098 = vst.msk [vmem:[%s11801_s14 + $0x3dd] sm:$0xff] %vm1876_vm2, %v6493_v6  ;;  %7091 = vst.msk [vmem:[%s11801_s14 + $0x3ac] sm:$0xff] %vm1876_vm2, %v6465_v41 }
 0x8f3   : > { %v5527_v38 = vpop.f32.mrb[26].mxu0 }
 0x8f4   : > { %v14347_v5 = vsub.f32 %v13877_v35, %v5527_v38  ;;  %v8413_v18 = vpop.f32.mrb[27].mxu0  ;;  %8564 = vmatmul.mubr.msk.f32.gmra.mrb[24].mxu1 %vm1876_vm2, %v5703_v48 }
 0x8f5   : > { %v6467_v49 = vpop.permute.xlu0 %6466  ;;  %v6439_v8 = vpop.permute.xlu1 %6438  ;;  %8566 = vmatprep.mubr.msk.f32.mxu1 %vm9843_vm0, %v15147_v30 }
 0x8f6   : > { %v5704_v14 = vmul.f32 %v14347_v5, %v14347_v5  ;;  %7092 = vst.msk [vmem:[%s11801_s14 + $0x3b4] sm:$0xff] %vm1876_vm2, %v6467_v49  ;;  %7085 = vst.msk [vmem:[%s11801_s14 + $0x383] sm:$0xff] %vm1876_vm2, %v6439_v8  ;;  %v15363_v49 = vld [vmem:[#allocation6_spill] sm:$0xff] }
 0x8f7   : > { %v5532_v24 = vpop.f32.mrb[28].mxu0 }
 0x8f8   : > { %v14359_v35 = vsub.f32 %v13884_v10, %v5532_v24  ;;  %v8416_v17 = vpop.f32.mrb[29].mxu0  ;;  %8567 = vmatmul.mubr.msk.f32.gmra.mrb[26].mxu1 %vm1876_vm2, %v5704_v14  ;;  %v15360_v10 = vld [vmem:[#allocation3_spill] sm:$0xff] }
 0x8f9   : > { %v6441_v3 = vpop.permute.xlu0 %6440  ;;  %v6495_v22 = vpop.permute.xlu1 %6494  ;;  %8569 = vmatprep.mubr.msk.f32.mxu1 %vm9843_vm0, %v15147_v30 }
 0x8fa   : > { %v5705_v62 = vmul.f32 %v14359_v35, %v14359_v35  ;;  %7086 = vst.msk [vmem:[%s11801_s14 + $0x38b] sm:$0xff] %vm1876_vm2, %v6441_v3  ;;  %7099 = vst.msk [vmem:[%s11801_s14 + $0x3e5] sm:$0xff] %vm1876_vm2, %v6495_v22 }
 0x8fb   : > { %v5537_v29 = vpop.f32.mrb[30].mxu0 }
 0x8fc   : > { %v14371_v0 = vsub.f32 %v15360_v10, %v5537_v29  ;;  %v8419_v58 = vpop.f32.mrb[31].mxu0  ;;  %8570 = vmatmul.mubr.msk.f32.gmra.mrb[28].mxu1 %vm1876_vm2, %v5705_v62  ;;  %v15364_v62 = vld [vmem:[#allocation7_spill] sm:$0xff] }
 0x8fd   : > { %v6497_v43 = vpop.permute.xlu0 %6496  ;;  %v6469_v7 = vpop.permute.xlu1 %6468  ;;  %8572 = vmatprep.mubr.msk.f32.mxu1 %vm9843_vm0, %v15147_v30 }
 0x8fe   : > { %v5706_v46 = vmul.f32 %v14371_v0, %v14371_v0  ;;  %7100 = vst.msk [vmem:[%s11801_s14 + $0x3ed] sm:$0xff] %vm1876_vm2, %v6497_v43  ;;  %7093 = vst.msk [vmem:[%s11801_s14 + $0x3bc] sm:$0xff] %vm1876_vm2, %v6469_v7 }
 0x8ff   : > { %v5542_v28 = vpop.f32.mrb[32].mxu0 }
 0x900   : > { %v14383_v39 = vsub.f32 %v15361_v4, %v5542_v28  ;;  %v8422_v16 = vpop.f32.mrb[33].mxu0  ;;  %8573 = vmatmul.mubr.msk.f32.gmra.mrb[30].mxu1 %vm1876_vm2, %v5706_v46  ;;  %v15365_v28 = vld [vmem:[#allocation8_spill] sm:$0xff] }
 0x901   : > { %v6471_v40 = vpop.permute.xlu0 %6470  ;;  %v6443_v44 = vpop.permute.xlu1 %6442  ;;  %8575 = vmatprep.mubr.msk.f32.mxu1 %vm9843_vm0, %v15147_v30 }
 0x902   : > { %v5707_v12 = vmul.f32 %v14383_v39, %v14383_v39  ;;  %7094 = vst.msk [vmem:[%s11801_s14 + $0x3c4] sm:$0xff] %vm1876_vm2, %v6471_v40  ;;  %7087 = vst.msk [vmem:[%s11801_s14 + $0x393] sm:$0xff] %vm1876_vm2, %v6443_v44 }
 0x903   : > { %v5547_v15 = vpop.f32.mrb[34].mxu0 }
 0x904   : > { %v14395_v63 = vsub.f32 %v15362_v32, %v5547_v15  ;;  %v8425_v6 = vpop.f32.mrb[35].mxu0  ;;  %8576 = vmatmul.mubr.msk.f32.gmra.mrb[32].mxu1 %vm1876_vm2, %v5707_v12  ;;  %v15366_v15 = vld [vmem:[#allocation9_spill] sm:$0xff] }
 0x905   : > { %v6445_v41 = vpop.permute.xlu0 %6444  ;;  %v6499_v48 = vpop.permute.xlu1 %6498  ;;  %8578 = vmatprep.mubr.msk.f32.mxu1 %vm9843_vm0, %v15147_v30 }
 0x906   : > { %v5708_v38 = vmul.f32 %v14395_v63, %v14395_v63  ;;  %7088 = vst.msk [vmem:[%s11801_s14 + $0x39b] sm:$0xff] %vm1876_vm2, %v6445_v41  ;;  %7101 = vst.msk [vmem:[%s11801_s14 + $0x3f5] sm:$0xff] %vm1876_vm2, %v6499_v48 }
 0x907   : > { %v5552_v18 = vpop.f32.mrb[36].mxu0 }
 0x908   : > { %v14407_v8 = vsub.f32 %v15363_v49, %v5552_v18  ;;  %v8428_v14 = vpop.f32.mrb[37].mxu0  ;;  %8579 = vmatmul.mubr.msk.f32.gmra.mrb[34].mxu1 %vm1876_vm2, %v5708_v38  ;;  %v15367_v38 = vld [vmem:[#allocation10_spill] sm:$0xff] }
 0x909   : > { %v6473_v24 = vpop.permute.xlu1 %6472  ;;  %v6475_v17 = vpop.permute.xlu0 %6474  ;;  %8581 = vmatprep.mubr.msk.f32.mxu1 %vm9843_vm0, %v15147_v30 }
 0x90a   : > { %v5709_v3 = vmul.f32 %v14407_v8, %v14407_v8  ;;  %7095 = vst.msk [vmem:[%s11801_s14 + $0x3cc] sm:$0xff] %vm1876_vm2, %v6473_v24 }
 0x90b   : > { %7096 = vst.msk [vmem:[%s11801_s14 + $0x3d4] sm:$0x1] %vm3490_vm3, %v6475_v17  ;;  %v5557_v22 = vpop.f32.mrb[38].mxu0  ;;  %v15368_v17 = vld [vmem:[#allocation11_spill] sm:$0xff] }
 0x90c   : > { %v14419_v29 = vsub.f32 %v15364_v62, %v5557_v22  ;;  %v8431_v10 = vpop.f32.mrb[39].mxu0  ;;  %8582 = vmatmul.mubr.msk.f32.gmra.mrb[36].mxu1 %vm1876_vm2, %v5709_v3 }
 0x90d   : > { %v6501_v58 = vpop.permute.xlu0 %6500  ;;  %v6447_v43 = vpop.permute.xlu1 %6446  ;;  %8584 = vmatprep.mubr.msk.f32.mxu1 %vm9843_vm0, %v15147_v30 }
 0x90e   : > { %v5710_v7 = vmul.f32 %v14419_v29, %v14419_v29  ;;  %7102 = vst.msk [vmem:[%s11801_s14 + $0x3fd] sm:$0xff] %vm1876_vm2, %v6501_v58  ;;  %v15369_v58 = vld [vmem:[#allocation13_spill] sm:$0xff] }
 0x90f   : > { %7089 = vst.msk [vmem:[%s11801_s14 + $0x3a3] sm:$0x1] %vm3490_vm3, %v6447_v43  ;;  %v5562_v46 = vpop.f32.mrb[40].mxu0 }
 0x910   : > { %v14431_v4 = vsub.f32 %v15365_v28, %v5562_v46  ;;  %v8434_v16 = vpop.f32.mrb[41].mxu0  ;;  %8585 = vmatmul.mubr.msk.f32.gmra.mrb[38].mxu1 %vm1876_vm2, %v5710_v7 }
 0x911   : > { %v6503_v40 = vpop.permute.xlu1 %6502  ;;  %8587 = vmatprep.mubr.msk.f32.mxu1 %vm9843_vm0, %v15147_v30  ;;  %v15370_v16 = vld [vmem:[#allocation15_spill] sm:$0xff] }
 0x912   : > { %v5711_v44 = vmul.f32 %v14431_v4, %v14431_v4  ;;  %7103 = vst.msk [vmem:[%s11801_s14 + $0x405] sm:$0x1] %vm3490_vm3, %v6503_v40 }
 0x913   : > { %v5567_v12 = vpop.f32.mrb[42].mxu0 }
 0x914   : > { %v14441_v32 = vsub.f32 %v15366_v15, %v5567_v12  ;;  %v8437_v6 = vpop.f32.mrb[43].mxu0  ;;  %8588 = vmatmul.mubr.msk.f32.gmra.mrb[40].mxu1 %vm1876_vm2, %v5711_v44 }
 0x915   : > { %8590 = vmatprep.mubr.msk.f32.mxu1 %vm9843_vm0, %v15147_v30  ;;  %v15371_v6 = vld [vmem:[#allocation17_spill] sm:$0xff] }
 0x916   : > { %v5712_v41 = vmul.f32 %v14441_v32, %v14441_v32 }
 0x917   : > { %v5572_v48 = vpop.f32.mrb[44].mxu0 }
 0x918   : > { %v14449_v18 = vsub.f32 %v15367_v38, %v5572_v48  ;;  %v8440_v49 = vpop.f32.mrb[45].mxu0  ;;  %8591 = vmatmul.mubr.msk.f32.gmra.mrb[42].mxu1 %vm1876_vm2, %v5712_v41 }
 0x919   : > { %8593 = vmatprep.mubr.msk.f32.mxu1 %vm9843_vm0, %v15147_v30 }
 0x91a   : > { %v5713_v14 = vmul.f32 %v14449_v18, %v14449_v18 }
 0x91b   : > { %v5577_v24 = vpop.f32.mrb[46].mxu0 }
 0x91c   : > { %v14457_v3 = vsub.f32 %v15368_v17, %v5577_v24  ;;  %v8443_v22 = vpop.f32.mrb[47].mxu0  ;;  %8594 = vmatmul.mubr.msk.f32.gmra.mrb[44].mxu1 %vm1876_vm2, %v5713_v14  ;;  %v15372_v14 = vld [vmem:[#allocation19_spill] sm:$0xff] }
 0x91d   : > { %8596 = vmatprep.mubr.msk.f32.mxu1 %vm9843_vm0, %v15147_v30 }
 0x91e   : > { %v5714_v62 = vmul.f32 %v14457_v3, %v14457_v3 }
 0x91f   : > { %v5582_v10 = vpop.f32.mrb[48].mxu0 }
 0x920   : > { %v14465_v43 = vsub.f32 %v15369_v58, %v5582_v10  ;;  %v8446_v7 = vpop.f32.mrb[49].mxu0  ;;  %8597 = vmatmul.mubr.msk.f32.gmra.mrb[46].mxu1 %vm1876_vm2, %v5714_v62  ;;  %v15373_v10 = vld [vmem:[#allocation21_spill] sm:$0xff] }
 0x921   : > { %8599 = vmatprep.mubr.msk.f32.mxu1 %vm9843_vm0, %v15147_v30 }
 0x922   : > { %v5715_v46 = vmul.f32 %v14465_v43, %v14465_v43 }
 0x923   : > { %v5587_v28 = vpop.f32.mrb[50].mxu0 }
 0x924   : > { %v14473_v40 = vsub.f32 %v15370_v16, %v5587_v28  ;;  %v8449_v44 = vpop.f32.mrb[51].mxu0  ;;  %8600 = vmatmul.mubr.msk.f32.gmra.mrb[48].mxu1 %vm1876_vm2, %v5715_v46  ;;  %v15374_v16 = vld [vmem:[#allocation23_spill] sm:$0xff] }
 0x925   : > { %8602 = vmatprep.mubr.msk.f32.mxu1 %vm9843_vm0, %v15147_v30 }
 0x926   : > { %v5716_v12 = vmul.f32 %v14473_v40, %v14473_v40 }
 0x927   : > { %v5592_v15 = vpop.f32.mrb[52].mxu0 }
 0x928   : > { %v14481_v41 = vsub.f32 %v15371_v6, %v5592_v15  ;;  %v8452_v48 = vpop.f32.mrb[53].mxu0  ;;  %8603 = vmatmul.mubr.msk.f32.gmra.mrb[50].mxu1 %vm1876_vm2, %v5716_v12 }
 0x929   : > { %8605 = vmatprep.mubr.msk.f32.mxu1 %vm9843_vm0, %v15147_v30  ;;  %v15375_v48 = vld [vmem:[#allocation24_spill] sm:$0xff] }
 0x92a   : > { %v5717_v38 = vmul.f32 %v14481_v41, %v14481_v41 }
 0x92b   : > { %v5597_v49 = vpop.f32.mrb[54].mxu0 }
 0x92c   : > { %v14489_v24 = vsub.f32 %v15372_v14, %v5597_v49  ;;  %v8455_v17 = vpop.f32.mrb[55].mxu0  ;;  %8606 = vmatmul.mubr.msk.f32.gmra.mrb[52].mxu1 %vm1876_vm2, %v5717_v38 }
 0x92d   : > { %8608 = vmatprep.mubr.msk.f32.mxu1 %vm9843_vm0, %v15147_v30 }
 0x92e   : > { %v5718_v22 = vmul.f32 %v14489_v24, %v14489_v24 }
 0x92f   : > { %v5602_v62 = vpop.f32.mrb[56].mxu0 }
 0x930   : > { %v14497_v58 = vsub.f32 %v15373_v10, %v5602_v62  ;;  %v8458_v7 = vpop.f32.mrb[57].mxu0  ;;  %8609 = vmatmul.mubr.msk.f32.gmra.mrb[54].mxu1 %vm1876_vm2, %v5718_v22  ;;  %v15376_v22 = vld [vmem:[#allocation26_spill] sm:$0xff] }
 0x931   : > { %8611 = vmatprep.mubr.msk.f32.mxu1 %vm9843_vm0, %v15147_v30 }
 0x932   : > { %v5719_v46 = vmul.f32 %v14497_v58, %v14497_v58 }
 0x933   : > { %v5607_v28 = vpop.f32.mrb[58].mxu0 }
 0x934   : > { %v14505_v44 = vsub.f32 %v15374_v16, %v5607_v28  ;;  %v8461_v12 = vpop.f32.mrb[59].mxu0  ;;  %8612 = vmatmul.mubr.msk.f32.gmra.mrb[56].mxu1 %vm1876_vm2, %v5719_v46  ;;  %v15378_v28 = vld [vmem:[#allocation28_spill] sm:$0xff] }
 0x935   : > { %8614 = vmatprep.mubr.msk.f32.mxu1 %vm9843_vm0, %v15147_v30 }
 0x936   : > { %v5720_v15 = vmul.f32 %v14505_v44, %v14505_v44 }
 0x937   : > { %v5612_v6 = vpop.f32.mrb[60].mxu0 }
 0x938   : > { %v14513_v38 = vsub.f32 %v15375_v48, %v5612_v6  ;;  %v8464_v49 = vpop.f32.mrb[61].mxu0  ;;  %8615 = vmatmul.mubr.msk.f32.gmra.mrb[58].mxu1 %vm1876_vm2, %v5720_v15 }
 0x939   : > { %8617 = vmatprep.mubr.msk.f32.mxu1 %vm9843_vm0, %v15147_v30 }
 0x93a   : > { %v5721_v14 = vmul.f32 %v14513_v38, %v14513_v38 }
 0x93b   : > { %v5617_v17 = vpop.f32.mrb[62].mxu0 }
 0x93c   : > { %v14521_v62 = vsub.f32 %v15376_v22, %v5617_v17  ;;  %v8467_v10 = vpop.f32.mrb[63].mxu0  ;;  %8618 = vmatmul.mubr.msk.f32.gmra.mrb[60].mxu1 %vm1876_vm2, %v5721_v14 }
 0x93d   : > { %8620 = vmatprep.mubr.msk.f32.mxu1 %vm9843_vm0, %v15147_v30 }
 0x93e   : > { %15377 = vst [vmem:[#allocation30_spill] sm:$0xff] %v14521_v62  ;;  %v5722_v7 = vmul.f32 %v14521_v62, %v14521_v62 }
 0x93f   : > { %v5622_v46 = vpop.f32.mrb[64].mxu0 }
 0x940   : > { %v14529_v16 = vsub.f32 %v15378_v28, %v5622_v46  ;;  %v8470_v12 = vpop.f32.mrb[65].mxu0  ;;  %8621 = vmatmul.mubr.msk.f32.gmra.mrb[62].mxu1 %vm1876_vm2, %v5722_v7 }
 0x941   : > { %8623 = vmatprep.mubr.msk.f32.mxu1 %vm9843_vm0, %v15147_v30 }
 0x942   : > { %15379 = vst [vmem:[#allocation32_spill] sm:$0xff] %v14529_v16  ;;  %v5723_v15 = vmul.f32 %v14529_v16, %v14529_v16 }
 0x944   : > { %8624 = vmatmul.mubr.msk.f32.gmra.mrb[64].mxu1 %vm1876_vm2, %v5723_v15 }
 0x957   : > { %v5937_v6 = vpop.f32.mrb[224].mxu1 }
 0x958   : > { %v5938_v48 = vadd.f32 1e-05, %v5937_v6  ;;  %v8481_v49 = vpop.f32.mrb[225].mxu1 }
 0x95a   : > { %9718 = vrsqrt.f32 %v5938_v48 }
 0x95b   : > { %v5942_v14 = vpop.f32.mrb[226].mxu1 }
 0x95c   : > { %v5943_v17 = vadd.f32 1e-05, %v5942_v14  ;;  %v8484_v22 = vpop.f32.mrb[227].mxu1 }
 0x95e   : > { %9720 = vrsqrt.f32 %v5943_v17 }
 0x95f   : > { %v5947_v10 = vpop.f32.mrb[228].mxu1 }
 0x960   : > { %v5948_v46 = vadd.f32 1e-05, %v5947_v10  ;;  %v8487_v28 = vpop.f32.mrb[229].mxu1 }
 0x962   : > { %9722 = vrsqrt.f32 %v5948_v46 }
 0x963   : > { %v5952_v7 = vpop.f32.mrb[230].mxu1 }
 0x964   : > { %v9719_v30 = vpop.eup %9718  ;;  %v5953_v12 = vadd.f32 1e-05, %v5952_v7  ;;  %v8490_v62 = vpop.f32.mrb[231].mxu1 }
 0x965   : > { %v6230_v16 = vmul.f32 %v9719_v30, %v14055_v51 }
 0x966   : > { %9724 = vrsqrt.f32 %v5953_v12 }
 0x967   : > { %v6279_v15 = vmul.f32 %v6230_v16, %v11789_v59  ;;  %v5957_v6 = vpop.f32.mrb[232].mxu1 }
 0x968   : > { %v9721_v48 = vpop.eup %9720  ;;  %v5958_v49 = vadd.f32 1e-05, %v5957_v6  ;;  %v8493_v14 = vpop.f32.mrb[233].mxu1 }
 0x969   : > { %v6328_v17 = vadd.f32 %v6279_v15, %v11794_v53  ;;  %v6231_v22 = vmul.f32 %v9721_v48, %v14072_v60 }
 0x96a   : > { %9726 = vrsqrt.f32 %v5958_v49 }
 0x96b   : > { %7111 = vst.msk [vmem:[%s11801_s14 + $0x437] sm:$0xff] %vm1876_vm2, %v6328_v17  ;;  %v6280_v10 = vmul.f32 %v6231_v22, %v11789_v59  ;;  %v5962_v62 = vpop.f32.mrb[234].mxu1 }
 0x96c   : > { %v9723_v51 = vpop.eup %9722  ;;  %v5963_v46 = vadd.f32 1e-05, %v5962_v62  ;;  %v8496_v28 = vpop.f32.mrb[235].mxu1 }
 0x96d   : > { %v6329_v16 = vadd.f32 %v6280_v10, %v11794_v53  ;;  %v6232_v7 = vmul.f32 %v9723_v51, %v14092_v50 }
 0x96e   : > { %9728 = vrsqrt.f32 %v5963_v46 }
 0x96f   : > { %7112 = vst.msk [vmem:[%s11801_s14 + $0x43f] sm:$0xff] %vm1876_vm2, %v6329_v16  ;;  %v6281_v30 = vmul.f32 %v6232_v7, %v11789_v59  ;;  %v5967_v60 = vpop.f32.mrb[236].mxu1 }
 0x970   : > { %v9725_v12 = vpop.eup %9724  ;;  %v5968_v15 = vadd.f32 1e-05, %v5967_v60  ;;  %v8499_v6 = vpop.f32.mrb[237].mxu1 }
 0x971   : > { %v6330_v48 = vadd.f32 %v6281_v30, %v11794_v53  ;;  %v6233_v49 = vmul.f32 %v9725_v12, %v14112_v34 }
 0x972   : > { %9730 = vrsqrt.f32 %v5968_v15 }
 0x973   : > { %7113 = vst.msk [vmem:[%s11801_s14 + $0x447] sm:$0xff] %vm1876_vm2, %v6330_v48  ;;  %v6282_v14 = vmul.f32 %v6233_v49, %v11789_v59  ;;  %v5972_v50 = vpop.f32.mrb[238].mxu1 }
 0x974   : > { %v9727_v17 = vpop.eup %9726  ;;  %v5973_v22 = vadd.f32 1e-05, %v5972_v50  ;;  %v8502_v10 = vpop.f32.mrb[239].mxu1 }
 0x975   : > { %v6331_v62 = vadd.f32 %v6282_v14, %v11794_v53  ;;  %v6234_v51 = vmul.f32 %v9727_v17, %v14128_v20 }
 0x976   : > { %9732 = vrsqrt.f32 %v5973_v22 }
 0x977   : > { %7114 = vst.msk [vmem:[%s11801_s14 + $0x44f] sm:$0xff] %vm1876_vm2, %v6331_v62  ;;  %v6283_v46 = vmul.f32 %v6234_v51, %v11789_v59  ;;  %v5977_v34 = vpop.f32.mrb[240].mxu1 }
 0x978   : > { %v9729_v28 = vpop.eup %9728  ;;  %v5978_v16 = vadd.f32 1e-05, %v5977_v34  ;;  %v8505_v7 = vpop.f32.mrb[241].mxu1 }
 0x979   : > { %v6332_v30 = vadd.f32 %v6283_v46, %v11794_v53  ;;  %v6235_v60 = vmul.f32 %v9729_v28, %v14138_v57 }
 0x97a   : > { %9734 = vrsqrt.f32 %v5978_v16 }
 0x97b   : > { %7115 = vst.msk [vmem:[%s11801_s14 + $0x457] sm:$0xff] %vm1876_vm2, %v6332_v30  ;;  %v6284_v12 = vmul.f32 %v6235_v60, %v11789_v59  ;;  %v5982_v20 = vpop.f32.mrb[242].mxu1 }
 0x97c   : > { %v9731_v15 = vpop.eup %9730  ;;  %v5983_v6 = vadd.f32 1e-05, %v5982_v20  ;;  %v8508_v48 = vpop.f32.mrb[243].mxu1 }
 0x97d   : > { %v6333_v49 = vadd.f32 %v6284_v12, %v11794_v53  ;;  %v6236_v14 = vmul.f32 %v9731_v15, %v14148_v37 }
 0x97e   : > { %9736 = vrsqrt.f32 %v5983_v6 }
 0x97f   : > { %7116 = vst.msk [vmem:[%s11801_s14 + $0x45f] sm:$0xff] %vm1876_vm2, %v6333_v49  ;;  %v6285_v50 = vmul.f32 %v6236_v14, %v11789_v59  ;;  %v5987_v57 = vpop.f32.mrb[244].mxu1 }
 0x980   : > { %v9733_v17 = vpop.eup %9732  ;;  %v5988_v22 = vadd.f32 1e-05, %v5987_v57  ;;  %v8511_v10 = vpop.f32.mrb[245].mxu1 }
 0x981   : > { %v6334_v62 = vadd.f32 %v6285_v50, %v11794_v53  ;;  %v6237_v51 = vmul.f32 %v9733_v17, %v14158_v31 }
 0x982   : > { %9738 = vrsqrt.f32 %v5988_v22 }
 0x983   : > { %7117 = vst.msk [vmem:[%s11801_s14 + $0x467] sm:$0xff] %vm1876_vm2, %v6334_v62  ;;  %v6286_v46 = vmul.f32 %v6237_v51, %v11789_v59  ;;  %v5992_v37 = vpop.f32.mrb[246].mxu1 }
 0x984   : > { %v9735_v34 = vpop.eup %9734  ;;  %v5993_v28 = vadd.f32 1e-05, %v5992_v37  ;;  %v8514_v16 = vpop.f32.mrb[247].mxu1 }
 0x985   : > { %v6335_v7 = vadd.f32 %v6286_v46, %v11794_v53  ;;  %v6238_v30 = vmul.f32 %v9735_v34, %v14167_v19 }
 0x986   : > { %9740 = vrsqrt.f32 %v5993_v28 }
 0x987   : > { %7118 = vst.msk [vmem:[%s11801_s14 + $0x46f] sm:$0xff] %vm1876_vm2, %v6335_v7  ;;  %v6287_v60 = vmul.f32 %v6238_v30, %v11789_v59  ;;  %v5997_v31 = vpop.f32.mrb[248].mxu1 }
 0x988   : > { %v9737_v12 = vpop.eup %9736  ;;  %v5998_v20 = vadd.f32 1e-05, %v5997_v31  ;;  %v8517_v15 = vpop.f32.mrb[249].mxu1 }
 0x989   : > { %v6336_v6 = vadd.f32 %v6287_v60, %v11794_v53  ;;  %v6239_v48 = vmul.f32 %v9737_v12, %v14175_v47 }
 0x98a   : > { %9742 = vrsqrt.f32 %v5998_v20 }
 0x98b   : > { %7119 = vst.msk [vmem:[%s11801_s14 + $0x477] sm:$0xff] %vm1876_vm2, %v6336_v6  ;;  %v6288_v49 = vmul.f32 %v6239_v48, %v11789_v59  ;;  %v6002_v19 = vpop.f32.mrb[250].mxu1 }
 0x98c   : > { %v9739_v14 = vpop.eup %9738  ;;  %v6003_v50 = vadd.f32 1e-05, %v6002_v19  ;;  %v8520_v57 = vpop.f32.mrb[251].mxu1 }
 0x98d   : > { %v6337_v17 = vadd.f32 %v6288_v49, %v11794_v53  ;;  %v6240_v22 = vmul.f32 %v9739_v14, %v14183_v61 }
 0x98e   : > { %9744 = vrsqrt.f32 %v6003_v50 }
 0x98f   : > { %7120 = vst.msk [vmem:[%s11801_s14 + $0x47f] sm:$0xff] %vm1876_vm2, %v6337_v17  ;;  %v6289_v10 = vmul.f32 %v6240_v22, %v11789_v59  ;;  %v6007_v47 = vpop.f32.mrb[252].mxu1 }
 0x990   : > { %v9741_v62 = vpop.eup %9740  ;;  %v6008_v51 = vadd.f32 1e-05, %v6007_v47  ;;  %v8523_v46 = vpop.f32.mrb[253].mxu1 }
 0x991   : > { %v6338_v37 = vadd.f32 %v6289_v10, %v11794_v53  ;;  %v6241_v34 = vmul.f32 %v9741_v62, %v14191_v13 }
 0x992   : > { %9746 = vrsqrt.f32 %v6008_v51 }
 0x993   : > { %7121 = vst.msk [vmem:[%s11801_s14 + $0x487] sm:$0xff] %vm1876_vm2, %v6338_v37  ;;  %v6290_v28 = vmul.f32 %v6241_v34, %v11789_v59  ;;  %v6012_v61 = vpop.f32.mrb[254].mxu1 }
 0x994   : > { %v9743_v16 = vpop.eup %9742  ;;  %v6013_v7 = vadd.f32 1e-05, %v6012_v61  ;;  %v8526_v30 = vpop.f32.mrb[255].mxu1 }
 0x995   : > { %v6339_v60 = vadd.f32 %v6290_v28, %v11794_v53  ;;  %v6242_v31 = vmul.f32 %v9743_v16, %v14199_v1 }
 0x996   : > { %9748 = vrsqrt.f32 %v6013_v7 }
 0x997   : > { %7122 = vst.msk [vmem:[%s11801_s14 + $0x48f] sm:$0xff] %vm1876_vm2, %v6339_v60  ;;  %v6291_v12 = vmul.f32 %v6242_v31, %v11789_v59  ;;  %v6017_v13 = vpop.f32.mrb[0].mxu1 }
 0x998   : > { %v9745_v20 = vpop.eup %9744  ;;  %v6018_v15 = vadd.f32 1e-05, %v6017_v13  ;;  %v8529_v6 = vpop.f32.mrb[1].mxu1 }
 0x999   : > { %v6340_v48 = vadd.f32 %v6291_v12, %v11794_v53  ;;  %v6243_v49 = vmul.f32 %v9745_v20, %v14207_v33 }
 0x99a   : > { %9750 = vrsqrt.f32 %v6018_v15 }
 0x99b   : > { %7123 = vst.msk [vmem:[%s11801_s14 + $0x497] sm:$0xff] %vm1876_vm2, %v6340_v48  ;;  %v6292_v19 = vmul.f32 %v6243_v49, %v11789_v59  ;;  %v6022_v1 = vpop.f32.mrb[2].mxu1 }
 0x99c   : > { %v9747_v14 = vpop.eup %9746  ;;  %v6023_v50 = vadd.f32 1e-05, %v6022_v1  ;;  %v8532_v57 = vpop.f32.mrb[3].mxu1 }
 0x99d   : > { %v6341_v17 = vadd.f32 %v6292_v19, %v11794_v53  ;;  %v6244_v22 = vmul.f32 %v9747_v14, %v14215_v21 }
 0x99e   : > { %9752 = vrsqrt.f32 %v6023_v50 }
 0x99f   : > { %7124 = vst.msk [vmem:[%s11801_s14 + $0x49f] sm:$0xff] %vm1876_vm2, %v6341_v17  ;;  %v6293_v10 = vmul.f32 %v6244_v22, %v11789_v59  ;;  %v6027_v33 = vpop.f32.mrb[4].mxu1 }
 0x9a0   : > { %v9749_v47 = vpop.eup %9748  ;;  %v6028_v62 = vadd.f32 1e-05, %v6027_v33  ;;  %v8535_v51 = vpop.f32.mrb[5].mxu1 }
 0x9a1   : > { %v6342_v46 = vadd.f32 %v6293_v10, %v11794_v53  ;;  %v6245_v37 = vmul.f32 %v9749_v47, %v14223_v52 }
 0x9a2   : > { %9754 = vrsqrt.f32 %v6028_v62 }
 0x9a3   : > { %7125 = vst.msk [vmem:[%s11801_s14 + $0x4a7] sm:$0xff] %vm1876_vm2, %v6342_v46  ;;  %v6294_v34 = vmul.f32 %v6245_v37, %v11789_v59  ;;  %v6032_v21 = vpop.f32.mrb[6].mxu1 }
 0x9a4   : > { %v9751_v28 = vpop.eup %9750  ;;  %v6033_v61 = vadd.f32 1e-05, %v6032_v21  ;;  %v8538_v16 = vpop.f32.mrb[7].mxu1 }
 0x9a5   : > { %v6343_v7 = vadd.f32 %v6294_v34, %v11794_v53  ;;  %v6246_v30 = vmul.f32 %v9751_v28, %v14231_v42 }
 0x9a6   : > { %9756 = vrsqrt.f32 %v6033_v61 }
 0x9a7   : > { %7126 = vst.msk [vmem:[%s11801_s14 + $0x4af] sm:$0xff] %vm1876_vm2, %v6343_v7  ;;  %v6295_v60 = vmul.f32 %v6246_v30, %v11789_v59  ;;  %v6037_v52 = vpop.f32.mrb[8].mxu1 }
 0x9a8   : > { %v9753_v31 = vpop.eup %9752  ;;  %v6038_v12 = vadd.f32 1e-05, %v6037_v52  ;;  %v8541_v13 = vpop.f32.mrb[9].mxu1 }
 0x9a9   : > { %v6344_v20 = vadd.f32 %v6295_v60, %v11794_v53  ;;  %v6247_v15 = vmul.f32 %v9753_v31, %v14239_v45 }
 0x9aa   : > { %9758 = vrsqrt.f32 %v6038_v12 }
 0x9ab   : > { %7127 = vst.msk [vmem:[%s11801_s14 + $0x4b7] sm:$0xff] %vm1876_vm2, %v6344_v20  ;;  %v6296_v6 = vmul.f32 %v6247_v15, %v11789_v59  ;;  %v6042_v42 = vpop.f32.mrb[10].mxu1 }
 0x9ac   : > { %v9755_v48 = vpop.eup %9754  ;;  %v6043_v49 = vadd.f32 1e-05, %v6042_v42  ;;  %v8544_v19 = vpop.f32.mrb[11].mxu1 }
 0x9ad   : > { %v6345_v1 = vadd.f32 %v6296_v6, %v11794_v53  ;;  %v6248_v14 = vmul.f32 %v9755_v48, %v14247_v23 }
 0x9ae   : > { %9760 = vrsqrt.f32 %v6043_v49 }
 0x9af   : > { %7128 = vst.msk [vmem:[%s11801_s14 + $0x4bf] sm:$0xff] %vm1876_vm2, %v6345_v1  ;;  %v6297_v50 = vmul.f32 %v6248_v14, %v11789_v59  ;;  %v6047_v45 = vpop.f32.mrb[12].mxu1 }
 0x9b0   : > { %v9757_v57 = vpop.eup %9756  ;;  %v6048_v17 = vadd.f32 1e-05, %v6047_v45  ;;  %v8547_v22 = vpop.f32.mrb[13].mxu1 }
 0x9b1   : > { %v6346_v10 = vadd.f32 %v6297_v50, %v11794_v53  ;;  %v6249_v33 = vmul.f32 %v9757_v57, %v14255_v56 }
 0x9b2   : > { %9762 = vrsqrt.f32 %v6048_v17 }
 0x9b3   : > { %7129 = vst.msk [vmem:[%s11801_s14 + $0x4c7] sm:$0xff] %vm1876_vm2, %v6346_v10  ;;  %v6298_v47 = vmul.f32 %v6249_v33, %v11789_v59  ;;  %v6052_v23 = vpop.f32.mrb[14].mxu1 }
 0x9b4   : > { %v9759_v62 = vpop.eup %9758  ;;  %v6053_v51 = vadd.f32 1e-05, %v6052_v23  ;;  %v8550_v46 = vpop.f32.mrb[15].mxu1 }
 0x9b5   : > { %v6347_v37 = vadd.f32 %v6298_v47, %v11794_v53  ;;  %v6250_v34 = vmul.f32 %v9759_v62, %v14263_v25 }
 0x9b6   : > { %9764 = vrsqrt.f32 %v6053_v51 }
 0x9b7   : > { %7130 = vst.msk [vmem:[%s11801_s14 + $0x4cf] sm:$0xff] %vm1876_vm2, %v6347_v37  ;;  %v6299_v21 = vmul.f32 %v6250_v34, %v11789_v59  ;;  %v6057_v56 = vpop.f32.mrb[16].mxu1 }
 0x9b8   : > { %v9761_v28 = vpop.eup %9760  ;;  %v6058_v61 = vadd.f32 1e-05, %v6057_v56  ;;  %v8553_v16 = vpop.f32.mrb[17].mxu1 }
 0x9b9   : > { %v6348_v7 = vadd.f32 %v6299_v21, %v11794_v53  ;;  %v6251_v30 = vmul.f32 %v9761_v28, %v14271_v26 }
 0x9ba   : > { %9766 = vrsqrt.f32 %v6058_v61 }
 0x9bb   : > { %7131 = vst.msk [vmem:[%s11801_s14 + $0x4d7] sm:$0xff] %vm1876_vm2, %v6348_v7  ;;  %v6300_v60 = vmul.f32 %v6251_v30, %v11789_v59  ;;  %v6062_v25 = vpop.f32.mrb[18].mxu1 }
 0x9bc   : > { %v9763_v52 = vpop.eup %9762  ;;  %v6063_v31 = vadd.f32 1e-05, %v6062_v25  ;;  %v8556_v12 = vpop.f32.mrb[19].mxu1 }
 0x9bd   : > { %v6349_v13 = vadd.f32 %v6300_v60, %v11794_v53  ;;  %v6252_v20 = vmul.f32 %v9763_v52, %v14279_v36 }
 0x9be   : > { %9768 = vrsqrt.f32 %v6063_v31 }
 0x9bf   : > { %7132 = vst.msk [vmem:[%s11801_s14 + $0x4df] sm:$0xff] %vm1876_vm2, %v6349_v13  ;;  %v6301_v15 = vmul.f32 %v6252_v20, %v11789_v59  ;;  %v6067_v26 = vpop.f32.mrb[20].mxu1 }
 0x9c0   : > { %v9765_v6 = vpop.eup %9764  ;;  %v6068_v42 = vadd.f32 1e-05, %v6067_v26  ;;  %v8559_v48 = vpop.f32.mrb[21].mxu1 }
 0x9c1   : > { %v6350_v49 = vadd.f32 %v6301_v15, %v11794_v53  ;;  %v6253_v19 = vmul.f32 %v9765_v6, %v14287_v9 }
 0x9c2   : > { %9770 = vrsqrt.f32 %v6068_v42 }
 0x9c3   : > { %7133 = vst.msk [vmem:[%s11801_s14 + $0x4e7] sm:$0xff] %vm1876_vm2, %v6350_v49  ;;  %v6302_v1 = vmul.f32 %v6253_v19, %v11789_v59  ;;  %v6072_v36 = vpop.f32.mrb[22].mxu1 }
 0x9c4   : > { %v9767_v14 = vpop.eup %9766  ;;  %v6073_v50 = vadd.f32 1e-05, %v6072_v36  ;;  %v8562_v45 = vpop.f32.mrb[23].mxu1 }
 0x9c5   : > { %v6351_v57 = vadd.f32 %v6302_v1, %v11794_v53  ;;  %v6254_v17 = vmul.f32 %v9767_v14, %v14295_v2 }
 0x9c6   : > { %9772 = vrsqrt.f32 %v6073_v50 }
 0x9c7   : > { %7134 = vst.msk [vmem:[%s11801_s14 + $0x4ef] sm:$0xff] %vm1876_vm2, %v6351_v57  ;;  %v6303_v22 = vmul.f32 %v6254_v17, %v11789_v59  ;;  %v6077_v9 = vpop.f32.mrb[24].mxu1 }
 0x9c8   : > { %v9769_v10 = vpop.eup %9768  ;;  %v6078_v33 = vadd.f32 1e-05, %v6077_v9  ;;  %v8565_v47 = vpop.f32.mrb[25].mxu1 }
 0x9c9   : > { %v6352_v23 = vadd.f32 %v6303_v22, %v11794_v53  ;;  %v6255_v62 = vmul.f32 %v9769_v10, %v14303_v55 }
 0x9ca   : > { %9774 = vrsqrt.f32 %v6078_v33 }
 0x9cb   : > { %7135 = vst.msk [vmem:[%s11801_s14 + $0x4f7] sm:$0xff] %vm1876_vm2, %v6352_v23  ;;  %v6304_v51 = vmul.f32 %v6255_v62, %v11789_v59  ;;  %v6082_v2 = vpop.f32.mrb[26].mxu1 }
 0x9cc   : > { %v9771_v46 = vpop.eup %9770  ;;  %v6083_v37 = vadd.f32 1e-05, %v6082_v2  ;;  %v8568_v34 = vpop.f32.mrb[27].mxu1 }
 0x9cd   : > { %v6353_v21 = vadd.f32 %v6304_v51, %v11794_v53  ;;  %v6256_v56 = vmul.f32 %v9771_v46, %v14311_v27 }
 0x9ce   : > { %9776 = vrsqrt.f32 %v6083_v37 }
 0x9cf   : > { %7136 = vst.msk [vmem:[%s11801_s14 + $0x4ff] sm:$0xff] %vm1876_vm2, %v6353_v21  ;;  %v6305_v28 = vmul.f32 %v6256_v56, %v11789_v59  ;;  %v6087_v55 = vpop.f32.mrb[28].mxu1 }
 0x9d0   : > { %v9773_v61 = vpop.eup %9772  ;;  %v6088_v16 = vadd.f32 1e-05, %v6087_v55  ;;  %v8571_v7 = vpop.f32.mrb[29].mxu1 }
 0x9d1   : > { %v6354_v30 = vadd.f32 %v6305_v28, %v11794_v53  ;;  %v6257_v60 = vmul.f32 %v9773_v61, %v14323_v11 }
 0x9d2   : > { %9778 = vrsqrt.f32 %v6088_v16 }
 0x9d3   : > { %7137 = vst.msk [vmem:[%s11801_s14 + $0x507] sm:$0xff] %vm1876_vm2, %v6354_v30  ;;  %v6306_v25 = vmul.f32 %v6257_v60, %v11789_v59  ;;  %v6092_v27 = vpop.f32.mrb[30].mxu1 }
 0x9d4   : > { %v9775_v52 = vpop.eup %9774  ;;  %v6093_v31 = vadd.f32 1e-05, %v6092_v27  ;;  %v8574_v12 = vpop.f32.mrb[31].mxu1 }
 0x9d5   : > { %v6355_v13 = vadd.f32 %v6306_v25, %v11794_v53  ;;  %v6258_v20 = vmul.f32 %v9775_v52, %v14335_v54 }
 0x9d6   : > { %9780 = vrsqrt.f32 %v6093_v31 }
 0x9d7   : > { %7138 = vst.msk [vmem:[%s11801_s14 + $0x50f] sm:$0xff] %vm1876_vm2, %v6355_v13  ;;  %v6307_v15 = vmul.f32 %v6258_v20, %v11789_v59  ;;  %v6097_v11 = vpop.f32.mrb[32].mxu1 }
 0x9d8   : > { %v9777_v26 = vpop.eup %9776  ;;  %v6098_v6 = vadd.f32 1e-05, %v6097_v11  ;;  %v8577_v42 = vpop.f32.mrb[33].mxu1 }
 0x9d9   : > { %v6356_v48 = vadd.f32 %v6307_v15, %v11794_v53  ;;  %v6259_v49 = vmul.f32 %v9777_v26, %v14347_v5 }
 0x9da   : > { %9782 = vrsqrt.f32 %v6098_v6 }
 0x9db   : > { %7139 = vst.msk [vmem:[%s11801_s14 + $0x517] sm:$0xff] %vm1876_vm2, %v6356_v48  ;;  %v6308_v19 = vmul.f32 %v6259_v49, %v11789_v59  ;;  %v6102_v54 = vpop.f32.mrb[34].mxu1 }
 0x9dc   : > { %v9779_v1 = vpop.eup %9778  ;;  %v6103_v36 = vadd.f32 1e-05, %v6102_v54  ;;  %v8580_v14 = vpop.f32.mrb[35].mxu1 }
 0x9dd   : > { %v6357_v50 = vadd.f32 %v6308_v19, %v11794_v53  ;;  %v6260_v45 = vmul.f32 %v9779_v1, %v14359_v35 }
 0x9de   : > { %9784 = vrsqrt.f32 %v6103_v36 }
 0x9df   : > { %7140 = vst.msk [vmem:[%s11801_s14 + $0x51f] sm:$0xff] %vm1876_vm2, %v6357_v50  ;;  %v6309_v57 = vmul.f32 %v6260_v45, %v11789_v59  ;;  %v6107_v5 = vpop.f32.mrb[36].mxu1 }
 0x9e0   : > { %v9781_v17 = vpop.eup %9780  ;;  %v6108_v22 = vadd.f32 1e-05, %v6107_v5  ;;  %v8583_v9 = vpop.f32.mrb[37].mxu1 }
 0x9e1   : > { %v6358_v10 = vadd.f32 %v6309_v57, %v11794_v53  ;;  %v6261_v33 = vmul.f32 %v9781_v17, %v14371_v0 }
 0x9e2   : > { %9786 = vrsqrt.f32 %v6108_v22 }
 0x9e3   : > { %7141 = vst.msk [vmem:[%s11801_s14 + $0x527] sm:$0xff] %vm1876_vm2, %v6358_v10  ;;  %v6310_v47 = vmul.f32 %v6261_v33, %v11789_v59  ;;  %v6112_v35 = vpop.f32.mrb[38].mxu1 }
 0x9e4   : > { %v9783_v23 = vpop.eup %9782  ;;  %v6113_v62 = vadd.f32 1e-05, %v6112_v35  ;;  %v8586_v51 = vpop.f32.mrb[39].mxu1 }
 0x9e5   : > { %v6359_v2 = vadd.f32 %v6310_v47, %v11794_v53  ;;  %v6262_v46 = vmul.f32 %v9783_v23, %v14383_v39 }
 0x9e6   : > { %9788 = vrsqrt.f32 %v6113_v62 }
 0x9e7   : > { %7142 = vst.msk [vmem:[%s11801_s14 + $0x52f] sm:$0xff] %vm1876_vm2, %v6359_v2  ;;  %v6311_v37 = vmul.f32 %v6262_v46, %v11789_v59  ;;  %v6117_v0 = vpop.f32.mrb[40].mxu1 }
 0x9e8   : > { %v9785_v34 = vpop.eup %9784  ;;  %v6118_v21 = vadd.f32 1e-05, %v6117_v0  ;;  %v8589_v56 = vpop.f32.mrb[41].mxu1 }
 0x9e9   : > { %v6360_v28 = vadd.f32 %v6311_v37, %v11794_v53  ;;  %v6263_v55 = vmul.f32 %v9785_v34, %v14395_v63 }
 0x9ea   : > { %9790 = vrsqrt.f32 %v6118_v21 }
 0x9eb   : > { %7143 = vst.msk [vmem:[%s11801_s14 + $0x537] sm:$0xff] %vm1876_vm2, %v6360_v28  ;;  %v6312_v61 = vmul.f32 %v6263_v55, %v11789_v59  ;;  %v6122_v39 = vpop.f32.mrb[42].mxu1 }
 0x9ec   : > { %v9787_v16 = vpop.eup %9786  ;;  %v6123_v7 = vadd.f32 1e-05, %v6122_v39  ;;  %v8592_v30 = vpop.f32.mrb[43].mxu1 }
 0x9ed   : > { %v6361_v60 = vadd.f32 %v6312_v61, %v11794_v53  ;;  %v6264_v25 = vmul.f32 %v9787_v16, %v14407_v8 }
 0x9ee   : > { %9792 = vrsqrt.f32 %v6123_v7 }
 0x9ef   : > { %7144 = vst.msk [vmem:[%s11801_s14 + $0x53f] sm:$0xff] %vm1876_vm2, %v6361_v60  ;;  %v6313_v27 = vmul.f32 %v6264_v25, %v11789_v59  ;;  %v6127_v63 = vpop.f32.mrb[44].mxu1 }
 0x9f0   : > { %v9789_v52 = vpop.eup %9788  ;;  %v6128_v31 = vadd.f32 1e-05, %v6127_v63  ;;  %v8595_v12 = vpop.f32.mrb[45].mxu1 }
 0x9f1   : > { %v6362_v13 = vadd.f32 %v6313_v27, %v11794_v53  ;;  %v6265_v20 = vmul.f32 %v9789_v52, %v14419_v29 }
 0x9f2   : > { %9794 = vrsqrt.f32 %v6128_v31 }
 0x9f3   : > { %7145 = vst.msk [vmem:[%s11801_s14 + $0x547] sm:$0xff] %vm1876_vm2, %v6362_v13  ;;  %v6314_v15 = vmul.f32 %v6265_v20, %v11789_v59  ;;  %v6132_v8 = vpop.f32.mrb[46].mxu1 }
 0x9f4   : > { %v9791_v11 = vpop.eup %9790  ;;  %v6133_v26 = vadd.f32 1e-05, %v6132_v8  ;;  %v8598_v6 = vpop.f32.mrb[47].mxu1 }
 0x9f5   : > { %v6363_v42 = vadd.f32 %v6314_v15, %v11794_v53  ;;  %v6266_v48 = vmul.f32 %v9791_v11, %v14431_v4 }
 0x9f6   : > { %9796 = vrsqrt.f32 %v6133_v26 }
 0x9f7   : > { %7146 = vst.msk [vmem:[%s11801_s14 + $0x54f] sm:$0xff] %vm1876_vm2, %v6363_v42  ;;  %v6315_v49 = vmul.f32 %v6266_v48, %v11789_v59  ;;  %v6137_v29 = vpop.f32.mrb[48].mxu1 }
 0x9f8   : > { %v9793_v19 = vpop.eup %9792  ;;  %v6138_v54 = vadd.f32 1e-05, %v6137_v29  ;;  %v8601_v1 = vpop.f32.mrb[49].mxu1 }
 0x9f9   : > { %v6364_v36 = vadd.f32 %v6315_v49, %v11794_v53  ;;  %v6267_v14 = vmul.f32 %v9793_v19, %v14441_v32 }
 0x9fa   : > { %9798 = vrsqrt.f32 %v6138_v54 }
 0x9fb   : > { %7147 = vst.msk [vmem:[%s11801_s14 + $0x557] sm:$0xff] %vm1876_vm2, %v6364_v36  ;;  %v6316_v50 = vmul.f32 %v6267_v14, %v11789_v59  ;;  %v6142_v4 = vpop.f32.mrb[50].mxu1 }
 0x9fc   : > { %v9795_v45 = vpop.eup %9794  ;;  %v6143_v57 = vadd.f32 1e-05, %v6142_v4  ;;  %v8604_v5 = vpop.f32.mrb[51].mxu1 }
 0x9fd   : > { %v6365_v17 = vadd.f32 %v6316_v50, %v11794_v53  ;;  %v6268_v22 = vmul.f32 %v9795_v45, %v14449_v18 }
 0x9fe   : > { %9800 = vrsqrt.f32 %v6143_v57 }
 0x9ff   : > { %7148 = vst.msk [vmem:[%s11801_s14 + $0x55f] sm:$0xff] %vm1876_vm2, %v6365_v17  ;;  %v6317_v9 = vmul.f32 %v6268_v22, %v11789_v59  ;;  %v6147_v32 = vpop.f32.mrb[52].mxu1 }
 0xa00   : > { %v9797_v10 = vpop.eup %9796  ;;  %v6148_v33 = vadd.f32 1e-05, %v6147_v32  ;;  %v8607_v47 = vpop.f32.mrb[53].mxu1 }
 0xa01   : > { %v6366_v35 = vadd.f32 %v6317_v9, %v11794_v53  ;;  %v6269_v23 = vmul.f32 %v9797_v10, %v14457_v3  ;;  %v15381_v9 = vld [vmem:[#allocation32_spill] sm:$0xff] }
 0xa02   : > { %9802 = vrsqrt.f32 %v6148_v33 }
 0xa03   : > { %7149 = vst.msk [vmem:[%s11801_s14 + $0x567] sm:$0xff] %vm1876_vm2, %v6366_v35  ;;  %v6318_v62 = vmul.f32 %v6269_v23, %v11789_v59  ;;  %v6152_v18 = vpop.f32.mrb[54].mxu1 }
 0xa04   : > { %v9799_v51 = vpop.eup %9798  ;;  %v6153_v2 = vadd.f32 1e-05, %v6152_v18  ;;  %v8610_v46 = vpop.f32.mrb[55].mxu1 }
 0xa05   : > { %v6367_v37 = vadd.f32 %v6318_v62, %v11794_v53  ;;  %v6270_v0 = vmul.f32 %v9799_v51, %v14465_v43 }
 0xa06   : > { %9804 = vrsqrt.f32 %v6153_v2 }
 0xa07   : > { %7150 = vst.msk [vmem:[%s11801_s14 + $0x56f] sm:$0xff] %vm1876_vm2, %v6367_v37  ;;  %v6319_v34 = vmul.f32 %v6270_v0, %v11789_v59  ;;  %v6157_v3 = vpop.f32.mrb[56].mxu1 }
 0xa08   : > { %v9801_v21 = vpop.eup %9800  ;;  %v6158_v56 = vadd.f32 1e-05, %v6157_v3  ;;  %v8613_v28 = vpop.f32.mrb[57].mxu1 }
 0xa09   : > { %v6368_v55 = vadd.f32 %v6319_v34, %v11794_v53  ;;  %v6271_v61 = vmul.f32 %v9801_v21, %v14473_v40 }
 0xa0a   : > { %9806 = vrsqrt.f32 %v6158_v56 }
 0xa0b   : > { %7151 = vst.msk [vmem:[%s11801_s14 + $0x577] sm:$0xff] %vm1876_vm2, %v6368_v55  ;;  %v6320_v39 = vmul.f32 %v6271_v61, %v11789_v59  ;;  %v6162_v43 = vpop.f32.mrb[58].mxu1 }
 0xa0c   : > { %v9803_v16 = vpop.eup %9802  ;;  %v6163_v7 = vadd.f32 1e-05, %v6162_v43  ;;  %v8616_v30 = vpop.f32.mrb[59].mxu1 }
 0xa0d   : > { %v6369_v60 = vadd.f32 %v6320_v39, %v11794_v53  ;;  %v6272_v25 = vmul.f32 %v9803_v16, %v14481_v41 }
 0xa0e   : > { %9808 = vrsqrt.f32 %v6163_v7 }
 0xa0f   : > { %7152 = vst.msk [vmem:[%s11801_s14 + $0x57f] sm:$0xff] %vm1876_vm2, %v6369_v60  ;;  %v6321_v27 = vmul.f32 %v6272_v25, %v11789_v59  ;;  %v6167_v40 = vpop.f32.mrb[60].mxu1 }
 0xa10   : > { %v9805_v63 = vpop.eup %9804  ;;  %v6168_v52 = vadd.f32 1e-05, %v6167_v40  ;;  %v8619_v31 = vpop.f32.mrb[61].mxu1 }
 0xa11   : > { %v6370_v12 = vadd.f32 %v6321_v27, %v11794_v53  ;;  %v6273_v13 = vmul.f32 %v9805_v63, %v14489_v24 }
 0xa12   : > { %9810 = vrsqrt.f32 %v6168_v52 }
 0xa13   : > { %7153 = vst.msk [vmem:[%s11801_s14 + $0x587] sm:$0xff] %vm1876_vm2, %v6370_v12  ;;  %v6322_v20 = vmul.f32 %v6273_v13, %v11789_v59  ;;  %v6172_v41 = vpop.f32.mrb[62].mxu1 }
 0xa14   : > { %v9807_v15 = vpop.eup %9806  ;;  %v6173_v8 = vadd.f32 1e-05, %v6172_v41  ;;  %v8622_v11 = vpop.f32.mrb[63].mxu1 }
 0xa15   : > { %v6371_v26 = vadd.f32 %v6322_v20, %v11794_v53  ;;  %v6274_v6 = vmul.f32 %v9807_v15, %v14497_v58 }
 0xa16   : > { %9812 = vrsqrt.f32 %v6173_v8 }
 0xa17   : > { %7154 = vst.msk [vmem:[%s11801_s14 + $0x58f] sm:$0xff] %vm1876_vm2, %v6371_v26  ;;  %v6323_v24 = vmul.f32 %v6274_v6, %v11789_v59  ;;  %v6177_v42 = vpop.f32.mrb[64].mxu1 }
 0xa18   : > { %v9809_v48 = vpop.eup %9808  ;;  %v6178_v49 = vadd.f32 1e-05, %v6177_v42  ;;  %v8625_v29 = vpop.f32.mrb[65].mxu1 }
 0xa19   : > { %v6372_v19 = vadd.f32 %v6323_v24, %v11794_v53  ;;  %v6275_v54 = vmul.f32 %v9809_v48, %v14505_v44  ;;  %v15380_v44 = vld [vmem:[#allocation30_spill] sm:$0xff] }
 0xa1a   : > { %9814 = vrsqrt.f32 %v6178_v49 }
 0xa1b   : > { %7155 = vst.msk [vmem:[%s11801_s14 + $0x597] sm:$0xff] %vm1876_vm2, %v6372_v19  ;;  %v6324_v58 = vmul.f32 %v6275_v54, %v11789_v59 }
 0xa1c   : > { %v9811_v1 = vpop.eup %9810 }
 0xa1d   : > { %v6373_v36 = vadd.f32 %v6324_v58, %v11794_v53  ;;  %v6276_v14 = vmul.f32 %v9811_v1, %v14513_v38 }
 0xa1f   : > { %7156 = vst.msk [vmem:[%s11801_s14 + $0x59f] sm:$0xff] %vm1876_vm2, %v6373_v36  ;;  %v6325_v50 = vmul.f32 %v6276_v14, %v11789_v59 }
 0xa20   : > { %v9813_v4 = vpop.eup %9812 }
 0xa21   : > { %v6374_v45 = vadd.f32 %v6325_v50, %v11794_v53  ;;  %v6277_v57 = vmul.f32 %v9813_v4, %v15380_v44 }
 0xa23   : > { %7157 = vst.msk [vmem:[%s11801_s14 + $0x5a7] sm:$0xff] %vm1876_vm2, %v6374_v45  ;;  %v6326_v5 = vmul.f32 %v6277_v57, %v11789_v59 }
 0xa24   : > { %v9815_v17 = vpop.eup %9814 }
 0xa25   : > { %v6375_v22 = vadd.f32 %v6326_v5, %v11794_v53  ;;  %v6278_v32 = vmul.f32 %v9815_v17, %v15381_v9 }
 0xa27   : > { %7158 = vst.msk [vmem:[%s11801_s14 + $0x5af] sm:$0xff] %vm1876_vm2, %v6375_v22  ;;  %v6327_v38 = vmul.f32 %v6278_v32, %v11789_v59 }
 0xa29   : > { %v6376_v10 = vadd.f32 %v6327_v38, %v11794_v53 }
 0xa2b   : > { %7159 = vst.msk [vmem:[%s11801_s14 + $0x5b7] sm:$0xff] %vm1876_vm2, %v6376_v10 }
 0xa2c PF: > { %s20_s13 = sadd.s32 1, %s9840_s13  }
 0xa2d   : > { %p17_p4 = scmp.ge.s32.totalorder %s20_s13, 4  }
 0xa2f   :  { %19 = sbr.rel (!%p17_p4) target bundleno = 1 (0x1), region = 100 }

</bundles_post_ra>
